<compile_context>
chip_gen: v5e
topology: v5e:2x2
jax: 0.10.0
libtpu: 0.0.40
codegen_flags: <defaults>
</compile_context>

<pallas_src>
import functools

import jax
import jax.numpy as jnp
from jax.experimental import pallas as pl
from jax.experimental.pallas import tpu as pltpu

CI = 3    # in channels  (fixed by the module)
CO = 3    # out channels (fixed by the module)
KH = 5    # kernel height
KW = 5    # kernel width
PAD = 2   # padding (=> "same" output at stride 1)


def fused_conv2_kernel(w_ref, x_ref, o_ref, *, n_batch, height, width):
    """y = conv(conv(x)) on lane-flattened channel planes, all in vregs.

    w_ref : SMEM (CO*CI*KH*KW,) f32 flat filter (PyTorch OIHW order).
    x_ref : VMEM (CI*n_batch, height*width) input, rows ordered (ci, n).
    o_ref : VMEM (CO*n_batch, height*width) output, rows ordered (co, n).
    """
    hw = height * width

    # ---- hoisted SMEM scalar weight reads (off the critical path) ---------
    wv = [[[[w_ref[((co * CI + ci) * KH + kh) * KW + kw]
             for kw in range(KW)]
            for kh in range(KH)]
           for ci in range(CI)]
          for co in range(CO)]

    # ---- per-axis bounds masks: these implement the zero padding ----------
    lane = jax.lax.broadcasted_iota(jnp.int32, (n_batch, hw), 1)
    if width & (width - 1) == 0:          # power-of-two fast path (test case)
        hh = lane >> (width.bit_length() - 1)
        ww = lane & (width - 1)
    else:                                  # TODO(synk): non-pow2 width uses int div
        hh = lane // width
        ww = lane % width

    def axis_mask(idx, d, size):
        if d < 0:
            return idx >= -d
        if d > 0:
            return idx < size - d
        return None                        # centre offset: always valid

    hmask = {kh - PAD: axis_mask(hh, kh - PAD, height) for kh in range(KH)}
    wmask = {kw - PAD: axis_mask(ww, kw - PAD, width) for kw in range(KW)}

    def tap_mask(dh, dw):
        hm, wm = hmask[dh], wmask[dw]
        if hm is None:
            return wm
        if wm is None:
            return hm
        return hm & wm

    # ---- one direct conv pass over a list of (n_batch, hw) planes ---------
    def conv_pass(planes):
        # Doubling makes every (kh, kw) tap a single static lane slice; both
        # concat pieces are whole planes (lane-tile aligned, cheap).  Wrapped
        # values only land in positions the tap mask zeroes out.
        dbl = [jnp.concatenate([p, p], axis=-1) for p in planes]
        totals = [jnp.zeros((n_batch, hw), jnp.float32) for _ in range(CO)]
        for kh in range(KH):
            dh = kh - PAD
            # per-(co, kh) partials keep the accumulation chains short
            parts = [jnp.zeros((n_batch, hw), jnp.float32) for _ in range(CO)]
            for kw in range(KW):
                dw = kw - PAD
                start = (dh * width + dw) % hw
                m = tap_mask(dh, dw)
                for ci in range(len(planes)):
                    tap = dbl[ci][:, start:start + hw]
                    if m is not None:
                        tap = jnp.where(m, tap, 0.0)
                    for co in range(CO):
                        parts[co] = parts[co] + tap * wv[co][ci][kh][kw]
            for co in range(CO):
                totals[co] = totals[co] + parts[co]
        return totals

    # conv #1: input planes read straight from the (ci, n)-ordered block
    x_planes = [
        x_ref[ci * n_batch:(ci + 1) * n_batch, :].astype(jnp.float32)
        for ci in range(CI)
    ]
    mid = conv_pass(x_planes)      # conv1 results stay live in vregs ...
    out = conv_pass(mid)           # ... and feed conv #2 directly

    for co in range(CO):
        o_ref[co * n_batch:(co + 1) * n_batch, :] = out[co].astype(o_ref.dtype)


def conv_twice(x, w):
    """y = conv(conv(x)); Conv2d(3,3,k=5,s=1,p=2,bias=False), NCHW / OIHW."""
    n, c, h, wd = x.shape
    assert c == CI and w.shape == (CO, CI, KH, KW)
    hw = h * wd

    # Layout plumbing only (tiny): rows ordered (channel, image), lanes = h*w.
    x_flat = jnp.transpose(x, (1, 0, 2, 3)).reshape(CI * n, hw)
    w_flat = w.reshape(-1).astype(jnp.float32)

    kernel = functools.partial(
        fused_conv2_kernel, n_batch=n, height=h, width=wd)

    out_flat = pl.pallas_call(
        kernel,
        out_shape=jax.ShapeDtypeStruct((CO * n, hw), x.dtype),
        in_specs=[
            pl.BlockSpec(memory_space=pltpu.MemorySpace.SMEM),   # weights
            pl.BlockSpec(memory_space=pltpu.MemorySpace.VMEM),   # input planes
        ],
        out_specs=pl.BlockSpec(memory_space=pltpu.MemorySpace.VMEM),
    )(w_flat, x_flat)

    # rows (co, n) -> NCHW
    return jnp.transpose(out_flat.reshape(CO, n, h, wd), (1, 0, 2, 3))


@jax.jit
def forward(x, w):
    # PyTorch: x = self.conv(x); x = self.conv(x)  -> one fused kernel.
    return conv_twice(x, w)


def reference(x, w):
    """Pure-JAX reference using lax convolution (NCHW / OIHW)."""
    def one(y):
        return jax.lax.conv_general_dilated(
            y, w, window_strides=(1, 1),
            padding=((PAD, PAD), (PAD, PAD)),
            dimension_numbers=("NCHW", "OIHW", "NCHW"))
    return one(one(x))


if __name__ == "__main__":
    key = jax.random.PRNGKey(0)
    k_x, k_w = jax.random.split(key)

    # batch=2, channels=3 (fixed by the module), spatial 16x16
    x = jax.random.normal(k_x, (2, CI, 16, 16), dtype=jnp.float32)

    # deterministic init mimicking PyTorch uniform(-b, b), b = 1/sqrt(fan_in)
    bound = 1.0 / (CI * KH * KW) ** 0.5
    w = jax.random.uniform(k_w, (CO, CI, KH, KW), dtype=jnp.float32,
                           minval=-bound, maxval=bound)

    out = jax.block_until_ready(forward(x, w))
    ref = reference(x, w)

    assert out.shape == (2, CO, 16, 16)
    assert jnp.max(jnp.abs(out - ref)) < 1e-4

    print("KERNEL_OK")
</pallas_src>

<mosaic_0001>
module attributes {stable_mosaic.version = 11 : i64} {
  func.func @fused_conv2_kernel(%arg0: memref<225xf32, #tpu.memory_space<smem>>, %arg1: memref<6x256xf32, #tpu.memory_space<vmem>>, %arg2: memref<6x256xf32, #tpu.memory_space<vmem>>) attributes {dimension_semantics = [], scalar_prefetch = 0 : i64, scratch_operands = 0 : i64, tpu.core_type = #tpu.core_type<tc>} {
    %c0 = arith.constant 0 : index
    %0 = memref.load %arg0[%c0] : memref<225xf32, #tpu.memory_space<smem>>
    %c1 = arith.constant 1 : index
    %1 = memref.load %arg0[%c1] : memref<225xf32, #tpu.memory_space<smem>>
    %c2 = arith.constant 2 : index
    %2 = memref.load %arg0[%c2] : memref<225xf32, #tpu.memory_space<smem>>
    %c3 = arith.constant 3 : index
    %3 = memref.load %arg0[%c3] : memref<225xf32, #tpu.memory_space<smem>>
    %c4 = arith.constant 4 : index
    %4 = memref.load %arg0[%c4] : memref<225xf32, #tpu.memory_space<smem>>
    %c5 = arith.constant 5 : index
    %5 = memref.load %arg0[%c5] : memref<225xf32, #tpu.memory_space<smem>>
    %c6 = arith.constant 6 : index
    %6 = memref.load %arg0[%c6] : memref<225xf32, #tpu.memory_space<smem>>
    %c7 = arith.constant 7 : index
    %7 = memref.load %arg0[%c7] : memref<225xf32, #tpu.memory_space<smem>>
    %c8 = arith.constant 8 : index
    %8 = memref.load %arg0[%c8] : memref<225xf32, #tpu.memory_space<smem>>
    %c9 = arith.constant 9 : index
    %9 = memref.load %arg0[%c9] : memref<225xf32, #tpu.memory_space<smem>>
    %c10 = arith.constant 10 : index
    %10 = memref.load %arg0[%c10] : memref<225xf32, #tpu.memory_space<smem>>
    %c11 = arith.constant 11 : index
    %11 = memref.load %arg0[%c11] : memref<225xf32, #tpu.memory_space<smem>>
    %c12 = arith.constant 12 : index
    %12 = memref.load %arg0[%c12] : memref<225xf32, #tpu.memory_space<smem>>
    %c13 = arith.constant 13 : index
    %13 = memref.load %arg0[%c13] : memref<225xf32, #tpu.memory_space<smem>>
    %c14 = arith.constant 14 : index
    %14 = memref.load %arg0[%c14] : memref<225xf32, #tpu.memory_space<smem>>
    %c15 = arith.constant 15 : index
    %15 = memref.load %arg0[%c15] : memref<225xf32, #tpu.memory_space<smem>>
    %c16 = arith.constant 16 : index
    %16 = memref.load %arg0[%c16] : memref<225xf32, #tpu.memory_space<smem>>
    %c17 = arith.constant 17 : index
    %17 = memref.load %arg0[%c17] : memref<225xf32, #tpu.memory_space<smem>>
    %c18 = arith.constant 18 : index
    %18 = memref.load %arg0[%c18] : memref<225xf32, #tpu.memory_space<smem>>
    %c19 = arith.constant 19 : index
    %19 = memref.load %arg0[%c19] : memref<225xf32, #tpu.memory_space<smem>>
    %c20 = arith.constant 20 : index
    %20 = memref.load %arg0[%c20] : memref<225xf32, #tpu.memory_space<smem>>
    %c21 = arith.constant 21 : index
    %21 = memref.load %arg0[%c21] : memref<225xf32, #tpu.memory_space<smem>>
    %c22 = arith.constant 22 : index
    %22 = memref.load %arg0[%c22] : memref<225xf32, #tpu.memory_space<smem>>
    %c23 = arith.constant 23 : index
    %23 = memref.load %arg0[%c23] : memref<225xf32, #tpu.memory_space<smem>>
    %c24 = arith.constant 24 : index
    %24 = memref.load %arg0[%c24] : memref<225xf32, #tpu.memory_space<smem>>
    %c25 = arith.constant 25 : index
    %25 = memref.load %arg0[%c25] : memref<225xf32, #tpu.memory_space<smem>>
    %c26 = arith.constant 26 : index
    %26 = memref.load %arg0[%c26] : memref<225xf32, #tpu.memory_space<smem>>
    %c27 = arith.constant 27 : index
    %27 = memref.load %arg0[%c27] : memref<225xf32, #tpu.memory_space<smem>>
    %c28 = arith.constant 28 : index
    %28 = memref.load %arg0[%c28] : memref<225xf32, #tpu.memory_space<smem>>
    %c29 = arith.constant 29 : index
    %29 = memref.load %arg0[%c29] : memref<225xf32, #tpu.memory_space<smem>>
    %c30 = arith.constant 30 : index
    %30 = memref.load %arg0[%c30] : memref<225xf32, #tpu.memory_space<smem>>
    %c31 = arith.constant 31 : index
    %31 = memref.load %arg0[%c31] : memref<225xf32, #tpu.memory_space<smem>>
    %c32 = arith.constant 32 : index
    %32 = memref.load %arg0[%c32] : memref<225xf32, #tpu.memory_space<smem>>
    %c33 = arith.constant 33 : index
    %33 = memref.load %arg0[%c33] : memref<225xf32, #tpu.memory_space<smem>>
    %c34 = arith.constant 34 : index
    %34 = memref.load %arg0[%c34] : memref<225xf32, #tpu.memory_space<smem>>
    %c35 = arith.constant 35 : index
    %35 = memref.load %arg0[%c35] : memref<225xf32, #tpu.memory_space<smem>>
    %c36 = arith.constant 36 : index
    %36 = memref.load %arg0[%c36] : memref<225xf32, #tpu.memory_space<smem>>
    %c37 = arith.constant 37 : index
    %37 = memref.load %arg0[%c37] : memref<225xf32, #tpu.memory_space<smem>>
    %c38 = arith.constant 38 : index
    %38 = memref.load %arg0[%c38] : memref<225xf32, #tpu.memory_space<smem>>
    %c39 = arith.constant 39 : index
    %39 = memref.load %arg0[%c39] : memref<225xf32, #tpu.memory_space<smem>>
    %c40 = arith.constant 40 : index
    %40 = memref.load %arg0[%c40] : memref<225xf32, #tpu.memory_space<smem>>
    %c41 = arith.constant 41 : index
    %41 = memref.load %arg0[%c41] : memref<225xf32, #tpu.memory_space<smem>>
    %c42 = arith.constant 42 : index
    %42 = memref.load %arg0[%c42] : memref<225xf32, #tpu.memory_space<smem>>
    %c43 = arith.constant 43 : index
    %43 = memref.load %arg0[%c43] : memref<225xf32, #tpu.memory_space<smem>>
    %c44 = arith.constant 44 : index
    %44 = memref.load %arg0[%c44] : memref<225xf32, #tpu.memory_space<smem>>
    %c45 = arith.constant 45 : index
    %45 = memref.load %arg0[%c45] : memref<225xf32, #tpu.memory_space<smem>>
    %c46 = arith.constant 46 : index
    %46 = memref.load %arg0[%c46] : memref<225xf32, #tpu.memory_space<smem>>
    %c47 = arith.constant 47 : index
    %47 = memref.load %arg0[%c47] : memref<225xf32, #tpu.memory_space<smem>>
    %c48 = arith.constant 48 : index
    %48 = memref.load %arg0[%c48] : memref<225xf32, #tpu.memory_space<smem>>
    %c49 = arith.constant 49 : index
    %49 = memref.load %arg0[%c49] : memref<225xf32, #tpu.memory_space<smem>>
    %c50 = arith.constant 50 : index
    %50 = memref.load %arg0[%c50] : memref<225xf32, #tpu.memory_space<smem>>
    %c51 = arith.constant 51 : index
    %51 = memref.load %arg0[%c51] : memref<225xf32, #tpu.memory_space<smem>>
    %c52 = arith.constant 52 : index
    %52 = memref.load %arg0[%c52] : memref<225xf32, #tpu.memory_space<smem>>
    %c53 = arith.constant 53 : index
    %53 = memref.load %arg0[%c53] : memref<225xf32, #tpu.memory_space<smem>>
    %c54 = arith.constant 54 : index
    %54 = memref.load %arg0[%c54] : memref<225xf32, #tpu.memory_space<smem>>
    %c55 = arith.constant 55 : index
    %55 = memref.load %arg0[%c55] : memref<225xf32, #tpu.memory_space<smem>>
    %c56 = arith.constant 56 : index
    %56 = memref.load %arg0[%c56] : memref<225xf32, #tpu.memory_space<smem>>
    %c57 = arith.constant 57 : index
    %57 = memref.load %arg0[%c57] : memref<225xf32, #tpu.memory_space<smem>>
    %c58 = arith.constant 58 : index
    %58 = memref.load %arg0[%c58] : memref<225xf32, #tpu.memory_space<smem>>
    %c59 = arith.constant 59 : index
    %59 = memref.load %arg0[%c59] : memref<225xf32, #tpu.memory_space<smem>>
    %c60 = arith.constant 60 : index
    %60 = memref.load %arg0[%c60] : memref<225xf32, #tpu.memory_space<smem>>
    %c61 = arith.constant 61 : index
    %61 = memref.load %arg0[%c61] : memref<225xf32, #tpu.memory_space<smem>>
    %c62 = arith.constant 62 : index
    %62 = memref.load %arg0[%c62] : memref<225xf32, #tpu.memory_space<smem>>
    %c63 = arith.constant 63 : index
    %63 = memref.load %arg0[%c63] : memref<225xf32, #tpu.memory_space<smem>>
    %c64 = arith.constant 64 : index
    %64 = memref.load %arg0[%c64] : memref<225xf32, #tpu.memory_space<smem>>
    %c65 = arith.constant 65 : index
    %65 = memref.load %arg0[%c65] : memref<225xf32, #tpu.memory_space<smem>>
    %c66 = arith.constant 66 : index
    %66 = memref.load %arg0[%c66] : memref<225xf32, #tpu.memory_space<smem>>
    %c67 = arith.constant 67 : index
    %67 = memref.load %arg0[%c67] : memref<225xf32, #tpu.memory_space<smem>>
    %c68 = arith.constant 68 : index
    %68 = memref.load %arg0[%c68] : memref<225xf32, #tpu.memory_space<smem>>
    %c69 = arith.constant 69 : index
    %69 = memref.load %arg0[%c69] : memref<225xf32, #tpu.memory_space<smem>>
    %c70 = arith.constant 70 : index
    %70 = memref.load %arg0[%c70] : memref<225xf32, #tpu.memory_space<smem>>
    %c71 = arith.constant 71 : index
    %71 = memref.load %arg0[%c71] : memref<225xf32, #tpu.memory_space<smem>>
    %c72 = arith.constant 72 : index
    %72 = memref.load %arg0[%c72] : memref<225xf32, #tpu.memory_space<smem>>
    %c73 = arith.constant 73 : index
    %73 = memref.load %arg0[%c73] : memref<225xf32, #tpu.memory_space<smem>>
    %c74 = arith.constant 74 : index
    %74 = memref.load %arg0[%c74] : memref<225xf32, #tpu.memory_space<smem>>
    %c75 = arith.constant 75 : index
    %75 = memref.load %arg0[%c75] : memref<225xf32, #tpu.memory_space<smem>>
    %c76 = arith.constant 76 : index
    %76 = memref.load %arg0[%c76] : memref<225xf32, #tpu.memory_space<smem>>
    %c77 = arith.constant 77 : index
    %77 = memref.load %arg0[%c77] : memref<225xf32, #tpu.memory_space<smem>>
    %c78 = arith.constant 78 : index
    %78 = memref.load %arg0[%c78] : memref<225xf32, #tpu.memory_space<smem>>
    %c79 = arith.constant 79 : index
    %79 = memref.load %arg0[%c79] : memref<225xf32, #tpu.memory_space<smem>>
    %c80 = arith.constant 80 : index
    %80 = memref.load %arg0[%c80] : memref<225xf32, #tpu.memory_space<smem>>
    %c81 = arith.constant 81 : index
    %81 = memref.load %arg0[%c81] : memref<225xf32, #tpu.memory_space<smem>>
    %c82 = arith.constant 82 : index
    %82 = memref.load %arg0[%c82] : memref<225xf32, #tpu.memory_space<smem>>
    %c83 = arith.constant 83 : index
    %83 = memref.load %arg0[%c83] : memref<225xf32, #tpu.memory_space<smem>>
    %c84 = arith.constant 84 : index
    %84 = memref.load %arg0[%c84] : memref<225xf32, #tpu.memory_space<smem>>
    %c85 = arith.constant 85 : index
    %85 = memref.load %arg0[%c85] : memref<225xf32, #tpu.memory_space<smem>>
    %c86 = arith.constant 86 : index
    %86 = memref.load %arg0[%c86] : memref<225xf32, #tpu.memory_space<smem>>
    %c87 = arith.constant 87 : index
    %87 = memref.load %arg0[%c87] : memref<225xf32, #tpu.memory_space<smem>>
    %c88 = arith.constant 88 : index
    %88 = memref.load %arg0[%c88] : memref<225xf32, #tpu.memory_space<smem>>
    %c89 = arith.constant 89 : index
    %89 = memref.load %arg0[%c89] : memref<225xf32, #tpu.memory_space<smem>>
    %c90 = arith.constant 90 : index
    %90 = memref.load %arg0[%c90] : memref<225xf32, #tpu.memory_space<smem>>
    %c91 = arith.constant 91 : index
    %91 = memref.load %arg0[%c91] : memref<225xf32, #tpu.memory_space<smem>>
    %c92 = arith.constant 92 : index
    %92 = memref.load %arg0[%c92] : memref<225xf32, #tpu.memory_space<smem>>
    %c93 = arith.constant 93 : index
    %93 = memref.load %arg0[%c93] : memref<225xf32, #tpu.memory_space<smem>>
    %c94 = arith.constant 94 : index
    %94 = memref.load %arg0[%c94] : memref<225xf32, #tpu.memory_space<smem>>
    %c95 = arith.constant 95 : index
    %95 = memref.load %arg0[%c95] : memref<225xf32, #tpu.memory_space<smem>>
    %c96 = arith.constant 96 : index
    %96 = memref.load %arg0[%c96] : memref<225xf32, #tpu.memory_space<smem>>
    %c97 = arith.constant 97 : index
    %97 = memref.load %arg0[%c97] : memref<225xf32, #tpu.memory_space<smem>>
    %c98 = arith.constant 98 : index
    %98 = memref.load %arg0[%c98] : memref<225xf32, #tpu.memory_space<smem>>
    %c99 = arith.constant 99 : index
    %99 = memref.load %arg0[%c99] : memref<225xf32, #tpu.memory_space<smem>>
    %c100 = arith.constant 100 : index
    %100 = memref.load %arg0[%c100] : memref<225xf32, #tpu.memory_space<smem>>
    %c101 = arith.constant 101 : index
    %101 = memref.load %arg0[%c101] : memref<225xf32, #tpu.memory_space<smem>>
    %c102 = arith.constant 102 : index
    %102 = memref.load %arg0[%c102] : memref<225xf32, #tpu.memory_space<smem>>
    %c103 = arith.constant 103 : index
    %103 = memref.load %arg0[%c103] : memref<225xf32, #tpu.memory_space<smem>>
    %c104 = arith.constant 104 : index
    %104 = memref.load %arg0[%c104] : memref<225xf32, #tpu.memory_space<smem>>
    %c105 = arith.constant 105 : index
    %105 = memref.load %arg0[%c105] : memref<225xf32, #tpu.memory_space<smem>>
    %c106 = arith.constant 106 : index
    %106 = memref.load %arg0[%c106] : memref<225xf32, #tpu.memory_space<smem>>
    %c107 = arith.constant 107 : index
    %107 = memref.load %arg0[%c107] : memref<225xf32, #tpu.memory_space<smem>>
    %c108 = arith.constant 108 : index
    %108 = memref.load %arg0[%c108] : memref<225xf32, #tpu.memory_space<smem>>
    %c109 = arith.constant 109 : index
    %109 = memref.load %arg0[%c109] : memref<225xf32, #tpu.memory_space<smem>>
    %c110 = arith.constant 110 : index
    %110 = memref.load %arg0[%c110] : memref<225xf32, #tpu.memory_space<smem>>
    %c111 = arith.constant 111 : index
    %111 = memref.load %arg0[%c111] : memref<225xf32, #tpu.memory_space<smem>>
    %c112 = arith.constant 112 : index
    %112 = memref.load %arg0[%c112] : memref<225xf32, #tpu.memory_space<smem>>
    %c113 = arith.constant 113 : index
    %113 = memref.load %arg0[%c113] : memref<225xf32, #tpu.memory_space<smem>>
    %c114 = arith.constant 114 : index
    %114 = memref.load %arg0[%c114] : memref<225xf32, #tpu.memory_space<smem>>
    %c115 = arith.constant 115 : index
    %115 = memref.load %arg0[%c115] : memref<225xf32, #tpu.memory_space<smem>>
    %c116 = arith.constant 116 : index
    %116 = memref.load %arg0[%c116] : memref<225xf32, #tpu.memory_space<smem>>
    %c117 = arith.constant 117 : index
    %117 = memref.load %arg0[%c117] : memref<225xf32, #tpu.memory_space<smem>>
    %c118 = arith.constant 118 : index
    %118 = memref.load %arg0[%c118] : memref<225xf32, #tpu.memory_space<smem>>
    %c119 = arith.constant 119 : index
    %119 = memref.load %arg0[%c119] : memref<225xf32, #tpu.memory_space<smem>>
    %c120 = arith.constant 120 : index
    %120 = memref.load %arg0[%c120] : memref<225xf32, #tpu.memory_space<smem>>
    %c121 = arith.constant 121 : index
    %121 = memref.load %arg0[%c121] : memref<225xf32, #tpu.memory_space<smem>>
    %c122 = arith.constant 122 : index
    %122 = memref.load %arg0[%c122] : memref<225xf32, #tpu.memory_space<smem>>
    %c123 = arith.constant 123 : index
    %123 = memref.load %arg0[%c123] : memref<225xf32, #tpu.memory_space<smem>>
    %c124 = arith.constant 124 : index
    %124 = memref.load %arg0[%c124] : memref<225xf32, #tpu.memory_space<smem>>
    %c125 = arith.constant 125 : index
    %125 = memref.load %arg0[%c125] : memref<225xf32, #tpu.memory_space<smem>>
    %c126 = arith.constant 126 : index
    %126 = memref.load %arg0[%c126] : memref<225xf32, #tpu.memory_space<smem>>
    %c127 = arith.constant 127 : index
    %127 = memref.load %arg0[%c127] : memref<225xf32, #tpu.memory_space<smem>>
    %c128 = arith.constant 128 : index
    %128 = memref.load %arg0[%c128] : memref<225xf32, #tpu.memory_space<smem>>
    %c129 = arith.constant 129 : index
    %129 = memref.load %arg0[%c129] : memref<225xf32, #tpu.memory_space<smem>>
    %c130 = arith.constant 130 : index
    %130 = memref.load %arg0[%c130] : memref<225xf32, #tpu.memory_space<smem>>
    %c131 = arith.constant 131 : index
    %131 = memref.load %arg0[%c131] : memref<225xf32, #tpu.memory_space<smem>>
    %c132 = arith.constant 132 : index
    %132 = memref.load %arg0[%c132] : memref<225xf32, #tpu.memory_space<smem>>
    %c133 = arith.constant 133 : index
    %133 = memref.load %arg0[%c133] : memref<225xf32, #tpu.memory_space<smem>>
    %c134 = arith.constant 134 : index
    %134 = memref.load %arg0[%c134] : memref<225xf32, #tpu.memory_space<smem>>
    %c135 = arith.constant 135 : index
    %135 = memref.load %arg0[%c135] : memref<225xf32, #tpu.memory_space<smem>>
    %c136 = arith.constant 136 : index
    %136 = memref.load %arg0[%c136] : memref<225xf32, #tpu.memory_space<smem>>
    %c137 = arith.constant 137 : index
    %137 = memref.load %arg0[%c137] : memref<225xf32, #tpu.memory_space<smem>>
    %c138 = arith.constant 138 : index
    %138 = memref.load %arg0[%c138] : memref<225xf32, #tpu.memory_space<smem>>
    %c139 = arith.constant 139 : index
    %139 = memref.load %arg0[%c139] : memref<225xf32, #tpu.memory_space<smem>>
    %c140 = arith.constant 140 : index
    %140 = memref.load %arg0[%c140] : memref<225xf32, #tpu.memory_space<smem>>
    %c141 = arith.constant 141 : index
    %141 = memref.load %arg0[%c141] : memref<225xf32, #tpu.memory_space<smem>>
    %c142 = arith.constant 142 : index
    %142 = memref.load %arg0[%c142] : memref<225xf32, #tpu.memory_space<smem>>
    %c143 = arith.constant 143 : index
    %143 = memref.load %arg0[%c143] : memref<225xf32, #tpu.memory_space<smem>>
    %c144 = arith.constant 144 : index
    %144 = memref.load %arg0[%c144] : memref<225xf32, #tpu.memory_space<smem>>
    %c145 = arith.constant 145 : index
    %145 = memref.load %arg0[%c145] : memref<225xf32, #tpu.memory_space<smem>>
    %c146 = arith.constant 146 : index
    %146 = memref.load %arg0[%c146] : memref<225xf32, #tpu.memory_space<smem>>
    %c147 = arith.constant 147 : index
    %147 = memref.load %arg0[%c147] : memref<225xf32, #tpu.memory_space<smem>>
    %c148 = arith.constant 148 : index
    %148 = memref.load %arg0[%c148] : memref<225xf32, #tpu.memory_space<smem>>
    %c149 = arith.constant 149 : index
    %149 = memref.load %arg0[%c149] : memref<225xf32, #tpu.memory_space<smem>>
    %c150 = arith.constant 150 : index
    %150 = memref.load %arg0[%c150] : memref<225xf32, #tpu.memory_space<smem>>
    %c151 = arith.constant 151 : index
    %151 = memref.load %arg0[%c151] : memref<225xf32, #tpu.memory_space<smem>>
    %c152 = arith.constant 152 : index
    %152 = memref.load %arg0[%c152] : memref<225xf32, #tpu.memory_space<smem>>
    %c153 = arith.constant 153 : index
    %153 = memref.load %arg0[%c153] : memref<225xf32, #tpu.memory_space<smem>>
    %c154 = arith.constant 154 : index
    %154 = memref.load %arg0[%c154] : memref<225xf32, #tpu.memory_space<smem>>
    %c155 = arith.constant 155 : index
    %155 = memref.load %arg0[%c155] : memref<225xf32, #tpu.memory_space<smem>>
    %c156 = arith.constant 156 : index
    %156 = memref.load %arg0[%c156] : memref<225xf32, #tpu.memory_space<smem>>
    %c157 = arith.constant 157 : index
    %157 = memref.load %arg0[%c157] : memref<225xf32, #tpu.memory_space<smem>>
    %c158 = arith.constant 158 : index
    %158 = memref.load %arg0[%c158] : memref<225xf32, #tpu.memory_space<smem>>
    %c159 = arith.constant 159 : index
    %159 = memref.load %arg0[%c159] : memref<225xf32, #tpu.memory_space<smem>>
    %c160 = arith.constant 160 : index
    %160 = memref.load %arg0[%c160] : memref<225xf32, #tpu.memory_space<smem>>
    %c161 = arith.constant 161 : index
    %161 = memref.load %arg0[%c161] : memref<225xf32, #tpu.memory_space<smem>>
    %c162 = arith.constant 162 : index
    %162 = memref.load %arg0[%c162] : memref<225xf32, #tpu.memory_space<smem>>
    %c163 = arith.constant 163 : index
    %163 = memref.load %arg0[%c163] : memref<225xf32, #tpu.memory_space<smem>>
    %c164 = arith.constant 164 : index
    %164 = memref.load %arg0[%c164] : memref<225xf32, #tpu.memory_space<smem>>
    %c165 = arith.constant 165 : index
    %165 = memref.load %arg0[%c165] : memref<225xf32, #tpu.memory_space<smem>>
    %c166 = arith.constant 166 : index
    %166 = memref.load %arg0[%c166] : memref<225xf32, #tpu.memory_space<smem>>
    %c167 = arith.constant 167 : index
    %167 = memref.load %arg0[%c167] : memref<225xf32, #tpu.memory_space<smem>>
    %c168 = arith.constant 168 : index
    %168 = memref.load %arg0[%c168] : memref<225xf32, #tpu.memory_space<smem>>
    %c169 = arith.constant 169 : index
    %169 = memref.load %arg0[%c169] : memref<225xf32, #tpu.memory_space<smem>>
    %c170 = arith.constant 170 : index
    %170 = memref.load %arg0[%c170] : memref<225xf32, #tpu.memory_space<smem>>
    %c171 = arith.constant 171 : index
    %171 = memref.load %arg0[%c171] : memref<225xf32, #tpu.memory_space<smem>>
    %c172 = arith.constant 172 : index
    %172 = memref.load %arg0[%c172] : memref<225xf32, #tpu.memory_space<smem>>
    %c173 = arith.constant 173 : index
    %173 = memref.load %arg0[%c173] : memref<225xf32, #tpu.memory_space<smem>>
    %c174 = arith.constant 174 : index
    %174 = memref.load %arg0[%c174] : memref<225xf32, #tpu.memory_space<smem>>
    %c175 = arith.constant 175 : index
    %175 = memref.load %arg0[%c175] : memref<225xf32, #tpu.memory_space<smem>>
    %c176 = arith.constant 176 : index
    %176 = memref.load %arg0[%c176] : memref<225xf32, #tpu.memory_space<smem>>
    %c177 = arith.constant 177 : index
    %177 = memref.load %arg0[%c177] : memref<225xf32, #tpu.memory_space<smem>>
    %c178 = arith.constant 178 : index
    %178 = memref.load %arg0[%c178] : memref<225xf32, #tpu.memory_space<smem>>
    %c179 = arith.constant 179 : index
    %179 = memref.load %arg0[%c179] : memref<225xf32, #tpu.memory_space<smem>>
    %c180 = arith.constant 180 : index
    %180 = memref.load %arg0[%c180] : memref<225xf32, #tpu.memory_space<smem>>
    %c181 = arith.constant 181 : index
    %181 = memref.load %arg0[%c181] : memref<225xf32, #tpu.memory_space<smem>>
    %c182 = arith.constant 182 : index
    %182 = memref.load %arg0[%c182] : memref<225xf32, #tpu.memory_space<smem>>
    %c183 = arith.constant 183 : index
    %183 = memref.load %arg0[%c183] : memref<225xf32, #tpu.memory_space<smem>>
    %c184 = arith.constant 184 : index
    %184 = memref.load %arg0[%c184] : memref<225xf32, #tpu.memory_space<smem>>
    %c185 = arith.constant 185 : index
    %185 = memref.load %arg0[%c185] : memref<225xf32, #tpu.memory_space<smem>>
    %c186 = arith.constant 186 : index
    %186 = memref.load %arg0[%c186] : memref<225xf32, #tpu.memory_space<smem>>
    %c187 = arith.constant 187 : index
    %187 = memref.load %arg0[%c187] : memref<225xf32, #tpu.memory_space<smem>>
    %c188 = arith.constant 188 : index
    %188 = memref.load %arg0[%c188] : memref<225xf32, #tpu.memory_space<smem>>
    %c189 = arith.constant 189 : index
    %189 = memref.load %arg0[%c189] : memref<225xf32, #tpu.memory_space<smem>>
    %c190 = arith.constant 190 : index
    %190 = memref.load %arg0[%c190] : memref<225xf32, #tpu.memory_space<smem>>
    %c191 = arith.constant 191 : index
    %191 = memref.load %arg0[%c191] : memref<225xf32, #tpu.memory_space<smem>>
    %c192 = arith.constant 192 : index
    %192 = memref.load %arg0[%c192] : memref<225xf32, #tpu.memory_space<smem>>
    %c193 = arith.constant 193 : index
    %193 = memref.load %arg0[%c193] : memref<225xf32, #tpu.memory_space<smem>>
    %c194 = arith.constant 194 : index
    %194 = memref.load %arg0[%c194] : memref<225xf32, #tpu.memory_space<smem>>
    %c195 = arith.constant 195 : index
    %195 = memref.load %arg0[%c195] : memref<225xf32, #tpu.memory_space<smem>>
    %c196 = arith.constant 196 : index
    %196 = memref.load %arg0[%c196] : memref<225xf32, #tpu.memory_space<smem>>
    %c197 = arith.constant 197 : index
    %197 = memref.load %arg0[%c197] : memref<225xf32, #tpu.memory_space<smem>>
    %c198 = arith.constant 198 : index
    %198 = memref.load %arg0[%c198] : memref<225xf32, #tpu.memory_space<smem>>
    %c199 = arith.constant 199 : index
    %199 = memref.load %arg0[%c199] : memref<225xf32, #tpu.memory_space<smem>>
    %c200 = arith.constant 200 : index
    %200 = memref.load %arg0[%c200] : memref<225xf32, #tpu.memory_space<smem>>
    %c201 = arith.constant 201 : index
    %201 = memref.load %arg0[%c201] : memref<225xf32, #tpu.memory_space<smem>>
    %c202 = arith.constant 202 : index
    %202 = memref.load %arg0[%c202] : memref<225xf32, #tpu.memory_space<smem>>
    %c203 = arith.constant 203 : index
    %203 = memref.load %arg0[%c203] : memref<225xf32, #tpu.memory_space<smem>>
    %c204 = arith.constant 204 : index
    %204 = memref.load %arg0[%c204] : memref<225xf32, #tpu.memory_space<smem>>
    %c205 = arith.constant 205 : index
    %205 = memref.load %arg0[%c205] : memref<225xf32, #tpu.memory_space<smem>>
    %c206 = arith.constant 206 : index
    %206 = memref.load %arg0[%c206] : memref<225xf32, #tpu.memory_space<smem>>
    %c207 = arith.constant 207 : index
    %207 = memref.load %arg0[%c207] : memref<225xf32, #tpu.memory_space<smem>>
    %c208 = arith.constant 208 : index
    %208 = memref.load %arg0[%c208] : memref<225xf32, #tpu.memory_space<smem>>
    %c209 = arith.constant 209 : index
    %209 = memref.load %arg0[%c209] : memref<225xf32, #tpu.memory_space<smem>>
    %c210 = arith.constant 210 : index
    %210 = memref.load %arg0[%c210] : memref<225xf32, #tpu.memory_space<smem>>
    %c211 = arith.constant 211 : index
    %211 = memref.load %arg0[%c211] : memref<225xf32, #tpu.memory_space<smem>>
    %c212 = arith.constant 212 : index
    %212 = memref.load %arg0[%c212] : memref<225xf32, #tpu.memory_space<smem>>
    %c213 = arith.constant 213 : index
    %213 = memref.load %arg0[%c213] : memref<225xf32, #tpu.memory_space<smem>>
    %c214 = arith.constant 214 : index
    %214 = memref.load %arg0[%c214] : memref<225xf32, #tpu.memory_space<smem>>
    %c215 = arith.constant 215 : index
    %215 = memref.load %arg0[%c215] : memref<225xf32, #tpu.memory_space<smem>>
    %c216 = arith.constant 216 : index
    %216 = memref.load %arg0[%c216] : memref<225xf32, #tpu.memory_space<smem>>
    %c217 = arith.constant 217 : index
    %217 = memref.load %arg0[%c217] : memref<225xf32, #tpu.memory_space<smem>>
    %c218 = arith.constant 218 : index
    %218 = memref.load %arg0[%c218] : memref<225xf32, #tpu.memory_space<smem>>
    %c219 = arith.constant 219 : index
    %219 = memref.load %arg0[%c219] : memref<225xf32, #tpu.memory_space<smem>>
    %c220 = arith.constant 220 : index
    %220 = memref.load %arg0[%c220] : memref<225xf32, #tpu.memory_space<smem>>
    %c221 = arith.constant 221 : index
    %221 = memref.load %arg0[%c221] : memref<225xf32, #tpu.memory_space<smem>>
    %c222 = arith.constant 222 : index
    %222 = memref.load %arg0[%c222] : memref<225xf32, #tpu.memory_space<smem>>
    %c223 = arith.constant 223 : index
    %223 = memref.load %arg0[%c223] : memref<225xf32, #tpu.memory_space<smem>>
    %c224 = arith.constant 224 : index
    %224 = memref.load %arg0[%c224] : memref<225xf32, #tpu.memory_space<smem>>
    %225 = tpu.iota {dimensions = array<i32: 1>} : vector<2x256xi32>
    %c4_i32 = arith.constant 4 : i32
    %226 = vector.broadcast %c4_i32 : i32 to vector<2x256xi32>
    %227 = arith.shrsi %225, %226 : vector<2x256xi32>
    %c15_i32 = arith.constant 15 : i32
    %228 = vector.broadcast %c15_i32 : i32 to vector<2x256xi32>
    %229 = arith.andi %225, %228 : vector<2x256xi32>
    %c2_i32 = arith.constant 2 : i32
    %230 = vector.broadcast %c2_i32 : i32 to vector<2x256xi32>
    %231 = arith.cmpi sge, %227, %230 : vector<2x256xi32>
    %c1_i32 = arith.constant 1 : i32
    %232 = vector.broadcast %c1_i32 : i32 to vector<2x256xi32>
    %233 = arith.cmpi sge, %227, %232 : vector<2x256xi32>
    %c15_i32_0 = arith.constant 15 : i32
    %234 = vector.broadcast %c15_i32_0 : i32 to vector<2x256xi32>
    %235 = arith.cmpi slt, %227, %234 : vector<2x256xi32>
    %c14_i32 = arith.constant 14 : i32
    %236 = vector.broadcast %c14_i32 : i32 to vector<2x256xi32>
    %237 = arith.cmpi slt, %227, %236 : vector<2x256xi32>
    %c2_i32_1 = arith.constant 2 : i32
    %238 = vector.broadcast %c2_i32_1 : i32 to vector<2x256xi32>
    %239 = arith.cmpi sge, %229, %238 : vector<2x256xi32>
    %c1_i32_2 = arith.constant 1 : i32
    %240 = vector.broadcast %c1_i32_2 : i32 to vector<2x256xi32>
    %241 = arith.cmpi sge, %229, %240 : vector<2x256xi32>
    %c15_i32_3 = arith.constant 15 : i32
    %242 = vector.broadcast %c15_i32_3 : i32 to vector<2x256xi32>
    %243 = arith.cmpi slt, %229, %242 : vector<2x256xi32>
    %c14_i32_4 = arith.constant 14 : i32
    %244 = vector.broadcast %c14_i32_4 : i32 to vector<2x256xi32>
    %245 = arith.cmpi slt, %229, %244 : vector<2x256xi32>
    %c0_5 = arith.constant 0 : index
    %c0_6 = arith.constant 0 : index
    %246 = vector.load %arg1[%c0_5, %c0_6] : memref<6x256xf32, #tpu.memory_space<vmem>>, vector<2x256xf32>
    %c2_7 = arith.constant 2 : index
    %c0_8 = arith.constant 0 : index
    %247 = vector.load %arg1[%c2_7, %c0_8] : memref<6x256xf32, #tpu.memory_space<vmem>>, vector<2x256xf32>
    %c4_9 = arith.constant 4 : index
    %c0_10 = arith.constant 0 : index
    %248 = vector.load %arg1[%c4_9, %c0_10] : memref<6x256xf32, #tpu.memory_space<vmem>>, vector<2x256xf32>
    %249 = tpu.concatenate %246, %246 in 1 : vector<2x256xf32>, vector<2x256xf32> -> vector<2x512xf32>
    %250 = tpu.concatenate %247, %247 in 1 : vector<2x256xf32>, vector<2x256xf32> -> vector<2x512xf32>
    %251 = tpu.concatenate %248, %248 in 1 : vector<2x256xf32>, vector<2x256xf32> -> vector<2x512xf32>
    %cst = arith.constant 0.000000e+00 : f32
    %252 = vector.broadcast %cst : f32 to vector<2x256xf32>
    %cst_11 = arith.constant 0.000000e+00 : f32
    %253 = vector.broadcast %cst_11 : f32 to vector<2x256xf32>
    %cst_12 = arith.constant 0.000000e+00 : f32
    %254 = vector.broadcast %cst_12 : f32 to vector<2x256xf32>
    %cst_13 = arith.constant 0.000000e+00 : f32
    %255 = vector.broadcast %cst_13 : f32 to vector<2x256xf32>
    %cst_14 = arith.constant 0.000000e+00 : f32
    %256 = vector.broadcast %cst_14 : f32 to vector<2x256xf32>
    %cst_15 = arith.constant 0.000000e+00 : f32
    %257 = vector.broadcast %cst_15 : f32 to vector<2x256xf32>
    %258 = arith.andi %231, %239 : vector<2x256xi1>
    %259 = vector.extract_strided_slice %249 {offsets = [0, 222], sizes = [2, 256], strides = [1, 1]} : vector<2x512xf32> to vector<2x256xf32>
    %cst_16 = arith.constant 0.000000e+00 : f32
    %260 = vector.broadcast %cst_16 : f32 to vector<2x256xf32>
    %261 = arith.select %258, %259, %260 : vector<2x256xi1>, vector<2x256xf32>
    %262 = vector.broadcast %0 : f32 to vector<2x256xf32>
    %263 = arith.mulf %261, %262 : vector<2x256xf32>
    %264 = arith.addf %255, %263 : vector<2x256xf32>
    %265 = vector.broadcast %75 : f32 to vector<2x256xf32>
    %266 = arith.mulf %261, %265 : vector<2x256xf32>
    %267 = arith.addf %256, %266 : vector<2x256xf32>
    %268 = vector.broadcast %150 : f32 to vector<2x256xf32>
    %269 = arith.mulf %261, %268 : vector<2x256xf32>
    %270 = arith.addf %257, %269 : vector<2x256xf32>
    %271 = vector.extract_strided_slice %250 {offsets = [0, 222], sizes = [2, 256], strides = [1, 1]} : vector<2x512xf32> to vector<2x256xf32>
    %cst_17 = arith.constant 0.000000e+00 : f32
    %272 = vector.broadcast %cst_17 : f32 to vector<2x256xf32>
    %273 = arith.select %258, %271, %272 : vector<2x256xi1>, vector<2x256xf32>
    %274 = vector.broadcast %25 : f32 to vector<2x256xf32>
    %275 = arith.mulf %273, %274 : vector<2x256xf32>
    %276 = arith.addf %264, %275 : vector<2x256xf32>
    %277 = vector.broadcast %100 : f32 to vector<2x256xf32>
    %278 = arith.mulf %273, %277 : vector<2x256xf32>
    %279 = arith.addf %267, %278 : vector<2x256xf32>
    %280 = vector.broadcast %175 : f32 to vector<2x256xf32>
    %281 = arith.mulf %273, %280 : vector<2x256xf32>
    %282 = arith.addf %270, %281 : vector<2x256xf32>
    %283 = vector.extract_strided_slice %251 {offsets = [0, 222], sizes = [2, 256], strides = [1, 1]} : vector<2x512xf32> to vector<2x256xf32>
    %cst_18 = arith.constant 0.000000e+00 : f32
    %284 = vector.broadcast %cst_18 : f32 to vector<2x256xf32>
    %285 = arith.select %258, %283, %284 : vector<2x256xi1>, vector<2x256xf32>
    %286 = vector.broadcast %50 : f32 to vector<2x256xf32>
    %287 = arith.mulf %285, %286 : vector<2x256xf32>
    %288 = arith.addf %276, %287 : vector<2x256xf32>
    %289 = vector.broadcast %125 : f32 to vector<2x256xf32>
    %290 = arith.mulf %285, %289 : vector<2x256xf32>
    %291 = arith.addf %279, %290 : vector<2x256xf32>
    %292 = vector.broadcast %200 : f32 to vector<2x256xf32>
    %293 = arith.mulf %285, %292 : vector<2x256xf32>
    %294 = arith.addf %282, %293 : vector<2x256xf32>
    %295 = arith.andi %231, %241 : vector<2x256xi1>
    %296 = vector.extract_strided_slice %249 {offsets = [0, 223], sizes = [2, 256], strides = [1, 1]} : vector<2x512xf32> to vector<2x256xf32>
    %cst_19 = arith.constant 0.000000e+00 : f32
    %297 = vector.broadcast %cst_19 : f32 to vector<2x256xf32>
    %298 = arith.select %295, %296, %297 : vector<2x256xi1>, vector<2x256xf32>
    %299 = vector.broadcast %1 : f32 to vector<2x256xf32>
    %300 = arith.mulf %298, %299 : vector<2x256xf32>
    %301 = arith.addf %288, %300 : vector<2x256xf32>
    %302 = vector.broadcast %76 : f32 to vector<2x256xf32>
    %303 = arith.mulf %298, %302 : vector<2x256xf32>
    %304 = arith.addf %291, %303 : vector<2x256xf32>
    %305 = vector.broadcast %151 : f32 to vector<2x256xf32>
    %306 = arith.mulf %298, %305 : vector<2x256xf32>
    %307 = arith.addf %294, %306 : vector<2x256xf32>
    %308 = vector.extract_strided_slice %250 {offsets = [0, 223], sizes = [2, 256], strides = [1, 1]} : vector<2x512xf32> to vector<2x256xf32>
    %cst_20 = arith.constant 0.000000e+00 : f32
    %309 = vector.broadcast %cst_20 : f32 to vector<2x256xf32>
    %310 = arith.select %295, %308, %309 : vector<2x256xi1>, vector<2x256xf32>
    %311 = vector.broadcast %26 : f32 to vector<2x256xf32>
    %312 = arith.mulf %310, %311 : vector<2x256xf32>
    %313 = arith.addf %301, %312 : vector<2x256xf32>
    %314 = vector.broadcast %101 : f32 to vector<2x256xf32>
    %315 = arith.mulf %310, %314 : vector<2x256xf32>
    %316 = arith.addf %304, %315 : vector<2x256xf32>
    %317 = vector.broadcast %176 : f32 to vector<2x256xf32>
    %318 = arith.mulf %310, %317 : vector<2x256xf32>
    %319 = arith.addf %307, %318 : vector<2x256xf32>
    %320 = vector.extract_strided_slice %251 {offsets = [0, 223], sizes = [2, 256], strides = [1, 1]} : vector<2x512xf32> to vector<2x256xf32>
    %cst_21 = arith.constant 0.000000e+00 : f32
    %321 = vector.broadcast %cst_21 : f32 to vector<2x256xf32>
    %322 = arith.select %295, %320, %321 : vector<2x256xi1>, vector<2x256xf32>
    %323 = vector.broadcast %51 : f32 to vector<2x256xf32>
    %324 = arith.mulf %322, %323 : vector<2x256xf32>
    %325 = arith.addf %313, %324 : vector<2x256xf32>
    %326 = vector.broadcast %126 : f32 to vector<2x256xf32>
    %327 = arith.mulf %322, %326 : vector<2x256xf32>
    %328 = arith.addf %316, %327 : vector<2x256xf32>
    %329 = vector.broadcast %201 : f32 to vector<2x256xf32>
    %330 = arith.mulf %322, %329 : vector<2x256xf32>
    %331 = arith.addf %319, %330 : vector<2x256xf32>
    %332 = vector.extract_strided_slice %249 {offsets = [0, 224], sizes = [2, 256], strides = [1, 1]} : vector<2x512xf32> to vector<2x256xf32>
    %cst_22 = arith.constant 0.000000e+00 : f32
    %333 = vector.broadcast %cst_22 : f32 to vector<2x256xf32>
    %334 = arith.select %231, %332, %333 : vector<2x256xi1>, vector<2x256xf32>
    %335 = vector.broadcast %2 : f32 to vector<2x256xf32>
    %336 = arith.mulf %334, %335 : vector<2x256xf32>
    %337 = arith.addf %325, %336 : vector<2x256xf32>
    %338 = vector.broadcast %77 : f32 to vector<2x256xf32>
    %339 = arith.mulf %334, %338 : vector<2x256xf32>
    %340 = arith.addf %328, %339 : vector<2x256xf32>
    %341 = vector.broadcast %152 : f32 to vector<2x256xf32>
    %342 = arith.mulf %334, %341 : vector<2x256xf32>
    %343 = arith.addf %331, %342 : vector<2x256xf32>
    %344 = vector.extract_strided_slice %250 {offsets = [0, 224], sizes = [2, 256], strides = [1, 1]} : vector<2x512xf32> to vector<2x256xf32>
    %cst_23 = arith.constant 0.000000e+00 : f32
    %345 = vector.broadcast %cst_23 : f32 to vector<2x256xf32>
    %346 = arith.select %231, %344, %345 : vector<2x256xi1>, vector<2x256xf32>
    %347 = vector.broadcast %27 : f32 to vector<2x256xf32>
    %348 = arith.mulf %346, %347 : vector<2x256xf32>
    %349 = arith.addf %337, %348 : vector<2x256xf32>
    %350 = vector.broadcast %102 : f32 to vector<2x256xf32>
    %351 = arith.mulf %346, %350 : vector<2x256xf32>
    %352 = arith.addf %340, %351 : vector<2x256xf32>
    %353 = vector.broadcast %177 : f32 to vector<2x256xf32>
    %354 = arith.mulf %346, %353 : vector<2x256xf32>
    %355 = arith.addf %343, %354 : vector<2x256xf32>
    %356 = vector.extract_strided_slice %251 {offsets = [0, 224], sizes = [2, 256], strides = [1, 1]} : vector<2x512xf32> to vector<2x256xf32>
    %cst_24 = arith.constant 0.000000e+00 : f32
    %357 = vector.broadcast %cst_24 : f32 to vector<2x256xf32>
    %358 = arith.select %231, %356, %357 : vector<2x256xi1>, vector<2x256xf32>
    %359 = vector.broadcast %52 : f32 to vector<2x256xf32>
    %360 = arith.mulf %358, %359 : vector<2x256xf32>
    %361 = arith.addf %349, %360 : vector<2x256xf32>
    %362 = vector.broadcast %127 : f32 to vector<2x256xf32>
    %363 = arith.mulf %358, %362 : vector<2x256xf32>
    %364 = arith.addf %352, %363 : vector<2x256xf32>
    %365 = vector.broadcast %202 : f32 to vector<2x256xf32>
    %366 = arith.mulf %358, %365 : vector<2x256xf32>
    %367 = arith.addf %355, %366 : vector<2x256xf32>
    %368 = arith.andi %231, %243 : vector<2x256xi1>
    %369 = vector.extract_strided_slice %249 {offsets = [0, 225], sizes = [2, 256], strides = [1, 1]} : vector<2x512xf32> to vector<2x256xf32>
    %cst_25 = arith.constant 0.000000e+00 : f32
    %370 = vector.broadcast %cst_25 : f32 to vector<2x256xf32>
    %371 = arith.select %368, %369, %370 : vector<2x256xi1>, vector<2x256xf32>
    %372 = vector.broadcast %3 : f32 to vector<2x256xf32>
    %373 = arith.mulf %371, %372 : vector<2x256xf32>
    %374 = arith.addf %361, %373 : vector<2x256xf32>
    %375 = vector.broadcast %78 : f32 to vector<2x256xf32>
    %376 = arith.mulf %371, %375 : vector<2x256xf32>
    %377 = arith.addf %364, %376 : vector<2x256xf32>
    %378 = vector.broadcast %153 : f32 to vector<2x256xf32>
    %379 = arith.mulf %371, %378 : vector<2x256xf32>
    %380 = arith.addf %367, %379 : vector<2x256xf32>
    %381 = vector.extract_strided_slice %250 {offsets = [0, 225], sizes = [2, 256], strides = [1, 1]} : vector<2x512xf32> to vector<2x256xf32>
    %cst_26 = arith.constant 0.000000e+00 : f32
    %382 = vector.broadcast %cst_26 : f32 to vector<2x256xf32>
    %383 = arith.select %368, %381, %382 : vector<2x256xi1>, vector<2x256xf32>
    %384 = vector.broadcast %28 : f32 to vector<2x256xf32>
    %385 = arith.mulf %383, %384 : vector<2x256xf32>
    %386 = arith.addf %374, %385 : vector<2x256xf32>
    %387 = vector.broadcast %103 : f32 to vector<2x256xf32>
    %388 = arith.mulf %383, %387 : vector<2x256xf32>
    %389 = arith.addf %377, %388 : vector<2x256xf32>
    %390 = vector.broadcast %178 : f32 to vector<2x256xf32>
    %391 = arith.mulf %383, %390 : vector<2x256xf32>
    %392 = arith.addf %380, %391 : vector<2x256xf32>
    %393 = vector.extract_strided_slice %251 {offsets = [0, 225], sizes = [2, 256], strides = [1, 1]} : vector<2x512xf32> to vector<2x256xf32>
    %cst_27 = arith.constant 0.000000e+00 : f32
    %394 = vector.broadcast %cst_27 : f32 to vector<2x256xf32>
    %395 = arith.select %368, %393, %394 : vector<2x256xi1>, vector<2x256xf32>
    %396 = vector.broadcast %53 : f32 to vector<2x256xf32>
    %397 = arith.mulf %395, %396 : vector<2x256xf32>
    %398 = arith.addf %386, %397 : vector<2x256xf32>
    %399 = vector.broadcast %128 : f32 to vector<2x256xf32>
    %400 = arith.mulf %395, %399 : vector<2x256xf32>
    %401 = arith.addf %389, %400 : vector<2x256xf32>
    %402 = vector.broadcast %203 : f32 to vector<2x256xf32>
    %403 = arith.mulf %395, %402 : vector<2x256xf32>
    %404 = arith.addf %392, %403 : vector<2x256xf32>
    %405 = arith.andi %231, %245 : vector<2x256xi1>
    %406 = vector.extract_strided_slice %249 {offsets = [0, 226], sizes = [2, 256], strides = [1, 1]} : vector<2x512xf32> to vector<2x256xf32>
    %cst_28 = arith.constant 0.000000e+00 : f32
    %407 = vector.broadcast %cst_28 : f32 to vector<2x256xf32>
    %408 = arith.select %405, %406, %407 : vector<2x256xi1>, vector<2x256xf32>
    %409 = vector.broadcast %4 : f32 to vector<2x256xf32>
    %410 = arith.mulf %408, %409 : vector<2x256xf32>
    %411 = arith.addf %398, %410 : vector<2x256xf32>
    %412 = vector.broadcast %79 : f32 to vector<2x256xf32>
    %413 = arith.mulf %408, %412 : vector<2x256xf32>
    %414 = arith.addf %401, %413 : vector<2x256xf32>
    %415 = vector.broadcast %154 : f32 to vector<2x256xf32>
    %416 = arith.mulf %408, %415 : vector<2x256xf32>
    %417 = arith.addf %404, %416 : vector<2x256xf32>
    %418 = vector.extract_strided_slice %250 {offsets = [0, 226], sizes = [2, 256], strides = [1, 1]} : vector<2x512xf32> to vector<2x256xf32>
    %cst_29 = arith.constant 0.000000e+00 : f32
    %419 = vector.broadcast %cst_29 : f32 to vector<2x256xf32>
    %420 = arith.select %405, %418, %419 : vector<2x256xi1>, vector<2x256xf32>
    %421 = vector.broadcast %29 : f32 to vector<2x256xf32>
    %422 = arith.mulf %420, %421 : vector<2x256xf32>
    %423 = arith.addf %411, %422 : vector<2x256xf32>
    %424 = vector.broadcast %104 : f32 to vector<2x256xf32>
    %425 = arith.mulf %420, %424 : vector<2x256xf32>
    %426 = arith.addf %414, %425 : vector<2x256xf32>
    %427 = vector.broadcast %179 : f32 to vector<2x256xf32>
    %428 = arith.mulf %420, %427 : vector<2x256xf32>
    %429 = arith.addf %417, %428 : vector<2x256xf32>
    %430 = vector.extract_strided_slice %251 {offsets = [0, 226], sizes = [2, 256], strides = [1, 1]} : vector<2x512xf32> to vector<2x256xf32>
    %cst_30 = arith.constant 0.000000e+00 : f32
    %431 = vector.broadcast %cst_30 : f32 to vector<2x256xf32>
    %432 = arith.select %405, %430, %431 : vector<2x256xi1>, vector<2x256xf32>
    %433 = vector.broadcast %54 : f32 to vector<2x256xf32>
    %434 = arith.mulf %432, %433 : vector<2x256xf32>
    %435 = arith.addf %423, %434 : vector<2x256xf32>
    %436 = vector.broadcast %129 : f32 to vector<2x256xf32>
    %437 = arith.mulf %432, %436 : vector<2x256xf32>
    %438 = arith.addf %426, %437 : vector<2x256xf32>
    %439 = vector.broadcast %204 : f32 to vector<2x256xf32>
    %440 = arith.mulf %432, %439 : vector<2x256xf32>
    %441 = arith.addf %429, %440 : vector<2x256xf32>
    %442 = arith.addf %252, %435 : vector<2x256xf32>
    %443 = arith.addf %253, %438 : vector<2x256xf32>
    %444 = arith.addf %254, %441 : vector<2x256xf32>
    %cst_31 = arith.constant 0.000000e+00 : f32
    %445 = vector.broadcast %cst_31 : f32 to vector<2x256xf32>
    %cst_32 = arith.constant 0.000000e+00 : f32
    %446 = vector.broadcast %cst_32 : f32 to vector<2x256xf32>
    %cst_33 = arith.constant 0.000000e+00 : f32
    %447 = vector.broadcast %cst_33 : f32 to vector<2x256xf32>
    %448 = arith.andi %233, %239 : vector<2x256xi1>
    %449 = vector.extract_strided_slice %249 {offsets = [0, 238], sizes = [2, 256], strides = [1, 1]} : vector<2x512xf32> to vector<2x256xf32>
    %cst_34 = arith.constant 0.000000e+00 : f32
    %450 = vector.broadcast %cst_34 : f32 to vector<2x256xf32>
    %451 = arith.select %448, %449, %450 : vector<2x256xi1>, vector<2x256xf32>
    %452 = vector.broadcast %5 : f32 to vector<2x256xf32>
    %453 = arith.mulf %451, %452 : vector<2x256xf32>
    %454 = arith.addf %445, %453 : vector<2x256xf32>
    %455 = vector.broadcast %80 : f32 to vector<2x256xf32>
    %456 = arith.mulf %451, %455 : vector<2x256xf32>
    %457 = arith.addf %446, %456 : vector<2x256xf32>
    %458 = vector.broadcast %155 : f32 to vector<2x256xf32>
    %459 = arith.mulf %451, %458 : vector<2x256xf32>
    %460 = arith.addf %447, %459 : vector<2x256xf32>
    %461 = vector.extract_strided_slice %250 {offsets = [0, 238], sizes = [2, 256], strides = [1, 1]} : vector<2x512xf32> to vector<2x256xf32>
    %cst_35 = arith.constant 0.000000e+00 : f32
    %462 = vector.broadcast %cst_35 : f32 to vector<2x256xf32>
    %463 = arith.select %448, %461, %462 : vector<2x256xi1>, vector<2x256xf32>
    %464 = vector.broadcast %30 : f32 to vector<2x256xf32>
    %465 = arith.mulf %463, %464 : vector<2x256xf32>
    %466 = arith.addf %454, %465 : vector<2x256xf32>
    %467 = vector.broadcast %105 : f32 to vector<2x256xf32>
    %468 = arith.mulf %463, %467 : vector<2x256xf32>
    %469 = arith.addf %457, %468 : vector<2x256xf32>
    %470 = vector.broadcast %180 : f32 to vector<2x256xf32>
    %471 = arith.mulf %463, %470 : vector<2x256xf32>
    %472 = arith.addf %460, %471 : vector<2x256xf32>
    %473 = vector.extract_strided_slice %251 {offsets = [0, 238], sizes = [2, 256], strides = [1, 1]} : vector<2x512xf32> to vector<2x256xf32>
    %cst_36 = arith.constant 0.000000e+00 : f32
    %474 = vector.broadcast %cst_36 : f32 to vector<2x256xf32>
    %475 = arith.select %448, %473, %474 : vector<2x256xi1>, vector<2x256xf32>
    %476 = vector.broadcast %55 : f32 to vector<2x256xf32>
    %477 = arith.mulf %475, %476 : vector<2x256xf32>
    %478 = arith.addf %466, %477 : vector<2x256xf32>
    %479 = vector.broadcast %130 : f32 to vector<2x256xf32>
    %480 = arith.mulf %475, %479 : vector<2x256xf32>
    %481 = arith.addf %469, %480 : vector<2x256xf32>
    %482 = vector.broadcast %205 : f32 to vector<2x256xf32>
    %483 = arith.mulf %475, %482 : vector<2x256xf32>
    %484 = arith.addf %472, %483 : vector<2x256xf32>
    %485 = arith.andi %233, %241 : vector<2x256xi1>
    %486 = vector.extract_strided_slice %249 {offsets = [0, 239], sizes = [2, 256], strides = [1, 1]} : vector<2x512xf32> to vector<2x256xf32>
    %cst_37 = arith.constant 0.000000e+00 : f32
    %487 = vector.broadcast %cst_37 : f32 to vector<2x256xf32>
    %488 = arith.select %485, %486, %487 : vector<2x256xi1>, vector<2x256xf32>
    %489 = vector.broadcast %6 : f32 to vector<2x256xf32>
    %490 = arith.mulf %488, %489 : vector<2x256xf32>
    %491 = arith.addf %478, %490 : vector<2x256xf32>
    %492 = vector.broadcast %81 : f32 to vector<2x256xf32>
    %493 = arith.mulf %488, %492 : vector<2x256xf32>
    %494 = arith.addf %481, %493 : vector<2x256xf32>
    %495 = vector.broadcast %156 : f32 to vector<2x256xf32>
    %496 = arith.mulf %488, %495 : vector<2x256xf32>
    %497 = arith.addf %484, %496 : vector<2x256xf32>
    %498 = vector.extract_strided_slice %250 {offsets = [0, 239], sizes = [2, 256], strides = [1, 1]} : vector<2x512xf32> to vector<2x256xf32>
    %cst_38 = arith.constant 0.000000e+00 : f32
    %499 = vector.broadcast %cst_38 : f32 to vector<2x256xf32>
    %500 = arith.select %485, %498, %499 : vector<2x256xi1>, vector<2x256xf32>
    %501 = vector.broadcast %31 : f32 to vector<2x256xf32>
    %502 = arith.mulf %500, %501 : vector<2x256xf32>
    %503 = arith.addf %491, %502 : vector<2x256xf32>
    %504 = vector.broadcast %106 : f32 to vector<2x256xf32>
    %505 = arith.mulf %500, %504 : vector<2x256xf32>
    %506 = arith.addf %494, %505 : vector<2x256xf32>
    %507 = vector.broadcast %181 : f32 to vector<2x256xf32>
    %508 = arith.mulf %500, %507 : vector<2x256xf32>
    %509 = arith.addf %497, %508 : vector<2x256xf32>
    %510 = vector.extract_strided_slice %251 {offsets = [0, 239], sizes = [2, 256], strides = [1, 1]} : vector<2x512xf32> to vector<2x256xf32>
    %cst_39 = arith.constant 0.000000e+00 : f32
    %511 = vector.broadcast %cst_39 : f32 to vector<2x256xf32>
    %512 = arith.select %485, %510, %511 : vector<2x256xi1>, vector<2x256xf32>
    %513 = vector.broadcast %56 : f32 to vector<2x256xf32>
    %514 = arith.mulf %512, %513 : vector<2x256xf32>
    %515 = arith.addf %503, %514 : vector<2x256xf32>
    %516 = vector.broadcast %131 : f32 to vector<2x256xf32>
    %517 = arith.mulf %512, %516 : vector<2x256xf32>
    %518 = arith.addf %506, %517 : vector<2x256xf32>
    %519 = vector.broadcast %206 : f32 to vector<2x256xf32>
    %520 = arith.mulf %512, %519 : vector<2x256xf32>
    %521 = arith.addf %509, %520 : vector<2x256xf32>
    %522 = vector.extract_strided_slice %249 {offsets = [0, 240], sizes = [2, 256], strides = [1, 1]} : vector<2x512xf32> to vector<2x256xf32>
    %cst_40 = arith.constant 0.000000e+00 : f32
    %523 = vector.broadcast %cst_40 : f32 to vector<2x256xf32>
    %524 = arith.select %233, %522, %523 : vector<2x256xi1>, vector<2x256xf32>
    %525 = vector.broadcast %7 : f32 to vector<2x256xf32>
    %526 = arith.mulf %524, %525 : vector<2x256xf32>
    %527 = arith.addf %515, %526 : vector<2x256xf32>
    %528 = vector.broadcast %82 : f32 to vector<2x256xf32>
    %529 = arith.mulf %524, %528 : vector<2x256xf32>
    %530 = arith.addf %518, %529 : vector<2x256xf32>
    %531 = vector.broadcast %157 : f32 to vector<2x256xf32>
    %532 = arith.mulf %524, %531 : vector<2x256xf32>
    %533 = arith.addf %521, %532 : vector<2x256xf32>
    %534 = vector.extract_strided_slice %250 {offsets = [0, 240], sizes = [2, 256], strides = [1, 1]} : vector<2x512xf32> to vector<2x256xf32>
    %cst_41 = arith.constant 0.000000e+00 : f32
    %535 = vector.broadcast %cst_41 : f32 to vector<2x256xf32>
    %536 = arith.select %233, %534, %535 : vector<2x256xi1>, vector<2x256xf32>
    %537 = vector.broadcast %32 : f32 to vector<2x256xf32>
    %538 = arith.mulf %536, %537 : vector<2x256xf32>
    %539 = arith.addf %527, %538 : vector<2x256xf32>
    %540 = vector.broadcast %107 : f32 to vector<2x256xf32>
    %541 = arith.mulf %536, %540 : vector<2x256xf32>
    %542 = arith.addf %530, %541 : vector<2x256xf32>
    %543 = vector.broadcast %182 : f32 to vector<2x256xf32>
    %544 = arith.mulf %536, %543 : vector<2x256xf32>
    %545 = arith.addf %533, %544 : vector<2x256xf32>
    %546 = vector.extract_strided_slice %251 {offsets = [0, 240], sizes = [2, 256], strides = [1, 1]} : vector<2x512xf32> to vector<2x256xf32>
    %cst_42 = arith.constant 0.000000e+00 : f32
    %547 = vector.broadcast %cst_42 : f32 to vector<2x256xf32>
    %548 = arith.select %233, %546, %547 : vector<2x256xi1>, vector<2x256xf32>
    %549 = vector.broadcast %57 : f32 to vector<2x256xf32>
    %550 = arith.mulf %548, %549 : vector<2x256xf32>
    %551 = arith.addf %539, %550 : vector<2x256xf32>
    %552 = vector.broadcast %132 : f32 to vector<2x256xf32>
    %553 = arith.mulf %548, %552 : vector<2x256xf32>
    %554 = arith.addf %542, %553 : vector<2x256xf32>
    %555 = vector.broadcast %207 : f32 to vector<2x256xf32>
    %556 = arith.mulf %548, %555 : vector<2x256xf32>
    %557 = arith.addf %545, %556 : vector<2x256xf32>
    %558 = arith.andi %233, %243 : vector<2x256xi1>
    %559 = vector.extract_strided_slice %249 {offsets = [0, 241], sizes = [2, 256], strides = [1, 1]} : vector<2x512xf32> to vector<2x256xf32>
    %cst_43 = arith.constant 0.000000e+00 : f32
    %560 = vector.broadcast %cst_43 : f32 to vector<2x256xf32>
    %561 = arith.select %558, %559, %560 : vector<2x256xi1>, vector<2x256xf32>
    %562 = vector.broadcast %8 : f32 to vector<2x256xf32>
    %563 = arith.mulf %561, %562 : vector<2x256xf32>
    %564 = arith.addf %551, %563 : vector<2x256xf32>
    %565 = vector.broadcast %83 : f32 to vector<2x256xf32>
    %566 = arith.mulf %561, %565 : vector<2x256xf32>
    %567 = arith.addf %554, %566 : vector<2x256xf32>
    %568 = vector.broadcast %158 : f32 to vector<2x256xf32>
    %569 = arith.mulf %561, %568 : vector<2x256xf32>
    %570 = arith.addf %557, %569 : vector<2x256xf32>
    %571 = vector.extract_strided_slice %250 {offsets = [0, 241], sizes = [2, 256], strides = [1, 1]} : vector<2x512xf32> to vector<2x256xf32>
    %cst_44 = arith.constant 0.000000e+00 : f32
    %572 = vector.broadcast %cst_44 : f32 to vector<2x256xf32>
    %573 = arith.select %558, %571, %572 : vector<2x256xi1>, vector<2x256xf32>
    %574 = vector.broadcast %33 : f32 to vector<2x256xf32>
    %575 = arith.mulf %573, %574 : vector<2x256xf32>
    %576 = arith.addf %564, %575 : vector<2x256xf32>
    %577 = vector.broadcast %108 : f32 to vector<2x256xf32>
    %578 = arith.mulf %573, %577 : vector<2x256xf32>
    %579 = arith.addf %567, %578 : vector<2x256xf32>
    %580 = vector.broadcast %183 : f32 to vector<2x256xf32>
    %581 = arith.mulf %573, %580 : vector<2x256xf32>
    %582 = arith.addf %570, %581 : vector<2x256xf32>
    %583 = vector.extract_strided_slice %251 {offsets = [0, 241], sizes = [2, 256], strides = [1, 1]} : vector<2x512xf32> to vector<2x256xf32>
    %cst_45 = arith.constant 0.000000e+00 : f32
    %584 = vector.broadcast %cst_45 : f32 to vector<2x256xf32>
    %585 = arith.select %558, %583, %584 : vector<2x256xi1>, vector<2x256xf32>
    %586 = vector.broadcast %58 : f32 to vector<2x256xf32>
    %587 = arith.mulf %585, %586 : vector<2x256xf32>
    %588 = arith.addf %576, %587 : vector<2x256xf32>
    %589 = vector.broadcast %133 : f32 to vector<2x256xf32>
    %590 = arith.mulf %585, %589 : vector<2x256xf32>
    %591 = arith.addf %579, %590 : vector<2x256xf32>
    %592 = vector.broadcast %208 : f32 to vector<2x256xf32>
    %593 = arith.mulf %585, %592 : vector<2x256xf32>
    %594 = arith.addf %582, %593 : vector<2x256xf32>
    %595 = arith.andi %233, %245 : vector<2x256xi1>
    %596 = vector.extract_strided_slice %249 {offsets = [0, 242], sizes = [2, 256], strides = [1, 1]} : vector<2x512xf32> to vector<2x256xf32>
    %cst_46 = arith.constant 0.000000e+00 : f32
    %597 = vector.broadcast %cst_46 : f32 to vector<2x256xf32>
    %598 = arith.select %595, %596, %597 : vector<2x256xi1>, vector<2x256xf32>
    %599 = vector.broadcast %9 : f32 to vector<2x256xf32>
    %600 = arith.mulf %598, %599 : vector<2x256xf32>
    %601 = arith.addf %588, %600 : vector<2x256xf32>
    %602 = vector.broadcast %84 : f32 to vector<2x256xf32>
    %603 = arith.mulf %598, %602 : vector<2x256xf32>
    %604 = arith.addf %591, %603 : vector<2x256xf32>
    %605 = vector.broadcast %159 : f32 to vector<2x256xf32>
    %606 = arith.mulf %598, %605 : vector<2x256xf32>
    %607 = arith.addf %594, %606 : vector<2x256xf32>
    %608 = vector.extract_strided_slice %250 {offsets = [0, 242], sizes = [2, 256], strides = [1, 1]} : vector<2x512xf32> to vector<2x256xf32>
    %cst_47 = arith.constant 0.000000e+00 : f32
    %609 = vector.broadcast %cst_47 : f32 to vector<2x256xf32>
    %610 = arith.select %595, %608, %609 : vector<2x256xi1>, vector<2x256xf32>
    %611 = vector.broadcast %34 : f32 to vector<2x256xf32>
    %612 = arith.mulf %610, %611 : vector<2x256xf32>
    %613 = arith.addf %601, %612 : vector<2x256xf32>
    %614 = vector.broadcast %109 : f32 to vector<2x256xf32>
    %615 = arith.mulf %610, %614 : vector<2x256xf32>
    %616 = arith.addf %604, %615 : vector<2x256xf32>
    %617 = vector.broadcast %184 : f32 to vector<2x256xf32>
    %618 = arith.mulf %610, %617 : vector<2x256xf32>
    %619 = arith.addf %607, %618 : vector<2x256xf32>
    %620 = vector.extract_strided_slice %251 {offsets = [0, 242], sizes = [2, 256], strides = [1, 1]} : vector<2x512xf32> to vector<2x256xf32>
    %cst_48 = arith.constant 0.000000e+00 : f32
    %621 = vector.broadcast %cst_48 : f32 to vector<2x256xf32>
    %622 = arith.select %595, %620, %621 : vector<2x256xi1>, vector<2x256xf32>
    %623 = vector.broadcast %59 : f32 to vector<2x256xf32>
    %624 = arith.mulf %622, %623 : vector<2x256xf32>
    %625 = arith.addf %613, %624 : vector<2x256xf32>
    %626 = vector.broadcast %134 : f32 to vector<2x256xf32>
    %627 = arith.mulf %622, %626 : vector<2x256xf32>
    %628 = arith.addf %616, %627 : vector<2x256xf32>
    %629 = vector.broadcast %209 : f32 to vector<2x256xf32>
    %630 = arith.mulf %622, %629 : vector<2x256xf32>
    %631 = arith.addf %619, %630 : vector<2x256xf32>
    %632 = arith.addf %442, %625 : vector<2x256xf32>
    %633 = arith.addf %443, %628 : vector<2x256xf32>
    %634 = arith.addf %444, %631 : vector<2x256xf32>
    %cst_49 = arith.constant 0.000000e+00 : f32
    %635 = vector.broadcast %cst_49 : f32 to vector<2x256xf32>
    %cst_50 = arith.constant 0.000000e+00 : f32
    %636 = vector.broadcast %cst_50 : f32 to vector<2x256xf32>
    %cst_51 = arith.constant 0.000000e+00 : f32
    %637 = vector.broadcast %cst_51 : f32 to vector<2x256xf32>
    %638 = vector.extract_strided_slice %249 {offsets = [0, 254], sizes = [2, 256], strides = [1, 1]} : vector<2x512xf32> to vector<2x256xf32>
    %cst_52 = arith.constant 0.000000e+00 : f32
    %639 = vector.broadcast %cst_52 : f32 to vector<2x256xf32>
    %640 = arith.select %239, %638, %639 : vector<2x256xi1>, vector<2x256xf32>
    %641 = vector.broadcast %10 : f32 to vector<2x256xf32>
    %642 = arith.mulf %640, %641 : vector<2x256xf32>
    %643 = arith.addf %635, %642 : vector<2x256xf32>
    %644 = vector.broadcast %85 : f32 to vector<2x256xf32>
    %645 = arith.mulf %640, %644 : vector<2x256xf32>
    %646 = arith.addf %636, %645 : vector<2x256xf32>
    %647 = vector.broadcast %160 : f32 to vector<2x256xf32>
    %648 = arith.mulf %640, %647 : vector<2x256xf32>
    %649 = arith.addf %637, %648 : vector<2x256xf32>
    %650 = vector.extract_strided_slice %250 {offsets = [0, 254], sizes = [2, 256], strides = [1, 1]} : vector<2x512xf32> to vector<2x256xf32>
    %cst_53 = arith.constant 0.000000e+00 : f32
    %651 = vector.broadcast %cst_53 : f32 to vector<2x256xf32>
    %652 = arith.select %239, %650, %651 : vector<2x256xi1>, vector<2x256xf32>
    %653 = vector.broadcast %35 : f32 to vector<2x256xf32>
    %654 = arith.mulf %652, %653 : vector<2x256xf32>
    %655 = arith.addf %643, %654 : vector<2x256xf32>
    %656 = vector.broadcast %110 : f32 to vector<2x256xf32>
    %657 = arith.mulf %652, %656 : vector<2x256xf32>
    %658 = arith.addf %646, %657 : vector<2x256xf32>
    %659 = vector.broadcast %185 : f32 to vector<2x256xf32>
    %660 = arith.mulf %652, %659 : vector<2x256xf32>
    %661 = arith.addf %649, %660 : vector<2x256xf32>
    %662 = vector.extract_strided_slice %251 {offsets = [0, 254], sizes = [2, 256], strides = [1, 1]} : vector<2x512xf32> to vector<2x256xf32>
    %cst_54 = arith.constant 0.000000e+00 : f32
    %663 = vector.broadcast %cst_54 : f32 to vector<2x256xf32>
    %664 = arith.select %239, %662, %663 : vector<2x256xi1>, vector<2x256xf32>
    %665 = vector.broadcast %60 : f32 to vector<2x256xf32>
    %666 = arith.mulf %664, %665 : vector<2x256xf32>
    %667 = arith.addf %655, %666 : vector<2x256xf32>
    %668 = vector.broadcast %135 : f32 to vector<2x256xf32>
    %669 = arith.mulf %664, %668 : vector<2x256xf32>
    %670 = arith.addf %658, %669 : vector<2x256xf32>
    %671 = vector.broadcast %210 : f32 to vector<2x256xf32>
    %672 = arith.mulf %664, %671 : vector<2x256xf32>
    %673 = arith.addf %661, %672 : vector<2x256xf32>
    %674 = vector.extract_strided_slice %249 {offsets = [0, 255], sizes = [2, 256], strides = [1, 1]} : vector<2x512xf32> to vector<2x256xf32>
    %cst_55 = arith.constant 0.000000e+00 : f32
    %675 = vector.broadcast %cst_55 : f32 to vector<2x256xf32>
    %676 = arith.select %241, %674, %675 : vector<2x256xi1>, vector<2x256xf32>
    %677 = vector.broadcast %11 : f32 to vector<2x256xf32>
    %678 = arith.mulf %676, %677 : vector<2x256xf32>
    %679 = arith.addf %667, %678 : vector<2x256xf32>
    %680 = vector.broadcast %86 : f32 to vector<2x256xf32>
    %681 = arith.mulf %676, %680 : vector<2x256xf32>
    %682 = arith.addf %670, %681 : vector<2x256xf32>
    %683 = vector.broadcast %161 : f32 to vector<2x256xf32>
    %684 = arith.mulf %676, %683 : vector<2x256xf32>
    %685 = arith.addf %673, %684 : vector<2x256xf32>
    %686 = vector.extract_strided_slice %250 {offsets = [0, 255], sizes = [2, 256], strides = [1, 1]} : vector<2x512xf32> to vector<2x256xf32>
    %cst_56 = arith.constant 0.000000e+00 : f32
    %687 = vector.broadcast %cst_56 : f32 to vector<2x256xf32>
    %688 = arith.select %241, %686, %687 : vector<2x256xi1>, vector<2x256xf32>
    %689 = vector.broadcast %36 : f32 to vector<2x256xf32>
    %690 = arith.mulf %688, %689 : vector<2x256xf32>
    %691 = arith.addf %679, %690 : vector<2x256xf32>
    %692 = vector.broadcast %111 : f32 to vector<2x256xf32>
    %693 = arith.mulf %688, %692 : vector<2x256xf32>
    %694 = arith.addf %682, %693 : vector<2x256xf32>
    %695 = vector.broadcast %186 : f32 to vector<2x256xf32>
    %696 = arith.mulf %688, %695 : vector<2x256xf32>
    %697 = arith.addf %685, %696 : vector<2x256xf32>
    %698 = vector.extract_strided_slice %251 {offsets = [0, 255], sizes = [2, 256], strides = [1, 1]} : vector<2x512xf32> to vector<2x256xf32>
    %cst_57 = arith.constant 0.000000e+00 : f32
    %699 = vector.broadcast %cst_57 : f32 to vector<2x256xf32>
    %700 = arith.select %241, %698, %699 : vector<2x256xi1>, vector<2x256xf32>
    %701 = vector.broadcast %61 : f32 to vector<2x256xf32>
    %702 = arith.mulf %700, %701 : vector<2x256xf32>
    %703 = arith.addf %691, %702 : vector<2x256xf32>
    %704 = vector.broadcast %136 : f32 to vector<2x256xf32>
    %705 = arith.mulf %700, %704 : vector<2x256xf32>
    %706 = arith.addf %694, %705 : vector<2x256xf32>
    %707 = vector.broadcast %211 : f32 to vector<2x256xf32>
    %708 = arith.mulf %700, %707 : vector<2x256xf32>
    %709 = arith.addf %697, %708 : vector<2x256xf32>
    %710 = vector.extract_strided_slice %249 {offsets = [0, 0], sizes = [2, 256], strides = [1, 1]} : vector<2x512xf32> to vector<2x256xf32>
    %711 = vector.broadcast %12 : f32 to vector<2x256xf32>
    %712 = arith.mulf %710, %711 : vector<2x256xf32>
    %713 = arith.addf %703, %712 : vector<2x256xf32>
    %714 = vector.broadcast %87 : f32 to vector<2x256xf32>
    %715 = arith.mulf %710, %714 : vector<2x256xf32>
    %716 = arith.addf %706, %715 : vector<2x256xf32>
    %717 = vector.broadcast %162 : f32 to vector<2x256xf32>
    %718 = arith.mulf %710, %717 : vector<2x256xf32>
    %719 = arith.addf %709, %718 : vector<2x256xf32>
    %720 = vector.extract_strided_slice %250 {offsets = [0, 0], sizes = [2, 256], strides = [1, 1]} : vector<2x512xf32> to vector<2x256xf32>
    %721 = vector.broadcast %37 : f32 to vector<2x256xf32>
    %722 = arith.mulf %720, %721 : vector<2x256xf32>
    %723 = arith.addf %713, %722 : vector<2x256xf32>
    %724 = vector.broadcast %112 : f32 to vector<2x256xf32>
    %725 = arith.mulf %720, %724 : vector<2x256xf32>
    %726 = arith.addf %716, %725 : vector<2x256xf32>
    %727 = vector.broadcast %187 : f32 to vector<2x256xf32>
    %728 = arith.mulf %720, %727 : vector<2x256xf32>
    %729 = arith.addf %719, %728 : vector<2x256xf32>
    %730 = vector.extract_strided_slice %251 {offsets = [0, 0], sizes = [2, 256], strides = [1, 1]} : vector<2x512xf32> to vector<2x256xf32>
    %731 = vector.broadcast %62 : f32 to vector<2x256xf32>
    %732 = arith.mulf %730, %731 : vector<2x256xf32>
    %733 = arith.addf %723, %732 : vector<2x256xf32>
    %734 = vector.broadcast %137 : f32 to vector<2x256xf32>
    %735 = arith.mulf %730, %734 : vector<2x256xf32>
    %736 = arith.addf %726, %735 : vector<2x256xf32>
    %737 = vector.broadcast %212 : f32 to vector<2x256xf32>
    %738 = arith.mulf %730, %737 : vector<2x256xf32>
    %739 = arith.addf %729, %738 : vector<2x256xf32>
    %740 = vector.extract_strided_slice %249 {offsets = [0, 1], sizes = [2, 256], strides = [1, 1]} : vector<2x512xf32> to vector<2x256xf32>
    %cst_58 = arith.constant 0.000000e+00 : f32
    %741 = vector.broadcast %cst_58 : f32 to vector<2x256xf32>
    %742 = arith.select %243, %740, %741 : vector<2x256xi1>, vector<2x256xf32>
    %743 = vector.broadcast %13 : f32 to vector<2x256xf32>
    %744 = arith.mulf %742, %743 : vector<2x256xf32>
    %745 = arith.addf %733, %744 : vector<2x256xf32>
    %746 = vector.broadcast %88 : f32 to vector<2x256xf32>
    %747 = arith.mulf %742, %746 : vector<2x256xf32>
    %748 = arith.addf %736, %747 : vector<2x256xf32>
    %749 = vector.broadcast %163 : f32 to vector<2x256xf32>
    %750 = arith.mulf %742, %749 : vector<2x256xf32>
    %751 = arith.addf %739, %750 : vector<2x256xf32>
    %752 = vector.extract_strided_slice %250 {offsets = [0, 1], sizes = [2, 256], strides = [1, 1]} : vector<2x512xf32> to vector<2x256xf32>
    %cst_59 = arith.constant 0.000000e+00 : f32
    %753 = vector.broadcast %cst_59 : f32 to vector<2x256xf32>
    %754 = arith.select %243, %752, %753 : vector<2x256xi1>, vector<2x256xf32>
    %755 = vector.broadcast %38 : f32 to vector<2x256xf32>
    %756 = arith.mulf %754, %755 : vector<2x256xf32>
    %757 = arith.addf %745, %756 : vector<2x256xf32>
    %758 = vector.broadcast %113 : f32 to vector<2x256xf32>
    %759 = arith.mulf %754, %758 : vector<2x256xf32>
    %760 = arith.addf %748, %759 : vector<2x256xf32>
    %761 = vector.broadcast %188 : f32 to vector<2x256xf32>
    %762 = arith.mulf %754, %761 : vector<2x256xf32>
    %763 = arith.addf %751, %762 : vector<2x256xf32>
    %764 = vector.extract_strided_slice %251 {offsets = [0, 1], sizes = [2, 256], strides = [1, 1]} : vector<2x512xf32> to vector<2x256xf32>
    %cst_60 = arith.constant 0.000000e+00 : f32
    %765 = vector.broadcast %cst_60 : f32 to vector<2x256xf32>
    %766 = arith.select %243, %764, %765 : vector<2x256xi1>, vector<2x256xf32>
    %767 = vector.broadcast %63 : f32 to vector<2x256xf32>
    %768 = arith.mulf %766, %767 : vector<2x256xf32>
    %769 = arith.addf %757, %768 : vector<2x256xf32>
    %770 = vector.broadcast %138 : f32 to vector<2x256xf32>
    %771 = arith.mulf %766, %770 : vector<2x256xf32>
    %772 = arith.addf %760, %771 : vector<2x256xf32>
    %773 = vector.broadcast %213 : f32 to vector<2x256xf32>
    %774 = arith.mulf %766, %773 : vector<2x256xf32>
    %775 = arith.addf %763, %774 : vector<2x256xf32>
    %776 = vector.extract_strided_slice %249 {offsets = [0, 2], sizes = [2, 256], strides = [1, 1]} : vector<2x512xf32> to vector<2x256xf32>
    %cst_61 = arith.constant 0.000000e+00 : f32
    %777 = vector.broadcast %cst_61 : f32 to vector<2x256xf32>
    %778 = arith.select %245, %776, %777 : vector<2x256xi1>, vector<2x256xf32>
    %779 = vector.broadcast %14 : f32 to vector<2x256xf32>
    %780 = arith.mulf %778, %779 : vector<2x256xf32>
    %781 = arith.addf %769, %780 : vector<2x256xf32>
    %782 = vector.broadcast %89 : f32 to vector<2x256xf32>
    %783 = arith.mulf %778, %782 : vector<2x256xf32>
    %784 = arith.addf %772, %783 : vector<2x256xf32>
    %785 = vector.broadcast %164 : f32 to vector<2x256xf32>
    %786 = arith.mulf %778, %785 : vector<2x256xf32>
    %787 = arith.addf %775, %786 : vector<2x256xf32>
    %788 = vector.extract_strided_slice %250 {offsets = [0, 2], sizes = [2, 256], strides = [1, 1]} : vector<2x512xf32> to vector<2x256xf32>
    %cst_62 = arith.constant 0.000000e+00 : f32
    %789 = vector.broadcast %cst_62 : f32 to vector<2x256xf32>
    %790 = arith.select %245, %788, %789 : vector<2x256xi1>, vector<2x256xf32>
    %791 = vector.broadcast %39 : f32 to vector<2x256xf32>
    %792 = arith.mulf %790, %791 : vector<2x256xf32>
    %793 = arith.addf %781, %792 : vector<2x256xf32>
    %794 = vector.broadcast %114 : f32 to vector<2x256xf32>
    %795 = arith.mulf %790, %794 : vector<2x256xf32>
    %796 = arith.addf %784, %795 : vector<2x256xf32>
    %797 = vector.broadcast %189 : f32 to vector<2x256xf32>
    %798 = arith.mulf %790, %797 : vector<2x256xf32>
    %799 = arith.addf %787, %798 : vector<2x256xf32>
    %800 = vector.extract_strided_slice %251 {offsets = [0, 2], sizes = [2, 256], strides = [1, 1]} : vector<2x512xf32> to vector<2x256xf32>
    %cst_63 = arith.constant 0.000000e+00 : f32
    %801 = vector.broadcast %cst_63 : f32 to vector<2x256xf32>
    %802 = arith.select %245, %800, %801 : vector<2x256xi1>, vector<2x256xf32>
    %803 = vector.broadcast %64 : f32 to vector<2x256xf32>
    %804 = arith.mulf %802, %803 : vector<2x256xf32>
    %805 = arith.addf %793, %804 : vector<2x256xf32>
    %806 = vector.broadcast %139 : f32 to vector<2x256xf32>
    %807 = arith.mulf %802, %806 : vector<2x256xf32>
    %808 = arith.addf %796, %807 : vector<2x256xf32>
    %809 = vector.broadcast %214 : f32 to vector<2x256xf32>
    %810 = arith.mulf %802, %809 : vector<2x256xf32>
    %811 = arith.addf %799, %810 : vector<2x256xf32>
    %812 = arith.addf %632, %805 : vector<2x256xf32>
    %813 = arith.addf %633, %808 : vector<2x256xf32>
    %814 = arith.addf %634, %811 : vector<2x256xf32>
    %cst_64 = arith.constant 0.000000e+00 : f32
    %815 = vector.broadcast %cst_64 : f32 to vector<2x256xf32>
    %cst_65 = arith.constant 0.000000e+00 : f32
    %816 = vector.broadcast %cst_65 : f32 to vector<2x256xf32>
    %cst_66 = arith.constant 0.000000e+00 : f32
    %817 = vector.broadcast %cst_66 : f32 to vector<2x256xf32>
    %818 = arith.andi %235, %239 : vector<2x256xi1>
    %819 = vector.extract_strided_slice %249 {offsets = [0, 14], sizes = [2, 256], strides = [1, 1]} : vector<2x512xf32> to vector<2x256xf32>
    %cst_67 = arith.constant 0.000000e+00 : f32
    %820 = vector.broadcast %cst_67 : f32 to vector<2x256xf32>
    %821 = arith.select %818, %819, %820 : vector<2x256xi1>, vector<2x256xf32>
    %822 = vector.broadcast %15 : f32 to vector<2x256xf32>
    %823 = arith.mulf %821, %822 : vector<2x256xf32>
    %824 = arith.addf %815, %823 : vector<2x256xf32>
    %825 = vector.broadcast %90 : f32 to vector<2x256xf32>
    %826 = arith.mulf %821, %825 : vector<2x256xf32>
    %827 = arith.addf %816, %826 : vector<2x256xf32>
    %828 = vector.broadcast %165 : f32 to vector<2x256xf32>
    %829 = arith.mulf %821, %828 : vector<2x256xf32>
    %830 = arith.addf %817, %829 : vector<2x256xf32>
    %831 = vector.extract_strided_slice %250 {offsets = [0, 14], sizes = [2, 256], strides = [1, 1]} : vector<2x512xf32> to vector<2x256xf32>
    %cst_68 = arith.constant 0.000000e+00 : f32
    %832 = vector.broadcast %cst_68 : f32 to vector<2x256xf32>
    %833 = arith.select %818, %831, %832 : vector<2x256xi1>, vector<2x256xf32>
    %834 = vector.broadcast %40 : f32 to vector<2x256xf32>
    %835 = arith.mulf %833, %834 : vector<2x256xf32>
    %836 = arith.addf %824, %835 : vector<2x256xf32>
    %837 = vector.broadcast %115 : f32 to vector<2x256xf32>
    %838 = arith.mulf %833, %837 : vector<2x256xf32>
    %839 = arith.addf %827, %838 : vector<2x256xf32>
    %840 = vector.broadcast %190 : f32 to vector<2x256xf32>
    %841 = arith.mulf %833, %840 : vector<2x256xf32>
    %842 = arith.addf %830, %841 : vector<2x256xf32>
    %843 = vector.extract_strided_slice %251 {offsets = [0, 14], sizes = [2, 256], strides = [1, 1]} : vector<2x512xf32> to vector<2x256xf32>
    %cst_69 = arith.constant 0.000000e+00 : f32
    %844 = vector.broadcast %cst_69 : f32 to vector<2x256xf32>
    %845 = arith.select %818, %843, %844 : vector<2x256xi1>, vector<2x256xf32>
    %846 = vector.broadcast %65 : f32 to vector<2x256xf32>
    %847 = arith.mulf %845, %846 : vector<2x256xf32>
    %848 = arith.addf %836, %847 : vector<2x256xf32>
    %849 = vector.broadcast %140 : f32 to vector<2x256xf32>
    %850 = arith.mulf %845, %849 : vector<2x256xf32>
    %851 = arith.addf %839, %850 : vector<2x256xf32>
    %852 = vector.broadcast %215 : f32 to vector<2x256xf32>
    %853 = arith.mulf %845, %852 : vector<2x256xf32>
    %854 = arith.addf %842, %853 : vector<2x256xf32>
    %855 = arith.andi %235, %241 : vector<2x256xi1>
    %856 = vector.extract_strided_slice %249 {offsets = [0, 15], sizes = [2, 256], strides = [1, 1]} : vector<2x512xf32> to vector<2x256xf32>
    %cst_70 = arith.constant 0.000000e+00 : f32
    %857 = vector.broadcast %cst_70 : f32 to vector<2x256xf32>
    %858 = arith.select %855, %856, %857 : vector<2x256xi1>, vector<2x256xf32>
    %859 = vector.broadcast %16 : f32 to vector<2x256xf32>
    %860 = arith.mulf %858, %859 : vector<2x256xf32>
    %861 = arith.addf %848, %860 : vector<2x256xf32>
    %862 = vector.broadcast %91 : f32 to vector<2x256xf32>
    %863 = arith.mulf %858, %862 : vector<2x256xf32>
    %864 = arith.addf %851, %863 : vector<2x256xf32>
    %865 = vector.broadcast %166 : f32 to vector<2x256xf32>
    %866 = arith.mulf %858, %865 : vector<2x256xf32>
    %867 = arith.addf %854, %866 : vector<2x256xf32>
    %868 = vector.extract_strided_slice %250 {offsets = [0, 15], sizes = [2, 256], strides = [1, 1]} : vector<2x512xf32> to vector<2x256xf32>
    %cst_71 = arith.constant 0.000000e+00 : f32
    %869 = vector.broadcast %cst_71 : f32 to vector<2x256xf32>
    %870 = arith.select %855, %868, %869 : vector<2x256xi1>, vector<2x256xf32>
    %871 = vector.broadcast %41 : f32 to vector<2x256xf32>
    %872 = arith.mulf %870, %871 : vector<2x256xf32>
    %873 = arith.addf %861, %872 : vector<2x256xf32>
    %874 = vector.broadcast %116 : f32 to vector<2x256xf32>
    %875 = arith.mulf %870, %874 : vector<2x256xf32>
    %876 = arith.addf %864, %875 : vector<2x256xf32>
    %877 = vector.broadcast %191 : f32 to vector<2x256xf32>
    %878 = arith.mulf %870, %877 : vector<2x256xf32>
    %879 = arith.addf %867, %878 : vector<2x256xf32>
    %880 = vector.extract_strided_slice %251 {offsets = [0, 15], sizes = [2, 256], strides = [1, 1]} : vector<2x512xf32> to vector<2x256xf32>
    %cst_72 = arith.constant 0.000000e+00 : f32
    %881 = vector.broadcast %cst_72 : f32 to vector<2x256xf32>
    %882 = arith.select %855, %880, %881 : vector<2x256xi1>, vector<2x256xf32>
    %883 = vector.broadcast %66 : f32 to vector<2x256xf32>
    %884 = arith.mulf %882, %883 : vector<2x256xf32>
    %885 = arith.addf %873, %884 : vector<2x256xf32>
    %886 = vector.broadcast %141 : f32 to vector<2x256xf32>
    %887 = arith.mulf %882, %886 : vector<2x256xf32>
    %888 = arith.addf %876, %887 : vector<2x256xf32>
    %889 = vector.broadcast %216 : f32 to vector<2x256xf32>
    %890 = arith.mulf %882, %889 : vector<2x256xf32>
    %891 = arith.addf %879, %890 : vector<2x256xf32>
    %892 = vector.extract_strided_slice %249 {offsets = [0, 16], sizes = [2, 256], strides = [1, 1]} : vector<2x512xf32> to vector<2x256xf32>
    %cst_73 = arith.constant 0.000000e+00 : f32
    %893 = vector.broadcast %cst_73 : f32 to vector<2x256xf32>
    %894 = arith.select %235, %892, %893 : vector<2x256xi1>, vector<2x256xf32>
    %895 = vector.broadcast %17 : f32 to vector<2x256xf32>
    %896 = arith.mulf %894, %895 : vector<2x256xf32>
    %897 = arith.addf %885, %896 : vector<2x256xf32>
    %898 = vector.broadcast %92 : f32 to vector<2x256xf32>
    %899 = arith.mulf %894, %898 : vector<2x256xf32>
    %900 = arith.addf %888, %899 : vector<2x256xf32>
    %901 = vector.broadcast %167 : f32 to vector<2x256xf32>
    %902 = arith.mulf %894, %901 : vector<2x256xf32>
    %903 = arith.addf %891, %902 : vector<2x256xf32>
    %904 = vector.extract_strided_slice %250 {offsets = [0, 16], sizes = [2, 256], strides = [1, 1]} : vector<2x512xf32> to vector<2x256xf32>
    %cst_74 = arith.constant 0.000000e+00 : f32
    %905 = vector.broadcast %cst_74 : f32 to vector<2x256xf32>
    %906 = arith.select %235, %904, %905 : vector<2x256xi1>, vector<2x256xf32>
    %907 = vector.broadcast %42 : f32 to vector<2x256xf32>
    %908 = arith.mulf %906, %907 : vector<2x256xf32>
    %909 = arith.addf %897, %908 : vector<2x256xf32>
    %910 = vector.broadcast %117 : f32 to vector<2x256xf32>
    %911 = arith.mulf %906, %910 : vector<2x256xf32>
    %912 = arith.addf %900, %911 : vector<2x256xf32>
    %913 = vector.broadcast %192 : f32 to vector<2x256xf32>
    %914 = arith.mulf %906, %913 : vector<2x256xf32>
    %915 = arith.addf %903, %914 : vector<2x256xf32>
    %916 = vector.extract_strided_slice %251 {offsets = [0, 16], sizes = [2, 256], strides = [1, 1]} : vector<2x512xf32> to vector<2x256xf32>
    %cst_75 = arith.constant 0.000000e+00 : f32
    %917 = vector.broadcast %cst_75 : f32 to vector<2x256xf32>
    %918 = arith.select %235, %916, %917 : vector<2x256xi1>, vector<2x256xf32>
    %919 = vector.broadcast %67 : f32 to vector<2x256xf32>
    %920 = arith.mulf %918, %919 : vector<2x256xf32>
    %921 = arith.addf %909, %920 : vector<2x256xf32>
    %922 = vector.broadcast %142 : f32 to vector<2x256xf32>
    %923 = arith.mulf %918, %922 : vector<2x256xf32>
    %924 = arith.addf %912, %923 : vector<2x256xf32>
    %925 = vector.broadcast %217 : f32 to vector<2x256xf32>
    %926 = arith.mulf %918, %925 : vector<2x256xf32>
    %927 = arith.addf %915, %926 : vector<2x256xf32>
    %928 = arith.andi %235, %243 : vector<2x256xi1>
    %929 = vector.extract_strided_slice %249 {offsets = [0, 17], sizes = [2, 256], strides = [1, 1]} : vector<2x512xf32> to vector<2x256xf32>
    %cst_76 = arith.constant 0.000000e+00 : f32
    %930 = vector.broadcast %cst_76 : f32 to vector<2x256xf32>
    %931 = arith.select %928, %929, %930 : vector<2x256xi1>, vector<2x256xf32>
    %932 = vector.broadcast %18 : f32 to vector<2x256xf32>
    %933 = arith.mulf %931, %932 : vector<2x256xf32>
    %934 = arith.addf %921, %933 : vector<2x256xf32>
    %935 = vector.broadcast %93 : f32 to vector<2x256xf32>
    %936 = arith.mulf %931, %935 : vector<2x256xf32>
    %937 = arith.addf %924, %936 : vector<2x256xf32>
    %938 = vector.broadcast %168 : f32 to vector<2x256xf32>
    %939 = arith.mulf %931, %938 : vector<2x256xf32>
    %940 = arith.addf %927, %939 : vector<2x256xf32>
    %941 = vector.extract_strided_slice %250 {offsets = [0, 17], sizes = [2, 256], strides = [1, 1]} : vector<2x512xf32> to vector<2x256xf32>
    %cst_77 = arith.constant 0.000000e+00 : f32
    %942 = vector.broadcast %cst_77 : f32 to vector<2x256xf32>
    %943 = arith.select %928, %941, %942 : vector<2x256xi1>, vector<2x256xf32>
    %944 = vector.broadcast %43 : f32 to vector<2x256xf32>
    %945 = arith.mulf %943, %944 : vector<2x256xf32>
    %946 = arith.addf %934, %945 : vector<2x256xf32>
    %947 = vector.broadcast %118 : f32 to vector<2x256xf32>
    %948 = arith.mulf %943, %947 : vector<2x256xf32>
    %949 = arith.addf %937, %948 : vector<2x256xf32>
    %950 = vector.broadcast %193 : f32 to vector<2x256xf32>
    %951 = arith.mulf %943, %950 : vector<2x256xf32>
    %952 = arith.addf %940, %951 : vector<2x256xf32>
    %953 = vector.extract_strided_slice %251 {offsets = [0, 17], sizes = [2, 256], strides = [1, 1]} : vector<2x512xf32> to vector<2x256xf32>
    %cst_78 = arith.constant 0.000000e+00 : f32
    %954 = vector.broadcast %cst_78 : f32 to vector<2x256xf32>
    %955 = arith.select %928, %953, %954 : vector<2x256xi1>, vector<2x256xf32>
    %956 = vector.broadcast %68 : f32 to vector<2x256xf32>
    %957 = arith.mulf %955, %956 : vector<2x256xf32>
    %958 = arith.addf %946, %957 : vector<2x256xf32>
    %959 = vector.broadcast %143 : f32 to vector<2x256xf32>
    %960 = arith.mulf %955, %959 : vector<2x256xf32>
    %961 = arith.addf %949, %960 : vector<2x256xf32>
    %962 = vector.broadcast %218 : f32 to vector<2x256xf32>
    %963 = arith.mulf %955, %962 : vector<2x256xf32>
    %964 = arith.addf %952, %963 : vector<2x256xf32>
    %965 = arith.andi %235, %245 : vector<2x256xi1>
    %966 = vector.extract_strided_slice %249 {offsets = [0, 18], sizes = [2, 256], strides = [1, 1]} : vector<2x512xf32> to vector<2x256xf32>
    %cst_79 = arith.constant 0.000000e+00 : f32
    %967 = vector.broadcast %cst_79 : f32 to vector<2x256xf32>
    %968 = arith.select %965, %966, %967 : vector<2x256xi1>, vector<2x256xf32>
    %969 = vector.broadcast %19 : f32 to vector<2x256xf32>
    %970 = arith.mulf %968, %969 : vector<2x256xf32>
    %971 = arith.addf %958, %970 : vector<2x256xf32>
    %972 = vector.broadcast %94 : f32 to vector<2x256xf32>
    %973 = arith.mulf %968, %972 : vector<2x256xf32>
    %974 = arith.addf %961, %973 : vector<2x256xf32>
    %975 = vector.broadcast %169 : f32 to vector<2x256xf32>
    %976 = arith.mulf %968, %975 : vector<2x256xf32>
    %977 = arith.addf %964, %976 : vector<2x256xf32>
    %978 = vector.extract_strided_slice %250 {offsets = [0, 18], sizes = [2, 256], strides = [1, 1]} : vector<2x512xf32> to vector<2x256xf32>
    %cst_80 = arith.constant 0.000000e+00 : f32
    %979 = vector.broadcast %cst_80 : f32 to vector<2x256xf32>
    %980 = arith.select %965, %978, %979 : vector<2x256xi1>, vector<2x256xf32>
    %981 = vector.broadcast %44 : f32 to vector<2x256xf32>
    %982 = arith.mulf %980, %981 : vector<2x256xf32>
    %983 = arith.addf %971, %982 : vector<2x256xf32>
    %984 = vector.broadcast %119 : f32 to vector<2x256xf32>
    %985 = arith.mulf %980, %984 : vector<2x256xf32>
    %986 = arith.addf %974, %985 : vector<2x256xf32>
    %987 = vector.broadcast %194 : f32 to vector<2x256xf32>
    %988 = arith.mulf %980, %987 : vector<2x256xf32>
    %989 = arith.addf %977, %988 : vector<2x256xf32>
    %990 = vector.extract_strided_slice %251 {offsets = [0, 18], sizes = [2, 256], strides = [1, 1]} : vector<2x512xf32> to vector<2x256xf32>
    %cst_81 = arith.constant 0.000000e+00 : f32
    %991 = vector.broadcast %cst_81 : f32 to vector<2x256xf32>
    %992 = arith.select %965, %990, %991 : vector<2x256xi1>, vector<2x256xf32>
    %993 = vector.broadcast %69 : f32 to vector<2x256xf32>
    %994 = arith.mulf %992, %993 : vector<2x256xf32>
    %995 = arith.addf %983, %994 : vector<2x256xf32>
    %996 = vector.broadcast %144 : f32 to vector<2x256xf32>
    %997 = arith.mulf %992, %996 : vector<2x256xf32>
    %998 = arith.addf %986, %997 : vector<2x256xf32>
    %999 = vector.broadcast %219 : f32 to vector<2x256xf32>
    %1000 = arith.mulf %992, %999 : vector<2x256xf32>
    %1001 = arith.addf %989, %1000 : vector<2x256xf32>
    %1002 = arith.addf %812, %995 : vector<2x256xf32>
    %1003 = arith.addf %813, %998 : vector<2x256xf32>
    %1004 = arith.addf %814, %1001 : vector<2x256xf32>
    %cst_82 = arith.constant 0.000000e+00 : f32
    %1005 = vector.broadcast %cst_82 : f32 to vector<2x256xf32>
    %cst_83 = arith.constant 0.000000e+00 : f32
    %1006 = vector.broadcast %cst_83 : f32 to vector<2x256xf32>
    %cst_84 = arith.constant 0.000000e+00 : f32
    %1007 = vector.broadcast %cst_84 : f32 to vector<2x256xf32>
    %1008 = arith.andi %237, %239 : vector<2x256xi1>
    %1009 = vector.extract_strided_slice %249 {offsets = [0, 30], sizes = [2, 256], strides = [1, 1]} : vector<2x512xf32> to vector<2x256xf32>
    %cst_85 = arith.constant 0.000000e+00 : f32
    %1010 = vector.broadcast %cst_85 : f32 to vector<2x256xf32>
    %1011 = arith.select %1008, %1009, %1010 : vector<2x256xi1>, vector<2x256xf32>
    %1012 = vector.broadcast %20 : f32 to vector<2x256xf32>
    %1013 = arith.mulf %1011, %1012 : vector<2x256xf32>
    %1014 = arith.addf %1005, %1013 : vector<2x256xf32>
    %1015 = vector.broadcast %95 : f32 to vector<2x256xf32>
    %1016 = arith.mulf %1011, %1015 : vector<2x256xf32>
    %1017 = arith.addf %1006, %1016 : vector<2x256xf32>
    %1018 = vector.broadcast %170 : f32 to vector<2x256xf32>
    %1019 = arith.mulf %1011, %1018 : vector<2x256xf32>
    %1020 = arith.addf %1007, %1019 : vector<2x256xf32>
    %1021 = vector.extract_strided_slice %250 {offsets = [0, 30], sizes = [2, 256], strides = [1, 1]} : vector<2x512xf32> to vector<2x256xf32>
    %cst_86 = arith.constant 0.000000e+00 : f32
    %1022 = vector.broadcast %cst_86 : f32 to vector<2x256xf32>
    %1023 = arith.select %1008, %1021, %1022 : vector<2x256xi1>, vector<2x256xf32>
    %1024 = vector.broadcast %45 : f32 to vector<2x256xf32>
    %1025 = arith.mulf %1023, %1024 : vector<2x256xf32>
    %1026 = arith.addf %1014, %1025 : vector<2x256xf32>
    %1027 = vector.broadcast %120 : f32 to vector<2x256xf32>
    %1028 = arith.mulf %1023, %1027 : vector<2x256xf32>
    %1029 = arith.addf %1017, %1028 : vector<2x256xf32>
    %1030 = vector.broadcast %195 : f32 to vector<2x256xf32>
    %1031 = arith.mulf %1023, %1030 : vector<2x256xf32>
    %1032 = arith.addf %1020, %1031 : vector<2x256xf32>
    %1033 = vector.extract_strided_slice %251 {offsets = [0, 30], sizes = [2, 256], strides = [1, 1]} : vector<2x512xf32> to vector<2x256xf32>
    %cst_87 = arith.constant 0.000000e+00 : f32
    %1034 = vector.broadcast %cst_87 : f32 to vector<2x256xf32>
    %1035 = arith.select %1008, %1033, %1034 : vector<2x256xi1>, vector<2x256xf32>
    %1036 = vector.broadcast %70 : f32 to vector<2x256xf32>
    %1037 = arith.mulf %1035, %1036 : vector<2x256xf32>
    %1038 = arith.addf %1026, %1037 : vector<2x256xf32>
    %1039 = vector.broadcast %145 : f32 to vector<2x256xf32>
    %1040 = arith.mulf %1035, %1039 : vector<2x256xf32>
    %1041 = arith.addf %1029, %1040 : vector<2x256xf32>
    %1042 = vector.broadcast %220 : f32 to vector<2x256xf32>
    %1043 = arith.mulf %1035, %1042 : vector<2x256xf32>
    %1044 = arith.addf %1032, %1043 : vector<2x256xf32>
    %1045 = arith.andi %237, %241 : vector<2x256xi1>
    %1046 = vector.extract_strided_slice %249 {offsets = [0, 31], sizes = [2, 256], strides = [1, 1]} : vector<2x512xf32> to vector<2x256xf32>
    %cst_88 = arith.constant 0.000000e+00 : f32
    %1047 = vector.broadcast %cst_88 : f32 to vector<2x256xf32>
    %1048 = arith.select %1045, %1046, %1047 : vector<2x256xi1>, vector<2x256xf32>
    %1049 = vector.broadcast %21 : f32 to vector<2x256xf32>
    %1050 = arith.mulf %1048, %1049 : vector<2x256xf32>
    %1051 = arith.addf %1038, %1050 : vector<2x256xf32>
    %1052 = vector.broadcast %96 : f32 to vector<2x256xf32>
    %1053 = arith.mulf %1048, %1052 : vector<2x256xf32>
    %1054 = arith.addf %1041, %1053 : vector<2x256xf32>
    %1055 = vector.broadcast %171 : f32 to vector<2x256xf32>
    %1056 = arith.mulf %1048, %1055 : vector<2x256xf32>
    %1057 = arith.addf %1044, %1056 : vector<2x256xf32>
    %1058 = vector.extract_strided_slice %250 {offsets = [0, 31], sizes = [2, 256], strides = [1, 1]} : vector<2x512xf32> to vector<2x256xf32>
    %cst_89 = arith.constant 0.000000e+00 : f32
    %1059 = vector.broadcast %cst_89 : f32 to vector<2x256xf32>
    %1060 = arith.select %1045, %1058, %1059 : vector<2x256xi1>, vector<2x256xf32>
    %1061 = vector.broadcast %46 : f32 to vector<2x256xf32>
    %1062 = arith.mulf %1060, %1061 : vector<2x256xf32>
    %1063 = arith.addf %1051, %1062 : vector<2x256xf32>
    %1064 = vector.broadcast %121 : f32 to vector<2x256xf32>
    %1065 = arith.mulf %1060, %1064 : vector<2x256xf32>
    %1066 = arith.addf %1054, %1065 : vector<2x256xf32>
    %1067 = vector.broadcast %196 : f32 to vector<2x256xf32>
    %1068 = arith.mulf %1060, %1067 : vector<2x256xf32>
    %1069 = arith.addf %1057, %1068 : vector<2x256xf32>
    %1070 = vector.extract_strided_slice %251 {offsets = [0, 31], sizes = [2, 256], strides = [1, 1]} : vector<2x512xf32> to vector<2x256xf32>
    %cst_90 = arith.constant 0.000000e+00 : f32
    %1071 = vector.broadcast %cst_90 : f32 to vector<2x256xf32>
    %1072 = arith.select %1045, %1070, %1071 : vector<2x256xi1>, vector<2x256xf32>
    %1073 = vector.broadcast %71 : f32 to vector<2x256xf32>
    %1074 = arith.mulf %1072, %1073 : vector<2x256xf32>
    %1075 = arith.addf %1063, %1074 : vector<2x256xf32>
    %1076 = vector.broadcast %146 : f32 to vector<2x256xf32>
    %1077 = arith.mulf %1072, %1076 : vector<2x256xf32>
    %1078 = arith.addf %1066, %1077 : vector<2x256xf32>
    %1079 = vector.broadcast %221 : f32 to vector<2x256xf32>
    %1080 = arith.mulf %1072, %1079 : vector<2x256xf32>
    %1081 = arith.addf %1069, %1080 : vector<2x256xf32>
    %1082 = vector.extract_strided_slice %249 {offsets = [0, 32], sizes = [2, 256], strides = [1, 1]} : vector<2x512xf32> to vector<2x256xf32>
    %cst_91 = arith.constant 0.000000e+00 : f32
    %1083 = vector.broadcast %cst_91 : f32 to vector<2x256xf32>
    %1084 = arith.select %237, %1082, %1083 : vector<2x256xi1>, vector<2x256xf32>
    %1085 = vector.broadcast %22 : f32 to vector<2x256xf32>
    %1086 = arith.mulf %1084, %1085 : vector<2x256xf32>
    %1087 = arith.addf %1075, %1086 : vector<2x256xf32>
    %1088 = vector.broadcast %97 : f32 to vector<2x256xf32>
    %1089 = arith.mulf %1084, %1088 : vector<2x256xf32>
    %1090 = arith.addf %1078, %1089 : vector<2x256xf32>
    %1091 = vector.broadcast %172 : f32 to vector<2x256xf32>
    %1092 = arith.mulf %1084, %1091 : vector<2x256xf32>
    %1093 = arith.addf %1081, %1092 : vector<2x256xf32>
    %1094 = vector.extract_strided_slice %250 {offsets = [0, 32], sizes = [2, 256], strides = [1, 1]} : vector<2x512xf32> to vector<2x256xf32>
    %cst_92 = arith.constant 0.000000e+00 : f32
    %1095 = vector.broadcast %cst_92 : f32 to vector<2x256xf32>
    %1096 = arith.select %237, %1094, %1095 : vector<2x256xi1>, vector<2x256xf32>
    %1097 = vector.broadcast %47 : f32 to vector<2x256xf32>
    %1098 = arith.mulf %1096, %1097 : vector<2x256xf32>
    %1099 = arith.addf %1087, %1098 : vector<2x256xf32>
    %1100 = vector.broadcast %122 : f32 to vector<2x256xf32>
    %1101 = arith.mulf %1096, %1100 : vector<2x256xf32>
    %1102 = arith.addf %1090, %1101 : vector<2x256xf32>
    %1103 = vector.broadcast %197 : f32 to vector<2x256xf32>
    %1104 = arith.mulf %1096, %1103 : vector<2x256xf32>
    %1105 = arith.addf %1093, %1104 : vector<2x256xf32>
    %1106 = vector.extract_strided_slice %251 {offsets = [0, 32], sizes = [2, 256], strides = [1, 1]} : vector<2x512xf32> to vector<2x256xf32>
    %cst_93 = arith.constant 0.000000e+00 : f32
    %1107 = vector.broadcast %cst_93 : f32 to vector<2x256xf32>
    %1108 = arith.select %237, %1106, %1107 : vector<2x256xi1>, vector<2x256xf32>
    %1109 = vector.broadcast %72 : f32 to vector<2x256xf32>
    %1110 = arith.mulf %1108, %1109 : vector<2x256xf32>
    %1111 = arith.addf %1099, %1110 : vector<2x256xf32>
    %1112 = vector.broadcast %147 : f32 to vector<2x256xf32>
    %1113 = arith.mulf %1108, %1112 : vector<2x256xf32>
    %1114 = arith.addf %1102, %1113 : vector<2x256xf32>
    %1115 = vector.broadcast %222 : f32 to vector<2x256xf32>
    %1116 = arith.mulf %1108, %1115 : vector<2x256xf32>
    %1117 = arith.addf %1105, %1116 : vector<2x256xf32>
    %1118 = arith.andi %237, %243 : vector<2x256xi1>
    %1119 = vector.extract_strided_slice %249 {offsets = [0, 33], sizes = [2, 256], strides = [1, 1]} : vector<2x512xf32> to vector<2x256xf32>
    %cst_94 = arith.constant 0.000000e+00 : f32
    %1120 = vector.broadcast %cst_94 : f32 to vector<2x256xf32>
    %1121 = arith.select %1118, %1119, %1120 : vector<2x256xi1>, vector<2x256xf32>
    %1122 = vector.broadcast %23 : f32 to vector<2x256xf32>
    %1123 = arith.mulf %1121, %1122 : vector<2x256xf32>
    %1124 = arith.addf %1111, %1123 : vector<2x256xf32>
    %1125 = vector.broadcast %98 : f32 to vector<2x256xf32>
    %1126 = arith.mulf %1121, %1125 : vector<2x256xf32>
    %1127 = arith.addf %1114, %1126 : vector<2x256xf32>
    %1128 = vector.broadcast %173 : f32 to vector<2x256xf32>
    %1129 = arith.mulf %1121, %1128 : vector<2x256xf32>
    %1130 = arith.addf %1117, %1129 : vector<2x256xf32>
    %1131 = vector.extract_strided_slice %250 {offsets = [0, 33], sizes = [2, 256], strides = [1, 1]} : vector<2x512xf32> to vector<2x256xf32>
    %cst_95 = arith.constant 0.000000e+00 : f32
    %1132 = vector.broadcast %cst_95 : f32 to vector<2x256xf32>
    %1133 = arith.select %1118, %1131, %1132 : vector<2x256xi1>, vector<2x256xf32>
    %1134 = vector.broadcast %48 : f32 to vector<2x256xf32>
    %1135 = arith.mulf %1133, %1134 : vector<2x256xf32>
    %1136 = arith.addf %1124, %1135 : vector<2x256xf32>
    %1137 = vector.broadcast %123 : f32 to vector<2x256xf32>
    %1138 = arith.mulf %1133, %1137 : vector<2x256xf32>
    %1139 = arith.addf %1127, %1138 : vector<2x256xf32>
    %1140 = vector.broadcast %198 : f32 to vector<2x256xf32>
    %1141 = arith.mulf %1133, %1140 : vector<2x256xf32>
    %1142 = arith.addf %1130, %1141 : vector<2x256xf32>
    %1143 = vector.extract_strided_slice %251 {offsets = [0, 33], sizes = [2, 256], strides = [1, 1]} : vector<2x512xf32> to vector<2x256xf32>
    %cst_96 = arith.constant 0.000000e+00 : f32
    %1144 = vector.broadcast %cst_96 : f32 to vector<2x256xf32>
    %1145 = arith.select %1118, %1143, %1144 : vector<2x256xi1>, vector<2x256xf32>
    %1146 = vector.broadcast %73 : f32 to vector<2x256xf32>
    %1147 = arith.mulf %1145, %1146 : vector<2x256xf32>
    %1148 = arith.addf %1136, %1147 : vector<2x256xf32>
    %1149 = vector.broadcast %148 : f32 to vector<2x256xf32>
    %1150 = arith.mulf %1145, %1149 : vector<2x256xf32>
    %1151 = arith.addf %1139, %1150 : vector<2x256xf32>
    %1152 = vector.broadcast %223 : f32 to vector<2x256xf32>
    %1153 = arith.mulf %1145, %1152 : vector<2x256xf32>
    %1154 = arith.addf %1142, %1153 : vector<2x256xf32>
    %1155 = arith.andi %237, %245 : vector<2x256xi1>
    %1156 = vector.extract_strided_slice %249 {offsets = [0, 34], sizes = [2, 256], strides = [1, 1]} : vector<2x512xf32> to vector<2x256xf32>
    %cst_97 = arith.constant 0.000000e+00 : f32
    %1157 = vector.broadcast %cst_97 : f32 to vector<2x256xf32>
    %1158 = arith.select %1155, %1156, %1157 : vector<2x256xi1>, vector<2x256xf32>
    %1159 = vector.broadcast %24 : f32 to vector<2x256xf32>
    %1160 = arith.mulf %1158, %1159 : vector<2x256xf32>
    %1161 = arith.addf %1148, %1160 : vector<2x256xf32>
    %1162 = vector.broadcast %99 : f32 to vector<2x256xf32>
    %1163 = arith.mulf %1158, %1162 : vector<2x256xf32>
    %1164 = arith.addf %1151, %1163 : vector<2x256xf32>
    %1165 = vector.broadcast %174 : f32 to vector<2x256xf32>
    %1166 = arith.mulf %1158, %1165 : vector<2x256xf32>
    %1167 = arith.addf %1154, %1166 : vector<2x256xf32>
    %1168 = vector.extract_strided_slice %250 {offsets = [0, 34], sizes = [2, 256], strides = [1, 1]} : vector<2x512xf32> to vector<2x256xf32>
    %cst_98 = arith.constant 0.000000e+00 : f32
    %1169 = vector.broadcast %cst_98 : f32 to vector<2x256xf32>
    %1170 = arith.select %1155, %1168, %1169 : vector<2x256xi1>, vector<2x256xf32>
    %1171 = vector.broadcast %49 : f32 to vector<2x256xf32>
    %1172 = arith.mulf %1170, %1171 : vector<2x256xf32>
    %1173 = arith.addf %1161, %1172 : vector<2x256xf32>
    %1174 = vector.broadcast %124 : f32 to vector<2x256xf32>
    %1175 = arith.mulf %1170, %1174 : vector<2x256xf32>
    %1176 = arith.addf %1164, %1175 : vector<2x256xf32>
    %1177 = vector.broadcast %199 : f32 to vector<2x256xf32>
    %1178 = arith.mulf %1170, %1177 : vector<2x256xf32>
    %1179 = arith.addf %1167, %1178 : vector<2x256xf32>
    %1180 = vector.extract_strided_slice %251 {offsets = [0, 34], sizes = [2, 256], strides = [1, 1]} : vector<2x512xf32> to vector<2x256xf32>
    %cst_99 = arith.constant 0.000000e+00 : f32
    %1181 = vector.broadcast %cst_99 : f32 to vector<2x256xf32>
    %1182 = arith.select %1155, %1180, %1181 : vector<2x256xi1>, vector<2x256xf32>
    %1183 = vector.broadcast %74 : f32 to vector<2x256xf32>
    %1184 = arith.mulf %1182, %1183 : vector<2x256xf32>
    %1185 = arith.addf %1173, %1184 : vector<2x256xf32>
    %1186 = vector.broadcast %149 : f32 to vector<2x256xf32>
    %1187 = arith.mulf %1182, %1186 : vector<2x256xf32>
    %1188 = arith.addf %1176, %1187 : vector<2x256xf32>
    %1189 = vector.broadcast %224 : f32 to vector<2x256xf32>
    %1190 = arith.mulf %1182, %1189 : vector<2x256xf32>
    %1191 = arith.addf %1179, %1190 : vector<2x256xf32>
    %1192 = arith.addf %1002, %1185 : vector<2x256xf32>
    %1193 = arith.addf %1003, %1188 : vector<2x256xf32>
    %1194 = arith.addf %1004, %1191 : vector<2x256xf32>
    %1195 = tpu.concatenate %1192, %1192 in 1 : vector<2x256xf32>, vector<2x256xf32> -> vector<2x512xf32>
    %1196 = tpu.concatenate %1193, %1193 in 1 : vector<2x256xf32>, vector<2x256xf32> -> vector<2x512xf32>
    %1197 = tpu.concatenate %1194, %1194 in 1 : vector<2x256xf32>, vector<2x256xf32> -> vector<2x512xf32>
    %cst_100 = arith.constant 0.000000e+00 : f32
    %1198 = vector.broadcast %cst_100 : f32 to vector<2x256xf32>
    %cst_101 = arith.constant 0.000000e+00 : f32
    %1199 = vector.broadcast %cst_101 : f32 to vector<2x256xf32>
    %cst_102 = arith.constant 0.000000e+00 : f32
    %1200 = vector.broadcast %cst_102 : f32 to vector<2x256xf32>
    %cst_103 = arith.constant 0.000000e+00 : f32
    %1201 = vector.broadcast %cst_103 : f32 to vector<2x256xf32>
    %cst_104 = arith.constant 0.000000e+00 : f32
    %1202 = vector.broadcast %cst_104 : f32 to vector<2x256xf32>
    %cst_105 = arith.constant 0.000000e+00 : f32
    %1203 = vector.broadcast %cst_105 : f32 to vector<2x256xf32>
    %1204 = arith.andi %231, %239 : vector<2x256xi1>
    %1205 = vector.extract_strided_slice %1195 {offsets = [0, 222], sizes = [2, 256], strides = [1, 1]} : vector<2x512xf32> to vector<2x256xf32>
    %cst_106 = arith.constant 0.000000e+00 : f32
    %1206 = vector.broadcast %cst_106 : f32 to vector<2x256xf32>
    %1207 = arith.select %1204, %1205, %1206 : vector<2x256xi1>, vector<2x256xf32>
    %1208 = vector.broadcast %0 : f32 to vector<2x256xf32>
    %1209 = arith.mulf %1207, %1208 : vector<2x256xf32>
    %1210 = arith.addf %1201, %1209 : vector<2x256xf32>
    %1211 = vector.broadcast %75 : f32 to vector<2x256xf32>
    %1212 = arith.mulf %1207, %1211 : vector<2x256xf32>
    %1213 = arith.addf %1202, %1212 : vector<2x256xf32>
    %1214 = vector.broadcast %150 : f32 to vector<2x256xf32>
    %1215 = arith.mulf %1207, %1214 : vector<2x256xf32>
    %1216 = arith.addf %1203, %1215 : vector<2x256xf32>
    %1217 = vector.extract_strided_slice %1196 {offsets = [0, 222], sizes = [2, 256], strides = [1, 1]} : vector<2x512xf32> to vector<2x256xf32>
    %cst_107 = arith.constant 0.000000e+00 : f32
    %1218 = vector.broadcast %cst_107 : f32 to vector<2x256xf32>
    %1219 = arith.select %1204, %1217, %1218 : vector<2x256xi1>, vector<2x256xf32>
    %1220 = vector.broadcast %25 : f32 to vector<2x256xf32>
    %1221 = arith.mulf %1219, %1220 : vector<2x256xf32>
    %1222 = arith.addf %1210, %1221 : vector<2x256xf32>
    %1223 = vector.broadcast %100 : f32 to vector<2x256xf32>
    %1224 = arith.mulf %1219, %1223 : vector<2x256xf32>
    %1225 = arith.addf %1213, %1224 : vector<2x256xf32>
    %1226 = vector.broadcast %175 : f32 to vector<2x256xf32>
    %1227 = arith.mulf %1219, %1226 : vector<2x256xf32>
    %1228 = arith.addf %1216, %1227 : vector<2x256xf32>
    %1229 = vector.extract_strided_slice %1197 {offsets = [0, 222], sizes = [2, 256], strides = [1, 1]} : vector<2x512xf32> to vector<2x256xf32>
    %cst_108 = arith.constant 0.000000e+00 : f32
    %1230 = vector.broadcast %cst_108 : f32 to vector<2x256xf32>
    %1231 = arith.select %1204, %1229, %1230 : vector<2x256xi1>, vector<2x256xf32>
    %1232 = vector.broadcast %50 : f32 to vector<2x256xf32>
    %1233 = arith.mulf %1231, %1232 : vector<2x256xf32>
    %1234 = arith.addf %1222, %1233 : vector<2x256xf32>
    %1235 = vector.broadcast %125 : f32 to vector<2x256xf32>
    %1236 = arith.mulf %1231, %1235 : vector<2x256xf32>
    %1237 = arith.addf %1225, %1236 : vector<2x256xf32>
    %1238 = vector.broadcast %200 : f32 to vector<2x256xf32>
    %1239 = arith.mulf %1231, %1238 : vector<2x256xf32>
    %1240 = arith.addf %1228, %1239 : vector<2x256xf32>
    %1241 = arith.andi %231, %241 : vector<2x256xi1>
    %1242 = vector.extract_strided_slice %1195 {offsets = [0, 223], sizes = [2, 256], strides = [1, 1]} : vector<2x512xf32> to vector<2x256xf32>
    %cst_109 = arith.constant 0.000000e+00 : f32
    %1243 = vector.broadcast %cst_109 : f32 to vector<2x256xf32>
    %1244 = arith.select %1241, %1242, %1243 : vector<2x256xi1>, vector<2x256xf32>
    %1245 = vector.broadcast %1 : f32 to vector<2x256xf32>
    %1246 = arith.mulf %1244, %1245 : vector<2x256xf32>
    %1247 = arith.addf %1234, %1246 : vector<2x256xf32>
    %1248 = vector.broadcast %76 : f32 to vector<2x256xf32>
    %1249 = arith.mulf %1244, %1248 : vector<2x256xf32>
    %1250 = arith.addf %1237, %1249 : vector<2x256xf32>
    %1251 = vector.broadcast %151 : f32 to vector<2x256xf32>
    %1252 = arith.mulf %1244, %1251 : vector<2x256xf32>
    %1253 = arith.addf %1240, %1252 : vector<2x256xf32>
    %1254 = vector.extract_strided_slice %1196 {offsets = [0, 223], sizes = [2, 256], strides = [1, 1]} : vector<2x512xf32> to vector<2x256xf32>
    %cst_110 = arith.constant 0.000000e+00 : f32
    %1255 = vector.broadcast %cst_110 : f32 to vector<2x256xf32>
    %1256 = arith.select %1241, %1254, %1255 : vector<2x256xi1>, vector<2x256xf32>
    %1257 = vector.broadcast %26 : f32 to vector<2x256xf32>
    %1258 = arith.mulf %1256, %1257 : vector<2x256xf32>
    %1259 = arith.addf %1247, %1258 : vector<2x256xf32>
    %1260 = vector.broadcast %101 : f32 to vector<2x256xf32>
    %1261 = arith.mulf %1256, %1260 : vector<2x256xf32>
    %1262 = arith.addf %1250, %1261 : vector<2x256xf32>
    %1263 = vector.broadcast %176 : f32 to vector<2x256xf32>
    %1264 = arith.mulf %1256, %1263 : vector<2x256xf32>
    %1265 = arith.addf %1253, %1264 : vector<2x256xf32>
    %1266 = vector.extract_strided_slice %1197 {offsets = [0, 223], sizes = [2, 256], strides = [1, 1]} : vector<2x512xf32> to vector<2x256xf32>
    %cst_111 = arith.constant 0.000000e+00 : f32
    %1267 = vector.broadcast %cst_111 : f32 to vector<2x256xf32>
    %1268 = arith.select %1241, %1266, %1267 : vector<2x256xi1>, vector<2x256xf32>
    %1269 = vector.broadcast %51 : f32 to vector<2x256xf32>
    %1270 = arith.mulf %1268, %1269 : vector<2x256xf32>
    %1271 = arith.addf %1259, %1270 : vector<2x256xf32>
    %1272 = vector.broadcast %126 : f32 to vector<2x256xf32>
    %1273 = arith.mulf %1268, %1272 : vector<2x256xf32>
    %1274 = arith.addf %1262, %1273 : vector<2x256xf32>
    %1275 = vector.broadcast %201 : f32 to vector<2x256xf32>
    %1276 = arith.mulf %1268, %1275 : vector<2x256xf32>
    %1277 = arith.addf %1265, %1276 : vector<2x256xf32>
    %1278 = vector.extract_strided_slice %1195 {offsets = [0, 224], sizes = [2, 256], strides = [1, 1]} : vector<2x512xf32> to vector<2x256xf32>
    %cst_112 = arith.constant 0.000000e+00 : f32
    %1279 = vector.broadcast %cst_112 : f32 to vector<2x256xf32>
    %1280 = arith.select %231, %1278, %1279 : vector<2x256xi1>, vector<2x256xf32>
    %1281 = vector.broadcast %2 : f32 to vector<2x256xf32>
    %1282 = arith.mulf %1280, %1281 : vector<2x256xf32>
    %1283 = arith.addf %1271, %1282 : vector<2x256xf32>
    %1284 = vector.broadcast %77 : f32 to vector<2x256xf32>
    %1285 = arith.mulf %1280, %1284 : vector<2x256xf32>
    %1286 = arith.addf %1274, %1285 : vector<2x256xf32>
    %1287 = vector.broadcast %152 : f32 to vector<2x256xf32>
    %1288 = arith.mulf %1280, %1287 : vector<2x256xf32>
    %1289 = arith.addf %1277, %1288 : vector<2x256xf32>
    %1290 = vector.extract_strided_slice %1196 {offsets = [0, 224], sizes = [2, 256], strides = [1, 1]} : vector<2x512xf32> to vector<2x256xf32>
    %cst_113 = arith.constant 0.000000e+00 : f32
    %1291 = vector.broadcast %cst_113 : f32 to vector<2x256xf32>
    %1292 = arith.select %231, %1290, %1291 : vector<2x256xi1>, vector<2x256xf32>
    %1293 = vector.broadcast %27 : f32 to vector<2x256xf32>
    %1294 = arith.mulf %1292, %1293 : vector<2x256xf32>
    %1295 = arith.addf %1283, %1294 : vector<2x256xf32>
    %1296 = vector.broadcast %102 : f32 to vector<2x256xf32>
    %1297 = arith.mulf %1292, %1296 : vector<2x256xf32>
    %1298 = arith.addf %1286, %1297 : vector<2x256xf32>
    %1299 = vector.broadcast %177 : f32 to vector<2x256xf32>
    %1300 = arith.mulf %1292, %1299 : vector<2x256xf32>
    %1301 = arith.addf %1289, %1300 : vector<2x256xf32>
    %1302 = vector.extract_strided_slice %1197 {offsets = [0, 224], sizes = [2, 256], strides = [1, 1]} : vector<2x512xf32> to vector<2x256xf32>
    %cst_114 = arith.constant 0.000000e+00 : f32
    %1303 = vector.broadcast %cst_114 : f32 to vector<2x256xf32>
    %1304 = arith.select %231, %1302, %1303 : vector<2x256xi1>, vector<2x256xf32>
    %1305 = vector.broadcast %52 : f32 to vector<2x256xf32>
    %1306 = arith.mulf %1304, %1305 : vector<2x256xf32>
    %1307 = arith.addf %1295, %1306 : vector<2x256xf32>
    %1308 = vector.broadcast %127 : f32 to vector<2x256xf32>
    %1309 = arith.mulf %1304, %1308 : vector<2x256xf32>
    %1310 = arith.addf %1298, %1309 : vector<2x256xf32>
    %1311 = vector.broadcast %202 : f32 to vector<2x256xf32>
    %1312 = arith.mulf %1304, %1311 : vector<2x256xf32>
    %1313 = arith.addf %1301, %1312 : vector<2x256xf32>
    %1314 = arith.andi %231, %243 : vector<2x256xi1>
    %1315 = vector.extract_strided_slice %1195 {offsets = [0, 225], sizes = [2, 256], strides = [1, 1]} : vector<2x512xf32> to vector<2x256xf32>
    %cst_115 = arith.constant 0.000000e+00 : f32
    %1316 = vector.broadcast %cst_115 : f32 to vector<2x256xf32>
    %1317 = arith.select %1314, %1315, %1316 : vector<2x256xi1>, vector<2x256xf32>
    %1318 = vector.broadcast %3 : f32 to vector<2x256xf32>
    %1319 = arith.mulf %1317, %1318 : vector<2x256xf32>
    %1320 = arith.addf %1307, %1319 : vector<2x256xf32>
    %1321 = vector.broadcast %78 : f32 to vector<2x256xf32>
    %1322 = arith.mulf %1317, %1321 : vector<2x256xf32>
    %1323 = arith.addf %1310, %1322 : vector<2x256xf32>
    %1324 = vector.broadcast %153 : f32 to vector<2x256xf32>
    %1325 = arith.mulf %1317, %1324 : vector<2x256xf32>
    %1326 = arith.addf %1313, %1325 : vector<2x256xf32>
    %1327 = vector.extract_strided_slice %1196 {offsets = [0, 225], sizes = [2, 256], strides = [1, 1]} : vector<2x512xf32> to vector<2x256xf32>
    %cst_116 = arith.constant 0.000000e+00 : f32
    %1328 = vector.broadcast %cst_116 : f32 to vector<2x256xf32>
    %1329 = arith.select %1314, %1327, %1328 : vector<2x256xi1>, vector<2x256xf32>
    %1330 = vector.broadcast %28 : f32 to vector<2x256xf32>
    %1331 = arith.mulf %1329, %1330 : vector<2x256xf32>
    %1332 = arith.addf %1320, %1331 : vector<2x256xf32>
    %1333 = vector.broadcast %103 : f32 to vector<2x256xf32>
    %1334 = arith.mulf %1329, %1333 : vector<2x256xf32>
    %1335 = arith.addf %1323, %1334 : vector<2x256xf32>
    %1336 = vector.broadcast %178 : f32 to vector<2x256xf32>
    %1337 = arith.mulf %1329, %1336 : vector<2x256xf32>
    %1338 = arith.addf %1326, %1337 : vector<2x256xf32>
    %1339 = vector.extract_strided_slice %1197 {offsets = [0, 225], sizes = [2, 256], strides = [1, 1]} : vector<2x512xf32> to vector<2x256xf32>
    %cst_117 = arith.constant 0.000000e+00 : f32
    %1340 = vector.broadcast %cst_117 : f32 to vector<2x256xf32>
    %1341 = arith.select %1314, %1339, %1340 : vector<2x256xi1>, vector<2x256xf32>
    %1342 = vector.broadcast %53 : f32 to vector<2x256xf32>
    %1343 = arith.mulf %1341, %1342 : vector<2x256xf32>
    %1344 = arith.addf %1332, %1343 : vector<2x256xf32>
    %1345 = vector.broadcast %128 : f32 to vector<2x256xf32>
    %1346 = arith.mulf %1341, %1345 : vector<2x256xf32>
    %1347 = arith.addf %1335, %1346 : vector<2x256xf32>
    %1348 = vector.broadcast %203 : f32 to vector<2x256xf32>
    %1349 = arith.mulf %1341, %1348 : vector<2x256xf32>
    %1350 = arith.addf %1338, %1349 : vector<2x256xf32>
    %1351 = arith.andi %231, %245 : vector<2x256xi1>
    %1352 = vector.extract_strided_slice %1195 {offsets = [0, 226], sizes = [2, 256], strides = [1, 1]} : vector<2x512xf32> to vector<2x256xf32>
    %cst_118 = arith.constant 0.000000e+00 : f32
    %1353 = vector.broadcast %cst_118 : f32 to vector<2x256xf32>
    %1354 = arith.select %1351, %1352, %1353 : vector<2x256xi1>, vector<2x256xf32>
    %1355 = vector.broadcast %4 : f32 to vector<2x256xf32>
    %1356 = arith.mulf %1354, %1355 : vector<2x256xf32>
    %1357 = arith.addf %1344, %1356 : vector<2x256xf32>
    %1358 = vector.broadcast %79 : f32 to vector<2x256xf32>
    %1359 = arith.mulf %1354, %1358 : vector<2x256xf32>
    %1360 = arith.addf %1347, %1359 : vector<2x256xf32>
    %1361 = vector.broadcast %154 : f32 to vector<2x256xf32>
    %1362 = arith.mulf %1354, %1361 : vector<2x256xf32>
    %1363 = arith.addf %1350, %1362 : vector<2x256xf32>
    %1364 = vector.extract_strided_slice %1196 {offsets = [0, 226], sizes = [2, 256], strides = [1, 1]} : vector<2x512xf32> to vector<2x256xf32>
    %cst_119 = arith.constant 0.000000e+00 : f32
    %1365 = vector.broadcast %cst_119 : f32 to vector<2x256xf32>
    %1366 = arith.select %1351, %1364, %1365 : vector<2x256xi1>, vector<2x256xf32>
    %1367 = vector.broadcast %29 : f32 to vector<2x256xf32>
    %1368 = arith.mulf %1366, %1367 : vector<2x256xf32>
    %1369 = arith.addf %1357, %1368 : vector<2x256xf32>
    %1370 = vector.broadcast %104 : f32 to vector<2x256xf32>
    %1371 = arith.mulf %1366, %1370 : vector<2x256xf32>
    %1372 = arith.addf %1360, %1371 : vector<2x256xf32>
    %1373 = vector.broadcast %179 : f32 to vector<2x256xf32>
    %1374 = arith.mulf %1366, %1373 : vector<2x256xf32>
    %1375 = arith.addf %1363, %1374 : vector<2x256xf32>
    %1376 = vector.extract_strided_slice %1197 {offsets = [0, 226], sizes = [2, 256], strides = [1, 1]} : vector<2x512xf32> to vector<2x256xf32>
    %cst_120 = arith.constant 0.000000e+00 : f32
    %1377 = vector.broadcast %cst_120 : f32 to vector<2x256xf32>
    %1378 = arith.select %1351, %1376, %1377 : vector<2x256xi1>, vector<2x256xf32>
    %1379 = vector.broadcast %54 : f32 to vector<2x256xf32>
    %1380 = arith.mulf %1378, %1379 : vector<2x256xf32>
    %1381 = arith.addf %1369, %1380 : vector<2x256xf32>
    %1382 = vector.broadcast %129 : f32 to vector<2x256xf32>
    %1383 = arith.mulf %1378, %1382 : vector<2x256xf32>
    %1384 = arith.addf %1372, %1383 : vector<2x256xf32>
    %1385 = vector.broadcast %204 : f32 to vector<2x256xf32>
    %1386 = arith.mulf %1378, %1385 : vector<2x256xf32>
    %1387 = arith.addf %1375, %1386 : vector<2x256xf32>
    %1388 = arith.addf %1198, %1381 : vector<2x256xf32>
    %1389 = arith.addf %1199, %1384 : vector<2x256xf32>
    %1390 = arith.addf %1200, %1387 : vector<2x256xf32>
    %cst_121 = arith.constant 0.000000e+00 : f32
    %1391 = vector.broadcast %cst_121 : f32 to vector<2x256xf32>
    %cst_122 = arith.constant 0.000000e+00 : f32
    %1392 = vector.broadcast %cst_122 : f32 to vector<2x256xf32>
    %cst_123 = arith.constant 0.000000e+00 : f32
    %1393 = vector.broadcast %cst_123 : f32 to vector<2x256xf32>
    %1394 = arith.andi %233, %239 : vector<2x256xi1>
    %1395 = vector.extract_strided_slice %1195 {offsets = [0, 238], sizes = [2, 256], strides = [1, 1]} : vector<2x512xf32> to vector<2x256xf32>
    %cst_124 = arith.constant 0.000000e+00 : f32
    %1396 = vector.broadcast %cst_124 : f32 to vector<2x256xf32>
    %1397 = arith.select %1394, %1395, %1396 : vector<2x256xi1>, vector<2x256xf32>
    %1398 = vector.broadcast %5 : f32 to vector<2x256xf32>
    %1399 = arith.mulf %1397, %1398 : vector<2x256xf32>
    %1400 = arith.addf %1391, %1399 : vector<2x256xf32>
    %1401 = vector.broadcast %80 : f32 to vector<2x256xf32>
    %1402 = arith.mulf %1397, %1401 : vector<2x256xf32>
    %1403 = arith.addf %1392, %1402 : vector<2x256xf32>
    %1404 = vector.broadcast %155 : f32 to vector<2x256xf32>
    %1405 = arith.mulf %1397, %1404 : vector<2x256xf32>
    %1406 = arith.addf %1393, %1405 : vector<2x256xf32>
    %1407 = vector.extract_strided_slice %1196 {offsets = [0, 238], sizes = [2, 256], strides = [1, 1]} : vector<2x512xf32> to vector<2x256xf32>
    %cst_125 = arith.constant 0.000000e+00 : f32
    %1408 = vector.broadcast %cst_125 : f32 to vector<2x256xf32>
    %1409 = arith.select %1394, %1407, %1408 : vector<2x256xi1>, vector<2x256xf32>
    %1410 = vector.broadcast %30 : f32 to vector<2x256xf32>
    %1411 = arith.mulf %1409, %1410 : vector<2x256xf32>
    %1412 = arith.addf %1400, %1411 : vector<2x256xf32>
    %1413 = vector.broadcast %105 : f32 to vector<2x256xf32>
    %1414 = arith.mulf %1409, %1413 : vector<2x256xf32>
    %1415 = arith.addf %1403, %1414 : vector<2x256xf32>
    %1416 = vector.broadcast %180 : f32 to vector<2x256xf32>
    %1417 = arith.mulf %1409, %1416 : vector<2x256xf32>
    %1418 = arith.addf %1406, %1417 : vector<2x256xf32>
    %1419 = vector.extract_strided_slice %1197 {offsets = [0, 238], sizes = [2, 256], strides = [1, 1]} : vector<2x512xf32> to vector<2x256xf32>
    %cst_126 = arith.constant 0.000000e+00 : f32
    %1420 = vector.broadcast %cst_126 : f32 to vector<2x256xf32>
    %1421 = arith.select %1394, %1419, %1420 : vector<2x256xi1>, vector<2x256xf32>
    %1422 = vector.broadcast %55 : f32 to vector<2x256xf32>
    %1423 = arith.mulf %1421, %1422 : vector<2x256xf32>
    %1424 = arith.addf %1412, %1423 : vector<2x256xf32>
    %1425 = vector.broadcast %130 : f32 to vector<2x256xf32>
    %1426 = arith.mulf %1421, %1425 : vector<2x256xf32>
    %1427 = arith.addf %1415, %1426 : vector<2x256xf32>
    %1428 = vector.broadcast %205 : f32 to vector<2x256xf32>
    %1429 = arith.mulf %1421, %1428 : vector<2x256xf32>
    %1430 = arith.addf %1418, %1429 : vector<2x256xf32>
    %1431 = arith.andi %233, %241 : vector<2x256xi1>
    %1432 = vector.extract_strided_slice %1195 {offsets = [0, 239], sizes = [2, 256], strides = [1, 1]} : vector<2x512xf32> to vector<2x256xf32>
    %cst_127 = arith.constant 0.000000e+00 : f32
    %1433 = vector.broadcast %cst_127 : f32 to vector<2x256xf32>
    %1434 = arith.select %1431, %1432, %1433 : vector<2x256xi1>, vector<2x256xf32>
    %1435 = vector.broadcast %6 : f32 to vector<2x256xf32>
    %1436 = arith.mulf %1434, %1435 : vector<2x256xf32>
    %1437 = arith.addf %1424, %1436 : vector<2x256xf32>
    %1438 = vector.broadcast %81 : f32 to vector<2x256xf32>
    %1439 = arith.mulf %1434, %1438 : vector<2x256xf32>
    %1440 = arith.addf %1427, %1439 : vector<2x256xf32>
    %1441 = vector.broadcast %156 : f32 to vector<2x256xf32>
    %1442 = arith.mulf %1434, %1441 : vector<2x256xf32>
    %1443 = arith.addf %1430, %1442 : vector<2x256xf32>
    %1444 = vector.extract_strided_slice %1196 {offsets = [0, 239], sizes = [2, 256], strides = [1, 1]} : vector<2x512xf32> to vector<2x256xf32>
    %cst_128 = arith.constant 0.000000e+00 : f32
    %1445 = vector.broadcast %cst_128 : f32 to vector<2x256xf32>
    %1446 = arith.select %1431, %1444, %1445 : vector<2x256xi1>, vector<2x256xf32>
    %1447 = vector.broadcast %31 : f32 to vector<2x256xf32>
    %1448 = arith.mulf %1446, %1447 : vector<2x256xf32>
    %1449 = arith.addf %1437, %1448 : vector<2x256xf32>
    %1450 = vector.broadcast %106 : f32 to vector<2x256xf32>
    %1451 = arith.mulf %1446, %1450 : vector<2x256xf32>
    %1452 = arith.addf %1440, %1451 : vector<2x256xf32>
    %1453 = vector.broadcast %181 : f32 to vector<2x256xf32>
    %1454 = arith.mulf %1446, %1453 : vector<2x256xf32>
    %1455 = arith.addf %1443, %1454 : vector<2x256xf32>
    %1456 = vector.extract_strided_slice %1197 {offsets = [0, 239], sizes = [2, 256], strides = [1, 1]} : vector<2x512xf32> to vector<2x256xf32>
    %cst_129 = arith.constant 0.000000e+00 : f32
    %1457 = vector.broadcast %cst_129 : f32 to vector<2x256xf32>
    %1458 = arith.select %1431, %1456, %1457 : vector<2x256xi1>, vector<2x256xf32>
    %1459 = vector.broadcast %56 : f32 to vector<2x256xf32>
    %1460 = arith.mulf %1458, %1459 : vector<2x256xf32>
    %1461 = arith.addf %1449, %1460 : vector<2x256xf32>
    %1462 = vector.broadcast %131 : f32 to vector<2x256xf32>
    %1463 = arith.mulf %1458, %1462 : vector<2x256xf32>
    %1464 = arith.addf %1452, %1463 : vector<2x256xf32>
    %1465 = vector.broadcast %206 : f32 to vector<2x256xf32>
    %1466 = arith.mulf %1458, %1465 : vector<2x256xf32>
    %1467 = arith.addf %1455, %1466 : vector<2x256xf32>
    %1468 = vector.extract_strided_slice %1195 {offsets = [0, 240], sizes = [2, 256], strides = [1, 1]} : vector<2x512xf32> to vector<2x256xf32>
    %cst_130 = arith.constant 0.000000e+00 : f32
    %1469 = vector.broadcast %cst_130 : f32 to vector<2x256xf32>
    %1470 = arith.select %233, %1468, %1469 : vector<2x256xi1>, vector<2x256xf32>
    %1471 = vector.broadcast %7 : f32 to vector<2x256xf32>
    %1472 = arith.mulf %1470, %1471 : vector<2x256xf32>
    %1473 = arith.addf %1461, %1472 : vector<2x256xf32>
    %1474 = vector.broadcast %82 : f32 to vector<2x256xf32>
    %1475 = arith.mulf %1470, %1474 : vector<2x256xf32>
    %1476 = arith.addf %1464, %1475 : vector<2x256xf32>
    %1477 = vector.broadcast %157 : f32 to vector<2x256xf32>
    %1478 = arith.mulf %1470, %1477 : vector<2x256xf32>
    %1479 = arith.addf %1467, %1478 : vector<2x256xf32>
    %1480 = vector.extract_strided_slice %1196 {offsets = [0, 240], sizes = [2, 256], strides = [1, 1]} : vector<2x512xf32> to vector<2x256xf32>
    %cst_131 = arith.constant 0.000000e+00 : f32
    %1481 = vector.broadcast %cst_131 : f32 to vector<2x256xf32>
    %1482 = arith.select %233, %1480, %1481 : vector<2x256xi1>, vector<2x256xf32>
    %1483 = vector.broadcast %32 : f32 to vector<2x256xf32>
    %1484 = arith.mulf %1482, %1483 : vector<2x256xf32>
    %1485 = arith.addf %1473, %1484 : vector<2x256xf32>
    %1486 = vector.broadcast %107 : f32 to vector<2x256xf32>
    %1487 = arith.mulf %1482, %1486 : vector<2x256xf32>
    %1488 = arith.addf %1476, %1487 : vector<2x256xf32>
    %1489 = vector.broadcast %182 : f32 to vector<2x256xf32>
    %1490 = arith.mulf %1482, %1489 : vector<2x256xf32>
    %1491 = arith.addf %1479, %1490 : vector<2x256xf32>
    %1492 = vector.extract_strided_slice %1197 {offsets = [0, 240], sizes = [2, 256], strides = [1, 1]} : vector<2x512xf32> to vector<2x256xf32>
    %cst_132 = arith.constant 0.000000e+00 : f32
    %1493 = vector.broadcast %cst_132 : f32 to vector<2x256xf32>
    %1494 = arith.select %233, %1492, %1493 : vector<2x256xi1>, vector<2x256xf32>
    %1495 = vector.broadcast %57 : f32 to vector<2x256xf32>
    %1496 = arith.mulf %1494, %1495 : vector<2x256xf32>
    %1497 = arith.addf %1485, %1496 : vector<2x256xf32>
    %1498 = vector.broadcast %132 : f32 to vector<2x256xf32>
    %1499 = arith.mulf %1494, %1498 : vector<2x256xf32>
    %1500 = arith.addf %1488, %1499 : vector<2x256xf32>
    %1501 = vector.broadcast %207 : f32 to vector<2x256xf32>
    %1502 = arith.mulf %1494, %1501 : vector<2x256xf32>
    %1503 = arith.addf %1491, %1502 : vector<2x256xf32>
    %1504 = arith.andi %233, %243 : vector<2x256xi1>
    %1505 = vector.extract_strided_slice %1195 {offsets = [0, 241], sizes = [2, 256], strides = [1, 1]} : vector<2x512xf32> to vector<2x256xf32>
    %cst_133 = arith.constant 0.000000e+00 : f32
    %1506 = vector.broadcast %cst_133 : f32 to vector<2x256xf32>
    %1507 = arith.select %1504, %1505, %1506 : vector<2x256xi1>, vector<2x256xf32>
    %1508 = vector.broadcast %8 : f32 to vector<2x256xf32>
    %1509 = arith.mulf %1507, %1508 : vector<2x256xf32>
    %1510 = arith.addf %1497, %1509 : vector<2x256xf32>
    %1511 = vector.broadcast %83 : f32 to vector<2x256xf32>
    %1512 = arith.mulf %1507, %1511 : vector<2x256xf32>
    %1513 = arith.addf %1500, %1512 : vector<2x256xf32>
    %1514 = vector.broadcast %158 : f32 to vector<2x256xf32>
    %1515 = arith.mulf %1507, %1514 : vector<2x256xf32>
    %1516 = arith.addf %1503, %1515 : vector<2x256xf32>
    %1517 = vector.extract_strided_slice %1196 {offsets = [0, 241], sizes = [2, 256], strides = [1, 1]} : vector<2x512xf32> to vector<2x256xf32>
    %cst_134 = arith.constant 0.000000e+00 : f32
    %1518 = vector.broadcast %cst_134 : f32 to vector<2x256xf32>
    %1519 = arith.select %1504, %1517, %1518 : vector<2x256xi1>, vector<2x256xf32>
    %1520 = vector.broadcast %33 : f32 to vector<2x256xf32>
    %1521 = arith.mulf %1519, %1520 : vector<2x256xf32>
    %1522 = arith.addf %1510, %1521 : vector<2x256xf32>
    %1523 = vector.broadcast %108 : f32 to vector<2x256xf32>
    %1524 = arith.mulf %1519, %1523 : vector<2x256xf32>
    %1525 = arith.addf %1513, %1524 : vector<2x256xf32>
    %1526 = vector.broadcast %183 : f32 to vector<2x256xf32>
    %1527 = arith.mulf %1519, %1526 : vector<2x256xf32>
    %1528 = arith.addf %1516, %1527 : vector<2x256xf32>
    %1529 = vector.extract_strided_slice %1197 {offsets = [0, 241], sizes = [2, 256], strides = [1, 1]} : vector<2x512xf32> to vector<2x256xf32>
    %cst_135 = arith.constant 0.000000e+00 : f32
    %1530 = vector.broadcast %cst_135 : f32 to vector<2x256xf32>
    %1531 = arith.select %1504, %1529, %1530 : vector<2x256xi1>, vector<2x256xf32>
    %1532 = vector.broadcast %58 : f32 to vector<2x256xf32>
    %1533 = arith.mulf %1531, %1532 : vector<2x256xf32>
    %1534 = arith.addf %1522, %1533 : vector<2x256xf32>
    %1535 = vector.broadcast %133 : f32 to vector<2x256xf32>
    %1536 = arith.mulf %1531, %1535 : vector<2x256xf32>
    %1537 = arith.addf %1525, %1536 : vector<2x256xf32>
    %1538 = vector.broadcast %208 : f32 to vector<2x256xf32>
    %1539 = arith.mulf %1531, %1538 : vector<2x256xf32>
    %1540 = arith.addf %1528, %1539 : vector<2x256xf32>
    %1541 = arith.andi %233, %245 : vector<2x256xi1>
    %1542 = vector.extract_strided_slice %1195 {offsets = [0, 242], sizes = [2, 256], strides = [1, 1]} : vector<2x512xf32> to vector<2x256xf32>
    %cst_136 = arith.constant 0.000000e+00 : f32
    %1543 = vector.broadcast %cst_136 : f32 to vector<2x256xf32>
    %1544 = arith.select %1541, %1542, %1543 : vector<2x256xi1>, vector<2x256xf32>
    %1545 = vector.broadcast %9 : f32 to vector<2x256xf32>
    %1546 = arith.mulf %1544, %1545 : vector<2x256xf32>
    %1547 = arith.addf %1534, %1546 : vector<2x256xf32>
    %1548 = vector.broadcast %84 : f32 to vector<2x256xf32>
    %1549 = arith.mulf %1544, %1548 : vector<2x256xf32>
    %1550 = arith.addf %1537, %1549 : vector<2x256xf32>
    %1551 = vector.broadcast %159 : f32 to vector<2x256xf32>
    %1552 = arith.mulf %1544, %1551 : vector<2x256xf32>
    %1553 = arith.addf %1540, %1552 : vector<2x256xf32>
    %1554 = vector.extract_strided_slice %1196 {offsets = [0, 242], sizes = [2, 256], strides = [1, 1]} : vector<2x512xf32> to vector<2x256xf32>
    %cst_137 = arith.constant 0.000000e+00 : f32
    %1555 = vector.broadcast %cst_137 : f32 to vector<2x256xf32>
    %1556 = arith.select %1541, %1554, %1555 : vector<2x256xi1>, vector<2x256xf32>
    %1557 = vector.broadcast %34 : f32 to vector<2x256xf32>
    %1558 = arith.mulf %1556, %1557 : vector<2x256xf32>
    %1559 = arith.addf %1547, %1558 : vector<2x256xf32>
    %1560 = vector.broadcast %109 : f32 to vector<2x256xf32>
    %1561 = arith.mulf %1556, %1560 : vector<2x256xf32>
    %1562 = arith.addf %1550, %1561 : vector<2x256xf32>
    %1563 = vector.broadcast %184 : f32 to vector<2x256xf32>
    %1564 = arith.mulf %1556, %1563 : vector<2x256xf32>
    %1565 = arith.addf %1553, %1564 : vector<2x256xf32>
    %1566 = vector.extract_strided_slice %1197 {offsets = [0, 242], sizes = [2, 256], strides = [1, 1]} : vector<2x512xf32> to vector<2x256xf32>
    %cst_138 = arith.constant 0.000000e+00 : f32
    %1567 = vector.broadcast %cst_138 : f32 to vector<2x256xf32>
    %1568 = arith.select %1541, %1566, %1567 : vector<2x256xi1>, vector<2x256xf32>
    %1569 = vector.broadcast %59 : f32 to vector<2x256xf32>
    %1570 = arith.mulf %1568, %1569 : vector<2x256xf32>
    %1571 = arith.addf %1559, %1570 : vector<2x256xf32>
    %1572 = vector.broadcast %134 : f32 to vector<2x256xf32>
    %1573 = arith.mulf %1568, %1572 : vector<2x256xf32>
    %1574 = arith.addf %1562, %1573 : vector<2x256xf32>
    %1575 = vector.broadcast %209 : f32 to vector<2x256xf32>
    %1576 = arith.mulf %1568, %1575 : vector<2x256xf32>
    %1577 = arith.addf %1565, %1576 : vector<2x256xf32>
    %1578 = arith.addf %1388, %1571 : vector<2x256xf32>
    %1579 = arith.addf %1389, %1574 : vector<2x256xf32>
    %1580 = arith.addf %1390, %1577 : vector<2x256xf32>
    %cst_139 = arith.constant 0.000000e+00 : f32
    %1581 = vector.broadcast %cst_139 : f32 to vector<2x256xf32>
    %cst_140 = arith.constant 0.000000e+00 : f32
    %1582 = vector.broadcast %cst_140 : f32 to vector<2x256xf32>
    %cst_141 = arith.constant 0.000000e+00 : f32
    %1583 = vector.broadcast %cst_141 : f32 to vector<2x256xf32>
    %1584 = vector.extract_strided_slice %1195 {offsets = [0, 254], sizes = [2, 256], strides = [1, 1]} : vector<2x512xf32> to vector<2x256xf32>
    %cst_142 = arith.constant 0.000000e+00 : f32
    %1585 = vector.broadcast %cst_142 : f32 to vector<2x256xf32>
    %1586 = arith.select %239, %1584, %1585 : vector<2x256xi1>, vector<2x256xf32>
    %1587 = vector.broadcast %10 : f32 to vector<2x256xf32>
    %1588 = arith.mulf %1586, %1587 : vector<2x256xf32>
    %1589 = arith.addf %1581, %1588 : vector<2x256xf32>
    %1590 = vector.broadcast %85 : f32 to vector<2x256xf32>
    %1591 = arith.mulf %1586, %1590 : vector<2x256xf32>
    %1592 = arith.addf %1582, %1591 : vector<2x256xf32>
    %1593 = vector.broadcast %160 : f32 to vector<2x256xf32>
    %1594 = arith.mulf %1586, %1593 : vector<2x256xf32>
    %1595 = arith.addf %1583, %1594 : vector<2x256xf32>
    %1596 = vector.extract_strided_slice %1196 {offsets = [0, 254], sizes = [2, 256], strides = [1, 1]} : vector<2x512xf32> to vector<2x256xf32>
    %cst_143 = arith.constant 0.000000e+00 : f32
    %1597 = vector.broadcast %cst_143 : f32 to vector<2x256xf32>
    %1598 = arith.select %239, %1596, %1597 : vector<2x256xi1>, vector<2x256xf32>
    %1599 = vector.broadcast %35 : f32 to vector<2x256xf32>
    %1600 = arith.mulf %1598, %1599 : vector<2x256xf32>
    %1601 = arith.addf %1589, %1600 : vector<2x256xf32>
    %1602 = vector.broadcast %110 : f32 to vector<2x256xf32>
    %1603 = arith.mulf %1598, %1602 : vector<2x256xf32>
    %1604 = arith.addf %1592, %1603 : vector<2x256xf32>
    %1605 = vector.broadcast %185 : f32 to vector<2x256xf32>
    %1606 = arith.mulf %1598, %1605 : vector<2x256xf32>
    %1607 = arith.addf %1595, %1606 : vector<2x256xf32>
    %1608 = vector.extract_strided_slice %1197 {offsets = [0, 254], sizes = [2, 256], strides = [1, 1]} : vector<2x512xf32> to vector<2x256xf32>
    %cst_144 = arith.constant 0.000000e+00 : f32
    %1609 = vector.broadcast %cst_144 : f32 to vector<2x256xf32>
    %1610 = arith.select %239, %1608, %1609 : vector<2x256xi1>, vector<2x256xf32>
    %1611 = vector.broadcast %60 : f32 to vector<2x256xf32>
    %1612 = arith.mulf %1610, %1611 : vector<2x256xf32>
    %1613 = arith.addf %1601, %1612 : vector<2x256xf32>
    %1614 = vector.broadcast %135 : f32 to vector<2x256xf32>
    %1615 = arith.mulf %1610, %1614 : vector<2x256xf32>
    %1616 = arith.addf %1604, %1615 : vector<2x256xf32>
    %1617 = vector.broadcast %210 : f32 to vector<2x256xf32>
    %1618 = arith.mulf %1610, %1617 : vector<2x256xf32>
    %1619 = arith.addf %1607, %1618 : vector<2x256xf32>
    %1620 = vector.extract_strided_slice %1195 {offsets = [0, 255], sizes = [2, 256], strides = [1, 1]} : vector<2x512xf32> to vector<2x256xf32>
    %cst_145 = arith.constant 0.000000e+00 : f32
    %1621 = vector.broadcast %cst_145 : f32 to vector<2x256xf32>
    %1622 = arith.select %241, %1620, %1621 : vector<2x256xi1>, vector<2x256xf32>
    %1623 = vector.broadcast %11 : f32 to vector<2x256xf32>
    %1624 = arith.mulf %1622, %1623 : vector<2x256xf32>
    %1625 = arith.addf %1613, %1624 : vector<2x256xf32>
    %1626 = vector.broadcast %86 : f32 to vector<2x256xf32>
    %1627 = arith.mulf %1622, %1626 : vector<2x256xf32>
    %1628 = arith.addf %1616, %1627 : vector<2x256xf32>
    %1629 = vector.broadcast %161 : f32 to vector<2x256xf32>
    %1630 = arith.mulf %1622, %1629 : vector<2x256xf32>
    %1631 = arith.addf %1619, %1630 : vector<2x256xf32>
    %1632 = vector.extract_strided_slice %1196 {offsets = [0, 255], sizes = [2, 256], strides = [1, 1]} : vector<2x512xf32> to vector<2x256xf32>
    %cst_146 = arith.constant 0.000000e+00 : f32
    %1633 = vector.broadcast %cst_146 : f32 to vector<2x256xf32>
    %1634 = arith.select %241, %1632, %1633 : vector<2x256xi1>, vector<2x256xf32>
    %1635 = vector.broadcast %36 : f32 to vector<2x256xf32>
    %1636 = arith.mulf %1634, %1635 : vector<2x256xf32>
    %1637 = arith.addf %1625, %1636 : vector<2x256xf32>
    %1638 = vector.broadcast %111 : f32 to vector<2x256xf32>
    %1639 = arith.mulf %1634, %1638 : vector<2x256xf32>
    %1640 = arith.addf %1628, %1639 : vector<2x256xf32>
    %1641 = vector.broadcast %186 : f32 to vector<2x256xf32>
    %1642 = arith.mulf %1634, %1641 : vector<2x256xf32>
    %1643 = arith.addf %1631, %1642 : vector<2x256xf32>
    %1644 = vector.extract_strided_slice %1197 {offsets = [0, 255], sizes = [2, 256], strides = [1, 1]} : vector<2x512xf32> to vector<2x256xf32>
    %cst_147 = arith.constant 0.000000e+00 : f32
    %1645 = vector.broadcast %cst_147 : f32 to vector<2x256xf32>
    %1646 = arith.select %241, %1644, %1645 : vector<2x256xi1>, vector<2x256xf32>
    %1647 = vector.broadcast %61 : f32 to vector<2x256xf32>
    %1648 = arith.mulf %1646, %1647 : vector<2x256xf32>
    %1649 = arith.addf %1637, %1648 : vector<2x256xf32>
    %1650 = vector.broadcast %136 : f32 to vector<2x256xf32>
    %1651 = arith.mulf %1646, %1650 : vector<2x256xf32>
    %1652 = arith.addf %1640, %1651 : vector<2x256xf32>
    %1653 = vector.broadcast %211 : f32 to vector<2x256xf32>
    %1654 = arith.mulf %1646, %1653 : vector<2x256xf32>
    %1655 = arith.addf %1643, %1654 : vector<2x256xf32>
    %1656 = vector.extract_strided_slice %1195 {offsets = [0, 0], sizes = [2, 256], strides = [1, 1]} : vector<2x512xf32> to vector<2x256xf32>
    %1657 = vector.broadcast %12 : f32 to vector<2x256xf32>
    %1658 = arith.mulf %1656, %1657 : vector<2x256xf32>
    %1659 = arith.addf %1649, %1658 : vector<2x256xf32>
    %1660 = vector.broadcast %87 : f32 to vector<2x256xf32>
    %1661 = arith.mulf %1656, %1660 : vector<2x256xf32>
    %1662 = arith.addf %1652, %1661 : vector<2x256xf32>
    %1663 = vector.broadcast %162 : f32 to vector<2x256xf32>
    %1664 = arith.mulf %1656, %1663 : vector<2x256xf32>
    %1665 = arith.addf %1655, %1664 : vector<2x256xf32>
    %1666 = vector.extract_strided_slice %1196 {offsets = [0, 0], sizes = [2, 256], strides = [1, 1]} : vector<2x512xf32> to vector<2x256xf32>
    %1667 = vector.broadcast %37 : f32 to vector<2x256xf32>
    %1668 = arith.mulf %1666, %1667 : vector<2x256xf32>
    %1669 = arith.addf %1659, %1668 : vector<2x256xf32>
    %1670 = vector.broadcast %112 : f32 to vector<2x256xf32>
    %1671 = arith.mulf %1666, %1670 : vector<2x256xf32>
    %1672 = arith.addf %1662, %1671 : vector<2x256xf32>
    %1673 = vector.broadcast %187 : f32 to vector<2x256xf32>
    %1674 = arith.mulf %1666, %1673 : vector<2x256xf32>
    %1675 = arith.addf %1665, %1674 : vector<2x256xf32>
    %1676 = vector.extract_strided_slice %1197 {offsets = [0, 0], sizes = [2, 256], strides = [1, 1]} : vector<2x512xf32> to vector<2x256xf32>
    %1677 = vector.broadcast %62 : f32 to vector<2x256xf32>
    %1678 = arith.mulf %1676, %1677 : vector<2x256xf32>
    %1679 = arith.addf %1669, %1678 : vector<2x256xf32>
    %1680 = vector.broadcast %137 : f32 to vector<2x256xf32>
    %1681 = arith.mulf %1676, %1680 : vector<2x256xf32>
    %1682 = arith.addf %1672, %1681 : vector<2x256xf32>
    %1683 = vector.broadcast %212 : f32 to vector<2x256xf32>
    %1684 = arith.mulf %1676, %1683 : vector<2x256xf32>
    %1685 = arith.addf %1675, %1684 : vector<2x256xf32>
    %1686 = vector.extract_strided_slice %1195 {offsets = [0, 1], sizes = [2, 256], strides = [1, 1]} : vector<2x512xf32> to vector<2x256xf32>
    %cst_148 = arith.constant 0.000000e+00 : f32
    %1687 = vector.broadcast %cst_148 : f32 to vector<2x256xf32>
    %1688 = arith.select %243, %1686, %1687 : vector<2x256xi1>, vector<2x256xf32>
    %1689 = vector.broadcast %13 : f32 to vector<2x256xf32>
    %1690 = arith.mulf %1688, %1689 : vector<2x256xf32>
    %1691 = arith.addf %1679, %1690 : vector<2x256xf32>
    %1692 = vector.broadcast %88 : f32 to vector<2x256xf32>
    %1693 = arith.mulf %1688, %1692 : vector<2x256xf32>
    %1694 = arith.addf %1682, %1693 : vector<2x256xf32>
    %1695 = vector.broadcast %163 : f32 to vector<2x256xf32>
    %1696 = arith.mulf %1688, %1695 : vector<2x256xf32>
    %1697 = arith.addf %1685, %1696 : vector<2x256xf32>
    %1698 = vector.extract_strided_slice %1196 {offsets = [0, 1], sizes = [2, 256], strides = [1, 1]} : vector<2x512xf32> to vector<2x256xf32>
    %cst_149 = arith.constant 0.000000e+00 : f32
    %1699 = vector.broadcast %cst_149 : f32 to vector<2x256xf32>
    %1700 = arith.select %243, %1698, %1699 : vector<2x256xi1>, vector<2x256xf32>
    %1701 = vector.broadcast %38 : f32 to vector<2x256xf32>
    %1702 = arith.mulf %1700, %1701 : vector<2x256xf32>
    %1703 = arith.addf %1691, %1702 : vector<2x256xf32>
    %1704 = vector.broadcast %113 : f32 to vector<2x256xf32>
    %1705 = arith.mulf %1700, %1704 : vector<2x256xf32>
    %1706 = arith.addf %1694, %1705 : vector<2x256xf32>
    %1707 = vector.broadcast %188 : f32 to vector<2x256xf32>
    %1708 = arith.mulf %1700, %1707 : vector<2x256xf32>
    %1709 = arith.addf %1697, %1708 : vector<2x256xf32>
    %1710 = vector.extract_strided_slice %1197 {offsets = [0, 1], sizes = [2, 256], strides = [1, 1]} : vector<2x512xf32> to vector<2x256xf32>
    %cst_150 = arith.constant 0.000000e+00 : f32
    %1711 = vector.broadcast %cst_150 : f32 to vector<2x256xf32>
    %1712 = arith.select %243, %1710, %1711 : vector<2x256xi1>, vector<2x256xf32>
    %1713 = vector.broadcast %63 : f32 to vector<2x256xf32>
    %1714 = arith.mulf %1712, %1713 : vector<2x256xf32>
    %1715 = arith.addf %1703, %1714 : vector<2x256xf32>
    %1716 = vector.broadcast %138 : f32 to vector<2x256xf32>
    %1717 = arith.mulf %1712, %1716 : vector<2x256xf32>
    %1718 = arith.addf %1706, %1717 : vector<2x256xf32>
    %1719 = vector.broadcast %213 : f32 to vector<2x256xf32>
    %1720 = arith.mulf %1712, %1719 : vector<2x256xf32>
    %1721 = arith.addf %1709, %1720 : vector<2x256xf32>
    %1722 = vector.extract_strided_slice %1195 {offsets = [0, 2], sizes = [2, 256], strides = [1, 1]} : vector<2x512xf32> to vector<2x256xf32>
    %cst_151 = arith.constant 0.000000e+00 : f32
    %1723 = vector.broadcast %cst_151 : f32 to vector<2x256xf32>
    %1724 = arith.select %245, %1722, %1723 : vector<2x256xi1>, vector<2x256xf32>
    %1725 = vector.broadcast %14 : f32 to vector<2x256xf32>
    %1726 = arith.mulf %1724, %1725 : vector<2x256xf32>
    %1727 = arith.addf %1715, %1726 : vector<2x256xf32>
    %1728 = vector.broadcast %89 : f32 to vector<2x256xf32>
    %1729 = arith.mulf %1724, %1728 : vector<2x256xf32>
    %1730 = arith.addf %1718, %1729 : vector<2x256xf32>
    %1731 = vector.broadcast %164 : f32 to vector<2x256xf32>
    %1732 = arith.mulf %1724, %1731 : vector<2x256xf32>
    %1733 = arith.addf %1721, %1732 : vector<2x256xf32>
    %1734 = vector.extract_strided_slice %1196 {offsets = [0, 2], sizes = [2, 256], strides = [1, 1]} : vector<2x512xf32> to vector<2x256xf32>
    %cst_152 = arith.constant 0.000000e+00 : f32
    %1735 = vector.broadcast %cst_152 : f32 to vector<2x256xf32>
    %1736 = arith.select %245, %1734, %1735 : vector<2x256xi1>, vector<2x256xf32>
    %1737 = vector.broadcast %39 : f32 to vector<2x256xf32>
    %1738 = arith.mulf %1736, %1737 : vector<2x256xf32>
    %1739 = arith.addf %1727, %1738 : vector<2x256xf32>
    %1740 = vector.broadcast %114 : f32 to vector<2x256xf32>
    %1741 = arith.mulf %1736, %1740 : vector<2x256xf32>
    %1742 = arith.addf %1730, %1741 : vector<2x256xf32>
    %1743 = vector.broadcast %189 : f32 to vector<2x256xf32>
    %1744 = arith.mulf %1736, %1743 : vector<2x256xf32>
    %1745 = arith.addf %1733, %1744 : vector<2x256xf32>
    %1746 = vector.extract_strided_slice %1197 {offsets = [0, 2], sizes = [2, 256], strides = [1, 1]} : vector<2x512xf32> to vector<2x256xf32>
    %cst_153 = arith.constant 0.000000e+00 : f32
    %1747 = vector.broadcast %cst_153 : f32 to vector<2x256xf32>
    %1748 = arith.select %245, %1746, %1747 : vector<2x256xi1>, vector<2x256xf32>
    %1749 = vector.broadcast %64 : f32 to vector<2x256xf32>
    %1750 = arith.mulf %1748, %1749 : vector<2x256xf32>
    %1751 = arith.addf %1739, %1750 : vector<2x256xf32>
    %1752 = vector.broadcast %139 : f32 to vector<2x256xf32>
    %1753 = arith.mulf %1748, %1752 : vector<2x256xf32>
    %1754 = arith.addf %1742, %1753 : vector<2x256xf32>
    %1755 = vector.broadcast %214 : f32 to vector<2x256xf32>
    %1756 = arith.mulf %1748, %1755 : vector<2x256xf32>
    %1757 = arith.addf %1745, %1756 : vector<2x256xf32>
    %1758 = arith.addf %1578, %1751 : vector<2x256xf32>
    %1759 = arith.addf %1579, %1754 : vector<2x256xf32>
    %1760 = arith.addf %1580, %1757 : vector<2x256xf32>
    %cst_154 = arith.constant 0.000000e+00 : f32
    %1761 = vector.broadcast %cst_154 : f32 to vector<2x256xf32>
    %cst_155 = arith.constant 0.000000e+00 : f32
    %1762 = vector.broadcast %cst_155 : f32 to vector<2x256xf32>
    %cst_156 = arith.constant 0.000000e+00 : f32
    %1763 = vector.broadcast %cst_156 : f32 to vector<2x256xf32>
    %1764 = arith.andi %235, %239 : vector<2x256xi1>
    %1765 = vector.extract_strided_slice %1195 {offsets = [0, 14], sizes = [2, 256], strides = [1, 1]} : vector<2x512xf32> to vector<2x256xf32>
    %cst_157 = arith.constant 0.000000e+00 : f32
    %1766 = vector.broadcast %cst_157 : f32 to vector<2x256xf32>
    %1767 = arith.select %1764, %1765, %1766 : vector<2x256xi1>, vector<2x256xf32>
    %1768 = vector.broadcast %15 : f32 to vector<2x256xf32>
    %1769 = arith.mulf %1767, %1768 : vector<2x256xf32>
    %1770 = arith.addf %1761, %1769 : vector<2x256xf32>
    %1771 = vector.broadcast %90 : f32 to vector<2x256xf32>
    %1772 = arith.mulf %1767, %1771 : vector<2x256xf32>
    %1773 = arith.addf %1762, %1772 : vector<2x256xf32>
    %1774 = vector.broadcast %165 : f32 to vector<2x256xf32>
    %1775 = arith.mulf %1767, %1774 : vector<2x256xf32>
    %1776 = arith.addf %1763, %1775 : vector<2x256xf32>
    %1777 = vector.extract_strided_slice %1196 {offsets = [0, 14], sizes = [2, 256], strides = [1, 1]} : vector<2x512xf32> to vector<2x256xf32>
    %cst_158 = arith.constant 0.000000e+00 : f32
    %1778 = vector.broadcast %cst_158 : f32 to vector<2x256xf32>
    %1779 = arith.select %1764, %1777, %1778 : vector<2x256xi1>, vector<2x256xf32>
    %1780 = vector.broadcast %40 : f32 to vector<2x256xf32>
    %1781 = arith.mulf %1779, %1780 : vector<2x256xf32>
    %1782 = arith.addf %1770, %1781 : vector<2x256xf32>
    %1783 = vector.broadcast %115 : f32 to vector<2x256xf32>
    %1784 = arith.mulf %1779, %1783 : vector<2x256xf32>
    %1785 = arith.addf %1773, %1784 : vector<2x256xf32>
    %1786 = vector.broadcast %190 : f32 to vector<2x256xf32>
    %1787 = arith.mulf %1779, %1786 : vector<2x256xf32>
    %1788 = arith.addf %1776, %1787 : vector<2x256xf32>
    %1789 = vector.extract_strided_slice %1197 {offsets = [0, 14], sizes = [2, 256], strides = [1, 1]} : vector<2x512xf32> to vector<2x256xf32>
    %cst_159 = arith.constant 0.000000e+00 : f32
    %1790 = vector.broadcast %cst_159 : f32 to vector<2x256xf32>
    %1791 = arith.select %1764, %1789, %1790 : vector<2x256xi1>, vector<2x256xf32>
    %1792 = vector.broadcast %65 : f32 to vector<2x256xf32>
    %1793 = arith.mulf %1791, %1792 : vector<2x256xf32>
    %1794 = arith.addf %1782, %1793 : vector<2x256xf32>
    %1795 = vector.broadcast %140 : f32 to vector<2x256xf32>
    %1796 = arith.mulf %1791, %1795 : vector<2x256xf32>
    %1797 = arith.addf %1785, %1796 : vector<2x256xf32>
    %1798 = vector.broadcast %215 : f32 to vector<2x256xf32>
    %1799 = arith.mulf %1791, %1798 : vector<2x256xf32>
    %1800 = arith.addf %1788, %1799 : vector<2x256xf32>
    %1801 = arith.andi %235, %241 : vector<2x256xi1>
    %1802 = vector.extract_strided_slice %1195 {offsets = [0, 15], sizes = [2, 256], strides = [1, 1]} : vector<2x512xf32> to vector<2x256xf32>
    %cst_160 = arith.constant 0.000000e+00 : f32
    %1803 = vector.broadcast %cst_160 : f32 to vector<2x256xf32>
    %1804 = arith.select %1801, %1802, %1803 : vector<2x256xi1>, vector<2x256xf32>
    %1805 = vector.broadcast %16 : f32 to vector<2x256xf32>
    %1806 = arith.mulf %1804, %1805 : vector<2x256xf32>
    %1807 = arith.addf %1794, %1806 : vector<2x256xf32>
    %1808 = vector.broadcast %91 : f32 to vector<2x256xf32>
    %1809 = arith.mulf %1804, %1808 : vector<2x256xf32>
    %1810 = arith.addf %1797, %1809 : vector<2x256xf32>
    %1811 = vector.broadcast %166 : f32 to vector<2x256xf32>
    %1812 = arith.mulf %1804, %1811 : vector<2x256xf32>
    %1813 = arith.addf %1800, %1812 : vector<2x256xf32>
    %1814 = vector.extract_strided_slice %1196 {offsets = [0, 15], sizes = [2, 256], strides = [1, 1]} : vector<2x512xf32> to vector<2x256xf32>
    %cst_161 = arith.constant 0.000000e+00 : f32
    %1815 = vector.broadcast %cst_161 : f32 to vector<2x256xf32>
    %1816 = arith.select %1801, %1814, %1815 : vector<2x256xi1>, vector<2x256xf32>
    %1817 = vector.broadcast %41 : f32 to vector<2x256xf32>
    %1818 = arith.mulf %1816, %1817 : vector<2x256xf32>
    %1819 = arith.addf %1807, %1818 : vector<2x256xf32>
    %1820 = vector.broadcast %116 : f32 to vector<2x256xf32>
    %1821 = arith.mulf %1816, %1820 : vector<2x256xf32>
    %1822 = arith.addf %1810, %1821 : vector<2x256xf32>
    %1823 = vector.broadcast %191 : f32 to vector<2x256xf32>
    %1824 = arith.mulf %1816, %1823 : vector<2x256xf32>
    %1825 = arith.addf %1813, %1824 : vector<2x256xf32>
    %1826 = vector.extract_strided_slice %1197 {offsets = [0, 15], sizes = [2, 256], strides = [1, 1]} : vector<2x512xf32> to vector<2x256xf32>
    %cst_162 = arith.constant 0.000000e+00 : f32
    %1827 = vector.broadcast %cst_162 : f32 to vector<2x256xf32>
    %1828 = arith.select %1801, %1826, %1827 : vector<2x256xi1>, vector<2x256xf32>
    %1829 = vector.broadcast %66 : f32 to vector<2x256xf32>
    %1830 = arith.mulf %1828, %1829 : vector<2x256xf32>
    %1831 = arith.addf %1819, %1830 : vector<2x256xf32>
    %1832 = vector.broadcast %141 : f32 to vector<2x256xf32>
    %1833 = arith.mulf %1828, %1832 : vector<2x256xf32>
    %1834 = arith.addf %1822, %1833 : vector<2x256xf32>
    %1835 = vector.broadcast %216 : f32 to vector<2x256xf32>
    %1836 = arith.mulf %1828, %1835 : vector<2x256xf32>
    %1837 = arith.addf %1825, %1836 : vector<2x256xf32>
    %1838 = vector.extract_strided_slice %1195 {offsets = [0, 16], sizes = [2, 256], strides = [1, 1]} : vector<2x512xf32> to vector<2x256xf32>
    %cst_163 = arith.constant 0.000000e+00 : f32
    %1839 = vector.broadcast %cst_163 : f32 to vector<2x256xf32>
    %1840 = arith.select %235, %1838, %1839 : vector<2x256xi1>, vector<2x256xf32>
    %1841 = vector.broadcast %17 : f32 to vector<2x256xf32>
    %1842 = arith.mulf %1840, %1841 : vector<2x256xf32>
    %1843 = arith.addf %1831, %1842 : vector<2x256xf32>
    %1844 = vector.broadcast %92 : f32 to vector<2x256xf32>
    %1845 = arith.mulf %1840, %1844 : vector<2x256xf32>
    %1846 = arith.addf %1834, %1845 : vector<2x256xf32>
    %1847 = vector.broadcast %167 : f32 to vector<2x256xf32>
    %1848 = arith.mulf %1840, %1847 : vector<2x256xf32>
    %1849 = arith.addf %1837, %1848 : vector<2x256xf32>
    %1850 = vector.extract_strided_slice %1196 {offsets = [0, 16], sizes = [2, 256], strides = [1, 1]} : vector<2x512xf32> to vector<2x256xf32>
    %cst_164 = arith.constant 0.000000e+00 : f32
    %1851 = vector.broadcast %cst_164 : f32 to vector<2x256xf32>
    %1852 = arith.select %235, %1850, %1851 : vector<2x256xi1>, vector<2x256xf32>
    %1853 = vector.broadcast %42 : f32 to vector<2x256xf32>
    %1854 = arith.mulf %1852, %1853 : vector<2x256xf32>
    %1855 = arith.addf %1843, %1854 : vector<2x256xf32>
    %1856 = vector.broadcast %117 : f32 to vector<2x256xf32>
    %1857 = arith.mulf %1852, %1856 : vector<2x256xf32>
    %1858 = arith.addf %1846, %1857 : vector<2x256xf32>
    %1859 = vector.broadcast %192 : f32 to vector<2x256xf32>
    %1860 = arith.mulf %1852, %1859 : vector<2x256xf32>
    %1861 = arith.addf %1849, %1860 : vector<2x256xf32>
    %1862 = vector.extract_strided_slice %1197 {offsets = [0, 16], sizes = [2, 256], strides = [1, 1]} : vector<2x512xf32> to vector<2x256xf32>
    %cst_165 = arith.constant 0.000000e+00 : f32
    %1863 = vector.broadcast %cst_165 : f32 to vector<2x256xf32>
    %1864 = arith.select %235, %1862, %1863 : vector<2x256xi1>, vector<2x256xf32>
    %1865 = vector.broadcast %67 : f32 to vector<2x256xf32>
    %1866 = arith.mulf %1864, %1865 : vector<2x256xf32>
    %1867 = arith.addf %1855, %1866 : vector<2x256xf32>
    %1868 = vector.broadcast %142 : f32 to vector<2x256xf32>
    %1869 = arith.mulf %1864, %1868 : vector<2x256xf32>
    %1870 = arith.addf %1858, %1869 : vector<2x256xf32>
    %1871 = vector.broadcast %217 : f32 to vector<2x256xf32>
    %1872 = arith.mulf %1864, %1871 : vector<2x256xf32>
    %1873 = arith.addf %1861, %1872 : vector<2x256xf32>
    %1874 = arith.andi %235, %243 : vector<2x256xi1>
    %1875 = vector.extract_strided_slice %1195 {offsets = [0, 17], sizes = [2, 256], strides = [1, 1]} : vector<2x512xf32> to vector<2x256xf32>
    %cst_166 = arith.constant 0.000000e+00 : f32
    %1876 = vector.broadcast %cst_166 : f32 to vector<2x256xf32>
    %1877 = arith.select %1874, %1875, %1876 : vector<2x256xi1>, vector<2x256xf32>
    %1878 = vector.broadcast %18 : f32 to vector<2x256xf32>
    %1879 = arith.mulf %1877, %1878 : vector<2x256xf32>
    %1880 = arith.addf %1867, %1879 : vector<2x256xf32>
    %1881 = vector.broadcast %93 : f32 to vector<2x256xf32>
    %1882 = arith.mulf %1877, %1881 : vector<2x256xf32>
    %1883 = arith.addf %1870, %1882 : vector<2x256xf32>
    %1884 = vector.broadcast %168 : f32 to vector<2x256xf32>
    %1885 = arith.mulf %1877, %1884 : vector<2x256xf32>
    %1886 = arith.addf %1873, %1885 : vector<2x256xf32>
    %1887 = vector.extract_strided_slice %1196 {offsets = [0, 17], sizes = [2, 256], strides = [1, 1]} : vector<2x512xf32> to vector<2x256xf32>
    %cst_167 = arith.constant 0.000000e+00 : f32
    %1888 = vector.broadcast %cst_167 : f32 to vector<2x256xf32>
    %1889 = arith.select %1874, %1887, %1888 : vector<2x256xi1>, vector<2x256xf32>
    %1890 = vector.broadcast %43 : f32 to vector<2x256xf32>
    %1891 = arith.mulf %1889, %1890 : vector<2x256xf32>
    %1892 = arith.addf %1880, %1891 : vector<2x256xf32>
    %1893 = vector.broadcast %118 : f32 to vector<2x256xf32>
    %1894 = arith.mulf %1889, %1893 : vector<2x256xf32>
    %1895 = arith.addf %1883, %1894 : vector<2x256xf32>
    %1896 = vector.broadcast %193 : f32 to vector<2x256xf32>
    %1897 = arith.mulf %1889, %1896 : vector<2x256xf32>
    %1898 = arith.addf %1886, %1897 : vector<2x256xf32>
    %1899 = vector.extract_strided_slice %1197 {offsets = [0, 17], sizes = [2, 256], strides = [1, 1]} : vector<2x512xf32> to vector<2x256xf32>
    %cst_168 = arith.constant 0.000000e+00 : f32
    %1900 = vector.broadcast %cst_168 : f32 to vector<2x256xf32>
    %1901 = arith.select %1874, %1899, %1900 : vector<2x256xi1>, vector<2x256xf32>
    %1902 = vector.broadcast %68 : f32 to vector<2x256xf32>
    %1903 = arith.mulf %1901, %1902 : vector<2x256xf32>
    %1904 = arith.addf %1892, %1903 : vector<2x256xf32>
    %1905 = vector.broadcast %143 : f32 to vector<2x256xf32>
    %1906 = arith.mulf %1901, %1905 : vector<2x256xf32>
    %1907 = arith.addf %1895, %1906 : vector<2x256xf32>
    %1908 = vector.broadcast %218 : f32 to vector<2x256xf32>
    %1909 = arith.mulf %1901, %1908 : vector<2x256xf32>
    %1910 = arith.addf %1898, %1909 : vector<2x256xf32>
    %1911 = arith.andi %235, %245 : vector<2x256xi1>
    %1912 = vector.extract_strided_slice %1195 {offsets = [0, 18], sizes = [2, 256], strides = [1, 1]} : vector<2x512xf32> to vector<2x256xf32>
    %cst_169 = arith.constant 0.000000e+00 : f32
    %1913 = vector.broadcast %cst_169 : f32 to vector<2x256xf32>
    %1914 = arith.select %1911, %1912, %1913 : vector<2x256xi1>, vector<2x256xf32>
    %1915 = vector.broadcast %19 : f32 to vector<2x256xf32>
    %1916 = arith.mulf %1914, %1915 : vector<2x256xf32>
    %1917 = arith.addf %1904, %1916 : vector<2x256xf32>
    %1918 = vector.broadcast %94 : f32 to vector<2x256xf32>
    %1919 = arith.mulf %1914, %1918 : vector<2x256xf32>
    %1920 = arith.addf %1907, %1919 : vector<2x256xf32>
    %1921 = vector.broadcast %169 : f32 to vector<2x256xf32>
    %1922 = arith.mulf %1914, %1921 : vector<2x256xf32>
    %1923 = arith.addf %1910, %1922 : vector<2x256xf32>
    %1924 = vector.extract_strided_slice %1196 {offsets = [0, 18], sizes = [2, 256], strides = [1, 1]} : vector<2x512xf32> to vector<2x256xf32>
    %cst_170 = arith.constant 0.000000e+00 : f32
    %1925 = vector.broadcast %cst_170 : f32 to vector<2x256xf32>
    %1926 = arith.select %1911, %1924, %1925 : vector<2x256xi1>, vector<2x256xf32>
    %1927 = vector.broadcast %44 : f32 to vector<2x256xf32>
    %1928 = arith.mulf %1926, %1927 : vector<2x256xf32>
    %1929 = arith.addf %1917, %1928 : vector<2x256xf32>
    %1930 = vector.broadcast %119 : f32 to vector<2x256xf32>
    %1931 = arith.mulf %1926, %1930 : vector<2x256xf32>
    %1932 = arith.addf %1920, %1931 : vector<2x256xf32>
    %1933 = vector.broadcast %194 : f32 to vector<2x256xf32>
    %1934 = arith.mulf %1926, %1933 : vector<2x256xf32>
    %1935 = arith.addf %1923, %1934 : vector<2x256xf32>
    %1936 = vector.extract_strided_slice %1197 {offsets = [0, 18], sizes = [2, 256], strides = [1, 1]} : vector<2x512xf32> to vector<2x256xf32>
    %cst_171 = arith.constant 0.000000e+00 : f32
    %1937 = vector.broadcast %cst_171 : f32 to vector<2x256xf32>
    %1938 = arith.select %1911, %1936, %1937 : vector<2x256xi1>, vector<2x256xf32>
    %1939 = vector.broadcast %69 : f32 to vector<2x256xf32>
    %1940 = arith.mulf %1938, %1939 : vector<2x256xf32>
    %1941 = arith.addf %1929, %1940 : vector<2x256xf32>
    %1942 = vector.broadcast %144 : f32 to vector<2x256xf32>
    %1943 = arith.mulf %1938, %1942 : vector<2x256xf32>
    %1944 = arith.addf %1932, %1943 : vector<2x256xf32>
    %1945 = vector.broadcast %219 : f32 to vector<2x256xf32>
    %1946 = arith.mulf %1938, %1945 : vector<2x256xf32>
    %1947 = arith.addf %1935, %1946 : vector<2x256xf32>
    %1948 = arith.addf %1758, %1941 : vector<2x256xf32>
    %1949 = arith.addf %1759, %1944 : vector<2x256xf32>
    %1950 = arith.addf %1760, %1947 : vector<2x256xf32>
    %cst_172 = arith.constant 0.000000e+00 : f32
    %1951 = vector.broadcast %cst_172 : f32 to vector<2x256xf32>
    %cst_173 = arith.constant 0.000000e+00 : f32
    %1952 = vector.broadcast %cst_173 : f32 to vector<2x256xf32>
    %cst_174 = arith.constant 0.000000e+00 : f32
    %1953 = vector.broadcast %cst_174 : f32 to vector<2x256xf32>
    %1954 = arith.andi %237, %239 : vector<2x256xi1>
    %1955 = vector.extract_strided_slice %1195 {offsets = [0, 30], sizes = [2, 256], strides = [1, 1]} : vector<2x512xf32> to vector<2x256xf32>
    %cst_175 = arith.constant 0.000000e+00 : f32
    %1956 = vector.broadcast %cst_175 : f32 to vector<2x256xf32>
    %1957 = arith.select %1954, %1955, %1956 : vector<2x256xi1>, vector<2x256xf32>
    %1958 = vector.broadcast %20 : f32 to vector<2x256xf32>
    %1959 = arith.mulf %1957, %1958 : vector<2x256xf32>
    %1960 = arith.addf %1951, %1959 : vector<2x256xf32>
    %1961 = vector.broadcast %95 : f32 to vector<2x256xf32>
    %1962 = arith.mulf %1957, %1961 : vector<2x256xf32>
    %1963 = arith.addf %1952, %1962 : vector<2x256xf32>
    %1964 = vector.broadcast %170 : f32 to vector<2x256xf32>
    %1965 = arith.mulf %1957, %1964 : vector<2x256xf32>
    %1966 = arith.addf %1953, %1965 : vector<2x256xf32>
    %1967 = vector.extract_strided_slice %1196 {offsets = [0, 30], sizes = [2, 256], strides = [1, 1]} : vector<2x512xf32> to vector<2x256xf32>
    %cst_176 = arith.constant 0.000000e+00 : f32
    %1968 = vector.broadcast %cst_176 : f32 to vector<2x256xf32>
    %1969 = arith.select %1954, %1967, %1968 : vector<2x256xi1>, vector<2x256xf32>
    %1970 = vector.broadcast %45 : f32 to vector<2x256xf32>
    %1971 = arith.mulf %1969, %1970 : vector<2x256xf32>
    %1972 = arith.addf %1960, %1971 : vector<2x256xf32>
    %1973 = vector.broadcast %120 : f32 to vector<2x256xf32>
    %1974 = arith.mulf %1969, %1973 : vector<2x256xf32>
    %1975 = arith.addf %1963, %1974 : vector<2x256xf32>
    %1976 = vector.broadcast %195 : f32 to vector<2x256xf32>
    %1977 = arith.mulf %1969, %1976 : vector<2x256xf32>
    %1978 = arith.addf %1966, %1977 : vector<2x256xf32>
    %1979 = vector.extract_strided_slice %1197 {offsets = [0, 30], sizes = [2, 256], strides = [1, 1]} : vector<2x512xf32> to vector<2x256xf32>
    %cst_177 = arith.constant 0.000000e+00 : f32
    %1980 = vector.broadcast %cst_177 : f32 to vector<2x256xf32>
    %1981 = arith.select %1954, %1979, %1980 : vector<2x256xi1>, vector<2x256xf32>
    %1982 = vector.broadcast %70 : f32 to vector<2x256xf32>
    %1983 = arith.mulf %1981, %1982 : vector<2x256xf32>
    %1984 = arith.addf %1972, %1983 : vector<2x256xf32>
    %1985 = vector.broadcast %145 : f32 to vector<2x256xf32>
    %1986 = arith.mulf %1981, %1985 : vector<2x256xf32>
    %1987 = arith.addf %1975, %1986 : vector<2x256xf32>
    %1988 = vector.broadcast %220 : f32 to vector<2x256xf32>
    %1989 = arith.mulf %1981, %1988 : vector<2x256xf32>
    %1990 = arith.addf %1978, %1989 : vector<2x256xf32>
    %1991 = arith.andi %237, %241 : vector<2x256xi1>
    %1992 = vector.extract_strided_slice %1195 {offsets = [0, 31], sizes = [2, 256], strides = [1, 1]} : vector<2x512xf32> to vector<2x256xf32>
    %cst_178 = arith.constant 0.000000e+00 : f32
    %1993 = vector.broadcast %cst_178 : f32 to vector<2x256xf32>
    %1994 = arith.select %1991, %1992, %1993 : vector<2x256xi1>, vector<2x256xf32>
    %1995 = vector.broadcast %21 : f32 to vector<2x256xf32>
    %1996 = arith.mulf %1994, %1995 : vector<2x256xf32>
    %1997 = arith.addf %1984, %1996 : vector<2x256xf32>
    %1998 = vector.broadcast %96 : f32 to vector<2x256xf32>
    %1999 = arith.mulf %1994, %1998 : vector<2x256xf32>
    %2000 = arith.addf %1987, %1999 : vector<2x256xf32>
    %2001 = vector.broadcast %171 : f32 to vector<2x256xf32>
    %2002 = arith.mulf %1994, %2001 : vector<2x256xf32>
    %2003 = arith.addf %1990, %2002 : vector<2x256xf32>
    %2004 = vector.extract_strided_slice %1196 {offsets = [0, 31], sizes = [2, 256], strides = [1, 1]} : vector<2x512xf32> to vector<2x256xf32>
    %cst_179 = arith.constant 0.000000e+00 : f32
    %2005 = vector.broadcast %cst_179 : f32 to vector<2x256xf32>
    %2006 = arith.select %1991, %2004, %2005 : vector<2x256xi1>, vector<2x256xf32>
    %2007 = vector.broadcast %46 : f32 to vector<2x256xf32>
    %2008 = arith.mulf %2006, %2007 : vector<2x256xf32>
    %2009 = arith.addf %1997, %2008 : vector<2x256xf32>
    %2010 = vector.broadcast %121 : f32 to vector<2x256xf32>
    %2011 = arith.mulf %2006, %2010 : vector<2x256xf32>
    %2012 = arith.addf %2000, %2011 : vector<2x256xf32>
    %2013 = vector.broadcast %196 : f32 to vector<2x256xf32>
    %2014 = arith.mulf %2006, %2013 : vector<2x256xf32>
    %2015 = arith.addf %2003, %2014 : vector<2x256xf32>
    %2016 = vector.extract_strided_slice %1197 {offsets = [0, 31], sizes = [2, 256], strides = [1, 1]} : vector<2x512xf32> to vector<2x256xf32>
    %cst_180 = arith.constant 0.000000e+00 : f32
    %2017 = vector.broadcast %cst_180 : f32 to vector<2x256xf32>
    %2018 = arith.select %1991, %2016, %2017 : vector<2x256xi1>, vector<2x256xf32>
    %2019 = vector.broadcast %71 : f32 to vector<2x256xf32>
    %2020 = arith.mulf %2018, %2019 : vector<2x256xf32>
    %2021 = arith.addf %2009, %2020 : vector<2x256xf32>
    %2022 = vector.broadcast %146 : f32 to vector<2x256xf32>
    %2023 = arith.mulf %2018, %2022 : vector<2x256xf32>
    %2024 = arith.addf %2012, %2023 : vector<2x256xf32>
    %2025 = vector.broadcast %221 : f32 to vector<2x256xf32>
    %2026 = arith.mulf %2018, %2025 : vector<2x256xf32>
    %2027 = arith.addf %2015, %2026 : vector<2x256xf32>
    %2028 = vector.extract_strided_slice %1195 {offsets = [0, 32], sizes = [2, 256], strides = [1, 1]} : vector<2x512xf32> to vector<2x256xf32>
    %cst_181 = arith.constant 0.000000e+00 : f32
    %2029 = vector.broadcast %cst_181 : f32 to vector<2x256xf32>
    %2030 = arith.select %237, %2028, %2029 : vector<2x256xi1>, vector<2x256xf32>
    %2031 = vector.broadcast %22 : f32 to vector<2x256xf32>
    %2032 = arith.mulf %2030, %2031 : vector<2x256xf32>
    %2033 = arith.addf %2021, %2032 : vector<2x256xf32>
    %2034 = vector.broadcast %97 : f32 to vector<2x256xf32>
    %2035 = arith.mulf %2030, %2034 : vector<2x256xf32>
    %2036 = arith.addf %2024, %2035 : vector<2x256xf32>
    %2037 = vector.broadcast %172 : f32 to vector<2x256xf32>
    %2038 = arith.mulf %2030, %2037 : vector<2x256xf32>
    %2039 = arith.addf %2027, %2038 : vector<2x256xf32>
    %2040 = vector.extract_strided_slice %1196 {offsets = [0, 32], sizes = [2, 256], strides = [1, 1]} : vector<2x512xf32> to vector<2x256xf32>
    %cst_182 = arith.constant 0.000000e+00 : f32
    %2041 = vector.broadcast %cst_182 : f32 to vector<2x256xf32>
    %2042 = arith.select %237, %2040, %2041 : vector<2x256xi1>, vector<2x256xf32>
    %2043 = vector.broadcast %47 : f32 to vector<2x256xf32>
    %2044 = arith.mulf %2042, %2043 : vector<2x256xf32>
    %2045 = arith.addf %2033, %2044 : vector<2x256xf32>
    %2046 = vector.broadcast %122 : f32 to vector<2x256xf32>
    %2047 = arith.mulf %2042, %2046 : vector<2x256xf32>
    %2048 = arith.addf %2036, %2047 : vector<2x256xf32>
    %2049 = vector.broadcast %197 : f32 to vector<2x256xf32>
    %2050 = arith.mulf %2042, %2049 : vector<2x256xf32>
    %2051 = arith.addf %2039, %2050 : vector<2x256xf32>
    %2052 = vector.extract_strided_slice %1197 {offsets = [0, 32], sizes = [2, 256], strides = [1, 1]} : vector<2x512xf32> to vector<2x256xf32>
    %cst_183 = arith.constant 0.000000e+00 : f32
    %2053 = vector.broadcast %cst_183 : f32 to vector<2x256xf32>
    %2054 = arith.select %237, %2052, %2053 : vector<2x256xi1>, vector<2x256xf32>
    %2055 = vector.broadcast %72 : f32 to vector<2x256xf32>
    %2056 = arith.mulf %2054, %2055 : vector<2x256xf32>
    %2057 = arith.addf %2045, %2056 : vector<2x256xf32>
    %2058 = vector.broadcast %147 : f32 to vector<2x256xf32>
    %2059 = arith.mulf %2054, %2058 : vector<2x256xf32>
    %2060 = arith.addf %2048, %2059 : vector<2x256xf32>
    %2061 = vector.broadcast %222 : f32 to vector<2x256xf32>
    %2062 = arith.mulf %2054, %2061 : vector<2x256xf32>
    %2063 = arith.addf %2051, %2062 : vector<2x256xf32>
    %2064 = arith.andi %237, %243 : vector<2x256xi1>
    %2065 = vector.extract_strided_slice %1195 {offsets = [0, 33], sizes = [2, 256], strides = [1, 1]} : vector<2x512xf32> to vector<2x256xf32>
    %cst_184 = arith.constant 0.000000e+00 : f32
    %2066 = vector.broadcast %cst_184 : f32 to vector<2x256xf32>
    %2067 = arith.select %2064, %2065, %2066 : vector<2x256xi1>, vector<2x256xf32>
    %2068 = vector.broadcast %23 : f32 to vector<2x256xf32>
    %2069 = arith.mulf %2067, %2068 : vector<2x256xf32>
    %2070 = arith.addf %2057, %2069 : vector<2x256xf32>
    %2071 = vector.broadcast %98 : f32 to vector<2x256xf32>
    %2072 = arith.mulf %2067, %2071 : vector<2x256xf32>
    %2073 = arith.addf %2060, %2072 : vector<2x256xf32>
    %2074 = vector.broadcast %173 : f32 to vector<2x256xf32>
    %2075 = arith.mulf %2067, %2074 : vector<2x256xf32>
    %2076 = arith.addf %2063, %2075 : vector<2x256xf32>
    %2077 = vector.extract_strided_slice %1196 {offsets = [0, 33], sizes = [2, 256], strides = [1, 1]} : vector<2x512xf32> to vector<2x256xf32>
    %cst_185 = arith.constant 0.000000e+00 : f32
    %2078 = vector.broadcast %cst_185 : f32 to vector<2x256xf32>
    %2079 = arith.select %2064, %2077, %2078 : vector<2x256xi1>, vector<2x256xf32>
    %2080 = vector.broadcast %48 : f32 to vector<2x256xf32>
    %2081 = arith.mulf %2079, %2080 : vector<2x256xf32>
    %2082 = arith.addf %2070, %2081 : vector<2x256xf32>
    %2083 = vector.broadcast %123 : f32 to vector<2x256xf32>
    %2084 = arith.mulf %2079, %2083 : vector<2x256xf32>
    %2085 = arith.addf %2073, %2084 : vector<2x256xf32>
    %2086 = vector.broadcast %198 : f32 to vector<2x256xf32>
    %2087 = arith.mulf %2079, %2086 : vector<2x256xf32>
    %2088 = arith.addf %2076, %2087 : vector<2x256xf32>
    %2089 = vector.extract_strided_slice %1197 {offsets = [0, 33], sizes = [2, 256], strides = [1, 1]} : vector<2x512xf32> to vector<2x256xf32>
    %cst_186 = arith.constant 0.000000e+00 : f32
    %2090 = vector.broadcast %cst_186 : f32 to vector<2x256xf32>
    %2091 = arith.select %2064, %2089, %2090 : vector<2x256xi1>, vector<2x256xf32>
    %2092 = vector.broadcast %73 : f32 to vector<2x256xf32>
    %2093 = arith.mulf %2091, %2092 : vector<2x256xf32>
    %2094 = arith.addf %2082, %2093 : vector<2x256xf32>
    %2095 = vector.broadcast %148 : f32 to vector<2x256xf32>
    %2096 = arith.mulf %2091, %2095 : vector<2x256xf32>
    %2097 = arith.addf %2085, %2096 : vector<2x256xf32>
    %2098 = vector.broadcast %223 : f32 to vector<2x256xf32>
    %2099 = arith.mulf %2091, %2098 : vector<2x256xf32>
    %2100 = arith.addf %2088, %2099 : vector<2x256xf32>
    %2101 = arith.andi %237, %245 : vector<2x256xi1>
    %2102 = vector.extract_strided_slice %1195 {offsets = [0, 34], sizes = [2, 256], strides = [1, 1]} : vector<2x512xf32> to vector<2x256xf32>
    %cst_187 = arith.constant 0.000000e+00 : f32
    %2103 = vector.broadcast %cst_187 : f32 to vector<2x256xf32>
    %2104 = arith.select %2101, %2102, %2103 : vector<2x256xi1>, vector<2x256xf32>
    %2105 = vector.broadcast %24 : f32 to vector<2x256xf32>
    %2106 = arith.mulf %2104, %2105 : vector<2x256xf32>
    %2107 = arith.addf %2094, %2106 : vector<2x256xf32>
    %2108 = vector.broadcast %99 : f32 to vector<2x256xf32>
    %2109 = arith.mulf %2104, %2108 : vector<2x256xf32>
    %2110 = arith.addf %2097, %2109 : vector<2x256xf32>
    %2111 = vector.broadcast %174 : f32 to vector<2x256xf32>
    %2112 = arith.mulf %2104, %2111 : vector<2x256xf32>
    %2113 = arith.addf %2100, %2112 : vector<2x256xf32>
    %2114 = vector.extract_strided_slice %1196 {offsets = [0, 34], sizes = [2, 256], strides = [1, 1]} : vector<2x512xf32> to vector<2x256xf32>
    %cst_188 = arith.constant 0.000000e+00 : f32
    %2115 = vector.broadcast %cst_188 : f32 to vector<2x256xf32>
    %2116 = arith.select %2101, %2114, %2115 : vector<2x256xi1>, vector<2x256xf32>
    %2117 = vector.broadcast %49 : f32 to vector<2x256xf32>
    %2118 = arith.mulf %2116, %2117 : vector<2x256xf32>
    %2119 = arith.addf %2107, %2118 : vector<2x256xf32>
    %2120 = vector.broadcast %124 : f32 to vector<2x256xf32>
    %2121 = arith.mulf %2116, %2120 : vector<2x256xf32>
    %2122 = arith.addf %2110, %2121 : vector<2x256xf32>
    %2123 = vector.broadcast %199 : f32 to vector<2x256xf32>
    %2124 = arith.mulf %2116, %2123 : vector<2x256xf32>
    %2125 = arith.addf %2113, %2124 : vector<2x256xf32>
    %2126 = vector.extract_strided_slice %1197 {offsets = [0, 34], sizes = [2, 256], strides = [1, 1]} : vector<2x512xf32> to vector<2x256xf32>
    %cst_189 = arith.constant 0.000000e+00 : f32
    %2127 = vector.broadcast %cst_189 : f32 to vector<2x256xf32>
    %2128 = arith.select %2101, %2126, %2127 : vector<2x256xi1>, vector<2x256xf32>
    %2129 = vector.broadcast %74 : f32 to vector<2x256xf32>
    %2130 = arith.mulf %2128, %2129 : vector<2x256xf32>
    %2131 = arith.addf %2119, %2130 : vector<2x256xf32>
    %2132 = vector.broadcast %149 : f32 to vector<2x256xf32>
    %2133 = arith.mulf %2128, %2132 : vector<2x256xf32>
    %2134 = arith.addf %2122, %2133 : vector<2x256xf32>
    %2135 = vector.broadcast %224 : f32 to vector<2x256xf32>
    %2136 = arith.mulf %2128, %2135 : vector<2x256xf32>
    %2137 = arith.addf %2125, %2136 : vector<2x256xf32>
    %2138 = arith.addf %1948, %2131 : vector<2x256xf32>
    %2139 = arith.addf %1949, %2134 : vector<2x256xf32>
    %2140 = arith.addf %1950, %2137 : vector<2x256xf32>
    %c0_190 = arith.constant 0 : index
    %c0_191 = arith.constant 0 : index
    %2141 = vector.load %arg2[%c0_190, %c0_191] : memref<6x256xf32, #tpu.memory_space<vmem>>, vector<2x256xf32>
    tpu.vector_store %arg2[%c0_190, %c0_191], %2138 {strides = array<i32>} : memref<6x256xf32, #tpu.memory_space<vmem>>, vector<2x256xf32>,
    %c2_192 = arith.constant 2 : index
    %c0_193 = arith.constant 0 : index
    %2142 = vector.load %arg2[%c2_192, %c0_193] : memref<6x256xf32, #tpu.memory_space<vmem>>, vector<2x256xf32>
    tpu.vector_store %arg2[%c2_192, %c0_193], %2139 {strides = array<i32>} : memref<6x256xf32, #tpu.memory_space<vmem>>, vector<2x256xf32>,
    %c4_194 = arith.constant 4 : index
    %c0_195 = arith.constant 0 : index
    %2143 = vector.load %arg2[%c4_194, %c0_195] : memref<6x256xf32, #tpu.memory_space<vmem>>, vector<2x256xf32>
    tpu.vector_store %arg2[%c4_194, %c0_195], %2140 {strides = array<i32>} : memref<6x256xf32, #tpu.memory_space<vmem>>, vector<2x256xf32>,
    return
  }
}

</mosaic_0001>

<bundles_post_ra>
// kernel: forward.1
= control target key start
LH: loop header
LB: loop body
LE: loop exit
PB: predicated region body
PF: predicated region fallthrough
CT: control target
= control target key end

     0   :  { %7 = vsyncpa [#allocation3], 0  ;;  %s4205_s12 = smov [#allocation2]   ;;  %s8949_s0 = inlined_call_operand.vmem [shape: f32[225], index: 0, kind: input, shape index: {}]   ;;  %s8950_s1 = inlined_call_operand.vmem [shape: f32[6,256], index: 1, kind: input, shape index: {}]   ;;  %s8951_s2 = inlined_call_operand.vmem [shape: f32[6,256], index: 2, kind: output, shape index: {}]  }
   0x1   :  { %s13_s11 = sshll.u32 %s8949_s0, 4  ;;  %s14_s11 = int_to_ptr.vmem [resolvable:$true] %s13_s11 }
   0x2   :  { %16 = dma.vmem_to_smem %s14_s11, 32, %s4205_s12, [#allocation3]  }
   0x3   :  { %4203 = dma.done.wait [#allocation3], 32  }
   0x4   :  { %4204 = vsyncadd [#allocation3], 4294967264 }
   0x5   :  { %23 = sfence }
   0x6   :  { %v4251_v0 = vld [vmem:[%s8950_s1 + $0x8] sm:$0x3]  ;;  %v275_v1 = vld [vmem:[%s8950_s1 + $0x8] sm:$0xc]  ;;  %s4206_s17 = smov 34   ;;  %s4207_s25 = smov 33   ;;  %v249_v19 = vlaneseq }
   0x7   :  { %282 = vrot.lane.b32.xlu0 %v4251_v0, %s4206_s17  ;;  %v4258_v2 = vrot.slane %v275_v1, 2  ;;  %v277_v3 = vld [vmem:[%s8950_s1 + $0x8] sm:$0x30]  ;;  %v274_v5 = vld [vmem:[%s8950_s1] sm:$0xc]  ;;  %s4208_s26 = smov 32  }
   0x8   :  { %v4265_v4 = vrot.slane %v277_v3, 4  ;;  %v4275_v6 = vld [vmem:[%s8950_s1] sm:$0x3]  ;;  %v276_v7 = vld [vmem:[%s8950_s1] sm:$0x30]  ;;  %v4280_v8 = vrot.slane %v274_v5, 2 }
   0x9   :  { %312 = vrot.lane.b32.xlu1 %v4258_v2, %s4206_s17  ;;  %v4284_v9 = vrot.slane %v276_v7, 4  ;;  %s4209_s27 = smov 31   ;;  %s4210_s28 = smov 30   ;;  %v250_v22 = vand.u32 127, %v249_v19  ;;  %vm9004_vm0 = vcmask 277504   ;;  %v9548_v33 = vmov 0 }
   0xa   :  { %341 = vrot.lane.b32.xlu2 %v4265_v4, %s4206_s17  ;;  %s4211_s29 = smov 18   ;;  %s4212_s30 = smov 17   ;;  %v9551_v35 = vmov 0  ;;  %vm9003_vm7 = vcmask 269312   ;;  %vm9002_vm12 = vcmask 261120   ;;  %vm9032_vm13 = vcmask 252928  }
   0xb   :  { %s4213_s3 = smov 16   ;;  %s4214_s4 = smov 15   ;;  %v251_v24 = vadd.s32 128, %v250_v22  ;;  %v4428_v26 = vshra.s32 %v250_v22, 4  ;;  %v4430_v27 = vand.u32 15, %v250_v22 }
   0xc   :  { %s4398_s5 = sld [smem:[#allocation2 + $0x32]]  ;;  %s4215_s19 = smov 14  }
   0xd   :  { %s4400_s6 = sld [smem:[#allocation2 + $0x7d]]  ;;  %v4438_v29 = vshra.s32 %v251_v24, 4  ;;  %v4440_v30 = vand.u32 15, %v251_v24  ;;  %vm9039_vm1 = vcmp.ge.s32.totalorder %v4428_v26, 2  ;;  %vm9061_vm2 = vcmp.ge.s32.totalorder %v4430_v27, 2 }
   0xe   :  { %s4406_s7 = sld [smem:[#allocation2 + $0xc8]]  ;;  %vm4470_vm5 = vmand %vm9039_vm1, %vm9061_vm2  ;;  %vm9126_vm8 = vcmp.ge.s32.totalorder %v4430_v27, 1  ;;  %vm9006_vm14 = vcmp.lt.s32.totalorder %v4430_v27, 15 }
   0xf   :  { %284 = vrot.lane.b32.xlu0 %v4275_v6, %s4206_s17  ;;  %s4408_s8 = sld [smem:[#allocation2]]  ;;  %vm9038_vm3 = vcmp.ge.s32.totalorder %v4438_v29, 2  ;;  %vm9087_vm4 = vcmp.ge.s32.totalorder %v4440_v30, 2  ;;  %v9549_v33 = vsel %vm4470_vm5, 4294967295, %v9548_v33  ;;  %vm9033_vm9 = vcmp.ge.s32.totalorder %v4440_v30, 1  ;;  %vm4655_vm10 = vmand %vm9039_vm1, %vm9126_vm8 }
  0x10   :  { %s4412_s9 = sld [smem:[#allocation2 + $0x4b]]  ;;  %9550 = vst [vmem:[#allocation5_spill] sm:$0xff] %v9549_v33  ;;  %vm4483_vm6 = vmand %vm9038_vm3, %vm9087_vm4  ;;  %vm9005_vm15 = vcmp.lt.s32.totalorder %v4440_v30, 15 }
  0x11   :  { %314 = vrot.lane.b32.xlu1 %v4280_v8, %s4206_s17  ;;  %s4414_s10 = sld [smem:[#allocation2 + $0x96]]  ;;  %v9552_v35 = vsel %vm4483_vm6, 4294967295, %v9551_v35  ;;  %vm4663_vm11 = vmand %vm9038_vm3, %vm9033_vm9 }
  0x12   :  { %343 = vrot.lane.b32.xlu2 %v4284_v9, %s4206_s17  ;;  %s4418_s11 = sld [smem:[#allocation2 + $0x19]]  ;;  %9553 = vst [vmem:[#allocation6_spill] sm:$0xff] %v9552_v35  ;;  %v4497_v38 = vstv %s4398_s5 }
  0x13   :  { %s4420_s12 = sld [smem:[#allocation2 + $0x64]]  ;;  %9554 = vst [vmem:[#allocation7_spill] sm:$0xff] %v4497_v38  ;;  %v4500_v39 = vstv %s4400_s6 }
  0x14   :  { %s4426_s13 = sld [smem:[#allocation2 + $0xaf]]  ;;  %9555 = vst [vmem:[#allocation8_spill] sm:$0xff] %v4500_v39  ;;  %v4503_v40 = vstv %s4406_s7 }
  0x15   :  { %s4432_s14 = sld [smem:[#allocation2 + $0x1]]  ;;  %9556 = vst [vmem:[#allocation9_spill] sm:$0xff] %v4503_v40  ;;  %v4506_v41 = vstv %s4408_s8 }
  0x16   :  { %s4442_s15 = sld [smem:[#allocation2 + $0x4c]]  ;;  %9557 = vst [vmem:[#allocation10_spill] sm:$0xff] %v4506_v41  ;;  %v4513_v43 = vstv %s4412_s9 }
  0x17   :  { %368 = vrot.lane.b32.xlu0 %v4251_v0, %s4207_s25  ;;  %s4444_s16 = sld [smem:[#allocation2 + $0x97]]  ;;  %9558 = vst [vmem:[#allocation11_spill] sm:$0xff] %v4513_v43  ;;  %v4516_v44 = vstv %s4414_s10 }
  0x18   :  { %s4448_s0 = sld [smem:[#allocation2 + $0x1a]]  ;;  %9559 = vst [vmem:[#allocation12_spill] sm:$0xff] %v4516_v44  ;;  %v4519_v45 = vstv %s4418_s11 }
  0x19   :  { %370 = vrot.lane.b32.xlu1 %v4275_v6, %s4207_s25  ;;  %s4452_s18 = sld [smem:[#allocation2 + $0x65]]  ;;  %9560 = vst [vmem:[#allocation13_spill] sm:$0xff] %v4519_v45  ;;  %v4528_v48 = vstv %s4420_s12 }
  0x1a   :  { %394 = vrot.lane.b32.xlu2 %v4258_v2, %s4207_s25  ;;  %s4458_s20 = sld [smem:[#allocation2 + $0xb0]]  ;;  %9562 = vst [vmem:[#allocation15_spill] sm:$0xff] %v4528_v48  ;;  %v4531_v49 = vstv %s4426_s13  ;;  %s4216_s13 = smov 2  }
  0x1b   :  { %s4460_s21 = sld [smem:[#allocation2 + $0x33]]  ;;  %9563 = vst [vmem:[#allocation16_spill] sm:$0xff] %v4531_v49  ;;  %v4551_v53 = vstv %s4432_s14 }
  0x1c   :  { %s4477_s22 = sld [smem:[#allocation2 + $0x7e]]  ;;  %9564 = vst [vmem:[#allocation17_spill] sm:$0xff] %v4551_v53  ;;  %v4554_v54 = vstv %s4442_s15 }
  0x1d   :  { %s4490_s23 = sld [smem:[#allocation2 + $0xc9]]  ;;  %9565 = vst [vmem:[#allocation18_spill] sm:$0xff] %v4554_v54  ;;  %v4557_v55 = vstv %s4444_s16 }
  0x1e   :  { %s4508_s24 = sld [smem:[#allocation2 + $0x2]]  ;;  %9566 = vst [vmem:[#allocation19_spill] sm:$0xff] %v4557_v55  ;;  %v4593_v5 = vstv %s4448_s0 }
  0x1f   :  { %396 = vrot.lane.b32.xlu0 %v4280_v8, %s4207_s25  ;;  %s4521_s5 = sld [smem:[#allocation2 + $0x4d]]  ;;  %9567 = vst [vmem:[#allocation20_spill] sm:$0xff] %v4593_v5  ;;  %v4596_v7 = vstv %s4452_s18 }
  0x20   :  { %s4533_s6 = sld [smem:[#allocation2 + $0x98]]  ;;  %9568 = vst [vmem:[#allocation21_spill] sm:$0xff] %v4596_v7 }
  0x21   :  { %419 = vrot.lane.b32.xlu1 %v4265_v4, %s4207_s25  ;;  %s4545_s7 = sld [smem:[#allocation2 + $0x1b]] }
  0x22   :  { %421 = vrot.lane.b32.xlu2 %v4284_v9, %s4207_s25  ;;  %s4575_s8 = sld [smem:[#allocation2 + $0x66]] }
  0x23   :  { %s4587_s9 = sld [smem:[#allocation2 + $0xb1]]  ;;  %v4622_v24 = vstv %s4490_s23 }
  0x24   :  { %s4603_s10 = sld [smem:[#allocation2 + $0x34]]  ;;  %9572 = vst [vmem:[#allocation25_spill] sm:$0xff] %v4622_v24 }
  0x25   :  { %s4617_s11 = sld [smem:[#allocation2 + $0x7f]] }
  0x26   :  { %s4627_s12 = sld [smem:[#allocation2 + $0xca]] }
  0x27   :  { %444 = vrot.lane.b32.xlu0 %v4251_v0, %s4208_s26  ;;  %s4681_s14 = sld [smem:[#allocation2 + $0x3]] }
  0x28   :  { %s4711_s15 = sld [smem:[#allocation2 + $0x4e]] }
  0x29   :  { %446 = vrot.lane.b32.xlu1 %v4275_v6, %s4208_s26  ;;  %s4725_s16 = sld [smem:[#allocation2 + $0x99]] }
  0x2a   :  { %470 = vrot.lane.b32.xlu2 %v4258_v2, %s4208_s26  ;;  %s4735_s0 = sld [smem:[#allocation2 + $0x1c]] }
  0x2b   :  { %s4747_s18 = sld [smem:[#allocation2 + $0x67]] }
  0x2c   :  { %s4776_s23 = sld [smem:[#allocation2 + $0xcb]] }
  0x2f   :  { %472 = vrot.lane.b32.xlu0 %v4280_v8, %s4208_s26 }
  0x31   :  { %495 = vrot.lane.b32.xlu1 %v4265_v4, %s4208_s26 }
  0x32   :  { %497 = vrot.lane.b32.xlu2 %v4284_v9, %s4208_s26 }
  0x37   :  { %522 = vrot.lane.b32.xlu0 %v4251_v0, %s4209_s27 }
  0x39   :  { %524 = vrot.lane.b32.xlu1 %v4275_v6, %s4209_s27 }
  0x3a   :  { %548 = vrot.lane.b32.xlu2 %v4258_v2, %s4209_s27 }
  0x3f   :  { %550 = vrot.lane.b32.xlu0 %v4280_v8, %s4209_s27 }
  0x41   :  { %573 = vrot.lane.b32.xlu1 %v4265_v4, %s4209_s27 }
  0x42   :  { %575 = vrot.lane.b32.xlu2 %v4284_v9, %s4209_s27 }
  0x47   :  { %600 = vrot.lane.b32.xlu0 %v4251_v0, %s4210_s28 }
  0x49   :  { %602 = vrot.lane.b32.xlu1 %v4275_v6, %s4210_s28 }
  0x4a   :  { %626 = vrot.lane.b32.xlu2 %v4258_v2, %s4210_s28 }
  0x4f   :  { %628 = vrot.lane.b32.xlu0 %v4280_v8, %s4210_s28 }
  0x51   :  { %651 = vrot.lane.b32.xlu1 %v4265_v4, %s4210_s28 }
  0x52   :  { %653 = vrot.lane.b32.xlu2 %v4284_v9, %s4210_s28 }
  0x57   :  { %684 = vrot.lane.b32.xlu0 %v4251_v0, %s4211_s29 }
  0x59   :  { %686 = vrot.lane.b32.xlu1 %v4275_v6, %s4211_s29 }
  0x5a   :  { %710 = vrot.lane.b32.xlu2 %v4258_v2, %s4211_s29 }
  0x5f   :  { %712 = vrot.lane.b32.xlu0 %v4280_v8, %s4211_s29 }
  0x61   :  { %735 = vrot.lane.b32.xlu1 %v4265_v4, %s4211_s29 }
  0x62   :  { %737 = vrot.lane.b32.xlu2 %v4284_v9, %s4211_s29 }
  0x64   :  { %v4350_v10 = vpop.permute.xlu2 %341 }
  0x67   :  { %762 = vrot.lane.b32.xlu0 %v4251_v0, %s4212_s30 }
  0x69   :  { %764 = vrot.lane.b32.xlu1 %v4275_v6, %s4212_s30 }
  0x6a   :  { %788 = vrot.lane.b32.xlu2 %v4258_v2, %s4212_s30 }
  0x6c   :  { %v4358_v11 = vpop.permute.xlu2 %343 }
  0x6d   :  { %v345_v34 = vsel %vm9004_vm0, %v4350_v10, %v4358_v11  ;;  %v346_v36 = vsel %vm9004_vm0, %v4358_v11, %v4350_v10  ;;  %v4599_v10 = vstv %s4458_s20  ;;  %s4757_s20 = sld [smem:[#allocation2 + $0xb2]] }
  0x6e   :  { %v349_v42 = vsel %vm4470_vm5, %v345_v34, 0.0  ;;  %v350_v47 = vsel %vm4483_vm6, %v346_v36, 0.0  ;;  %9569 = vst [vmem:[#allocation22_spill] sm:$0xff] %v4599_v10  ;;  %v4625_v34 = vstv %s4508_s24  ;;  %s4217_s24 = smov 1  }
  0x6f   :  { %790 = vrot.lane.b32.xlu0 %v4280_v8, %s4212_s30  ;;  %v4548_v52 = vmul.f32 %v4497_v38, %v349_v42  ;;  %v4560_v56 = vmul.f32 %v4497_v38, %v350_v47  ;;  %v4563_v57 = vmul.f32 %v4500_v39, %v349_v42  ;;  %v4578_v61 = vmul.f32 %v4500_v39, %v350_v47 }
  0x70   :  { %v4581_v62 = vmul.f32 %v4503_v40, %v349_v42  ;;  %v4590_v3 = vmul.f32 %v4503_v40, %v350_v47  ;;  %9573 = vst [vmem:[#allocation26_spill] sm:$0xff] %v4625_v34  ;;  %v4643_v39 = vstv %s4545_s7  ;;  %s4846_s7 = sld [smem:[#allocation2 + $0x9a]] }
  0x71   :  { %813 = vrot.lane.b32.xlu1 %v4265_v4, %s4212_s30  ;;  %9577 = vst [vmem:[#allocation30_spill] sm:$0xff] %v4643_v39 }
  0x72   :  { %815 = vrot.lane.b32.xlu2 %v4284_v9, %s4212_s30 }
  0x74   :  { %v4366_v12 = vpop.permute.xlu2 %394 }
  0x77   :  { %838 = vrot.lane.b32.xlu0 %v4251_v0, %s4213_s3 }
  0x79   :  { %v4370_v13 = vpop.permute.xlu0 %282  ;;  %840 = vrot.lane.b32.xlu1 %v4275_v6, %s4213_s3 }
  0x7a   :  { %864 = vrot.lane.b32.xlu2 %v4258_v2, %s4213_s3 }
  0x7b   :  { %v4374_v14 = vpop.permute.xlu1 %312 }
  0x7c   :  { %v4378_v15 = vpop.permute.xlu2 %421 }
  0x7f   :  { %866 = vrot.lane.b32.xlu0 %v4280_v8, %s4213_s3 }
  0x81   :  { %889 = vrot.lane.b32.xlu1 %v4265_v4, %s4213_s3  ;;  %v4384_v16 = vpop.permute.xlu0 %284 }
  0x82   :  { %891 = vrot.lane.b32.xlu2 %v4284_v9, %s4213_s3  ;;  %v287_v58 = vsel %vm9004_vm0, %v4370_v13, %v4384_v16  ;;  %v288_v59 = vsel %vm9004_vm0, %v4384_v16, %v4370_v13  ;;  %v4612_v16 = vstv %s4460_s21  ;;  %s4766_s21 = sld [smem:[#allocation2 + $0x35]] }
  0x83   :  { %v4386_v17 = vpop.permute.xlu1 %314  ;;  %v291_v13 = vsel %vm4470_vm5, %v287_v58, 0.0  ;;  %9570 = vst [vmem:[#allocation23_spill] sm:$0xff] %v4612_v16 }
  0x84   :  { %v4390_v18 = vpop.permute.xlu2 %470  ;;  %v316_v50 = vsel %vm9004_vm0, %v4374_v14, %v4386_v17  ;;  %v317_v51 = vsel %vm9004_vm0, %v4386_v17, %v4374_v14  ;;  %v292_v14 = vsel %vm4483_vm6, %v288_v59, 0.0  ;;  %v4615_v17 = vstv %s4477_s22  ;;  %s4771_s22 = sld [smem:[#allocation2 + $0x80]] }
  0x85   :  { %v320_v63 = vsel %vm4470_vm5, %v316_v50, 0.0  ;;  %v321_v1 = vsel %vm4483_vm6, %v317_v51, 0.0  ;;  %9571 = vst [vmem:[#allocation24_spill] sm:$0xff] %v4615_v17  ;;  %v4634_v50 = vstv %s4521_s5  ;;  %v4637_v51 = vstv %s4533_s6  ;;  %s4804_s5 = sld [smem:[#allocation2 + $0x4]] }
  0x86   :  { %v323_v19 = vmul.f32 %v4519_v45, %v320_v63  ;;  %v324_v22 = vmul.f32 %v4519_v45, %v321_v1  ;;  %v328_v42 = vmul.f32 %v4528_v48, %v320_v63  ;;  %v329_v47 = vmul.f32 %v4528_v48, %v321_v1  ;;  %9575 = vst [vmem:[#allocation28_spill] sm:$0xff] %v4634_v50  ;;  %s4823_s6 = sld [smem:[#allocation2 + $0x4f]] }
  0x87   :  { %916 = vrot.lane.b32.xlu0 %v4251_v0, %s4214_s4  ;;  %9576 = vst [vmem:[#allocation29_spill] sm:$0xff] %v4637_v51  ;;  %v294_v58 = vmul.f32 %v4506_v41, %v291_v13  ;;  %v295_v59 = vmul.f32 %v4506_v41, %v292_v14  ;;  %v333_v40 = vmul.f32 %v4531_v49, %v320_v63  ;;  %v9578_v63 = vmov 0 }
  0x88   :  { %v299_v38 = vmul.f32 %v4513_v43, %v291_v13  ;;  %v300_v48 = vmul.f32 %v4513_v43, %v292_v14  ;;  %v304_v45 = vmul.f32 %v4516_v44, %v291_v13  ;;  %v334_v35 = vmul.f32 %v4531_v49, %v321_v1 }
  0x89   :  { %918 = vrot.lane.b32.xlu1 %v4275_v6, %s4214_s4  ;;  %v4396_v20 = vpop.permute.xlu0 %368  ;;  %v9579_v63 = vsel %vm4655_vm10, 4294967295, %v9578_v63  ;;  %v325_v41 = vadd.f32 %v323_v19, %v294_v58  ;;  %v326_v33 = vadd.f32 %v324_v22, %v295_v59  ;;  %v9581_v43 = vmov 0 }
  0x8a   :  { %942 = vrot.lane.b32.xlu2 %v4258_v2, %s4214_s4  ;;  %9580 = vst [vmem:[#allocation31_spill] sm:$0xff] %v9579_v63  ;;  %v9582_v43 = vsel %vm4663_vm11, 4294967295, %v9581_v43  ;;  %v305_v22 = vmul.f32 %v4516_v44, %v292_v14  ;;  %v330_v58 = vadd.f32 %v328_v42, %v299_v38  ;;  %v331_v59 = vadd.f32 %v329_v47, %v300_v48 }
  0x8b   :  { %v4402_v21 = vpop.permute.xlu1 %370  ;;  %9583 = vst [vmem:[#allocation32_spill] sm:$0xff] %v9582_v43  ;;  %v4679_v49 = vstv %s4575_s8  ;;  %v354_v42 = vadd.f32 %v4548_v52, %v325_v41  ;;  %v4709_v47 = vstv %s4627_s12  ;;  %s4858_s8 = sld [smem:[#allocation2 + $0x1d]]  ;;  %vm9060_vm0 = vcmp.lt.s32.totalorder %v4430_v27, 14 }
  0x8c   :  { %v4410_v23 = vpop.permute.xlu2 %497  ;;  %v373_v1 = vsel %vm9003_vm7, %v4396_v20, %v4402_v21  ;;  %v374_v13 = vsel %vm9003_vm7, %v4402_v21, %v4396_v20  ;;  %9584 = vst [vmem:[#allocation33_spill] sm:$0xff] %v4679_v49  ;;  %v336_v38 = vadd.f32 %v334_v35, %v305_v22  ;;  %v360_v22 = vadd.f32 %v4578_v61, %v331_v59  ;;  %s4890_s12 = sld [smem:[#allocation2 + $0x81]] }
  0x8d   :  { %v377_v48 = vsel %vm4655_vm10, %v373_v1, 0.0  ;;  %9588 = vst [vmem:[#allocation37_spill] sm:$0xff] %v4709_v47  ;;  %v359_v1 = vadd.f32 %v4563_v57, %v330_v58 }
  0x8e   :  { %v380_v52 = vmul.f32 %v4551_v53, %v377_v48  ;;  %v385_v44 = vmul.f32 %v4554_v54, %v377_v48  ;;  %v365_v57 = vadd.f32 %v4590_v3, %v336_v38  ;;  %v390_v58 = vmul.f32 %v4557_v55, %v377_v48 }
  0x8f   :  { %944 = vrot.lane.b32.xlu0 %v4280_v8, %s4214_s4 }
  0x91   :  { %967 = vrot.lane.b32.xlu1 %v4265_v4, %s4214_s4  ;;  %v4424_v25 = vpop.permute.xlu0 %396 }
  0x92   :  { %969 = vrot.lane.b32.xlu2 %v4284_v9, %s4214_s4  ;;  %v398_v20 = vsel %vm9003_vm7, %v4366_v12, %v4424_v25  ;;  %v399_v21 = vsel %vm9003_vm7, %v4424_v25, %v4366_v12  ;;  %v355_v12 = vadd.f32 %v4560_v56, %v326_v33  ;;  %v4706_v25 = vstv %s4617_s11  ;;  %s4886_s11 = sld [smem:[#allocation2 + $0x36]] }
  0x93   :  { %v4434_v28 = vpop.permute.xlu1 %419  ;;  %9587 = vst [vmem:[#allocation36_spill] sm:$0xff] %v4706_v25  ;;  %v403_v41 = vsel %vm4663_vm11, %v399_v21, 0.0 }
  0x94   :  { %v4446_v31 = vpop.permute.xlu2 %548  ;;  %v424_v3 = vsel %vm9003_vm7, %v4378_v15, %v4434_v28  ;;  %v411_v48 = vmul.f32 %v4596_v7, %v403_v41 }
  0x97   :  { %994 = vrot.lane.b32.xlu0 %v4251_v0, %s4215_s19 }
  0x99   :  { %996 = vrot.lane.b32.xlu1 %v4275_v6, %s4215_s19  ;;  %v4464_v32 = vpop.permute.xlu0 %444 }
  0x9a   :  { %1020 = vrot.lane.b32.xlu2 %v4258_v2, %s4215_s19 }
  0x9b   :  { %v4492_v37 = vpop.permute.xlu1 %446 }
  0x9c   :  { %v4523_v46 = vpop.permute.xlu2 %575 }
  0x9d   :  { %9561 = vst [vmem:[#allocation14_spill] sm:$0xff] %v4523_v46  ;;  %v4690_v46 = vstv %s4587_s9  ;;  %s4864_s9 = sld [smem:[#allocation2 + $0x68]] }
  0x9e   :  { %9585 = vst [vmem:[#allocation34_spill] sm:$0xff] %v4690_v46 }
  0x9f   :  { %1022 = vrot.lane.b32.xlu0 %v4280_v8, %s4215_s19 }
  0xa1   :  { %1045 = vrot.lane.b32.xlu1 %v4265_v4, %s4215_s19  ;;  %v4573_v60 = vpop.permute.xlu0 %472 }
  0xa2   :  { %1047 = vrot.lane.b32.xlu2 %v4284_v9, %s4215_s19 }
  0xa3   :  { %v4601_v11 = vpop.permute.xlu1 %495 }
  0xa4   :  { %v4629_v36 = vpop.permute.xlu2 %626 }
  0xa5   :  { %9574 = vst [vmem:[#allocation27_spill] sm:$0xff] %v4629_v36  ;;  %v335_v36 = vadd.f32 %v333_v40, %v304_v45  ;;  %v378_v40 = vsel %vm4663_vm11, %v374_v13, 0.0  ;;  %v4701_v45 = vstv %s4603_s10  ;;  %v402_v13 = vsel %vm4655_vm10, %v398_v20, 0.0  ;;  %s4874_s10 = sld [smem:[#allocation2 + $0xb3]] }
  0xa6   :  { %9586 = vst [vmem:[#allocation35_spill] sm:$0xff] %v4701_v45  ;;  %v381_v56 = vmul.f32 %v4551_v53, %v378_v40  ;;  %v386_v61 = vmul.f32 %v4554_v54, %v378_v40  ;;  %v405_v59 = vmul.f32 %v4593_v5, %v402_v13  ;;  %v406_v20 = vmul.f32 %v4593_v5, %v403_v41 }
  0xa7   :  { %1076 = vrot.lane.b32.xlu0 %v4251_v0, %s4216_s13  ;;  %v364_v33 = vadd.f32 %v4581_v62, %v335_v36  ;;  %v423_v62 = vsel %vm9003_vm7, %v4434_v28, %v4378_v15  ;;  %v391_v36 = vmul.f32 %v4557_v55, %v378_v40  ;;  %v410_v38 = vmul.f32 %v4596_v7, %v402_v13  ;;  %vm4914_vm7 = vmand %vm9038_vm3, %vm9005_vm15 }
  0xa8   :  { %v415_v40 = vmul.f32 %v4599_v10, %v402_v13  ;;  %v4753_v55 = vstv %s4681_s14  ;;  %v382_v5 = vadd.f32 %v380_v52, %v354_v42  ;;  %v383_v54 = vadd.f32 %v381_v56, %v355_v12  ;;  %s4921_s14 = sld [smem:[#allocation2 + $0xcc]] }
  0xa9   :  { %1078 = vrot.lane.b32.xlu1 %v4275_v6, %s4216_s13  ;;  %v4675_v19 = vpop.permute.xlu0 %522  ;;  %9590 = vst [vmem:[#allocation39_spill] sm:$0xff] %v4753_v55  ;;  %v387_v53 = vadd.f32 %v385_v44, %v359_v1  ;;  %v427_v15 = vsel %vm4655_vm10, %v423_v62, 0.0  ;;  %v392_v7 = vadd.f32 %v390_v58, %v364_v33  ;;  %v416_v13 = vmul.f32 %v4599_v10, %v403_v41 }
  0xaa   :  { %1102 = vrot.lane.b32.xlu2 %v4258_v2, %s4216_s13  ;;  %v428_v55 = vsel %vm4663_vm11, %v424_v3, 0.0  ;;  %v393_v44 = vadd.f32 %v391_v36, %v365_v57  ;;  %v407_v42 = vadd.f32 %v405_v59, %v382_v5  ;;  %v408_v12 = vadd.f32 %v406_v20, %v383_v54 }
  0xab   :  { %v4692_v14 = vpop.permute.xlu1 %524  ;;  %v4769_v1 = vstv %s4711_s15  ;;  %v412_v56 = vadd.f32 %v410_v38, %v387_v53  ;;  %v417_v41 = vadd.f32 %v415_v40, %v392_v7  ;;  %v430_v33 = vmul.f32 %v4612_v16, %v427_v15  ;;  %s4218_s15 = smov 127  }
  0xac   :  { %v4713_v35 = vpop.permute.xlu2 %653  ;;  %9591 = vst [vmem:[#allocation40_spill] sm:$0xff] %v4769_v1  ;;  %v431_v57 = vmul.f32 %v4612_v16, %v428_v55  ;;  %v435_v54 = vmul.f32 %v4615_v17, %v427_v15  ;;  %v449_v5 = vsel %vm9002_vm12, %v4464_v32, %v4492_v37  ;;  %v450_v53 = vsel %vm9002_vm12, %v4492_v37, %v4464_v32 }
  0xad   :  { %9589 = vst [vmem:[#allocation38_spill] sm:$0xff] %v4713_v35  ;;  %v388_v35 = vadd.f32 %v386_v61, %v360_v22  ;;  %v418_v7 = vadd.f32 %v416_v13, %v393_v44  ;;  %v440_v61 = vmul.f32 %v4622_v24, %v427_v15  ;;  %v441_v58 = vmul.f32 %v4622_v24, %v428_v55 }
  0xae   :  { %v4792_v62 = vstv %s4725_s16  ;;  %v4795_v36 = vstv %s4735_s0  ;;  %v4798_v59 = vstv %s4747_s18  ;;  %v453_v37 = vsel %vm9039_vm1, %v449_v5, 0.0  ;;  %s4933_s16 = sld [smem:[#allocation2 + $0x5]] }
  0xaf   :  { %1104 = vrot.lane.b32.xlu0 %v4280_v8, %s4216_s13  ;;  %v413_v22 = vadd.f32 %v411_v48, %v388_v35  ;;  %v436_v35 = vmul.f32 %v4615_v17, %v428_v55  ;;  %9592 = vst [vmem:[#allocation41_spill] sm:$0xff] %v4792_v62  ;;  %v454_v55 = vsel %vm9038_vm3, %v450_v53, 0.0  ;;  %v474_v20 = vsel %vm9002_vm12, %v4390_v18, %v4573_v60  ;;  %s4966_s0 = sld [smem:[#allocation2 + $0x50]] }
  0xb0   :  { %9593 = vst [vmem:[#allocation42_spill] sm:$0xff] %v4795_v36  ;;  %v475_v3 = vsel %vm9002_vm12, %v4573_v60, %v4390_v18  ;;  %v432_v38 = vadd.f32 %v430_v33, %v407_v42  ;;  %v433_v48 = vadd.f32 %v431_v57, %v408_v12  ;;  %v437_v40 = vadd.f32 %v435_v54, %v412_v56  ;;  %s4976_s18 = sld [smem:[#allocation2 + $0x9b]] }
  0xb1   :  { %1127 = vrot.lane.b32.xlu1 %v4265_v4, %s4216_s13  ;;  %v4745_v21 = vpop.permute.xlu0 %550  ;;  %9594 = vst [vmem:[#allocation43_spill] sm:$0xff] %v4798_v59  ;;  %v4819_v15 = vstv %s4757_s20  ;;  %v438_v18 = vadd.f32 %v436_v35, %v413_v22  ;;  %v442_v60 = vadd.f32 %v440_v61, %v417_v41  ;;  %v443_v44 = vadd.f32 %v441_v58, %v418_v7  ;;  %s4984_s20 = sld [smem:[#allocation2 + $0x1e]] }
  0xb2   :  { %1129 = vrot.lane.b32.xlu2 %v4284_v9, %s4216_s13  ;;  %9595 = vst [vmem:[#allocation44_spill] sm:$0xff] %v4819_v15  ;;  %v4828_v5 = vstv %s4766_s21  ;;  %v456_v42 = vmul.f32 %v4625_v34, %v453_v37  ;;  %v457_v12 = vmul.f32 %v4625_v34, %v454_v55  ;;  %v478_v56 = vsel %vm9039_vm1, %v474_v20, 0.0  ;;  %s4994_s21 = sld [smem:[#allocation2 + $0x69]] }
  0xb3   :  { %v4759_v28 = vpop.permute.xlu1 %573  ;;  %9596 = vst [vmem:[#allocation45_spill] sm:$0xff] %v4828_v5  ;;  %v479_v33 = vsel %vm9038_vm3, %v475_v3, 0.0  ;;  %v461_v54 = vmul.f32 %v4634_v50, %v453_v37  ;;  %v462_v22 = vmul.f32 %v4634_v50, %v454_v55  ;;  %v4841_v41 = vstv %s4771_s22  ;;  %s5005_s22 = sld [smem:[#allocation2 + $0xb4]] }
  0xb4   :  { %v4773_v52 = vpop.permute.xlu2 %710  ;;  %9597 = vst [vmem:[#allocation46_spill] sm:$0xff] %v4841_v41  ;;  %v4844_v53 = vstv %s4776_s23  ;;  %v466_v7 = vmul.f32 %v4637_v51, %v453_v37  ;;  %v467_v35 = vmul.f32 %v4637_v51, %v454_v55  ;;  %v499_v61 = vsel %vm9002_vm12, %v4601_v11, %v4410_v23  ;;  %s5016_s23 = sld [smem:[#allocation2 + $0x37]] }
  0xb5   :  { %9598 = vst [vmem:[#allocation47_spill] sm:$0xff] %v4844_v53  ;;  %v500_v58 = vsel %vm9002_vm12, %v4410_v23, %v4601_v11  ;;  %v481_v20 = vmul.f32 %v4643_v39, %v478_v56  ;;  %v482_v3 = vmul.f32 %v4643_v39, %v479_v33  ;;  %v486_v37 = vmul.f32 %v4679_v49, %v478_v56  ;;  %vm4898_vm12 = vmand %vm9039_vm1, %vm9006_vm14 }
  0xb6   :  { %v487_v55 = vmul.f32 %v4679_v49, %v479_v33  ;;  %v458_v51 = vadd.f32 %v456_v42, %v432_v38  ;;  %v459_v50 = vadd.f32 %v457_v12, %v433_v48  ;;  %v491_v23 = vmul.f32 %v4690_v46, %v478_v56 }
  0xb7   :  { %1152 = vrot.lane.b32.xlu0 %v4251_v0, %s4217_s24  ;;  %v4868_v11 = vstv %s4804_s5  ;;  %v463_v39 = vadd.f32 %v461_v54, %v437_v40  ;;  %v464_v24 = vadd.f32 %v462_v22, %v438_v18  ;;  %v503_v49 = vsel %vm9039_vm1, %v499_v61, 0.0  ;;  %s5026_s5 = sld [smem:[#allocation2 + $0x82]] }
  0xb8   :  { %9599 = vst [vmem:[#allocation48_spill] sm:$0xff] %v4868_v11  ;;  %v504_v38 = vsel %vm9038_vm3, %v500_v58, 0.0  ;;  %v468_v48 = vadd.f32 %v466_v7, %v442_v60  ;;  %v469_v42 = vadd.f32 %v467_v35, %v443_v44  ;;  %v492_v12 = vmul.f32 %v4690_v46, %v479_v33 }
  0xb9   :  { %1154 = vrot.lane.b32.xlu1 %v4275_v6, %s4217_s24  ;;  %v4802_v32 = vpop.permute.xlu0 %600  ;;  %v4882_v56 = vstv %s4823_s6  ;;  %v483_v40 = vadd.f32 %v481_v20, %v458_v51  ;;  %v484_v18 = vadd.f32 %v482_v3, %v459_v50  ;;  %v488_v54 = vadd.f32 %v486_v37, %v463_v39  ;;  %s5051_s6 = sld [smem:[#allocation2 + $0xcd]] }
  0xba   :  { %1178 = vrot.lane.b32.xlu2 %v4258_v2, %s4217_s24  ;;  %9600 = vst [vmem:[#allocation49_spill] sm:$0xff] %v4882_v56  ;;  %v489_v22 = vadd.f32 %v487_v55, %v464_v24  ;;  %v493_v61 = vadd.f32 %v491_v23, %v468_v48  ;;  %v506_v60 = vmul.f32 %v4701_v45, %v503_v49  ;;  %v9601_v33 = vmov 0 }
  0xbb   :  { %v4821_v13 = vpop.permute.xlu1 %602  ;;  %v507_v44 = vmul.f32 %v4701_v45, %v504_v38  ;;  %v9602_v33 = vsel %vm4898_vm12, 4294967295, %v9601_v33  ;;  %v527_v39 = vsel %vm9032_vm13, %v4675_v19, %v4692_v14  ;;  %v511_v50 = vmul.f32 %v4706_v25, %v503_v49 }
  0xbc   :  { %v4836_v57 = vpop.permute.xlu2 %737  ;;  %9603 = vst [vmem:[#allocation50_spill] sm:$0xff] %v9602_v33  ;;  %v512_v51 = vmul.f32 %v4706_v25, %v504_v38  ;;  %v516_v7 = vmul.f32 %v4709_v47, %v503_v49  ;;  %v9604_v35 = vmov 0  ;;  %v528_v58 = vsel %vm9032_vm13, %v4692_v14, %v4675_v19 }
  0xbd   :  { %v9605_v35 = vsel %vm4914_vm7, 4294967295, %v9604_v35  ;;  %v494_v20 = vadd.f32 %v492_v12, %v469_v42  ;;  %v517_v3 = vmul.f32 %v4709_v47, %v504_v38  ;;  %v552_v49 = vsel %vm9032_vm13, %v4446_v31, %v4745_v21 }
  0xbe   :  { %9606 = vst [vmem:[#allocation51_spill] sm:$0xff] %v9605_v35  ;;  %v4929_v37 = vstv %s4846_s7  ;;  %v531_v19 = vsel %vm4898_vm12, %v527_v39, 0.0  ;;  %v553_v14 = vsel %vm9032_vm13, %v4745_v21, %v4446_v31  ;;  %vm9059_vm15 = vcmask 244736   ;;  %s4219_s7 = smov 126  }
  0xbf   :  { %1180 = vrot.lane.b32.xlu0 %v4280_v8, %s4217_s24  ;;  %9607 = vst [vmem:[#allocation52_spill] sm:$0xff] %v4929_v37  ;;  %vm9040_vm14 = vcmp.lt.s32.totalorder %v4440_v30, 14  ;;  %v4942_v55 = vstv %s4858_s8  ;;  %v4945_v23 = vstv %s4864_s9  ;;  %v508_v38 = vadd.f32 %v506_v60, %v483_v40  ;;  %v9611_v40 = vld [vmem:[#allocation39_spill] sm:$0xff]  ;;  %s5083_s8 = sld [smem:[#allocation2 + $0x6]] }
  0xc0   :  { %9608 = vst [vmem:[#allocation53_spill] sm:$0xff] %v4942_v55  ;;  %v509_v48 = vadd.f32 %v507_v44, %v484_v18  ;;  %v532_v42 = vsel %vm4914_vm7, %v528_v58, 0.0  ;;  %v4950_v12 = vstv %s4874_s10  ;;  %v513_v21 = vadd.f32 %v511_v50, %v488_v54  ;;  %vm5033_vm9 = vmand %vm9038_vm3, %vm9040_vm14  ;;  %s5086_s9 = sld [smem:[#allocation2 + $0x51]] }
  0xc1   :  { %1203 = vrot.lane.b32.xlu1 %v4265_v4, %s4217_s24  ;;  %v4872_v34 = vpop.permute.xlu0 %628  ;;  %9609 = vst [vmem:[#allocation54_spill] sm:$0xff] %v4945_v23  ;;  %v514_v39 = vadd.f32 %v512_v51, %v489_v22  ;;  %v518_v47 = vadd.f32 %v516_v7, %v493_v61  ;;  %v556_v25 = vsel %vm4898_vm12, %v552_v49, 0.0  ;;  %v519_v45 = vadd.f32 %v517_v3, %v494_v20  ;;  %v9614_v3 = vld [vmem:[#allocation14_spill] sm:$0xff]  ;;  %s5106_s10 = sld [smem:[#allocation2 + $0x9c]] }
  0xc2   :  { %1205 = vrot.lane.b32.xlu2 %v4284_v9, %s4217_s24  ;;  %9610 = vst [vmem:[#allocation55_spill] sm:$0xff] %v4950_v12  ;;  %v534_v18 = vmul.f32 %v9611_v40, %v531_v19  ;;  %v557_v60 = vsel %vm4914_vm7, %v553_v14, 0.0  ;;  %v4962_v44 = vstv %s4886_s11  ;;  %v535_v54 = vmul.f32 %v9611_v40, %v532_v42  ;;  %s5118_s11 = sld [smem:[#allocation2 + $0x1f]] }
  0xc3   :  { %v4884_v17 = vpop.permute.xlu1 %651  ;;  %9612 = vst [vmem:[#allocation56_spill] sm:$0xff] %v4962_v44  ;;  %v539_v22 = vmul.f32 %v4769_v1, %v531_v19  ;;  %v540_v61 = vmul.f32 %v4769_v1, %v532_v42  ;;  %v4974_v50 = vstv %s4890_s12  ;;  %v544_v51 = vmul.f32 %v4792_v62, %v531_v19  ;;  %s5128_s12 = sld [smem:[#allocation2 + $0x6a]] }
  0xc4   :  { %v4905_v24 = vpop.permute.xlu2 %788  ;;  %9613 = vst [vmem:[#allocation57_spill] sm:$0xff] %v4974_v50  ;;  %v545_v7 = vmul.f32 %v4792_v62, %v532_v42  ;;  %v559_v20 = vmul.f32 %v4795_v36, %v556_v25  ;;  %v577_v49 = vsel %vm9032_vm13, %v4759_v28, %v9614_v3  ;;  %v560_v1 = vmul.f32 %v4795_v36, %v557_v60 }
  0xc5   :  { %v564_v40 = vmul.f32 %v4798_v59, %v556_v25  ;;  %v565_v46 = vmul.f32 %v4798_v59, %v557_v60  ;;  %v578_v19 = vsel %vm9032_vm13, %v9614_v3, %v4759_v28  ;;  %v536_v42 = vadd.f32 %v534_v18, %v508_v38  ;;  %vm5022_vm13 = vmand %vm9039_vm1, %vm9060_vm0 }
  0xc6   :  { %v569_v62 = vmul.f32 %v4819_v15, %v556_v25  ;;  %v4998_v16 = vstv %s4921_s14  ;;  %v5001_v10 = vstv %s4933_s16  ;;  %v537_v36 = vadd.f32 %v535_v54, %v509_v48  ;;  %s5132_s14 = sld [smem:[#allocation2 + $0xb5]] }
  0xc7   :  { %1309 = vrot.lane.b32.xlu0 %v4275_v6, %s4218_s15  ;;  %9615 = vst [vmem:[#allocation14_spill] sm:$0xff] %v4998_v16  ;;  %v541_v59 = vadd.f32 %v539_v22, %v513_v21  ;;  %v542_v43 = vadd.f32 %v540_v61, %v514_v39  ;;  %v581_v28 = vsel %vm4898_vm12, %v577_v49, 0.0  ;;  %v546_v3 = vadd.f32 %v544_v51, %v518_v47  ;;  %s5147_s16 = sld [smem:[#allocation2 + $0x38]] }
  0xc8   :  { %9616 = vst [vmem:[#allocation58_spill] sm:$0xff] %v5001_v10  ;;  %v547_v63 = vadd.f32 %v545_v7, %v519_v45  ;;  %v570_v38 = vmul.f32 %v4819_v15, %v557_v60  ;;  %v582_v25 = vsel %vm4914_vm7, %v578_v19, 0.0  ;;  %v561_v48 = vadd.f32 %v559_v20, %v536_v42  ;;  %v9625_v19 = vld [vmem:[#allocation27_spill] sm:$0xff] }
  0xc9   :  { %1311 = vrot.lane.b32.xlu1 %v4251_v0, %s4218_s15  ;;  %v4954_v31 = vpop.permute.xlu0 %684  ;;  %v562_v21 = vadd.f32 %v560_v1, %v537_v36  ;;  %v566_v39 = vadd.f32 %v564_v40, %v541_v59  ;;  %v567_v54 = vadd.f32 %v565_v46, %v542_v43  ;;  %v9617_v45 = vmov 0 }
  0xca   :  { %1335 = vrot.lane.b32.xlu2 %v4280_v8, %s4218_s15  ;;  %v9618_v45 = vsel %vm5022_vm13, 4294967295, %v9617_v45  ;;  %v571_v47 = vadd.f32 %v569_v62, %v546_v3  ;;  %v584_v60 = vmul.f32 %v4828_v5, %v581_v28  ;;  %v9620_v43 = vmov 0 }
  0xcb   :  { %v4964_v58 = vpop.permute.xlu1 %686  ;;  %9619 = vst [vmem:[#allocation59_spill] sm:$0xff] %v9618_v45  ;;  %v9621_v43 = vsel %vm5033_vm9, 4294967295, %v9620_v43  ;;  %v605_v46 = vsel %vm9059_vm15, %v4802_v32, %v4821_v13  ;;  %v606_v1 = vsel %vm9059_vm15, %v4821_v13, %v4802_v32  ;;  %v585_v62 = vmul.f32 %v4828_v5, %v582_v25 }
  0xcc   :  { %v4986_v14 = vpop.permute.xlu2 %815  ;;  %9622 = vst [vmem:[#allocation60_spill] sm:$0xff] %v9621_v43  ;;  %v589_v59 = vmul.f32 %v4841_v41, %v581_v28  ;;  %v590_v40 = vmul.f32 %v4841_v41, %v582_v25  ;;  %v594_v22 = vmul.f32 %v4844_v53, %v581_v28  ;;  %v572_v61 = vadd.f32 %v570_v38, %v547_v63 }
  0xcd   :  { %v595_v32 = vmul.f32 %v4844_v53, %v582_v25  ;;  %v5055_v13 = vstv %s4966_s0  ;;  %v5058_v51 = vstv %s4976_s18  ;;  %v609_v20 = vsel %vm5022_vm13, %v605_v46, 0.0  ;;  %s5152_s0 = sld [smem:[#allocation2 + $0x83]] }
  0xce   :  { %9623 = vst [vmem:[#allocation61_spill] sm:$0xff] %v5055_v13  ;;  %v610_v49 = vsel %vm5033_vm9, %v606_v1, 0.0  ;;  %v630_v42 = vsel %vm9059_vm15, %v9625_v19, %v4872_v34  ;;  %v631_v63 = vsel %vm9059_vm15, %v4872_v34, %v9625_v19  ;;  %v586_v28 = vadd.f32 %v584_v60, %v561_v48  ;;  %s5162_s18 = sld [smem:[#allocation2 + $0xce]] }
  0xcf   :  { %1337 = vrot.lane.b32.xlu0 %v4258_v2, %s4218_s15  ;;  %9624 = vst [vmem:[#allocation62_spill] sm:$0xff] %v5058_v51  ;;  %v5073_v3 = vstv %s4984_s20  ;;  %v5076_v38 = vstv %s4994_s21  ;;  %v5079_v25 = vstv %s5005_s22  ;;  %v587_v46 = vadd.f32 %v585_v62, %v562_v21  ;;  %s5204_s20 = sld [smem:[#allocation2 + $0x7]] }
  0xd0   :  { %9626 = vst [vmem:[#allocation27_spill] sm:$0xff] %v5073_v3  ;;  %v591_v1 = vadd.f32 %v589_v59, %v566_v39  ;;  %v592_v53 = vadd.f32 %v590_v40, %v567_v54  ;;  %v596_v41 = vadd.f32 %v594_v22, %v571_v47  ;;  %vm9129_vm3 = vcmp.ge.s32.totalorder %v4428_v26, 1  ;;  %v9631_v22 = vld [vmem:[#allocation38_spill] sm:$0xff]  ;;  %s5226_s21 = sld [smem:[#allocation2 + $0x52]] }
  0xd1   :  { %1360 = vrot.lane.b32.xlu1 %v4284_v9, %s4218_s15  ;;  %v5014_v18 = vpop.permute.xlu0 %712  ;;  %9627 = vst [vmem:[#allocation63_spill] sm:$0xff] %v5076_v38  ;;  %v612_v34 = vmul.f32 %v4868_v11, %v609_v20  ;;  %v613_v48 = vmul.f32 %v4868_v11, %v610_v49  ;;  %v634_v60 = vsel %vm5022_vm13, %v630_v42, 0.0  ;;  %vm9086_vm1 = vcmask 146432   ;;  %s5398_s22 = sld [smem:[#allocation2 + $0x21]] }
  0xd2   :  { %1362 = vrot.lane.b32.xlu2 %v4265_v4, %s4218_s15  ;;  %9628 = vst [vmem:[#allocation64_spill] sm:$0xff] %v5079_v25  ;;  %vm9154_vm14 = vcmp.ge.s32.totalorder %v4438_v29, 1  ;;  %v597_v39 = vadd.f32 %v595_v32, %v572_v61  ;;  %v617_v54 = vmul.f32 %v4882_v56, %v609_v20  ;;  %v5101_v47 = vstv %s5016_s23  ;;  %s4221_s23 = smov 113  }
  0xd3   :  { %v5043_v36 = vpop.permute.xlu1 %735  ;;  %9629 = vst [vmem:[#allocation65_spill] sm:$0xff] %v5101_v47  ;;  %v5104_v62 = vstv %s5026_s5  ;;  %v618_v59 = vmul.f32 %v4882_v56, %v610_v49  ;;  %v622_v40 = vmul.f32 %v4929_v37, %v609_v20  ;;  %v656_v61 = vsel %vm9059_vm15, %v9631_v22, %v4884_v17  ;;  %s4220_s5 = smov 114  }
  0xd4   :  { %v5060_v7 = vpop.permute.xlu2 %864  ;;  %9630 = vst [vmem:[#allocation66_spill] sm:$0xff] %v5104_v62  ;;  %v623_v19 = vmul.f32 %v4929_v37, %v610_v49  ;;  %v637_v42 = vmul.f32 %v4942_v55, %v634_v60  ;;  %v614_v56 = vadd.f32 %v612_v34, %v586_v28  ;;  %v647_v49 = vmul.f32 %v4950_v12, %v634_v60 }
  0xd5   :  { %v660_v28 = vsel %vm5033_vm9, %v656_v61, 0.0  ;;  %v620_v34 = vadd.f32 %v618_v59, %v592_v53  ;;  %v5143_v15 = vstv %s5083_s8  ;;  %v9635_v61 = vmov 0  ;;  %s5257_s8 = sld [smem:[#allocation2 + $0x20]] }
  0xd6   :  { %9633 = vst [vmem:[#allocation67_spill] sm:$0xff] %v5143_v15  ;;  %v668_v59 = vmul.f32 %v4974_v50, %v660_v28  ;;  %vm9110_vm0 = vcmask 138240   ;;  %v5296_v33 = vstv %s5204_s20  ;;  %s5369_s20 = sld [smem:[#allocation2 + $0x53]] }
  0xd7   :  { %1385 = vrot.lane.b32.xlu0 %v4275_v6, %s4219_s7  ;;  %v635_v6 = vsel %vm5033_vm9, %v631_v63, 0.0  ;;  %v5126_v63 = vstv %s5051_s6  ;;  %s5243_s6 = sld [smem:[#allocation2 + $0x9d]]  ;;  %9654 = vst [vmem:[#allocation84_spill] sm:$0xff] %v5296_v33 }
  0xd8   :  { %v638_v20 = vmul.f32 %v4942_v55, %v635_v6  ;;  %9632 = vst [vmem:[#allocation38_spill] sm:$0xff] %v5126_v63  ;;  %v643_v11 = vmul.f32 %v4945_v23, %v635_v6  ;;  %v648_v55 = vmul.f32 %v4950_v12, %v635_v6  ;;  %v5150_v6 = vstv %s5086_s9  ;;  %s5432_s9 = sld [smem:[#allocation2 + $0x3a]] }
  0xd9   :  { %1387 = vrot.lane.b32.xlu1 %v4251_v0, %s4219_s7  ;;  %v5097_v21 = vpop.permute.xlu0 %762  ;;  %v655_v0 = vsel %vm9059_vm15, %v4884_v17, %v9631_v22  ;;  %v615_v17 = vadd.f32 %v613_v48, %v587_v46  ;;  %v642_v22 = vmul.f32 %v4945_v23, %v634_v60  ;;  %v619_v46 = vadd.f32 %v617_v54, %v591_v1  ;;  %vm5170_vm15 = vmand %vm9129_vm3, %vm9061_vm2 }
  0xda   :  { %1411 = vrot.lane.b32.xlu2 %v4280_v8, %s4219_s7  ;;  %v659_v37 = vsel %vm5022_vm13, %v655_v0, 0.0  ;;  %v624_v48 = vadd.f32 %v622_v40, %v596_v41  ;;  %v625_v23 = vadd.f32 %v623_v19, %v597_v39  ;;  %v639_v60 = vadd.f32 %v637_v42, %v614_v56  ;;  %9634 = vst [vmem:[#allocation68_spill] sm:$0xff] %v5150_v6  ;;  %vm5188_vm2 = vmand %vm9154_vm14, %vm9087_vm4 }
  0xdb   :  { %v5116_v32 = vpop.permute.xlu1 %764  ;;  %v640_v35 = vadd.f32 %v638_v20, %v615_v17  ;;  %v644_v0 = vadd.f32 %v642_v22, %v619_v46  ;;  %v645_v12 = vadd.f32 %v643_v11, %v620_v34  ;;  %v662_v1 = vmul.f32 %v4962_v44, %v659_v37 }
  0xdc   :  { %v5134_v5 = vpop.permute.xlu2 %891  ;;  %v663_v41 = vmul.f32 %v4962_v44, %v660_v28  ;;  %v649_v54 = vadd.f32 %v647_v49, %v624_v48  ;;  %v650_v39 = vadd.f32 %v648_v55, %v625_v23  ;;  %v667_v56 = vmul.f32 %v4974_v50, %v659_v37 }
  0xdd   :  { %v672_v11 = vmul.f32 %v4998_v16, %v659_v37  ;;  %v673_v40 = vmul.f32 %v4998_v16, %v660_v28  ;;  %v9636_v61 = vsel %vm5170_vm15, 4294967295, %v9635_v61  ;;  %v714_v55 = vsel %vm9086_vm1, %v4773_v52, %v5014_v18 }
  0xde   :  { %9637 = vst [vmem:[#allocation69_spill] sm:$0xff] %v9636_v61  ;;  %v715_v37 = vsel %vm9086_vm1, %v5014_v18, %v4773_v52  ;;  %v9638_v19 = vmov 0  ;;  %v689_v42 = vsel %vm9086_vm1, %v4954_v31, %v4964_v58  ;;  %v690_v52 = vsel %vm9086_vm1, %v4964_v58, %v4954_v31 }
  0xdf   :  { %1413 = vrot.lane.b32.xlu0 %v4258_v2, %s4219_s7  ;;  %v9639_v19 = vsel %vm5188_vm2, 4294967295, %v9638_v19  ;;  %v5199_v18 = vstv %s5106_s10  ;;  %v5202_v20 = vstv %s5118_s11  ;;  %v5206_v17 = vadd.f32 %v662_v1, %v639_v60  ;;  %s5272_s11 = sld [smem:[#allocation2 + $0x6b]] }
  0xe0   :  { %9640 = vst [vmem:[#allocation70_spill] sm:$0xff] %v9639_v19  ;;  %v5208_v22 = vadd.f32 %v663_v41, %v640_v35  ;;  %v5211_v49 = vstv %s5128_s12  ;;  %v5214_v28 = vstv %s5132_s14  ;;  %v5218_v34 = vadd.f32 %v667_v56, %v644_v0  ;;  %s5280_s12 = sld [smem:[#allocation2 + $0xb6]] }
  0xe1   :  { %1436 = vrot.lane.b32.xlu1 %v4284_v9, %s4219_s7  ;;  %v5158_v53 = vpop.permute.xlu0 %790  ;;  %9641 = vst [vmem:[#allocation71_spill] sm:$0xff] %v5199_v18  ;;  %v5220_v31 = vadd.f32 %v668_v59, %v645_v12  ;;  %v718_v58 = vsel %vm5170_vm15, %v714_v55, 0.0  ;;  %v719_v48 = vsel %vm5188_vm2, %v715_v37, 0.0  ;;  %v5228_v35 = vadd.f32 %v672_v11, %v649_v54  ;;  %v5239_v12 = vld [vmem:[%s8950_s1] sm:$0x3]  ;;  %s5298_s14 = sld [smem:[#allocation2 + $0x39]] }
  0xe2   :  { %1438 = vrot.lane.b32.xlu2 %v4265_v4, %s4219_s7  ;;  %9642 = vst [vmem:[#allocation72_spill] sm:$0xff] %v5202_v20  ;;  %v5230_v60 = vadd.f32 %v673_v40, %v650_v39  ;;  %v693_v1 = vsel %vm5170_vm15, %v689_v42, 0.0  ;;  %v694_v0 = vsel %vm5188_vm2, %v690_v52, 0.0  ;;  %v739_v41 = vsel %vm9086_vm1, %v5043_v36, %v4836_v57  ;;  %v5266_v37 = vld [vmem:[%s8950_s1 + $0x8] sm:$0x3]  ;;  %s5438_s10 = sld [smem:[#allocation2 + $0x85]] }
  0xe3   :  { %v5180_v23 = vpop.permute.xlu1 %813  ;;  %9643 = vst [vmem:[#allocation73_spill] sm:$0xff] %v5206_v17  ;;  %v740_v54 = vsel %vm9086_vm1, %v4836_v57, %v5043_v36  ;;  %v5252_v39 = vstv %s5147_s16  ;;  %v5255_v56 = vstv %s5152_s0  ;;  %v721_v59 = vmul.f32 %v5073_v3, %v718_v58  ;;  %s5300_s16 = sld [smem:[#allocation2 + $0x84]]  ;;  %vm5310_vm1 = vmand %vm9129_vm3, %vm9126_vm8 }
  0xe4   :  { %9644 = vst [vmem:[#allocation74_spill] sm:$0xff] %v5208_v22  ;;  %v5216_v46 = vpop.permute.xlu2 %942  ;;  %v722_v11 = vmul.f32 %v5073_v3, %v719_v48  ;;  %v726_v40 = vmul.f32 %v5076_v38, %v718_v58  ;;  %v727_v55 = vmul.f32 %v5076_v38, %v719_v48  ;;  %v696_v36 = vmul.f32 %v5001_v10, %v693_v1  ;;  %s5333_s0 = sld [smem:[#allocation2 + $0xcf]] }
  0xe5   :  { %9645 = vst [vmem:[#allocation75_spill] sm:$0xff] %v5211_v49  ;;  %v697_v42 = vmul.f32 %v5001_v10, %v694_v0  ;;  %v731_v52 = vmul.f32 %v5079_v25, %v718_v58  ;;  %v5278_v38 = vstv %s5162_s18  ;;  %v701_v3 = vmul.f32 %v5055_v13, %v693_v1  ;;  %s5342_s18 = sld [smem:[#allocation2 + $0x8]] }
  0xe6   :  { %9646 = vst [vmem:[#allocation76_spill] sm:$0xff] %v5214_v28  ;;  %v702_v16 = vmul.f32 %v5055_v13, %v694_v0  ;;  %v743_v50 = vsel %vm5170_vm15, %v739_v41, 0.0  ;;  %v744_v44 = vsel %vm5188_vm2, %v740_v54, 0.0  ;;  %v706_v58 = vmul.f32 %v5058_v51, %v693_v1 }
  0xe7   :  { %9647 = vst [vmem:[#allocation77_spill] sm:$0xff] %v5218_v34  ;;  %1469 = vrot.lane.b32.xlu0 %v5239_v12, %s4220_s5  ;;  %v707_v10 = vmul.f32 %v5058_v51, %v694_v0  ;;  %v732_v45 = vmul.f32 %v5079_v25, %v719_v48  ;;  %v723_v13 = vadd.f32 %v721_v59, %v696_v36  ;;  %v9655_v48 = vmov 0 }
  0xe8   :  { %9648 = vst [vmem:[#allocation78_spill] sm:$0xff] %v5220_v31  ;;  %v724_v41 = vadd.f32 %v722_v11, %v697_v42  ;;  %v728_v61 = vadd.f32 %v726_v40, %v701_v3  ;;  %v729_v19 = vadd.f32 %v727_v55, %v702_v16  ;;  %v746_v1 = vmul.f32 %v5101_v47, %v743_v50 }
  0xe9   :  { %9649 = vst [vmem:[#allocation79_spill] sm:$0xff] %v5228_v35  ;;  %1471 = vrot.lane.b32.xlu1 %v5266_v37, %s4220_s5  ;;  %v5270_v57 = vpop.permute.xlu0 %838  ;;  %v747_v0 = vmul.f32 %v5101_v47, %v744_v44  ;;  %v9656_v48 = vsel %vm5310_vm1, 4294967295, %v9655_v48  ;;  %v767_v16 = vsel %vm9110_vm0, %v5097_v21, %v5116_v32  ;;  %v751_v3 = vmul.f32 %v5104_v62, %v743_v50 }
  0xea   :  { %9650 = vst [vmem:[#allocation80_spill] sm:$0xff] %v5230_v60  ;;  %1495 = vrot.lane.b32.xlu2 %v4280_v8, %s4220_s5  ;;  %v733_v60 = vadd.f32 %v731_v52, %v706_v58  ;;  %v752_v59 = vmul.f32 %v5104_v62, %v744_v44  ;;  %v756_v11 = vmul.f32 %v5126_v63, %v743_v50  ;;  %vm9658_vm4 = vcmp.ge.s32.totalorder %v4440_v30, 1 }
  0xeb   :  { %9651 = vst [vmem:[#allocation81_spill] sm:$0xff] %v5252_v39  ;;  %v5288_v43 = vpop.permute.xlu1 %840  ;;  %vm5324_vm2 = vmand %vm9154_vm14, %vm9658_vm4  ;;  %v9659_v40 = vmov 0  ;;  %v768_v55 = vsel %vm9110_vm0, %v5116_v32, %v5097_v21  ;;  %v734_v50 = vadd.f32 %v732_v45, %v707_v10  ;;  %v757_v36 = vmul.f32 %v5126_v63, %v744_v44 }
  0xec   :  { %9652 = vst [vmem:[#allocation82_spill] sm:$0xff] %v5255_v56  ;;  %v5302_v54 = vpop.permute.xlu2 %969  ;;  %v9660_v40 = vsel %vm5324_vm2, 4294967295, %v9659_v40  ;;  %v5337_v42 = vstv %s5226_s21  ;;  %v5340_v52 = vstv %s5243_s6  ;;  %v771_v58 = vsel %vm5310_vm1, %v767_v16, 0.0  ;;  %s5386_s21 = sld [smem:[#allocation2 + $0x9e]] }
  0xed   :  { %9653 = vst [vmem:[#allocation83_spill] sm:$0xff] %v5278_v38  ;;  %v792_v21 = vsel %vm9110_vm0, %v4905_v24, %v5158_v53  ;;  %v793_v32 = vsel %vm9110_vm0, %v5158_v53, %v4905_v24  ;;  %v5357_v44 = vstv %s5257_s8  ;;  %v748_v45 = vadd.f32 %v746_v1, %v723_v13  ;;  %s5408_s6 = sld [smem:[#allocation2 + $0x6c]] }
  0xee   :  { %9657 = vst [vmem:[#allocation85_spill] sm:$0xff] %v9656_v48  ;;  %v772_v63 = vsel %vm5324_vm2, %v768_v55, 0.0  ;;  %vm9125_vm4 = vcmask 130048   ;;  %v5362_v16 = vstv %s5272_s11  ;;  %v5365_v62 = vstv %s5280_s12  ;;  %s5415_s8 = sld [smem:[#allocation2 + $0xb7]] }
  0xef   :  { %9661 = vst [vmem:[#allocation86_spill] sm:$0xff] %v9660_v40  ;;  %1497 = vrot.lane.b32.xlu0 %v4258_v2, %s4220_s5  ;;  %v749_v47 = vadd.f32 %v747_v0, %v724_v41  ;;  %v753_v24 = vadd.f32 %v751_v3, %v728_v61  ;;  %v754_v53 = vadd.f32 %v752_v59, %v729_v19  ;;  %v796_v55 = vsel %vm5310_vm1, %v792_v21, 0.0  ;;  %s5452_s11 = sld [smem:[#allocation2 + $0xd0]] }
  0xf0   :  { %9662 = vst [vmem:[#allocation87_spill] sm:$0xff] %v5337_v42  ;;  %v758_v25 = vadd.f32 %v756_v11, %v733_v60  ;;  %v759_v13 = vadd.f32 %v757_v36, %v734_v50  ;;  %v774_v1 = vmul.f32 %v5143_v15, %v771_v58  ;;  %v797_v41 = vsel %vm5324_vm2, %v793_v32, 0.0  ;;  %s5482_s12 = sld [smem:[#allocation2 + $0x9]] }
  0xf1   :  { %9663 = vst [vmem:[#allocation88_spill] sm:$0xff] %v5340_v52  ;;  %1520 = vrot.lane.b32.xlu1 %v4284_v9, %s4220_s5  ;;  %v5354_v10 = vpop.permute.xlu0 %866  ;;  %v775_v61 = vmul.f32 %v5143_v15, %v772_v63  ;;  %v779_v19 = vmul.f32 %v5150_v6, %v771_v58  ;;  %v5381_v60 = vstv %s5298_s14  ;;  %v5384_v0 = vstv %s5300_s16  ;;  %s5488_s14 = sld [smem:[#allocation2 + $0x54]] }
  0xf2   :  { %9664 = vst [vmem:[#allocation89_spill] sm:$0xff] %v5357_v44  ;;  %1522 = vrot.lane.b32.xlu2 %v4265_v4, %s4220_s5  ;;  %v780_v59 = vmul.f32 %v5150_v6, %v772_v63  ;;  %v784_v11 = vmul.f32 %v5199_v18, %v771_v58  ;;  %v817_v50 = vsel %vm9110_vm0, %v5180_v23, %v4986_v14  ;;  %v5404_v35 = vstv %s5333_s0  ;;  %s5498_s16 = sld [smem:[#allocation2 + $0x9f]] }
  0xf3   :  { %9665 = vst [vmem:[#allocation90_spill] sm:$0xff] %v5362_v16  ;;  %v5367_v51 = vpop.permute.xlu1 %889  ;;  %v818_v36 = vsel %vm9110_vm0, %v4986_v14, %v5180_v23  ;;  %v785_v21 = vmul.f32 %v5199_v18, %v772_v63  ;;  %v799_v32 = vmul.f32 %v5202_v20, %v796_v55  ;;  %v800_v15 = vmul.f32 %v5202_v20, %v797_v41  ;;  %s5510_s0 = sld [smem:[#allocation2 + $0x22]] }
  0xf4   :  { %9666 = vst [vmem:[#allocation91_spill] sm:$0xff] %v5365_v62  ;;  %v5388_v3 = vpop.permute.xlu2 %1020  ;;  %v776_v58 = vadd.f32 %v774_v1, %v748_v45  ;;  %v804_v6 = vmul.f32 %v5211_v49, %v796_v55  ;;  %v805_v14 = vmul.f32 %v5211_v49, %v797_v41  ;;  %v5413_v23 = vstv %s5342_s18  ;;  %s5518_s18 = sld [smem:[#allocation2 + $0x6d]] }
  0xf5   :  { %9667 = vst [vmem:[#allocation92_spill] sm:$0xff] %v5381_v60  ;;  %v777_v63 = vadd.f32 %v775_v61, %v749_v47  ;;  %v781_v20 = vadd.f32 %v779_v19, %v753_v24  ;;  %v821_v18 = vsel %vm5310_vm1, %v817_v50, 0.0  ;;  %v822_v34 = vsel %vm5324_vm2, %v818_v36, 0.0 }
  0xf6   :  { %9668 = vst [vmem:[#allocation93_spill] sm:$0xff] %v5384_v0  ;;  %v782_v1 = vadd.f32 %v780_v59, %v754_v53  ;;  %v786_v49 = vadd.f32 %v784_v11, %v758_v25  ;;  %v809_v31 = vmul.f32 %v5214_v28, %v796_v55  ;;  %v810_v22 = vmul.f32 %v5214_v28, %v797_v41 }
  0xf7   :  { %9669 = vst [vmem:[#allocation94_spill] sm:$0xff] %v5404_v35  ;;  %1547 = vrot.lane.b32.xlu0 %v5239_v12, %s4221_s23  ;;  %v787_v17 = vadd.f32 %v785_v21, %v759_v13  ;;  %v801_v47 = vadd.f32 %v799_v32, %v776_v58  ;;  %v802_v24 = vadd.f32 %v800_v15, %v777_v63  ;;  %v5430_v19 = vstv %s5369_s20  ;;  %s4222_s20 = smov 112  }
  0xf8   :  { %9670 = vst [vmem:[#allocation95_spill] sm:$0xff] %v5413_v23  ;;  %v806_v50 = vadd.f32 %v804_v6, %v781_v20  ;;  %v807_v36 = vadd.f32 %v805_v14, %v782_v1  ;;  %v824_v25 = vmul.f32 %v5252_v39, %v821_v18  ;;  %v825_v53 = vmul.f32 %v5252_v39, %v822_v34 }
  0xf9   :  { %1549 = vrot.lane.b32.xlu1 %v5266_v37, %s4221_s23  ;;  %v5423_v45 = vpop.permute.xlu0 %916  ;;  %9671 = vst [vmem:[#allocation96_spill] sm:$0xff] %v5430_v19  ;;  %v829_v15 = vmul.f32 %v5255_v56, %v821_v18  ;;  %v830_v13 = vmul.f32 %v5255_v56, %v822_v34  ;;  %v843_v55 = vsel %vm9125_vm4, %v5270_v57, %v5288_v43  ;;  %vm9684_vm0 = vcmp.lt.s32.totalorder %v4440_v30, 15 }
  0xfa   :  { %1573 = vrot.lane.b32.xlu2 %v4280_v8, %s4221_s23  ;;  %v844_v6 = vsel %vm9125_vm4, %v5288_v43, %v5270_v57  ;;  %v811_v41 = vadd.f32 %v809_v31, %v786_v49  ;;  %v812_v59 = vadd.f32 %v810_v22, %v787_v17  ;;  %v834_v11 = vmul.f32 %v5278_v38, %v821_v18  ;;  %vm5565_vm2 = vmand %vm9154_vm14, %vm9684_vm0 }
  0xfb   :  { %v5427_v61 = vpop.permute.xlu1 %918  ;;  %v835_v21 = vmul.f32 %v5278_v38, %v822_v34  ;;  %v868_v32 = vsel %vm9125_vm4, %v5060_v7, %v5354_v10  ;;  %v869_v58 = vsel %vm9125_vm4, %v5354_v10, %v5060_v7  ;;  %v5461_v43 = vstv %s5386_s21  ;;  %s5532_s21 = sld [smem:[#allocation2 + $0xb8]] }
  0xfc   :  { %v5448_v20 = vpop.permute.xlu2 %1047  ;;  %9672 = vst [vmem:[#allocation97_spill] sm:$0xff] %v5461_v43  ;;  %v5466_v17 = vstv %s5398_s22  ;;  %v847_v18 = vsel %vm9129_vm3, %v843_v55, 0.0  ;;  %v848_v22 = vsel %vm9154_vm14, %v844_v6, 0.0  ;;  %v5473_v49 = vstv %s5408_s6  ;;  %s5537_s22 = sld [smem:[#allocation2 + $0x3b]] }
  0xfd   :  { %9673 = vst [vmem:[#allocation98_spill] sm:$0xff] %v5466_v17  ;;  %v5476_v34 = vstv %s5415_s8  ;;  %v826_v31 = vadd.f32 %v824_v25, %v801_v47  ;;  %v827_v7 = vadd.f32 %v825_v53, %v802_v24  ;;  %v831_v57 = vadd.f32 %v829_v15, %v806_v50  ;;  %s5546_s6 = sld [smem:[#allocation2 + $0x86]] }
  0xfe   :  { %9674 = vst [vmem:[#allocation99_spill] sm:$0xff] %v5473_v49  ;;  %v832_v10 = vadd.f32 %v830_v13, %v807_v36  ;;  %v836_v63 = vadd.f32 %v834_v11, %v811_v41  ;;  %v837_v1 = vadd.f32 %v835_v21, %v812_v59  ;;  %v872_v55 = vsel %vm9129_vm3, %v868_v32, 0.0  ;;  %s5557_s8 = sld [smem:[#allocation2 + $0xd1]] }
  0xff   :  { %1575 = vrot.lane.b32.xlu0 %v4258_v2, %s4221_s23  ;;  %9675 = vst [vmem:[#allocation100_spill] sm:$0xff] %v5476_v34  ;;  %v873_v47 = vsel %vm9154_vm14, %v869_v58, 0.0  ;;  %v850_v24 = vmul.f32 %v5296_v33, %v847_v18  ;;  %v851_v50 = vmul.f32 %v5296_v33, %v848_v22  ;;  %v855_v36 = vmul.f32 %v5337_v42, %v847_v18 }
 0x100   :  { %v5496_v53 = vstv %s5432_s9  ;;  %v856_v15 = vmul.f32 %v5337_v42, %v848_v22  ;;  %v860_v13 = vmul.f32 %v5340_v52, %v847_v18  ;;  %v893_v6 = vsel %vm9125_vm4, %v5367_v51, %v5134_v5  ;;  %s5582_s9 = sld [smem:[#allocation2 + $0xa]] }
 0x101   :  { %1598 = vrot.lane.b32.xlu1 %v4284_v9, %s4221_s23  ;;  %v5480_v14 = vpop.permute.xlu0 %944  ;;  %9676 = vst [vmem:[#allocation101_spill] sm:$0xff] %v5496_v53  ;;  %v5508_v41 = vstv %s5438_s10  ;;  %v861_v59 = vmul.f32 %v5340_v52, %v848_v22  ;;  %v875_v11 = vmul.f32 %v5357_v44, %v872_v55  ;;  %v876_v21 = vmul.f32 %v5357_v44, %v873_v47  ;;  %s5596_s10 = sld [smem:[#allocation2 + $0x55]] }
 0x102   :  { %1600 = vrot.lane.b32.xlu2 %v4265_v4, %s4221_s23  ;;  %9677 = vst [vmem:[#allocation102_spill] sm:$0xff] %v5508_v41  ;;  %v894_v32 = vsel %vm9125_vm4, %v5134_v5, %v5367_v51  ;;  %v880_v18 = vmul.f32 %v5362_v16, %v872_v55  ;;  %v881_v42 = vmul.f32 %v5362_v16, %v873_v47  ;;  %v5526_v38 = vstv %s5452_s11  ;;  %s5636_s11 = sld [smem:[#allocation2 + $0xa0]] }
 0x103   :  { %v5493_v25 = vpop.permute.xlu1 %967  ;;  %v885_v33 = vmul.f32 %v5365_v62, %v872_v55  ;;  %9678 = vst [vmem:[#allocation103_spill] sm:$0xff] %v5526_v38  ;;  %v852_v22 = vadd.f32 %v850_v24, %v826_v31  ;;  %v853_v52 = vadd.f32 %v851_v50, %v827_v7  ;;  %v857_v44 = vadd.f32 %v855_v36, %v831_v57 }
 0x104   :  { %v5520_v58 = vpop.permute.xlu2 %1102  ;;  %v897_v56 = vsel %vm9129_vm3, %v893_v6, 0.0  ;;  %v858_v5 = vadd.f32 %v856_v15, %v832_v10  ;;  %v862_v51 = vadd.f32 %v860_v13, %v836_v63  ;;  %v886_v16 = vmul.f32 %v5365_v62, %v873_v47 }
 0x105   :  { %v898_v55 = vsel %vm9154_vm14, %v894_v32, 0.0  ;;  %v863_v31 = vadd.f32 %v861_v59, %v837_v1  ;;  %v877_v7 = vadd.f32 %v875_v11, %v852_v22  ;;  %v878_v57 = vadd.f32 %v876_v21, %v853_v52 }
 0x106   :  { %v5544_v50 = vstv %s5482_s12  ;;  %v882_v10 = vadd.f32 %v880_v18, %v857_v44  ;;  %v883_v63 = vadd.f32 %v881_v42, %v858_v5  ;;  %v887_v47 = vadd.f32 %v885_v33, %v862_v51  ;;  %s5648_s12 = sld [smem:[#allocation2 + $0x23]] }
 0x107   :  { %1623 = vrot.lane.b32.xlu0 %v5239_v12, %s4222_s20  ;;  %9679 = vst [vmem:[#allocation104_spill] sm:$0xff] %v5544_v50  ;;  %v900_v36 = vmul.f32 %v5381_v60, %v897_v56  ;;  %vm9680_vm4 = vcmp.lt.s32.totalorder %v4430_v27, 15  ;;  %v9681_v52 = vmov 0  ;;  %v901_v1 = vmul.f32 %v5381_v60, %v898_v55 }
 0x108   :  { %vm5553_vm8 = vmand %vm9129_vm3, %vm9680_vm4  ;;  %v905_v33 = vmul.f32 %v5384_v0, %v897_v56  ;;  %v9685_v42 = vmov 0  ;;  %vm9688_vm4 = vcmask 121856   ;;  %v888_v6 = vadd.f32 %v886_v16, %v863_v31 }
 0x109   :  { %1625 = vrot.lane.b32.xlu1 %v5266_v37, %s4222_s20  ;;  %v5541_v24 = vpop.permute.xlu0 %994  ;;  %v9682_v52 = vsel %vm5553_vm8, 4294967295, %v9681_v52  ;;  %v9686_v42 = vsel %vm5565_vm2, 4294967295, %v9685_v42  ;;  %v921_v44 = vsel %vm9688_vm4, %v5423_v45, %v5427_v61  ;;  %vm9689_vm3 = vmmov %vm9688_vm4  ;;  %v906_v59 = vmul.f32 %v5384_v0, %v898_v55 }
 0x10a   :  { %9683 = vst [vmem:[#allocation105_spill] sm:$0xff] %v9682_v52  ;;  %v922_v15 = vsel %vm9689_vm3, %v5427_v61, %v5423_v45  ;;  %1649 = vrot.lane.b32.xlu2 %v4280_v8, %s4222_s20  ;;  %v910_v11 = vmul.f32 %v5404_v35, %v897_v56  ;;  %v911_v21 = vmul.f32 %v5404_v35, %v898_v55  ;;  %vm9179_vm0 = vcmask 113664   ;;  %vm9694_vm4 = vmmov %vm9689_vm3 }
 0x10b   :  { %9687 = vst [vmem:[#allocation106_spill] sm:$0xff] %v9686_v42  ;;  %v5575_v13 = vpop.permute.xlu1 %996  ;;  %v5585_v32 = vstv %s5488_s14  ;;  %v5588_v18 = vstv %s5498_s16  ;;  %v5591_v45 = vstv %s5510_s0  ;;  %v5594_v61 = vstv %s5518_s18  ;;  %s5658_s14 = sld [smem:[#allocation2 + $0x6e]]  ;;  %s4223_s0 = smov 111  }
 0x10c   :  { %9690 = vst [vmem:[#allocation107_spill] sm:$0xff] %v5585_v32  ;;  %v5598_v16 = vpop.permute.xlu2 %1129  ;;  %v925_v56 = vsel %vm5553_vm8, %v921_v44, 0.0  ;;  %v926_v22 = vsel %vm5565_vm2, %v922_v15, 0.0  ;;  %v946_v5 = vsel %vm9689_vm3, %v5216_v46, %v5480_v14  ;;  %v947_v51 = vsel %vm9694_vm4, %v5480_v14, %v5216_v46  ;;  %vm9699_vm4 = vmmov %vm9689_vm3  ;;  %s5664_s16 = sld [smem:[#allocation2 + $0xb9]] }
 0x10d   :  { %9691 = vst [vmem:[#allocation108_spill] sm:$0xff] %v5588_v18  ;;  %v902_v55 = vadd.f32 %v900_v36, %v877_v7  ;;  %v903_v31 = vadd.f32 %v901_v1, %v878_v57  ;;  %v907_v35 = vadd.f32 %v905_v33, %v882_v10  ;;  %v5613_v44 = vstv %s5532_s21  ;;  %s5676_s18 = sld [smem:[#allocation2 + $0x3c]] }
 0x10e   :  { %9692 = vst [vmem:[#allocation109_spill] sm:$0xff] %v5591_v45  ;;  %v908_v0 = vadd.f32 %v906_v59, %v883_v63  ;;  %v912_v15 = vadd.f32 %v910_v11, %v887_v47  ;;  %v913_v60 = vadd.f32 %v911_v21, %v888_v6  ;;  %v5616_v62 = vstv %s5537_s22  ;;  %s5689_s21 = sld [smem:[#allocation2 + $0x87]] }
 0x10f   :  { %9693 = vst [vmem:[#allocation110_spill] sm:$0xff] %v5594_v61  ;;  %1651 = vrot.lane.b32.xlu0 %v4258_v2, %s4222_s20  ;;  %v928_v39 = vmul.f32 %v5413_v23, %v925_v56  ;;  %v929_v28 = vmul.f32 %v5413_v23, %v926_v22  ;;  %v950_v46 = vsel %vm5553_vm8, %v946_v5, 0.0  ;;  %v951_v14 = vsel %vm5565_vm2, %v947_v51, 0.0  ;;  %s5708_s22 = sld [smem:[#allocation2 + $0xd2]] }
 0x110   :  { %9695 = vst [vmem:[#allocation111_spill] sm:$0xff] %v5613_v44  ;;  %v933_v57 = vmul.f32 %v5430_v19, %v925_v56  ;;  %v934_v10 = vmul.f32 %v5430_v19, %v926_v22  ;;  %v5631_v63 = vstv %s5546_s6  ;;  %v5634_v47 = vstv %s5557_s8  ;;  %s5713_s6 = sld [smem:[#allocation2 + $0xb]] }
 0x111   :  { %9696 = vst [vmem:[#allocation112_spill] sm:$0xff] %v5616_v62  ;;  %1674 = vrot.lane.b32.xlu1 %v4284_v9, %s4222_s20  ;;  %v5626_v7 = vpop.permute.xlu0 %1022  ;;  %v938_v36 = vmul.f32 %v5461_v43, %v925_v56  ;;  %v939_v1 = vmul.f32 %v5461_v43, %v926_v22  ;;  %v971_v33 = vsel %vm9689_vm3, %v5493_v25, %v5302_v54  ;;  %v5656_v22 = vstv %s5582_s9  ;;  %s5742_s8 = sld [smem:[#allocation2 + $0x56]] }
 0x112   :  { %9697 = vst [vmem:[#allocation113_spill] sm:$0xff] %v5631_v63  ;;  %v972_v6 = vsel %vm9699_vm4, %v5302_v54, %v5493_v25  ;;  %1676 = vrot.lane.b32.xlu2 %v4265_v4, %s4222_s20  ;;  %v953_v11 = vmul.f32 %v5466_v17, %v950_v46  ;;  %v954_v21 = vmul.f32 %v5466_v17, %v951_v14  ;;  %v5662_v25 = vstv %s5596_s10  ;;  %s5747_s9 = sld [smem:[#allocation2 + $0xa1]] }
 0x113   :  { %9698 = vst [vmem:[#allocation114_spill] sm:$0xff] %v5634_v47  ;;  %v5646_v59 = vpop.permute.xlu1 %1045  ;;  %v958_v56 = vmul.f32 %v5473_v49, %v950_v46  ;;  %v930_v5 = vadd.f32 %v928_v39, %v902_v55  ;;  %v931_v51 = vadd.f32 %v929_v28, %v903_v31  ;;  %v959_v54 = vmul.f32 %v5473_v49, %v951_v14  ;;  %s5766_s10 = sld [smem:[#allocation2 + $0x24]] }
 0x114   :  { %9700 = vst [vmem:[#allocation115_spill] sm:$0xff] %v5656_v22  ;;  %v5666_v43 = vpop.permute.xlu2 %1178  ;;  %v935_v19 = vadd.f32 %v933_v57, %v907_v35  ;;  %v963_v23 = vmul.f32 %v5476_v34, %v950_v46  ;;  %v975_v17 = vsel %vm5553_vm8, %v971_v33, 0.0  ;;  %v976_v40 = vsel %vm5565_vm2, %v972_v6, 0.0 }
 0x115   :  { %9701 = vst [vmem:[#allocation116_spill] sm:$0xff] %v5662_v25  ;;  %v936_v48 = vadd.f32 %v934_v10, %v908_v0  ;;  %v940_v39 = vadd.f32 %v938_v36, %v912_v15  ;;  %v941_v28 = vadd.f32 %v939_v1, %v913_v60  ;;  %v964_v55 = vmul.f32 %v5476_v34, %v951_v14 }
 0x116   :  { %v955_v35 = vadd.f32 %v953_v11, %v930_v5  ;;  %v956_v31 = vadd.f32 %v954_v21, %v931_v51  ;;  %v960_v46 = vadd.f32 %v958_v56, %v935_v19  ;;  %vm9702_vm3 = vcmp.lt.s32.totalorder %v4430_v27, 14 }
 0x117   :  { %1701 = vrot.lane.b32.xlu0 %v5239_v12, %s4223_s0  ;;  %vm9703_vm4 = vcmp.ge.s32.totalorder %v4428_v26, 1  ;;  %v9704_v57 = vmov 0  ;;  %v999_v60 = vsel %vm9179_vm0, %v5541_v24, %v5575_v13  ;;  %v961_v0 = vadd.f32 %v959_v54, %v936_v48 }
 0x118   :  { %vm5682_vm14 = vmand %vm9703_vm4, %vm9702_vm3  ;;  %v978_v15 = vmul.f32 %v5496_v53, %v975_v17  ;;  %v979_v19 = vmul.f32 %v5496_v53, %v976_v40  ;;  %vm9707_vm2 = vcmp.lt.s32.totalorder %v4440_v30, 14  ;;  %vm9708_vm8 = vcmp.ge.s32.totalorder %v4438_v29, 1 }
 0x119   :  { %v9705_v57 = vsel %vm5682_vm14, 4294967295, %v9704_v57  ;;  %vm5697_vm3 = vmand %vm9708_vm8, %vm9707_vm2  ;;  %v9709_v14 = vmov 0  ;;  %v1000_v10 = vsel %vm9179_vm0, %v5575_v13, %v5541_v24  ;;  %1703 = vrot.lane.b32.xlu1 %v5266_v37, %s4223_s0  ;;  %v5706_v48 = vpop.permute.xlu0 %1076  ;;  %v965_v36 = vadd.f32 %v963_v23, %v940_v39 }
 0x11a   :  { %9706 = vst [vmem:[#allocation117_spill] sm:$0xff] %v9705_v57  ;;  %v9710_v14 = vsel %vm5697_vm3, 4294967295, %v9709_v14  ;;  %v983_v1 = vmul.f32 %v5508_v41, %v975_v17  ;;  %v984_v33 = vmul.f32 %v5508_v41, %v976_v40  ;;  %v988_v6 = vmul.f32 %v5526_v38, %v975_v17  ;;  %1727 = vrot.lane.b32.xlu2 %v4280_v8, %s4223_s0 }
 0x11b   :  { %9711 = vst [vmem:[#allocation118_spill] sm:$0xff] %v9710_v14  ;;  %v966_v24 = vadd.f32 %v964_v55, %v941_v28  ;;  %v989_v13 = vmul.f32 %v5526_v38, %v976_v40  ;;  %v1003_v11 = vsel %vm5682_vm14, %v999_v60, 0.0  ;;  %v5718_v21 = vpop.permute.xlu1 %1078  ;;  %v5721_v56 = vstv %s5636_s11  ;;  %s5776_s11 = sld [smem:[#allocation2 + $0x6f]] }
 0x11c   :  { %9712 = vst [vmem:[#allocation119_spill] sm:$0xff] %v5721_v56  ;;  %v1004_v23 = vsel %vm5697_vm3, %v1000_v10, 0.0  ;;  %v1024_v17 = vsel %vm9179_vm0, %v5388_v3, %v5626_v7  ;;  %v5731_v5 = vstv %s5648_s12  ;;  %v5734_v40 = vstv %s5658_s14  ;;  %v5744_v55 = vpop.permute.xlu2 %1205  ;;  %s5785_s12 = sld [smem:[#allocation2 + $0xba]] }
 0x11d   :  { %9713 = vst [vmem:[#allocation120_spill] sm:$0xff] %v5731_v5  ;;  %v980_v51 = vadd.f32 %v978_v15, %v955_v35  ;;  %v981_v54 = vadd.f32 %v979_v19, %v956_v31  ;;  %v1025_v39 = vsel %vm9179_vm0, %v5626_v7, %v5388_v3  ;;  %v5740_v28 = vstv %s5664_s16  ;;  %s5793_s14 = sld [smem:[#allocation2 + $0x3d]] }
 0x11e   :  { %9714 = vst [vmem:[#allocation121_spill] sm:$0xff] %v5734_v40  ;;  %v985_v60 = vadd.f32 %v983_v1, %v960_v46  ;;  %v986_v10 = vadd.f32 %v984_v33, %v961_v0  ;;  %v990_v38 = vadd.f32 %v988_v6, %v965_v36  ;;  %v1006_v41 = vmul.f32 %v5544_v50, %v1003_v11  ;;  %s5801_s16 = sld [smem:[#allocation2 + $0xc]] }
 0x11f   :  { %9715 = vst [vmem:[#allocation122_spill] sm:$0xff] %v5740_v28  ;;  %vm9180_vm2 = vcmask 15360   ;;  %v991_v35 = vadd.f32 %v989_v13, %v966_v24  ;;  %v1007_v31 = vmul.f32 %v5544_v50, %v1004_v23  ;;  %v1028_v3 = vsel %vm5682_vm14, %v1024_v17, 0.0  ;;  %1729 = vrot.lane.b32.xlu0 %v4258_v2, %s4223_s0 }
 0x120   :  { %v5755_v7 = vstv %s5676_s18  ;;  %v1011_v46 = vmul.f32 %v5585_v32, %v1003_v11  ;;  %v1029_v0 = vsel %vm5697_vm3, %v1025_v39, 0.0  ;;  %v1049_v15 = vsel %vm9179_vm0, %v5646_v59, %v5448_v20  ;;  %s5804_s18 = sld [smem:[#allocation2 + $0x88]] }
 0x121   :  { %9716 = vst [vmem:[#allocation123_spill] sm:$0xff] %v5755_v7  ;;  %v5764_v19 = vstv %s5689_s21  ;;  %v1012_v36 = vmul.f32 %v5585_v32, %v1004_v23  ;;  %v1016_v1 = vmul.f32 %v5588_v18, %v1003_v11  ;;  %v1017_v33 = vmul.f32 %v5588_v18, %v1004_v23  ;;  %1752 = vrot.lane.b32.xlu1 %v4284_v9, %s4223_s0  ;;  %v1105_v24 = vpop.permute.xlu0 %1104  ;;  %s5815_s21 = sld [smem:[#allocation2 + $0xd3]] }
 0x122   :  { %9717 = vst [vmem:[#allocation124_spill] sm:$0xff] %v5764_v19  ;;  %v1050_v6 = vsel %vm9179_vm0, %v5448_v20, %v5646_v59  ;;  %v1008_v13 = vadd.f32 %v1006_v41, %v980_v51  ;;  %v1031_v17 = vmul.f32 %v5591_v45, %v1028_v3  ;;  %v5780_v39 = vstv %s5708_s22  ;;  %1754 = vrot.lane.b32.xlu2 %v4265_v4, %s4223_s0  ;;  %s9387_s22 = smov 110  }
 0x123   :  { %9718 = vst [vmem:[#allocation125_spill] sm:$0xff] %v5780_v39  ;;  %v5783_v32 = vstv %s5713_s6  ;;  %v1009_v11 = vadd.f32 %v1007_v31, %v981_v54  ;;  %v1032_v23 = vmul.f32 %v5591_v45, %v1029_v0  ;;  %v1036_v20 = vmul.f32 %v5594_v61, %v1028_v3  ;;  %v5791_v18 = vpop.permute.xlu1 %1127  ;;  %s5839_s6 = sld [smem:[#allocation2 + $0x57]] }
 0x124   :  { %9719 = vst [vmem:[#allocation126_spill] sm:$0xff] %v5783_v32  ;;  %v1053_v59 = vsel %vm5682_vm14, %v1049_v15, 0.0  ;;  %v1013_v41 = vadd.f32 %v1011_v46, %v985_v60  ;;  %v1037_v51 = vmul.f32 %v5594_v61, %v1029_v0  ;;  %v1041_v54 = vmul.f32 %v5613_v44, %v1028_v3  ;;  %v5806_v53 = vpop.permute.xlu2 %1335 }
 0x125   :  { %v1054_v31 = vsel %vm5697_vm3, %v1050_v6, 0.0  ;;  %v1014_v15 = vadd.f32 %v1012_v36, %v986_v10  ;;  %v1018_v45 = vadd.f32 %v1016_v1, %v990_v38  ;;  %v1019_v50 = vadd.f32 %v1017_v33, %v991_v35 }
 0x126   :  { %v1042_v57 = vmul.f32 %v5613_v44, %v1029_v0  ;;  %v1033_v34 = vadd.f32 %v1031_v17, %v1008_v13  ;;  %v1056_v60 = vmul.f32 %v5616_v62, %v1053_v59  ;;  %v5810_v46 = vstv %s5742_s8  ;;  %s5851_s8 = sld [smem:[#allocation2 + $0xa2]] }
 0x127   :  { %9720 = vst [vmem:[#allocation127_spill] sm:$0xff] %v5810_v46  ;;  %v5813_v3 = vstv %s5747_s9  ;;  %v1034_v6 = vadd.f32 %v1032_v23, %v1009_v11  ;;  %v1038_v61 = vadd.f32 %v1036_v20, %v1013_v41  ;;  %v1057_v38 = vmul.f32 %v5616_v62, %v1054_v31  ;;  %1779 = vrot.lane.b32.xlu0 %v5239_v12, %s9387_s22  ;;  %s5886_s9 = sld [smem:[#allocation2 + $0x25]] }
 0x128   :  { %9721 = vst [vmem:[#allocation128_spill] sm:$0xff] %v5813_v3  ;;  %v1061_v10 = vmul.f32 %v5631_v63, %v1053_v59  ;;  %v1039_v35 = vadd.f32 %v1037_v51, %v1014_v15  ;;  %v1043_v0 = vadd.f32 %v1041_v54, %v1018_v45  ;;  %v1062_v36 = vmul.f32 %v5631_v63, %v1054_v31 }
 0x129   :  { %v1066_v1 = vmul.f32 %v5634_v47, %v1053_v59  ;;  %v1044_v33 = vadd.f32 %v1042_v57, %v1019_v50  ;;  %v1067_v13 = vmul.f32 %v5634_v47, %v1054_v31  ;;  %v1081_v17 = vsel %vm9180_vm2, %v5706_v48, %v5718_v21  ;;  %1781 = vrot.lane.b32.xlu1 %v5266_v37, %s9387_s22  ;;  %v1153_v45 = vpop.permute.xlu0 %1152 }
 0x12a   :  { %v1082_v11 = vsel %vm9180_vm2, %v5718_v21, %v5706_v48  ;;  %v1058_v23 = vadd.f32 %v1056_v60, %v1033_v34  ;;  %v1106_v50 = vsel %vm9180_vm2, %v5520_v58, %v1105_v24  ;;  %v1107_v57 = vsel %vm9180_vm2, %v1105_v24, %v5520_v58  ;;  %1805 = vrot.lane.b32.xlu2 %v4280_v8, %s9387_s22 }
 0x12b   :  { %v5837_v20 = vstv %s5766_s10  ;;  %v5841_v59 = vadd.f32 %v1057_v38, %v1034_v6  ;;  %v5843_v48 = vadd.f32 %v1061_v10, %v1038_v61  ;;  %v1155_v21 = vpop.permute.xlu1 %1154  ;;  %v5846_v41 = vstv %s5776_s11  ;;  %v9732_v38 = vld [vmem:[#allocation73_spill] sm:$0xff]  ;;  %s5942_s10 = sld [smem:[#allocation2 + $0x70]]  ;;  %s9229_s11 = smov 98  }
 0x12c   :  { %9722 = vst [vmem:[#allocation129_spill] sm:$0xff] %v5837_v20  ;;  %v5849_v34 = vstv %s5785_s12  ;;  %v5855_v58 = vadd.f32 %v1062_v36, %v1039_v35  ;;  %v5857_v24 = vadd.f32 %v1066_v1, %v1043_v0  ;;  %vm9726_vm4 = vcmp.ge.s32.totalorder %v4430_v27, 2  ;;  %v5872_v6 = vpop.permute.xlu2 %1362  ;;  %s5979_s12 = sld [smem:[#allocation2 + $0xbb]] }
 0x12d   :  { %9723 = vst [vmem:[#allocation130_spill] sm:$0xff] %v5846_v41  ;;  %v1085_v61 = vsel %vm9726_vm4, %v1081_v17, 0.0  ;;  %vm9727_vm0 = vcmp.ge.s32.totalorder %v4440_v30, 2  ;;  %v5863_v54 = vadd.f32 %v1067_v13, %v1044_v33  ;;  %vm9729_vm8 = vmmov %vm9726_vm4  ;;  %v5870_v60 = vstv %s5793_s14  ;;  %s5990_s14 = sld [smem:[#allocation2 + $0x3e]] }
 0x12e   :  { %9724 = vst [vmem:[#allocation131_spill] sm:$0xff] %v5849_v34  ;;  %v1086_v51 = vsel %vm9727_vm0, %v1082_v11, 0.0  ;;  %v1110_v31 = vsel %vm9729_vm8, %v1106_v50, 0.0  ;;  %vm9730_vm2 = vmmov %vm9727_vm0  ;;  %v5875_v10 = vadd.f32 %v1058_v23, %v9732_v38  ;;  %v5878_v35 = vstv %s5804_s18  ;;  %s6016_s18 = sld [smem:[#allocation2 + $0xd4]] }
 0x12f   :  { %9725 = vst [vmem:[#allocation132_spill] sm:$0xff] %v5857_v24  ;;  %v1111_v15 = vsel %vm9730_vm2, %v1107_v57, 0.0  ;;  %v5881_v0 = vstv %s5815_s21  ;;  %v5884_v36 = vstv %s5801_s16  ;;  %v1088_v1 = vmul.f32 %v5656_v22, %v1085_v61  ;;  %1807 = vrot.lane.b32.xlu0 %v4258_v2, %s9387_s22  ;;  %vm9738_vm8 = vmmov %vm9726_vm4  ;;  %s6006_s16 = sld [smem:[#allocation2 + $0x89]]  ;;  %s9365_s21 = smov 97  }
 0x130   :  { %9728 = vst [vmem:[#allocation133_spill] sm:$0xff] %v5863_v54  ;;  %v1089_v33 = vmul.f32 %v5656_v22, %v1086_v51  ;;  %vm9736_vm0 = vcmask 15360   ;;  %v1093_v11 = vmul.f32 %v5662_v25, %v1085_v61  ;;  %v1113_v23 = vmul.f32 %v5731_v5, %v1110_v31 }
 0x131   :  { %9731 = vst [vmem:[#allocation134_spill] sm:$0xff] %v5870_v60  ;;  %v1131_v13 = vsel %vm9736_vm0, %v5791_v18, %v5598_v16  ;;  %vm9737_vm2 = vmmov %vm9736_vm0  ;;  %v1114_v50 = vmul.f32 %v5731_v5, %v1111_v15  ;;  %v1118_v57 = vmul.f32 %v5734_v40, %v1110_v31  ;;  %v1094_v38 = vmul.f32 %v5662_v25, %v1086_v51 }
 0x132   :  { %9733 = vst [vmem:[#allocation73_spill] sm:$0xff] %v5878_v35  ;;  %v1132_v17 = vsel %vm9737_vm2, %v5598_v16, %v5791_v18  ;;  %v1098_v22 = vmul.f32 %v5721_v56, %v1085_v61  ;;  %v1099_v47 = vmul.f32 %v5721_v56, %v1086_v51  ;;  %1830 = vrot.lane.b32.xlu1 %v4284_v9, %s9387_s22  ;;  %v1181_v18 = vpop.permute.xlu0 %1180  ;;  %v1135_v5 = vsel %vm9738_vm8, %v1131_v13, 0.0 }
 0x133   :  { %9734 = vst [vmem:[#allocation135_spill] sm:$0xff] %v5881_v0  ;;  %v5909_v16 = vmul.f32 %v5239_v12, %v5884_v36  ;;  %v1119_v63 = vmul.f32 %v5734_v40, %v1111_v15  ;;  %vm9739_vm4 = vcmp.ge.s32.totalorder %v4440_v30, 2  ;;  %v5918_v61 = vmul.f32 %v5266_v37, %v5884_v36  ;;  %v1204_v62 = vpop.permute.xlu1 %1203  ;;  %1832 = vrot.lane.b32.xlu2 %v4265_v4, %s9387_s22  ;;  %s6961_s22 = sld [smem:[#allocation2 + $0x2e]] }
 0x134   :  { %9735 = vst [vmem:[#allocation136_spill] sm:$0xff] %v5884_v36  ;;  %v1136_v25 = vsel %vm9739_vm4, %v1132_v17, 0.0  ;;  %v1123_v51 = vmul.f32 %v5740_v28, %v1110_v31  ;;  %v1124_v56 = vmul.f32 %v5740_v28, %v1111_v15  ;;  %v5923_v44 = vstv %s5839_s6  ;;  %v5935_v42 = vpop.permute.xlu2 %1411  ;;  %s9265_s6 = smov 96  }
 0x135   :  { %9740 = vst [vmem:[#allocation137_spill] sm:$0xff] %v5923_v44  ;;  %v5926_v14 = vstv %s5851_s8  ;;  %v1115_v13 = vadd.f32 %v1113_v23, %v1088_v1  ;;  %v1116_v40 = vadd.f32 %v1114_v50, %v1089_v33  ;;  %v1120_v17 = vadd.f32 %v1118_v57, %v1093_v11  ;;  %s6143_s8 = sld [smem:[#allocation2 + $0x8a]] }
 0x136   :  { %9741 = vst [vmem:[#allocation138_spill] sm:$0xff] %v5926_v14  ;;  %vm9742_vm0 = vcmask 7168   ;;  %v1138_v36 = vmul.f32 %v5755_v7, %v1135_v5  ;;  %v1139_v31 = vmul.f32 %v5755_v7, %v1136_v25  ;;  %v1143_v15 = vmul.f32 %v5764_v19, %v1135_v5 }
 0x137   :  { %v1157_v49 = vsel %vm9742_vm0, %v1153_v45, %v1155_v21  ;;  %vm9743_vm2 = vmmov %vm9742_vm0  ;;  %v1121_v52 = vadd.f32 %v1119_v63, %v1094_v38  ;;  %v1144_v54 = vmul.f32 %v5764_v19, %v1136_v25  ;;  %v5940_v1 = vmul.f32 %v5239_v12, %v5923_v44  ;;  %1863 = vrot.lane.b32.xlu0 %v5239_v12, %s9229_s11 }
 0x138   :  { %v1158_v28 = vsel %vm9743_vm2, %v1155_v21, %v1153_v45  ;;  %v5945_v33 = vstv %s5886_s9  ;;  %vm9745_vm8 = vcmp.ge.s32.totalorder %v4430_v27, 1  ;;  %vm9746_vm4 = vmmov %vm9742_vm0  ;;  %v1183_v45 = vsel %vm9742_vm0, %v1181_v18, %v5666_v43  ;;  %s6065_s9 = sld [smem:[#allocation2 + $0x58]] }
 0x139   :  { %9744 = vst [vmem:[#allocation139_spill] sm:$0xff] %v5945_v33  ;;  %v1161_v11 = vsel %vm9745_vm8, %v1157_v49, 0.0  ;;  %v1182_v23 = vsel %vm9746_vm4, %v5666_v43, %v1181_v18  ;;  %v5955_v63 = vmul.f32 %v5266_v37, %v5923_v44  ;;  %v1125_v21 = vadd.f32 %v1123_v51, %v1098_v22 }
 0x13a   :  { %v1126_v50 = vadd.f32 %v1124_v56, %v1099_v47  ;;  %v1148_v57 = vmul.f32 %v5780_v39, %v1135_v5  ;;  %vm9747_vm2 = vcmp.ge.s32.totalorder %v4440_v30, 1  ;;  %v1140_v38 = vadd.f32 %v1138_v36, %v1115_v13  ;;  %1865 = vrot.lane.b32.xlu1 %v5266_v37, %s9229_s11  ;;  %v5965_v18 = vpop.permute.xlu0 %1309 }
 0x13b   :  { %v1162_v49 = vsel %vm9747_vm2, %v1158_v28, 0.0  ;;  %v1141_v19 = vadd.f32 %v1139_v31, %v1116_v40  ;;  %v1145_v7 = vadd.f32 %v1143_v15, %v1120_v17  ;;  %v1149_v43 = vmul.f32 %v5780_v39, %v1136_v25  ;;  %vm9748_vm4 = vmmov %vm9747_vm2  ;;  %v5977_v28 = vpop.permute.xlu1 %1311  ;;  %1889 = vrot.lane.b32.xlu2 %v4280_v8, %s9229_s11 }
 0x13c   :  { %v1146_v44 = vadd.f32 %v1144_v54, %v1121_v52  ;;  %v1164_v24 = vmul.f32 %v5783_v32, %v1161_v11  ;;  %v1186_v47 = vsel %vm9745_vm8, %v1182_v23, 0.0  ;;  %v1187_v22 = vsel %vm9748_vm4, %v1183_v45, 0.0  ;;  %vm9749_vm2 = vmmov %vm9742_vm0  ;;  %v5992_v23 = vpop.permute.xlu2 %1438 }
 0x13d   :  { %v1165_v56 = vmul.f32 %v5783_v32, %v1162_v49  ;;  %v1169_v5 = vmul.f32 %v5810_v46, %v1161_v11  ;;  %v1170_v25 = vmul.f32 %v5810_v46, %v1162_v49  ;;  %v1207_v40 = vsel %vm9742_vm0, %v1204_v62, %v5744_v55 }
 0x13e   :  { %v1150_v52 = vadd.f32 %v1148_v57, %v1125_v21  ;;  %v1174_v54 = vmul.f32 %v5813_v3, %v1161_v11  ;;  %v1175_v36 = vmul.f32 %v5813_v3, %v1162_v49  ;;  %v1208_v51 = vsel %vm9749_vm2, %v5744_v55, %v1204_v62 }
 0x13f   :  { %v1151_v13 = vadd.f32 %v1149_v43, %v1126_v50  ;;  %v1189_v17 = vmul.f32 %v5837_v20, %v1186_v47  ;;  %v1190_v31 = vmul.f32 %v5837_v20, %v1187_v22  ;;  %v1194_v15 = vmul.f32 %v5846_v41, %v1186_v47  ;;  %1891 = vrot.lane.b32.xlu0 %v4258_v2, %s9229_s11 }
 0x140   :  { %v1166_v45 = vadd.f32 %v1164_v24, %v1140_v38  ;;  %v1195_v21 = vmul.f32 %v5846_v41, %v1187_v22  ;;  %v1211_v11 = vsel %vm9745_vm8, %v1207_v40, 0.0  ;;  %v5998_v57 = vstv %s5942_s10  ;;  %s6046_s10 = sld [smem:[#allocation2 + $0xd]] }
 0x141   :  { %9750 = vst [vmem:[#allocation140_spill] sm:$0xff] %v5998_v57  ;;  %v1167_v62 = vadd.f32 %v1165_v56, %v1141_v19  ;;  %v1171_v55 = vadd.f32 %v1169_v5, %v1145_v7  ;;  %v1172_v50 = vadd.f32 %v1170_v25, %v1146_v44  ;;  %v1212_v49 = vsel %vm9748_vm4, %v1208_v51, 0.0 }
 0x142   :  { %v1176_v43 = vadd.f32 %v1174_v54, %v1150_v52  ;;  %v1177_v20 = vadd.f32 %v1175_v36, %v1151_v13  ;;  %v1199_v24 = vmul.f32 %v5849_v34, %v1186_v47  ;;  %v1200_v38 = vmul.f32 %v5849_v34, %v1187_v22  ;;  %1914 = vrot.lane.b32.xlu1 %v4284_v9, %s9229_s11  ;;  %v6011_v7 = vpop.permute.xlu0 %1337  ;;  %v4185_v52 = vld [vmem:[%s8950_s1] sm:$0xc]  ;;  %v4186_v36 = vld [vmem:[%s8950_s1 + $0x8] sm:$0xc] }
 0x143   :  { %v1191_v40 = vadd.f32 %v1189_v17, %v1166_v45  ;;  %v1192_v41 = vadd.f32 %v1190_v31, %v1167_v62  ;;  %v1196_v19 = vadd.f32 %v1194_v15, %v1171_v55  ;;  %v1214_v44 = vmul.f32 %v5870_v60, %v1211_v11  ;;  %v6031_v17 = vpop.permute.xlu1 %1360  ;;  %1916 = vrot.lane.b32.xlu2 %v4265_v4, %s9229_s11  ;;  %s6103_s11 = sld [smem:[#allocation2 + $0x71]] }
 0x144   :  { %vm9252_vm0 = vcmask 1039360   ;;  %v1197_v56 = vadd.f32 %v1195_v21, %v1172_v50  ;;  %v1215_v5 = vmul.f32 %v5870_v60, %v1212_v49  ;;  %v1219_v47 = vmul.f32 %v5878_v35, %v1211_v11 }
 0x145   :  { %v1220_v22 = vmul.f32 %v5878_v35, %v1212_v49  ;;  %v1239_v25 = vmul.f32 %v5239_v12, %v5926_v14  ;;  %v1244_v54 = vmul.f32 %v4185_v52, %v5945_v33  ;;  %v1245_v51 = vmul.f32 %v4186_v36, %v5945_v33  ;;  %v6042_v35 = vpop.permute.xlu2 %1495 }
 0x146   :  { %v6029_v13 = vstv %s5979_s12  ;;  %v1201_v12 = vadd.f32 %v1199_v24, %v1176_v43  ;;  %v1202_v31 = vadd.f32 %v1200_v38, %v1177_v20  ;;  %v1224_v15 = vmul.f32 %v5881_v0, %v1211_v11  ;;  %v6053_v38 = vld [vmem:[%s8950_s1] sm:$0x3]  ;;  %s6171_s12 = sld [smem:[#allocation2 + $0xe]] }
 0x147   :  { %9751 = vst [vmem:[#allocation141_spill] sm:$0xff] %v6029_v13  ;;  %v1225_v45 = vmul.f32 %v5881_v0, %v1212_v49  ;;  %v1216_v21 = vadd.f32 %v1214_v44, %v1191_v40  ;;  %v1255_v62 = vmul.f32 %v4185_v52, %v5998_v57  ;;  %v1256_v55 = vmul.f32 %v4186_v36, %v5998_v57 }
 0x148   :  { %v6040_v50 = vstv %s5990_s14  ;;  %v1217_v60 = vadd.f32 %v1215_v5, %v1192_v41  ;;  %v1221_v34 = vadd.f32 %v1219_v47, %v1196_v19  ;;  %v1222_v33 = vadd.f32 %v1220_v22, %v1197_v56  ;;  %1941 = vrot.lane.b32.xlu0 %v6053_v38, %s9365_s21  ;;  %v4189_v22 = vld [vmem:[%s8950_s1 + $0x8] sm:$0x30]  ;;  %s6180_s14 = sld [smem:[#allocation2 + $0x59]] }
 0x149   :  { %9752 = vst [vmem:[#allocation142_spill] sm:$0xff] %v6040_v50  ;;  %v1240_v20 = vmul.f32 %v5266_v37, %v5926_v14  ;;  %v1248_v11 = vrot.slane %v1244_v54, 2  ;;  %v1249_v49 = vrot.slane %v1245_v51, 2  ;;  %v1266_v43 = vmul.f32 %v4185_v52, %v6029_v13  ;;  %v4188_v37 = vld [vmem:[%s8950_s1] sm:$0x30] }
 0x14a   :  { %v1267_v24 = vmul.f32 %v4186_v36, %v6029_v13  ;;  %v1226_v41 = vadd.f32 %v1224_v15, %v1201_v12  ;;  %v1227_v40 = vadd.f32 %v1225_v45, %v1202_v31  ;;  %v1277_v19 = vmul.f32 %v4188_v37, %v6040_v50  ;;  %v6074_v54 = vld [vmem:[%s8950_s1 + $0x8] sm:$0x3]  ;;  %v6078_v36 = vpop.permute.xlu0 %1385  ;;  %s6097_s1 = sld [smem:[#allocation2 + $0x26]] }
 0x14b   :  { %v6062_v44 = vstv %s6006_s16  ;;  %v1231_v56 = vadd.f32 %v5909_v16, %v1216_v21  ;;  %v1259_v5 = vrot.slane %v1255_v62, 2  ;;  %v1260_v47 = vrot.slane %v1256_v55, 2  ;;  %1943 = vrot.lane.b32.xlu1 %v6074_v54, %s9365_s21  ;;  %s6083_s16 = sld [smem:[#allocation2 + $0xa3]]  ;;  %v6090_v55 = vpop.permute.xlu1 %1387  ;;  %1967 = vrot.lane.b32.xlu2 %v4280_v8, %s9365_s21 }
 0x14c   :  { %9753 = vst [vmem:[#allocation143_spill] sm:$0xff] %v6062_v44  ;;  %v1278_v52 = vmul.f32 %v4189_v22, %v6040_v50  ;;  %v1232_v16 = vadd.f32 %v5918_v61, %v1217_v60  ;;  %v1236_v51 = vadd.f32 %v5940_v1, %v1221_v34  ;;  %v1237_v12 = vadd.f32 %v5955_v63, %v1222_v33 }
 0x14d   :  { %v6086_v31 = vstv %s6016_s18  ;;  %v1270_v15 = vrot.slane %v1266_v43, 2  ;;  %v1271_v45 = vrot.slane %v1267_v24, 2  ;;  %v1288_v21 = vmul.f32 %v4188_v37, %v6062_v44  ;;  %s6121_s18 = sld [smem:[#allocation2 + $0xbc]] }
 0x14e   :  { %9754 = vst [vmem:[#allocation144_spill] sm:$0xff] %v6086_v31  ;;  %v1289_v62 = vmul.f32 %v4189_v22, %v6062_v44  ;;  %v1241_v60 = vadd.f32 %v1239_v25, %v1226_v41  ;;  %v1242_v61 = vadd.f32 %v1240_v20, %v1227_v40  ;;  %v1281_v34 = vrot.slane %v1277_v19, 4  ;;  %v6105_v25 = vpop.permute.xlu2 %1522 }
 0x14f   :  { %v1314_v1 = vsel %vm9252_vm0, %v5965_v18, %v5977_v28  ;;  %v1252_v33 = vadd.f32 %v1248_v11, %v1231_v56  ;;  %v1282_v63 = vrot.slane %v1278_v52, 4  ;;  %v1299_v43 = vmul.f32 %v4188_v37, %v6086_v31 }
 0x150   :  { %v1315_v24 = vsel %vm9252_vm0, %v5977_v28, %v5965_v18  ;;  %v1253_v20 = vadd.f32 %v1249_v49, %v1232_v16  ;;  %v1263_v41 = vadd.f32 %v1259_v5, %v1236_v51  ;;  %v1264_v40 = vadd.f32 %v1260_v47, %v1237_v12  ;;  %1969 = vrot.lane.b32.xlu0 %v4258_v2, %s9365_s21  ;;  %v9757_v18 = vld [vmem:[#allocation74_spill] sm:$0xff] }
 0x151   :  { %v1300_v19 = vmul.f32 %v4189_v22, %v6086_v31  ;;  %v1292_v0 = vrot.slane %v1288_v21, 4  ;;  %v1293_v44 = vrot.slane %v1289_v62, 4  ;;  %vm9755_vm2 = vcmp.lt.s32.totalorder %v4430_v27, 15 }
 0x152   :  { %v1318_v11 = vsel %vm9755_vm2, %v1314_v1, 0.0  ;;  %v6111_v37 = vstv %s6046_s10  ;;  %v6117_v28 = vadd.f32 %v5841_v59, %v9757_v18  ;;  %v1274_v49 = vadd.f32 %v1270_v15, %v1241_v60  ;;  %v6131_v59 = vpop.permute.xlu0 %1413  ;;  %s6140_s10 = sld [smem:[#allocation2 + $0x3f]]  ;;  %vm9761_vm4 = vmmov %vm9755_vm2 }
 0x153   :  { %9756 = vst [vmem:[#allocation145_spill] sm:$0xff] %v6111_v37  ;;  %v1275_v56 = vadd.f32 %v1271_v45, %v1242_v61  ;;  %vm9758_vm8 = vcmp.lt.s32.totalorder %v4440_v30, 15  ;;  %v1285_v47 = vadd.f32 %v1281_v34, %v1252_v33  ;;  %v1303_v22 = vrot.slane %v1299_v43, 4  ;;  %1992 = vrot.lane.b32.xlu1 %v4284_v9, %s9365_s21  ;;  %v6145_v34 = vpop.permute.xlu1 %1436  ;;  %1994 = vrot.lane.b32.xlu2 %v4265_v4, %s9365_s21  ;;  %s6875_s21 = sld [smem:[#allocation2 + $0x5f]] }
 0x154   :  { %v1319_v5 = vsel %vm9758_vm8, %v1315_v24, 0.0  ;;  %v6124_v52 = vstv %s6065_s9  ;;  %v1339_v16 = vsel %vm9252_vm0, %v5806_v53, %v6011_v7  ;;  %v1304_v51 = vrot.slane %v1300_v19, 4  ;;  %vm9763_vm2 = vmmov %vm9758_vm8  ;;  %s6162_s9 = sld [smem:[#allocation2 + $0xd5]] }
 0x155   :  { %9759 = vst [vmem:[#allocation74_spill] sm:$0xff] %v6124_v52  ;;  %v1321_v12 = vmul.f32 %v6111_v37, %v1318_v11  ;;  %v6135_v15 = vstv %s6083_s16  ;;  %v1340_v45 = vsel %vm9252_vm0, %v6011_v7, %v5806_v53  ;;  %v1286_v21 = vadd.f32 %v1282_v63, %v1253_v20  ;;  %v9765_v20 = vld [vmem:[#allocation78_spill] sm:$0xff]  ;;  %s6189_s16 = sld [smem:[#allocation2 + $0xa4]] }
 0x156   :  { %9760 = vst [vmem:[#allocation146_spill] sm:$0xff] %v6135_v15  ;;  %v1296_v62 = vadd.f32 %v1292_v0, %v1263_v41  ;;  %v1297_v60 = vadd.f32 %v1293_v44, %v1264_v40  ;;  %v1322_v61 = vmul.f32 %v6111_v37, %v1319_v5  ;;  %v1326_v1 = vmul.f32 %v6124_v52, %v1318_v11  ;;  %v6164_v24 = vpop.permute.xlu2 %1573 }
 0x157   :  { %v1327_v33 = vmul.f32 %v6124_v52, %v1319_v5  ;;  %v1343_v53 = vsel %vm9761_vm4, %v1339_v16, 0.0  ;;  %v6154_v7 = vstv %s6097_s1  ;;  %v1307_v0 = vadd.f32 %v1303_v22, %v1274_v49  ;;  %s6211_s1 = sld [smem:[#allocation2 + $0x27]] }
 0x158   :  { %9762 = vst [vmem:[#allocation147_spill] sm:$0xff] %v6154_v7  ;;  %v1331_v44 = vmul.f32 %v6135_v15, %v1318_v11  ;;  %v1344_v63 = vsel %vm9763_vm2, %v1340_v45, 0.0  ;;  %v6160_v43 = vstv %s6103_s11  ;;  %v6168_v41 = vadd.f32 %v5855_v58, %v9765_v20  ;;  %2017 = vrot.lane.b32.xlu0 %v6053_v38, %s9265_s6  ;;  %s6220_s11 = sld [smem:[#allocation2 + $0x72]] }
 0x159   :  { %9764 = vst [vmem:[#allocation148_spill] sm:$0xff] %v6160_v43  ;;  %v1308_v40 = vadd.f32 %v1304_v51, %v1275_v56  ;;  %v1323_v19 = vadd.f32 %v1321_v12, %v1285_v47  ;;  %v1332_v18 = vmul.f32 %v6135_v15, %v1319_v5  ;;  %v1324_v11 = vadd.f32 %v1322_v61, %v1286_v21 }
 0x15a   :  { %v1346_v49 = vmul.f32 %v6154_v7, %v1343_v53  ;;  %v1364_v22 = vsel %vm9252_vm0, %v6031_v17, %v5872_v6  ;;  %v1365_v16 = vsel %vm9252_vm0, %v5872_v6, %v6031_v17  ;;  %v1347_v58 = vmul.f32 %v6154_v7, %v1344_v63  ;;  %v6194_v12 = vpop.permute.xlu0 %1469 }
 0x15b   :  { %v1351_v56 = vmul.f32 %v6160_v43, %v1343_v53  ;;  %v6187_v5 = vstv %s6121_s18  ;;  %vm9251_vm8 = vcmask 1031168   ;;  %v1328_v47 = vadd.f32 %v1326_v1, %v1296_v62  ;;  %2019 = vrot.lane.b32.xlu1 %v6074_v54, %s9265_s6  ;;  %2043 = vrot.lane.b32.xlu2 %v4280_v8, %s9265_s6  ;;  %s6227_s18 = sld [smem:[#allocation2 + $0xbd]] }
 0x15c   :  { %9766 = vst [vmem:[#allocation78_spill] sm:$0xff] %v6187_v5  ;;  %v1329_v51 = vadd.f32 %v1327_v33, %v1297_v60  ;;  %v1333_v6 = vadd.f32 %v1331_v44, %v1307_v0  ;;  %v1352_v17 = vmul.f32 %v6160_v43, %v1344_v63  ;;  %v1334_v45 = vadd.f32 %v1332_v18, %v1308_v40  ;;  %v6213_v0 = vpop.permute.xlu1 %1471 }
 0x15d   :  { %v1368_v21 = vsel %vm9761_vm4, %v1364_v22, 0.0  ;;  %v1369_v61 = vsel %vm9763_vm2, %v1365_v16, 0.0  ;;  %v6201_v20 = vstv %s6140_s10  ;;  %v1356_v62 = vmul.f32 %v6187_v5, %v1343_v53  ;;  %s6253_s10 = sld [smem:[#allocation2 + $0x40]] }
 0x15e   :  { %9767 = vst [vmem:[#allocation149_spill] sm:$0xff] %v6201_v20  ;;  %v1357_v60 = vmul.f32 %v6187_v5, %v1344_v63  ;;  %v6206_v1 = vstv %s6143_s8  ;;  %v1390_v33 = vsel %vm9251_vm8, %v6078_v36, %v6090_v55  ;;  %v1348_v44 = vadd.f32 %v1346_v49, %v1323_v19  ;;  %v6229_v19 = vpop.permute.xlu2 %1600  ;;  %s6265_s8 = sld [smem:[#allocation2 + $0x8b]] }
 0x15f   :  { %9768 = vst [vmem:[#allocation150_spill] sm:$0xff] %v6206_v1  ;;  %v1349_v40 = vadd.f32 %v1347_v58, %v1324_v11  ;;  %v1353_v18 = vadd.f32 %v1351_v56, %v1328_v47  ;;  %v1391_v53 = vsel %vm9251_vm8, %v6090_v55, %v6078_v36  ;;  %v1354_v63 = vadd.f32 %v1352_v17, %v1329_v51 }
 0x160   :  { %v1371_v22 = vmul.f32 %v6201_v20, %v1368_v21  ;;  %v1372_v16 = vmul.f32 %v6201_v20, %v1369_v61  ;;  %v6225_v5 = vstv %s6162_s9  ;;  %v1376_v11 = vmul.f32 %v6206_v1, %v1368_v21  ;;  %2045 = vrot.lane.b32.xlu0 %v4258_v2, %s9265_s6  ;;  %s6274_s9 = sld [smem:[#allocation2 + $0xd6]] }
 0x161   :  { %9769 = vst [vmem:[#allocation151_spill] sm:$0xff] %v6225_v5  ;;  %v1377_v49 = vmul.f32 %v6206_v1, %v1369_v61  ;;  %vm9770_vm4 = vcmp.lt.s32.totalorder %v4430_v27, 14  ;;  %v6236_v55 = vstv %s6171_s12  ;;  %v1358_v58 = vadd.f32 %v1356_v62, %v1333_v6  ;;  %s6298_s12 = sld [smem:[#allocation2 + $0xf]] }
 0x162   :  { %v1394_v36 = vsel %vm9770_vm4, %v1390_v33, 0.0  ;;  %9771 = vst [vmem:[#allocation152_spill] sm:$0xff] %v6236_v55  ;;  %v1359_v56 = vadd.f32 %v1357_v60, %v1334_v45  ;;  %vm9772_vm2 = vcmp.lt.s32.totalorder %v4440_v30, 14  ;;  %v6241_v51 = vstv %s6180_s14  ;;  %s6302_s14 = sld [smem:[#allocation2 + $0x5a]] }
 0x163   :  { %v1395_v47 = vsel %vm9772_vm2, %v1391_v53, 0.0  ;;  %9773 = vst [vmem:[#allocation153_spill] sm:$0xff] %v6241_v51  ;;  %v1381_v17 = vmul.f32 %v6225_v5, %v1368_v21  ;;  %v1382_v20 = vmul.f32 %v6225_v5, %v1369_v61  ;;  %v6248_v1 = vstv %s6189_s16  ;;  %2068 = vrot.lane.b32.xlu1 %v4284_v9, %s9265_s6  ;;  %v6261_v21 = vpop.permute.xlu0 %1497  ;;  %2070 = vrot.lane.b32.xlu2 %v4265_v4, %s9265_s6  ;;  %s9353_s16 = smov 95   ;;  %s6398_s6 = sld [smem:[#allocation2 + $0xd7]] }
 0x164   :  { %9774 = vst [vmem:[#allocation154_spill] sm:$0xff] %v6248_v1  ;;  %v1415_v33 = vsel %vm9251_vm8, %v5935_v42, %v6131_v59  ;;  %v1373_v6 = vadd.f32 %v1371_v22, %v1348_v44  ;;  %v1374_v45 = vadd.f32 %v1372_v16, %v1349_v40  ;;  %v1397_v62 = vmul.f32 %v6236_v55, %v1394_v36 }
 0x165   :  { %v1416_v60 = vsel %vm9251_vm8, %v6131_v59, %v5935_v42  ;;  %v1378_v61 = vadd.f32 %v1376_v11, %v1353_v18  ;;  %v1379_v53 = vadd.f32 %v1377_v49, %v1354_v63  ;;  %v1398_v5 = vmul.f32 %v6236_v55, %v1395_v47  ;;  %v6276_v18 = vpop.permute.xlu1 %1520 }
 0x166   :  { %v1402_v44 = vmul.f32 %v6241_v51, %v1394_v36  ;;  %v1403_v40 = vmul.f32 %v6241_v51, %v1395_v47  ;;  %v1407_v22 = vmul.f32 %v6248_v1, %v1394_v36  ;;  %v1419_v42 = vsel %vm9770_vm4, %v1415_v33, 0.0  ;;  %v6292_v43 = vpop.permute.xlu2 %1649 }
 0x167   :  { %v6272_v59 = vstv %s6211_s1  ;;  %v1383_v63 = vadd.f32 %v1381_v17, %v1358_v58  ;;  %v1384_v16 = vadd.f32 %v1382_v20, %v1359_v56  ;;  %v1420_v11 = vsel %vm9772_vm2, %v1416_v60, 0.0  ;;  %s6313_s1 = sld [smem:[#allocation2 + $0x28]] }
 0x168   :  { %9775 = vst [vmem:[#allocation155_spill] sm:$0xff] %v6272_v59  ;;  %v6283_v49 = vstv %s6220_s11  ;;  %v1399_v36 = vadd.f32 %v1397_v62, %v1373_v6  ;;  %v1408_v51 = vmul.f32 %v6248_v1, %v1395_v47  ;;  %v6287_v33 = vstv %s6227_s18  ;;  %2095 = vrot.lane.b32.xlu0 %v6053_v38, %s9353_s16  ;;  %s6318_s11 = sld [smem:[#allocation2 + $0x73]] }
 0x169   :  { %9776 = vst [vmem:[#allocation156_spill] sm:$0xff] %v6283_v49  ;;  %v1440_v55 = vsel %vm9251_vm8, %v6145_v34, %v5992_v23  ;;  %v1400_v7 = vadd.f32 %v1398_v5, %v1374_v45  ;;  %v1404_v58 = vadd.f32 %v1402_v44, %v1378_v61  ;;  %v1422_v20 = vmul.f32 %v6272_v59, %v1419_v42  ;;  %s6329_s18 = sld [smem:[#allocation2 + $0xbe]] }
 0x16a   :  { %9777 = vst [vmem:[#allocation157_spill] sm:$0xff] %v6287_v33  ;;  %v1441_v56 = vsel %vm9251_vm8, %v5992_v23, %v6145_v34  ;;  %v1405_v47 = vadd.f32 %v1403_v40, %v1379_v53  ;;  %v1409_v17 = vadd.f32 %v1407_v22, %v1383_v63  ;;  %v1423_v6 = vmul.f32 %v6272_v59, %v1420_v11 }
 0x16b   :  { %v1427_v62 = vmul.f32 %v6283_v49, %v1419_v42  ;;  %v1428_v5 = vmul.f32 %v6283_v49, %v1420_v11  ;;  %v1432_v45 = vmul.f32 %v6287_v33, %v1419_v42  ;;  %v1444_v23 = vsel %vm9770_vm4, %v1440_v55, 0.0  ;;  %2097 = vrot.lane.b32.xlu1 %v6074_v54, %s9353_s16  ;;  %v6322_v53 = vpop.permute.xlu0 %1547  ;;  %2121 = vrot.lane.b32.xlu2 %v4280_v8, %s9353_s16 }
 0x16c   :  { %v6311_v34 = vstv %s6253_s10  ;;  %v1410_v60 = vadd.f32 %v1408_v51, %v1384_v16  ;;  %v1445_v61 = vsel %vm9772_vm2, %v1441_v56, 0.0  ;;  %vm9295_vm8 = vcmask 932864   ;;  %s6335_s10 = sld [smem:[#allocation2 + $0xa5]] }
 0x16d   :  { %9778 = vst [vmem:[#allocation158_spill] sm:$0xff] %v6311_v34  ;;  %vm9296_vm0 = vcmp.lt.s32.totalorder %v4428_v26, 15  ;;  %v1424_v55 = vadd.f32 %v1422_v20, %v1399_v36  ;;  %v1433_v44 = vmul.f32 %v6287_v33, %v1420_v11  ;;  %v6326_v40 = vstv %s6265_s8  ;;  %v6337_v16 = vpop.permute.xlu1 %1549  ;;  %s6371_s8 = sld [smem:[#allocation2 + $0x41]] }
 0x16e   :  { %9779 = vst [vmem:[#allocation159_spill] sm:$0xff] %v6326_v40  ;;  %v1425_v51 = vadd.f32 %v1423_v6, %v1400_v7  ;;  %v1429_v22 = vadd.f32 %v1427_v62, %v1404_v58  ;;  %v1447_v42 = vmul.f32 %v6311_v34, %v1444_v23  ;;  %v6333_v63 = vstv %s6274_s9  ;;  %s6386_s9 = sld [smem:[#allocation2 + $0x8c]] }
 0x16f   :  { %9780 = vst [vmem:[#allocation160_spill] sm:$0xff] %v6333_v63  ;;  %v1430_v11 = vadd.f32 %v1428_v5, %v1405_v47  ;;  %v6341_v36 = vadd.f32 %v1432_v45, %v1409_v17  ;;  %v1448_v20 = vmul.f32 %v6311_v34, %v1445_v61  ;;  %vm9781_vm2 = vcmp.ge.s32.totalorder %v4430_v27, 2  ;;  %v6373_v5 = vpop.permute.xlu2 %1676 }
 0x170   :  { %vm6348_vm4 = vmand %vm9296_vm0, %vm9781_vm2  ;;  %v9782_v7 = vmov 0  ;;  %v1474_v58 = vsel %vm9295_vm8, %v6194_v12, %v6213_v0  ;;  %v1452_v56 = vmul.f32 %v6326_v40, %v1444_v23  ;;  %v1453_v47 = vmul.f32 %v6326_v40, %v1445_v61  ;;  %2123 = vrot.lane.b32.xlu0 %v4258_v2, %s9353_s16 }
 0x171   :  { %v9783_v7 = vsel %vm6348_vm4, 4294967295, %v9782_v7  ;;  %vm9785_vm3 = vcmp.ge.s32.totalorder %v4440_v30, 2  ;;  %vm9786_vm14 = vcmp.lt.s32.totalorder %v4438_v29, 15  ;;  %v9787_v17 = vmov 0 }
 0x172   :  { %9784 = vst [vmem:[#allocation161_spill] sm:$0xff] %v9783_v7  ;;  %vm6361_vm1 = vmand %vm9786_vm14, %vm9785_vm3  ;;  %v1475_v6 = vsel %vm9295_vm8, %v6213_v0, %v6194_v12  ;;  %v1499_v62 = vsel %vm9295_vm8, %v6042_v35, %v6261_v21  ;;  %v6375_v45 = vadd.f32 %v1433_v44, %v1410_v60  ;;  %v6378_v40 = vmul.f32 %v6333_v63, %v1444_v23 }
 0x173   :  { %v9788_v17 = vsel %vm6361_vm1, 4294967295, %v9787_v17  ;;  %v6381_v34 = vmul.f32 %v6333_v63, %v1445_v61  ;;  %v1500_v12 = vsel %vm9295_vm8, %v6261_v21, %v6042_v35  ;;  %v6388_v0 = vadd.f32 %v1447_v42, %v1424_v55  ;;  %2146 = vrot.lane.b32.xlu1 %v4284_v9, %s9353_s16  ;;  %2148 = vrot.lane.b32.xlu2 %v4265_v4, %s9353_s16  ;;  %s6828_s16 = sld [smem:[#allocation2 + $0x90]] }
 0x174   :  { %9789 = vst [vmem:[#allocation162_spill] sm:$0xff] %v9788_v17  ;;  %v1478_v33 = vsel %vm6348_vm4, %v1474_v58, 0.0  ;;  %v6393_v60 = vstv %s6298_s12  ;;  %v6396_v23 = vstv %s6302_s14  ;;  %v6402_v61 = vadd.f32 %v1448_v20, %v1425_v51  ;;  %v1576_v51 = vpop.permute.xlu0 %1575  ;;  %s6430_s12 = sld [smem:[#allocation2 + $0x10]] }
 0x175   :  { %9790 = vst [vmem:[#allocation163_spill] sm:$0xff] %v6393_v60  ;;  %v1479_v35 = vsel %vm6361_vm1, %v1475_v6, 0.0  ;;  %v1503_v21 = vsel %vm6348_vm4, %v1499_v62, 0.0  ;;  %v6409_v55 = vstv %s6313_s1  ;;  %v6411_v44 = vadd.f32 %v1452_v56, %v1429_v22  ;;  %s6440_s14 = sld [smem:[#allocation2 + $0x5b]]  ;;  %v6442_v49 = vpop.permute.xlu1 %1598 }
 0x176   :  { %9791 = vst [vmem:[#allocation164_spill] sm:$0xff] %v6396_v23  ;;  %v6413_v42 = vadd.f32 %v1453_v47, %v1430_v11  ;;  %v1504_v58 = vsel %vm6361_vm1, %v1500_v12, 0.0  ;;  %v6418_v63 = vstv %s6318_s11  ;;  %v1481_v20 = vmul.f32 %v6393_v60, %v1478_v33  ;;  %s6456_s1 = sld [smem:[#allocation2 + $0xa6]] }
 0x177   :  { %9792 = vst [vmem:[#allocation165_spill] sm:$0xff] %v6409_v55  ;;  %v1486_v6 = vmul.f32 %v6396_v23, %v1478_v33  ;;  %v6425_v62 = vstv %s6329_s18  ;;  %v1524_v22 = vsel %vm9295_vm8, %v6276_v18, %v6105_v25  ;;  %v1482_v11 = vmul.f32 %v6393_v60, %v1479_v35  ;;  %v6458_v37 = vpop.permute.xlu2 %1727  ;;  %s6482_s11 = sld [smem:[#allocation2 + $0x29]]  ;;  %s9349_s18 = smov 94  }
 0x178   :  { %9793 = vst [vmem:[#allocation166_spill] sm:$0xff] %v6411_v44  ;;  %v6434_v56 = vstv %s6335_s10  ;;  %v1506_v47 = vmul.f32 %v6409_v55, %v1503_v21  ;;  %v1525_v12 = vsel %vm9295_vm8, %v6105_v25, %v6276_v18  ;;  %v1487_v59 = vmul.f32 %v6396_v23, %v1479_v35  ;;  %2173 = vrot.lane.b32.xlu0 %v6053_v38, %s9349_s18  ;;  %s6502_s10 = sld [smem:[#allocation2 + $0xbf]] }
 0x179   :  { %9794 = vst [vmem:[#allocation167_spill] sm:$0xff] %v6418_v63  ;;  %v1507_v60 = vmul.f32 %v6409_v55, %v1504_v58  ;;  %v1511_v1 = vmul.f32 %v6418_v63, %v1503_v21  ;;  %vm9311_vm14 = vcmask 924672   ;;  %v1512_v15 = vmul.f32 %v6418_v63, %v1504_v58 }
 0x17a   :  { %9795 = vst [vmem:[#allocation168_spill] sm:$0xff] %v6425_v62  ;;  %v1516_v25 = vmul.f32 %v6425_v62, %v1503_v21  ;;  %v1528_v18 = vsel %vm6348_vm4, %v1524_v22, 0.0  ;;  %v6454_v52 = vstv %s6371_s8  ;;  %v1491_v23 = vmul.f32 %v6434_v56, %v1478_v33  ;;  %s6533_s8 = sld [smem:[#allocation2 + $0x42]] }
 0x17b   :  { %9796 = vst [vmem:[#allocation169_spill] sm:$0xff] %v6434_v56  ;;  %v1492_v55 = vmul.f32 %v6434_v56, %v1479_v35  ;;  %v1529_v31 = vsel %vm6361_vm1, %v1525_v12, 0.0  ;;  %v6465_v50 = vstv %s6386_s9  ;;  %v1508_v63 = vadd.f32 %v1506_v47, %v1481_v20  ;;  %2175 = vrot.lane.b32.xlu1 %v6074_v54, %s9349_s18  ;;  %2199 = vrot.lane.b32.xlu2 %v4280_v8, %s9349_s18  ;;  %s6539_s9 = sld [smem:[#allocation2 + $0x8d]] }
 0x17c   :  { %9797 = vst [vmem:[#allocation170_spill] sm:$0xff] %v6454_v52  ;;  %v1517_v21 = vmul.f32 %v6425_v62, %v1504_v58  ;;  %v6469_v7 = vstv %s6398_s6  ;;  %vm9800_vm3 = vcmp.ge.s32.totalorder %v4430_v27, 1  ;;  %v9801_v22 = vmov 0  ;;  %s6498_s6 = sld [smem:[#allocation2 + $0x74]] }
 0x17d   :  { %9798 = vst [vmem:[#allocation171_spill] sm:$0xff] %v6465_v50  ;;  %vm6475_vm2 = vmand %vm9296_vm0, %vm9800_vm3  ;;  %v1552_v33 = vsel %vm9311_vm14, %v6322_v53, %v6337_v16  ;;  %v1509_v35 = vadd.f32 %v1507_v60, %v1482_v11  ;;  %v1513_v58 = vadd.f32 %v1511_v1, %v1486_v6  ;;  %v1531_v20 = vmul.f32 %v6454_v52, %v1528_v18  ;;  %v6506_v11 = vpop.permute.xlu0 %1623 }
 0x17e   :  { %9799 = vst [vmem:[#allocation172_spill] sm:$0xff] %v6469_v7  ;;  %v9802_v22 = vsel %vm6475_vm2, 4294967295, %v9801_v22  ;;  %vm9804_vm3 = vcmp.ge.s32.totalorder %v4440_v30, 1  ;;  %vm9805_vm8 = vcmp.lt.s32.totalorder %v4438_v29, 15  ;;  %v9806_v47 = vmov 0 }
 0x17f   :  { %9803 = vst [vmem:[#allocation173_spill] sm:$0xff] %v9802_v22  ;;  %vm6491_vm0 = vmand %vm9805_vm8, %vm9804_vm3  ;;  %v1553_v12 = vsel %vm9311_vm14, %v6337_v16, %v6322_v53  ;;  %v1514_v38 = vadd.f32 %v1512_v15, %v1487_v59  ;;  %v1518_v60 = vadd.f32 %v1516_v25, %v1491_v23  ;;  %v1532_v1 = vmul.f32 %v6454_v52, %v1529_v31  ;;  %v6524_v52 = vpop.permute.xlu1 %1625  ;;  %v6541_v8 = vpop.permute.xlu2 %1754 }
 0x180   :  { %v9807_v47 = vsel %vm6491_vm0, 4294967295, %v9806_v47  ;;  %v1536_v6 = vmul.f32 %v6465_v50, %v1528_v18  ;;  %v1537_v62 = vmul.f32 %v6465_v50, %v1529_v31  ;;  %v1541_v53 = vmul.f32 %v6469_v7, %v1528_v18  ;;  %2201 = vrot.lane.b32.xlu0 %v4258_v2, %s9349_s18 }
 0x181   :  { %9808 = vst [vmem:[#allocation174_spill] sm:$0xff] %v9807_v47  ;;  %v1556_v16 = vsel %vm6475_vm2, %v1552_v33, 0.0  ;;  %v6513_v15 = vstv %s6430_s12  ;;  %v6517_v59 = vadd.f32 %v6378_v40, %v6341_v36  ;;  %v1519_v23 = vadd.f32 %v1517_v21, %v1492_v55  ;;  %s6545_s12 = sld [smem:[#allocation2 + $0xd8]] }
 0x182   :  { %9809 = vst [vmem:[#allocation175_spill] sm:$0xff] %v6513_v15  ;;  %v1557_v54 = vsel %vm6491_vm0, %v1553_v12, 0.0  ;;  %v6522_v25 = vstv %s6440_s14  ;;  %v1533_v18 = vadd.f32 %v1531_v20, %v1508_v63  ;;  %v1542_v33 = vmul.f32 %v6469_v7, %v1529_v31  ;;  %s6571_s14 = sld [smem:[#allocation2 + $0x11]] }
 0x183   :  { %9810 = vst [vmem:[#allocation176_spill] sm:$0xff] %v6517_v59  ;;  %v1577_v50 = vsel %vm9311_vm14, %v6164_v24, %v1576_v51  ;;  %v1578_v40 = vsel %vm9311_vm14, %v1576_v51, %v6164_v24  ;;  %v1534_v36 = vadd.f32 %v1532_v1, %v1509_v35  ;;  %v1538_v55 = vadd.f32 %v1536_v6, %v1513_v58 }
 0x184   :  { %9811 = vst [vmem:[#allocation177_spill] sm:$0xff] %v6522_v25  ;;  %v1559_v21 = vmul.f32 %v6513_v15, %v1556_v16  ;;  %v6537_v12 = vstv %s6456_s1  ;;  %v1539_v31 = vadd.f32 %v1537_v62, %v1514_v38  ;;  %v1543_v63 = vadd.f32 %v1541_v53, %v1518_v60  ;;  %2224 = vrot.lane.b32.xlu1 %v4284_v9, %s9349_s18  ;;  %s6577_s1 = sld [smem:[#allocation2 + $0x5c]] }
 0x185   :  { %9812 = vst [vmem:[#allocation178_spill] sm:$0xff] %v6537_v12  ;;  %v1560_v20 = vmul.f32 %v6513_v15, %v1557_v54  ;;  %v1564_v24 = vmul.f32 %v6522_v25, %v1556_v16  ;;  %v1565_v51 = vmul.f32 %v6522_v25, %v1557_v54  ;;  %v1581_v35 = vsel %vm6475_vm2, %v1577_v50, 0.0  ;;  %v1652_v2 = vpop.permute.xlu0 %1651  ;;  %2226 = vrot.lane.b32.xlu2 %v4265_v4, %s9349_s18  ;;  %s6820_s18 = sld [smem:[#allocation2 + $0x45]] }
 0x186   :  { %v1582_v58 = vsel %vm6491_vm0, %v1578_v40, 0.0  ;;  %v6553_v1 = vstv %s6482_s11  ;;  %v1544_v62 = vadd.f32 %v1542_v33, %v1519_v23  ;;  %v1569_v38 = vmul.f32 %v6537_v12, %v1556_v16  ;;  %s6593_s11 = sld [smem:[#allocation2 + $0xa7]] }
 0x187   :  { %9813 = vst [vmem:[#allocation179_spill] sm:$0xff] %v6553_v1  ;;  %v1570_v60 = vmul.f32 %v6537_v12, %v1557_v54  ;;  %v6560_v6 = vstv %s6498_s6  ;;  %v1561_v53 = vadd.f32 %v1559_v21, %v1533_v18  ;;  %v6563_v25 = vstv %s6502_s10  ;;  %s6599_s6 = sld [smem:[#allocation2 + $0x2a]]  ;;  %v6601_v4 = vpop.permute.xlu2 %1805 }
 0x188   :  { %9814 = vst [vmem:[#allocation180_spill] sm:$0xff] %v6560_v6  ;;  %v1602_v50 = vsel %vm9311_vm14, %v6442_v49, %v6229_v19  ;;  %v1603_v40 = vsel %vm9311_vm14, %v6229_v19, %v6442_v49  ;;  %v1562_v16 = vadd.f32 %v1560_v20, %v1534_v36  ;;  %v1566_v23 = vadd.f32 %v1564_v24, %v1538_v55  ;;  %v6581_v49 = vpop.permute.xlu1 %1674  ;;  %s6614_s10 = sld [smem:[#allocation2 + $0x75]] }
 0x189   :  { %9815 = vst [vmem:[#allocation181_spill] sm:$0xff] %v6563_v25  ;;  %v1584_v54 = vmul.f32 %v6553_v1, %v1581_v35  ;;  %v1585_v18 = vmul.f32 %v6553_v1, %v1582_v58  ;;  %v1567_v33 = vadd.f32 %v1565_v51, %v1539_v31  ;;  %v1589_v21 = vmul.f32 %v6560_v6, %v1581_v35 }
 0x18a   :  { %v1590_v19 = vmul.f32 %v6560_v6, %v1582_v58  ;;  %vm9322_vm8 = vcmask 916480   ;;  %v1594_v9 = vmul.f32 %v6563_v25, %v1581_v35  ;;  %v1606_v36 = vsel %vm6475_vm2, %v1602_v50, 0.0 }
 0x18b   :  { %v1607_v55 = vsel %vm6491_vm0, %v1603_v40, 0.0  ;;  %v6591_v31 = vstv %s6533_s8  ;;  %v1571_v20 = vadd.f32 %v1569_v38, %v1543_v63  ;;  %v1572_v24 = vadd.f32 %v1570_v60, %v1544_v62  ;;  %s6618_s8 = sld [smem:[#allocation2 + $0xc0]] }
 0x18c   :  { %9816 = vst [vmem:[#allocation182_spill] sm:$0xff] %v6591_v31  ;;  %v1595_v51 = vmul.f32 %v6563_v25, %v1582_v58  ;;  %v6597_v6 = vstv %s6539_s9  ;;  %v1586_v35 = vadd.f32 %v1584_v54, %v1561_v53  ;;  %v1587_v1 = vadd.f32 %v1585_v18, %v1562_v16  ;;  %s6626_s9 = sld [smem:[#allocation2 + $0x43]] }
 0x18d   :  { %9817 = vst [vmem:[#allocation183_spill] sm:$0xff] %v6597_v6  ;;  %v6604_v50 = vstv %s6545_s12  ;;  %v1628_v40 = vsel %vm9322_vm8, %v6506_v11, %v6524_v52  ;;  %v1591_v12 = vadd.f32 %v1589_v21, %v1566_v23  ;;  %v1609_v63 = vmul.f32 %v6591_v31, %v1606_v36  ;;  %s6648_s12 = sld [smem:[#allocation2 + $0x8e]] }
 0x18e   :  { %9818 = vst [vmem:[#allocation184_spill] sm:$0xff] %v6604_v50  ;;  %v1610_v58 = vmul.f32 %v6591_v31, %v1607_v55  ;;  %v1629_v62 = vsel %vm9322_vm8, %v6524_v52, %v6506_v11  ;;  %v1592_v38 = vadd.f32 %v1590_v19, %v1567_v33  ;;  %v1596_v60 = vadd.f32 %v1594_v9, %v1571_v20  ;;  %v6628_v52 = vpop.permute.xlu0 %1701 }
 0x18f   :  { %v1614_v53 = vmul.f32 %v6597_v6, %v1606_v36  ;;  %v1615_v16 = vmul.f32 %v6597_v6, %v1607_v55  ;;  %v1597_v23 = vadd.f32 %v1595_v51, %v1572_v24  ;;  %v1619_v54 = vmul.f32 %v6604_v50, %v1606_v36 }
 0x190   :  { %vm9819_vm3 = vcmp.lt.s32.totalorder %v4428_v26, 15  ;;  %v6624_v21 = vstv %s6571_s14  ;;  %v1620_v11 = vmul.f32 %v6604_v50, %v1607_v55  ;;  %vm9821_vm14 = vcmp.lt.s32.totalorder %v4438_v29, 15  ;;  %s6657_s14 = sld [smem:[#allocation2 + $0xd9]] }
 0x191   :  { %v1632_v18 = vsel %vm9819_vm3, %v1628_v40, 0.0  ;;  %9820 = vst [vmem:[#allocation185_spill] sm:$0xff] %v6624_v21  ;;  %v1633_v33 = vsel %vm9821_vm14, %v1629_v62, 0.0  ;;  %v6634_v19 = vstv %s6577_s1  ;;  %v1653_v9 = vsel %vm9322_vm8, %v6292_v43, %v1652_v2  ;;  %v1704_v40 = vpop.permute.xlu1 %1703  ;;  %vm9824_vm14 = vmmov %vm9819_vm3  ;;  %s6679_s1 = sld [smem:[#allocation2 + $0x12]] }
 0x192   :  { %9822 = vst [vmem:[#allocation186_spill] sm:$0xff] %v6634_v19  ;;  %v6640_v36 = vadd.f32 %v6388_v0, %v5875_v10  ;;  %v1611_v20 = vadd.f32 %v1609_v63, %v1586_v35  ;;  %v1612_v24 = vadd.f32 %v1610_v58, %v1587_v1  ;;  %v1654_v51 = vsel %vm9322_vm8, %v1652_v2, %v6292_v43  ;;  %v6662_v63 = vpop.permute.xlu2 %1832 }
 0x193   :  { %v1616_v55 = vadd.f32 %v1614_v53, %v1591_v12  ;;  %v1617_v50 = vadd.f32 %v1615_v16, %v1592_v38  ;;  %v1635_v62 = vmul.f32 %v6624_v21, %v1632_v18  ;;  %v6646_v6 = vstv %s6593_s11  ;;  %s6689_s11 = sld [smem:[#allocation2 + $0x5d]] }
 0x194   :  { %9823 = vst [vmem:[#allocation187_spill] sm:$0xff] %v6646_v6  ;;  %v1636_v31 = vmul.f32 %v6624_v21, %v1633_v33  ;;  %v1640_v10 = vmul.f32 %v6634_v19, %v1632_v18  ;;  %v1657_v0 = vsel %vm9824_vm14, %v1653_v9, 0.0  ;;  %v6655_v1 = vstv %s6599_s6  ;;  %s6695_s6 = sld [smem:[#allocation2 + $0xa8]] }
 0x195   :  { %9825 = vst [vmem:[#allocation188_spill] sm:$0xff] %v6655_v1  ;;  %v1621_v43 = vadd.f32 %v1619_v54, %v1596_v60  ;;  %v1622_v12 = vadd.f32 %v1620_v11, %v1597_v23  ;;  %v1641_v2 = vmul.f32 %v6634_v19, %v1633_v33  ;;  %vm9826_vm3 = vcmp.lt.s32.totalorder %v4438_v29, 15 }
 0x196   :  { %v1658_v35 = vsel %vm9826_vm3, %v1654_v51, 0.0  ;;  %v1645_v58 = vmul.f32 %v6646_v6, %v1632_v18  ;;  %v1646_v38 = vmul.f32 %v6646_v6, %v1633_v33  ;;  %v6667_v53 = vstv %s6614_s10  ;;  %v1730_v6 = vpop.permute.xlu0 %1729  ;;  %s6700_s10 = sld [smem:[#allocation2 + $0x2b]] }
 0x197   :  { %9827 = vst [vmem:[#allocation189_spill] sm:$0xff] %v6667_v53  ;;  %v1678_v16 = vsel %vm9322_vm8, %v6581_v49, %v6373_v5  ;;  %v1637_v60 = vadd.f32 %v1635_v62, %v1611_v20  ;;  %v1660_v23 = vmul.f32 %v6655_v1, %v1657_v0  ;;  %v6674_v54 = vstv %s6618_s8  ;;  %s6716_s8 = sld [smem:[#allocation2 + $0x76]] }
 0x198   :  { %9828 = vst [vmem:[#allocation190_spill] sm:$0xff] %v6674_v54  ;;  %v1679_v11 = vsel %vm9322_vm8, %v6373_v5, %v6581_v49  ;;  %v1638_v18 = vadd.f32 %v1636_v31, %v1612_v24  ;;  %v1642_v9 = vadd.f32 %v1640_v10, %v1616_v55  ;;  %v1661_v33 = vmul.f32 %v6655_v1, %v1658_v35  ;;  %vm9830_vm8 = vmmov %vm9826_vm3 }
 0x199   :  { %v6683_v51 = vstv %s6626_s9  ;;  %v1665_v20 = vmul.f32 %v6667_v53, %v1657_v0  ;;  %v1666_v62 = vmul.f32 %v6667_v53, %v1658_v35  ;;  %v1682_v19 = vsel %vm9824_vm14, %v1678_v16, 0.0  ;;  %v1753_v55 = vpop.permute.xlu1 %1752  ;;  %s6729_s9 = sld [smem:[#allocation2 + $0xc1]] }
 0x19a   :  { %9829 = vst [vmem:[#allocation191_spill] sm:$0xff] %v6683_v51  ;;  %v1643_v5 = vadd.f32 %v1641_v2, %v1617_v50  ;;  %v1670_v49 = vmul.f32 %v6674_v54, %v1657_v0  ;;  %v1671_v31 = vmul.f32 %v6674_v54, %v1658_v35  ;;  %v1683_v24 = vsel %vm9830_vm8, %v1679_v11, 0.0 }
 0x19b   :  { %v1647_v10 = vadd.f32 %v1645_v58, %v1621_v43  ;;  %v1648_v53 = vadd.f32 %v1646_v38, %v1622_v12  ;;  %v1662_v1 = vadd.f32 %v1660_v23, %v1637_v60  ;;  %v6698_v21 = vstv %s6648_s12  ;;  %s6733_s12 = sld [smem:[#allocation2 + $0x44]] }
 0x19c   :  { %9831 = vst [vmem:[#allocation192_spill] sm:$0xff] %v6698_v21  ;;  %v1663_v16 = vadd.f32 %v1661_v33, %v1638_v18  ;;  %v1685_v50 = vmul.f32 %v6683_v51, %v1682_v19  ;;  %v6704_v2 = vstv %s6657_s14  ;;  %vm9833_vm14 = vcmp.lt.s32.totalorder %v4430_v27, 15  ;;  %s6763_s14 = sld [smem:[#allocation2 + $0x8f]] }
 0x19d   :  { %9832 = vst [vmem:[#allocation193_spill] sm:$0xff] %v6704_v2  ;;  %vm9834_vm3 = vcmp.lt.s32.totalorder %v4428_v26, 15  ;;  %v9835_v0 = vmov 0  ;;  %vm9838_vm0 = vcmask 908288   ;;  %v1667_v12 = vadd.f32 %v1665_v20, %v1642_v9 }
 0x19e   :  { %vm6710_vm8 = vmand %vm9834_vm3, %vm9833_vm14  ;;  %v1706_v43 = vsel %vm9838_vm0, %v6628_v52, %v1704_v40  ;;  %v1668_v35 = vadd.f32 %v1666_v62, %v1643_v5  ;;  %v1686_v58 = vmul.f32 %v6683_v51, %v1683_v24  ;;  %vm9839_vm2 = vcmp.lt.s32.totalorder %v4440_v30, 15 }
 0x19f   :  { %v9836_v0 = vsel %vm6710_vm8, 4294967295, %v9835_v0  ;;  %vm9840_vm1 = vcmp.lt.s32.totalorder %v4438_v29, 15  ;;  %v9841_v38 = vmov 0  ;;  %vm9844_vm3 = vmmov %vm9838_vm0  ;;  %v1672_v23 = vadd.f32 %v1670_v49, %v1647_v10 }
 0x1a0   :  { %9837 = vst [vmem:[#allocation194_spill] sm:$0xff] %v9836_v0  ;;  %vm6723_vm4 = vmand %vm9840_vm1, %vm9839_vm2  ;;  %v1707_v60 = vsel %vm9844_vm3, %v1704_v40, %v6628_v52  ;;  %v1673_v11 = vadd.f32 %v1671_v31, %v1648_v53  ;;  %v1690_v18 = vmul.f32 %v6698_v21, %v1682_v19  ;;  %v1691_v9 = vmul.f32 %v6698_v21, %v1683_v24  ;;  %v6742_v40 = vpop.permute.xlu2 %1889  ;;  %v6754_v31 = vpop.permute.xlu0 %1779 }
 0x1a1   :  { %v9842_v38 = vsel %vm6723_vm4, 4294967295, %v9841_v38  ;;  %v1695_v33 = vmul.f32 %v6704_v2, %v1682_v19  ;;  %v1696_v20 = vmul.f32 %v6704_v2, %v1683_v24  ;;  %v1710_v62 = vsel %vm6710_vm8, %v1706_v43, 0.0  ;;  %vm9847_vm1 = vmmov %vm9838_vm0 }
 0x1a2   :  { %9843 = vst [vmem:[#allocation195_spill] sm:$0xff] %v9842_v38  ;;  %v6740_v52 = vstv %s6679_s1  ;;  %v6746_v53 = vadd.f32 %v6402_v61, %v6117_v28  ;;  %v6750_v5 = vadd.f32 %v6413_v42, %v6168_v41  ;;  %v1687_v49 = vadd.f32 %v1685_v50, %v1662_v1  ;;  %s6769_s1 = sld [smem:[#allocation2 + $0xda]]  ;;  %vm9852_vm2 = vmmov %vm9838_vm0 }
 0x1a3   :  { %9845 = vst [vmem:[#allocation196_spill] sm:$0xff] %v6740_v52  ;;  %v1711_v19 = vsel %vm6723_vm4, %v1707_v60, 0.0  ;;  %v1688_v24 = vadd.f32 %v1686_v58, %v1663_v16  ;;  %v6757_v10 = vstv %s6689_s11  ;;  %v1731_v43 = vsel %vm9847_vm1, %v6458_v37, %v1730_v6  ;;  %v1782_v16 = vpop.permute.xlu1 %1781  ;;  %s6775_s11 = sld [smem:[#allocation2 + $0x13]]  ;;  %vm9853_vm14 = vmmov %vm9838_vm0 }
 0x1a4   :  { %9846 = vst [vmem:[#allocation197_spill] sm:$0xff] %v6757_v10  ;;  %v1732_v28 = vsel %vm9838_vm0, %v1730_v6, %v6458_v37  ;;  %v1692_v41 = vadd.f32 %v1690_v18, %v1667_v12  ;;  %v1693_v61 = vadd.f32 %v1691_v9, %v1668_v35  ;;  %v1713_v42 = vmul.f32 %v6740_v52, %v1710_v62 }
 0x1a5   :  { %v6767_v1 = vstv %s6695_s6  ;;  %v1697_v50 = vadd.f32 %v1695_v33, %v1672_v23  ;;  %v1698_v58 = vadd.f32 %v1696_v20, %v1673_v11  ;;  %v1714_v60 = vmul.f32 %v6740_v52, %v1711_v19  ;;  %s6785_s6 = sld [smem:[#allocation2 + $0x5e]] }
 0x1a6   :  { %9848 = vst [vmem:[#allocation198_spill] sm:$0xff] %v6767_v1  ;;  %v6773_v2 = vstv %s6700_s10  ;;  %v1718_v37 = vmul.f32 %v6757_v10, %v1710_v62  ;;  %v1735_v6 = vsel %vm6710_vm8, %v1731_v43, 0.0  ;;  %v1736_v12 = vsel %vm6723_vm4, %v1732_v28, 0.0  ;;  %s6794_s10 = sld [smem:[#allocation2 + $0xa9]] }
 0x1a7   :  { %9849 = vst [vmem:[#allocation199_spill] sm:$0xff] %v6773_v2  ;;  %v6783_v35 = vstv %s6716_s8  ;;  %v1719_v23 = vmul.f32 %v6757_v10, %v1711_v19  ;;  %v1723_v11 = vmul.f32 %v6767_v1, %v1710_v62  ;;  %v6790_v18 = vstv %s6729_s9  ;;  %s6802_s8 = sld [smem:[#allocation2 + $0x2c]] }
 0x1a8   :  { %9850 = vst [vmem:[#allocation200_spill] sm:$0xff] %v6783_v35  ;;  %v1756_v9 = vsel %vm9852_vm2, %v1753_v55, %v6541_v8  ;;  %v1715_v33 = vadd.f32 %v1713_v42, %v1687_v49  ;;  %v1724_v20 = vmul.f32 %v6767_v1, %v1711_v19  ;;  %v1757_v43 = vsel %vm9853_vm14, %v6541_v8, %v1753_v55  ;;  %s6807_s9 = sld [smem:[#allocation2 + $0x77]]  ;;  %v1808_v42 = vpop.permute.xlu0 %1807 }
 0x1a9   :  { %9851 = vst [vmem:[#allocation201_spill] sm:$0xff] %v6790_v18  ;;  %v6800_v28 = vstv %s6733_s12  ;;  %v1716_v10 = vadd.f32 %v1714_v60, %v1688_v24  ;;  %v1738_v62 = vmul.f32 %v6773_v2, %v1735_v6  ;;  %v1739_v52 = vmul.f32 %v6773_v2, %v1736_v12  ;;  %s6813_s12 = sld [smem:[#allocation2 + $0xc2]] }
 0x1aa   :  { %9854 = vst [vmem:[#allocation202_spill] sm:$0xff] %v6800_v28  ;;  %v1743_v21 = vmul.f32 %v6783_v35, %v1735_v6  ;;  %v1720_v49 = vadd.f32 %v1718_v37, %v1692_v41  ;;  %v1744_v19 = vmul.f32 %v6783_v35, %v1736_v12  ;;  %v1748_v8 = vmul.f32 %v6790_v18, %v1735_v6  ;;  %v6822_v41 = vpop.permute.xlu2 %1916 }
 0x1ab   :  { %v1760_v55 = vsel %vm6710_vm8, %v1756_v9, 0.0  ;;  %v1721_v24 = vadd.f32 %v1719_v23, %v1693_v61  ;;  %v1725_v60 = vadd.f32 %v1723_v11, %v1697_v50  ;;  %v1761_v2 = vsel %vm6723_vm4, %v1757_v43, 0.0  ;;  %v1831_v9 = vpop.permute.xlu1 %1830 }
 0x1ac   :  { %v6818_v1 = vstv %s6763_s14  ;;  %v1726_v37 = vadd.f32 %v1724_v20, %v1698_v58  ;;  %v1749_v6 = vmul.f32 %v6790_v18, %v1736_v12  ;;  %v6826_v35 = vstv %s6769_s1  ;;  %s6855_s14 = sld [smem:[#allocation2 + $0xdb]] }
 0x1ad   :  { %9855 = vst [vmem:[#allocation203_spill] sm:$0xff] %v6818_v1  ;;  %v1740_v61 = vadd.f32 %v1738_v62, %v1715_v33  ;;  %v1741_v50 = vadd.f32 %v1739_v52, %v1716_v10  ;;  %v1745_v23 = vadd.f32 %v1743_v21, %v1720_v49  ;;  %v1763_v11 = vmul.f32 %v6800_v28, %v1760_v55  ;;  %s6864_s1 = sld [smem:[#allocation2 + $0x14]] }
 0x1ae   :  { %9856 = vst [vmem:[#allocation204_spill] sm:$0xff] %v6826_v35  ;;  %v1746_v43 = vadd.f32 %v1744_v19, %v1721_v24  ;;  %v1750_v38 = vadd.f32 %v1748_v8, %v1725_v60  ;;  %v1764_v58 = vmul.f32 %v6800_v28, %v1761_v2  ;;  %v1768_v12 = vmul.f32 %v6818_v1, %v1760_v55 }
 0x1af   :  { %vm9857_vm1 = vcmp.lt.s32.totalorder %v4430_v27, 14  ;;  %vm9858_vm0 = vcmp.lt.s32.totalorder %v4428_v26, 15  ;;  %v9859_v52 = vmov 0  ;;  %v1769_v21 = vmul.f32 %v6818_v1, %v1761_v2 }
 0x1b0   :  { %vm6837_vm2 = vmand %vm9858_vm0, %vm9857_vm1  ;;  %v1773_v10 = vmul.f32 %v6826_v35, %v1760_v55  ;;  %vm9862_vm14 = vcmp.lt.s32.totalorder %v4440_v30, 14  ;;  %vm9863_vm3 = vcmp.lt.s32.totalorder %v4438_v29, 15  ;;  %v9864_v33 = vmov 0 }
 0x1b1   :  { %v9860_v52 = vsel %vm6837_vm2, 4294967295, %v9859_v52  ;;  %vm6847_vm4 = vmand %vm9863_vm3, %vm9862_vm14  ;;  %vm9867_vm8 = vcmask 900096   ;;  %v1751_v49 = vadd.f32 %v1749_v6, %v1726_v37  ;;  %v1774_v19 = vmul.f32 %v6826_v35, %v1761_v2  ;;  %v6885_v6 = vpop.permute.xlu0 %1863 }
 0x1b2   :  { %9861 = vst [vmem:[#allocation205_spill] sm:$0xff] %v9860_v52  ;;  %v9865_v33 = vsel %vm6847_vm4, 4294967295, %v9864_v33  ;;  %v1784_v20 = vsel %vm9867_vm8, %v6754_v31, %v1782_v16  ;;  %vm9868_vm1 = vmmov %vm9867_vm8  ;;  %v6859_v8 = vstv %s6775_s11  ;;  %v6862_v55 = vstv %s6785_s6  ;;  %s6887_s11 = sld [smem:[#allocation2 + $0xaa]] }
 0x1b3   :  { %9866 = vst [vmem:[#allocation206_spill] sm:$0xff] %v9865_v33  ;;  %v1785_v62 = vsel %vm9868_vm1, %v1782_v16, %v6754_v31  ;;  %v1765_v24 = vadd.f32 %v1763_v11, %v1740_v61  ;;  %v6867_v60 = vstv %s6794_s10  ;;  %v6870_v1 = vstv %s6802_s8  ;;  %vm9874_vm8 = vmmov %vm9868_vm1  ;;  %s6889_s6 = sld [smem:[#allocation2 + $0x2d]]  ;;  %v1866_v54 = vpop.permute.xlu1 %1865 }
 0x1b4   :  { %9869 = vst [vmem:[#allocation207_spill] sm:$0xff] %v6859_v8  ;;  %v6873_v28 = vstv %s6807_s9  ;;  %v1788_v2 = vsel %vm6837_vm2, %v1784_v20, 0.0  ;;  %v1789_v31 = vsel %vm6847_vm4, %v1785_v62, 0.0  ;;  %v1809_v16 = vsel %vm9874_vm8, %v6601_v4, %v1808_v42  ;;  %vm9875_vm3 = vmmov %vm9868_vm1  ;;  %s6900_s10 = sld [smem:[#allocation2 + $0x78]] }
 0x1b5   :  { %9870 = vst [vmem:[#allocation208_spill] sm:$0xff] %v6862_v55  ;;  %v1810_v37 = vsel %vm9875_vm3, %v1808_v42, %v6601_v4  ;;  %v1766_v61 = vadd.f32 %v1764_v58, %v1741_v50  ;;  %v1770_v11 = vadd.f32 %v1768_v12, %v1745_v23  ;;  %v1771_v35 = vadd.f32 %v1769_v21, %v1746_v43  ;;  %s6908_s8 = sld [smem:[#allocation2 + $0xc3]]  ;;  %v6910_v23 = vpop.permute.xlu2 %1967  ;;  %vm9879_vm0 = vmmov %vm9868_vm1 }
 0x1b6   :  { %9871 = vst [vmem:[#allocation209_spill] sm:$0xff] %v6867_v60  ;;  %v1775_v18 = vadd.f32 %v1773_v10, %v1750_v38  ;;  %v1776_v20 = vadd.f32 %v1774_v19, %v1751_v49  ;;  %v6892_v0 = vstv %s6813_s12  ;;  %v6895_v62 = vstv %s6820_s18  ;;  %vm9880_vm14 = vmmov %vm9879_vm0  ;;  %s6929_s18 = sld [smem:[#allocation2 + $0x91]] }
 0x1b7   :  { %9872 = vst [vmem:[#allocation210_spill] sm:$0xff] %v6870_v1  ;;  %v6898_v51 = vstv %s6828_s16  ;;  %v1791_v4 = vmul.f32 %v6859_v8, %v1788_v2  ;;  %v1792_v42 = vmul.f32 %v6859_v8, %v1789_v31  ;;  %v1813_v38 = vsel %vm6837_vm2, %v1809_v16, 0.0  ;;  %s6918_s16 = sld [smem:[#allocation2 + $0x46]] }
 0x1b8   :  { %9873 = vst [vmem:[#allocation211_spill] sm:$0xff] %v6873_v28  ;;  %v1814_v50 = vsel %vm6847_vm4, %v1810_v37, 0.0  ;;  %v1796_v43 = vmul.f32 %v6862_v55, %v1788_v2  ;;  %v1797_v58 = vmul.f32 %v6862_v55, %v1789_v31  ;;  %v1834_v12 = vsel %vm9879_vm0, %v1831_v9, %v6662_v63  ;;  %s6938_s9 = sld [smem:[#allocation2 + $0xdc]] }
 0x1b9   :  { %9876 = vst [vmem:[#allocation212_spill] sm:$0xff] %v6892_v0  ;;  %v1835_v21 = vsel %vm9880_vm14, %v6662_v63, %v1831_v9  ;;  %v1801_v10 = vmul.f32 %v6867_v60, %v1788_v2  ;;  %v6922_v49 = vstv %s6855_s14  ;;  %vm9391_vm8 = vcmp.lt.s32.totalorder %v4428_v26, 14  ;;  %v1892_v25 = vpop.permute.xlu0 %1891  ;;  %s6941_s12 = sld [smem:[#allocation2 + $0x15]] }
 0x1ba   :  { %9877 = vst [vmem:[#allocation213_spill] sm:$0xff] %v6895_v62  ;;  %v1802_v19 = vmul.f32 %v6867_v60, %v1789_v31  ;;  %v1816_v16 = vmul.f32 %v6870_v1, %v1813_v38  ;;  %v1817_v37 = vmul.f32 %v6870_v1, %v1814_v50  ;;  %vm9436_vm3 = vcmp.lt.s32.totalorder %v4438_v29, 14  ;;  %s6946_s14 = sld [smem:[#allocation2 + $0x60]] }
 0x1bb   :  { %9878 = vst [vmem:[#allocation214_spill] sm:$0xff] %v6898_v51  ;;  %v1793_v63 = vadd.f32 %v1791_v4, %v1765_v24  ;;  %v1838_v9 = vsel %vm6837_vm2, %v1834_v12, 0.0  ;;  %v1839_v2 = vsel %vm6847_vm4, %v1835_v21, 0.0  ;;  %v6936_v55 = vstv %s6864_s1  ;;  %s6950_s1 = sld [smem:[#allocation2 + $0xab]] }
 0x1bc   :  { %9881 = vst [vmem:[#allocation215_spill] sm:$0xff] %v6922_v49  ;;  %v1794_v31 = vadd.f32 %v1792_v42, %v1766_v61  ;;  %v1798_v60 = vadd.f32 %v1796_v43, %v1770_v11  ;;  %v1799_v8 = vadd.f32 %v1797_v58, %v1771_v35  ;;  %v1821_v1 = vmul.f32 %v6873_v28, %v1813_v38  ;;  %v1915_v43 = vpop.permute.xlu1 %1914 }
 0x1bd   :  { %9882 = vst [vmem:[#allocation216_spill] sm:$0xff] %v6936_v55  ;;  %v1803_v24 = vadd.f32 %v1801_v10, %v1775_v18  ;;  %v1822_v4 = vmul.f32 %v6873_v28, %v1814_v50  ;;  %v1826_v12 = vmul.f32 %v6892_v0, %v1813_v38  ;;  %v1827_v21 = vmul.f32 %v6892_v0, %v1814_v50 }
 0x1be   :  { %v1818_v35 = vadd.f32 %v1816_v16, %v1793_v63  ;;  %v1819_v61 = vadd.f32 %v1817_v37, %v1794_v31  ;;  %v1841_v11 = vmul.f32 %v6895_v62, %v1838_v9  ;;  %v1842_v42 = vmul.f32 %v6895_v62, %v1839_v2 }
 0x1bf   :  { %v1804_v18 = vadd.f32 %v1802_v19, %v1776_v20  ;;  %v6953_v58 = vstv %s6875_s21  ;;  %v6956_v38 = vstv %s6887_s11  ;;  %v6959_v10 = vstv %s6889_s6  ;;  %s6982_s21 = sld [smem:[#allocation2 + $0x79]] }
 0x1c0   :  { %9883 = vst [vmem:[#allocation217_spill] sm:$0xff] %v6953_v58  ;;  %v6963_v50 = vadd.f32 %v1821_v1, %v1798_v60  ;;  %vm9886_vm0 = vcmp.ge.s32.totalorder %v4430_v27, 2  ;;  %v9887_v16 = vmov 0  ;;  %v6974_v37 = vstv %s6900_s10  ;;  %s6997_s11 = sld [smem:[#allocation2 + $0xc4]] }
 0x1c1   :  { %9884 = vst [vmem:[#allocation218_spill] sm:$0xff] %v6956_v38  ;;  %vm6969_vm14 = vmand %vm9391_vm8, %vm9886_vm0  ;;  %v6977_v20 = vstv %s6908_s8  ;;  %v6980_v19 = vstv %s6918_s16  ;;  %v1824_v63 = vadd.f32 %v1822_v4, %v1799_v8  ;;  %v1847_v1 = vmul.f32 %v6898_v51, %v1839_v2  ;;  %v6999_v8 = vpop.permute.xlu2 %1994  ;;  %s7005_s6 = sld [smem:[#allocation2 + $0x47]] }
 0x1c2   :  { %9885 = vst [vmem:[#allocation219_spill] sm:$0xff] %v6959_v10  ;;  %v9888_v16 = vsel %vm6969_vm14, 4294967295, %v9887_v16  ;;  %vm9893_vm1 = vcmp.ge.s32.totalorder %v4440_v30, 2  ;;  %v9894_v60 = vmov 0  ;;  %vm9897_vm0 = vcmask 801792   ;;  %s7017_s10 = sld [smem:[#allocation2 + $0x92]] }
 0x1c3   :  { %9889 = vst [vmem:[#allocation220_spill] sm:$0xff] %v9888_v16  ;;  %vm6989_vm4 = vmand %vm9436_vm3, %vm9893_vm1  ;;  %v1868_v31 = vsel %vm9897_vm0, %v6885_v6, %v1866_v54  ;;  %v7001_v4 = vadd.f32 %v1826_v12, %v1803_v24  ;;  %v7003_v0 = vadd.f32 %v1827_v21, %v1804_v18  ;;  %v1843_v28 = vadd.f32 %v1841_v11, %v1818_v35  ;;  %s7029_s8 = sld [smem:[#allocation2 + $0xdd]] }
 0x1c4   :  { %9890 = vst [vmem:[#allocation221_spill] sm:$0xff] %v6974_v37  ;;  %v9895_v60 = vsel %vm6989_vm4, 4294967295, %v9894_v60  ;;  %vm9898_vm8 = vmmov %vm9897_vm0  ;;  %v1844_v33 = vadd.f32 %v1842_v42, %v1819_v61  ;;  %v7008_v52 = vmul.f32 %v6898_v51, %v1838_v9  ;;  %v7020_v12 = vmul.f32 %v6922_v49, %v1839_v2  ;;  %v1942_v61 = vpop.permute.xlu0 %1941  ;;  %s7049_s16 = sld [smem:[#allocation2 + $0x16]] }
 0x1c5   :  { %9891 = vst [vmem:[#allocation222_spill] sm:$0xff] %v6977_v20  ;;  %v1869_v62 = vsel %vm9898_vm8, %v1866_v54, %v6885_v6  ;;  %v7011_v54 = vmul.f32 %v6922_v49, %v1838_v9  ;;  %vm9899_vm1 = vmmov %vm9897_vm0  ;;  %v1872_v21 = vsel %vm6969_vm14, %v1868_v31, 0.0  ;;  %v7027_v9 = vstv %s6929_s18  ;;  %v1944_v31 = vpop.permute.xlu1 %1943  ;;  %s7059_s18 = sld [smem:[#allocation2 + $0x61]] }
 0x1c6   :  { %9892 = vst [vmem:[#allocation223_spill] sm:$0xff] %v6980_v19  ;;  %v1893_v6 = vsel %vm9899_vm1, %v6742_v40, %v1892_v25  ;;  %vm9900_vm8 = vmmov %vm9897_vm0  ;;  %v1873_v35 = vsel %vm6989_vm4, %v1869_v62, 0.0  ;;  %v7031_v11 = vadd.f32 %v1847_v1, %v1824_v63  ;;  %v7040_v2 = vadd.f32 %v1843_v28, %v6640_v36 }
 0x1c7   :  { %9896 = vst [vmem:[#allocation224_spill] sm:$0xff] %v9895_v60  ;;  %v1894_v24 = vsel %vm9900_vm8, %v1892_v25, %v6742_v40  ;;  %v7034_v25 = vstv %s6938_s9  ;;  %v7037_v40 = vstv %s6941_s12  ;;  %v7043_v42 = vadd.f32 %v1844_v33, %v6746_v53  ;;  %vm9907_vm1 = vmmov %vm9897_vm0  ;;  %s7067_s9 = sld [smem:[#allocation2 + $0xac]] }
 0x1c8   :  { %9901 = vst [vmem:[#allocation225_spill] sm:$0xff] %v7020_v12  ;;  %v1897_v62 = vsel %vm6969_vm14, %v1893_v6, 0.0  ;;  %v1898_v18 = vsel %vm6989_vm4, %v1894_v24, 0.0  ;;  %v1875_v63 = vmul.f32 %v6936_v55, %v1872_v21  ;;  %v1876_v1 = vmul.f32 %v6936_v55, %v1873_v35  ;;  %vm9908_vm8 = vmmov %vm9897_vm0  ;;  %s7073_s12 = sld [smem:[#allocation2 + $0x2f]] }
 0x1c9   :  { %9902 = vst [vmem:[#allocation226_spill] sm:$0xff] %v7027_v9  ;;  %v7054_v49 = vstv %s6946_s14  ;;  %v7057_v36 = vstv %s6950_s1  ;;  %v1880_v53 = vmul.f32 %v6953_v58, %v1872_v21  ;;  %v1881_v28 = vmul.f32 %v6953_v58, %v1873_v35  ;;  %s7083_s14 = sld [smem:[#allocation2 + $0x7a]]  ;;  %v7093_v56 = vpop.permute.xlu2 %2043 }
 0x1ca   :  { %9903 = vst [vmem:[#allocation227_spill] sm:$0xff] %v7034_v25  ;;  %v1918_v33 = vsel %vm9907_vm1, %v1915_v43, %v6822_v41  ;;  %v1919_v6 = vsel %vm9908_vm8, %v6822_v41, %v1915_v43  ;;  %v1900_v24 = vmul.f32 %v6959_v10, %v1897_v62  ;;  %v1901_v55 = vmul.f32 %v6959_v10, %v1898_v18  ;;  %s7095_s1 = sld [smem:[#allocation2 + $0xc5]] }
 0x1cb   :  { %9904 = vst [vmem:[#allocation228_spill] sm:$0xff] %v7037_v40  ;;  %v1905_v51 = vmul.f32 %v6974_v37, %v1897_v62  ;;  %v1906_v15 = vmul.f32 %v6974_v37, %v1898_v18  ;;  %v1885_v58 = vmul.f32 %v6956_v38, %v1872_v21  ;;  %v1886_v47 = vmul.f32 %v6956_v38, %v1873_v35 }
 0x1cc   :  { %9905 = vst [vmem:[#allocation229_spill] sm:$0xff] %v7054_v49  ;;  %v7078_v41 = vstv %s6961_s22  ;;  %v7081_v43 = vstv %s6982_s21  ;;  %v1910_v10 = vmul.f32 %v6977_v20, %v1897_v62  ;;  %v1922_v22 = vsel %vm6969_vm14, %v1918_v33, 0.0  ;;  %v1970_v35 = vpop.permute.xlu0 %1969  ;;  %s7107_s22 = sld [smem:[#allocation2 + $0x48]] }
 0x1cd   :  { %9906 = vst [vmem:[#allocation230_spill] sm:$0xff] %v7057_v36  ;;  %v1923_v37 = vsel %vm6989_vm4, %v1919_v6, 0.0  ;;  %v7091_v7 = vstv %s6997_s11  ;;  %v1911_v21 = vmul.f32 %v6977_v20, %v1898_v18  ;;  %v7099_v38 = vstv %s7005_s6  ;;  %s7117_s21 = sld [smem:[#allocation2 + $0x93]] }
 0x1ce   :  { %9909 = vst [vmem:[#allocation231_spill] sm:$0xff] %v7078_v41  ;;  %v7102_v17 = vstv %s7017_s10  ;;  %v7105_v62 = vstv %s7029_s8  ;;  %v1902_v33 = vadd.f32 %v1900_v24, %v1875_v63  ;;  %v1903_v60 = vadd.f32 %v1901_v55, %v1876_v1  ;;  %v1993_v63 = vpop.permute.xlu1 %1992  ;;  %s7131_s11 = sld [smem:[#allocation2 + $0xde]] }
 0x1cf   :  { %9910 = vst [vmem:[#allocation232_spill] sm:$0xff] %v7081_v43  ;;  %v1907_v6 = vadd.f32 %v1905_v51, %v1880_v53  ;;  %v1908_v16 = vadd.f32 %v1906_v15, %v1881_v28  ;;  %vm9915_vm1 = vcmp.ge.s32.totalorder %v4430_v27, 1  ;;  %vm9916_vm8 = vcmp.lt.s32.totalorder %v4428_v26, 14  ;;  %s7136_s6 = sld [smem:[#allocation2 + $0x17]] }
 0x1d0   :  { %9911 = vst [vmem:[#allocation233_spill] sm:$0xff] %v7091_v7  ;;  %vm7113_vm0 = vmand %vm9916_vm8, %vm9915_vm1  ;;  %v9917_v13 = vmov 0  ;;  %v1925_v18 = vmul.f32 %v6980_v19, %v1922_v22  ;;  %v1926_v20 = vmul.f32 %v6980_v19, %v1923_v37  ;;  %vm9920_vm3 = vcmp.ge.s32.totalorder %v4440_v30, 1  ;;  %s7160_s10 = sld [smem:[#allocation2 + $0x62]] }
 0x1d1   :  { %9912 = vst [vmem:[#allocation234_spill] sm:$0xff] %v7099_v38  ;;  %v9918_v13 = vsel %vm7113_vm0, 4294967295, %v9917_v13  ;;  %vm9921_vm4 = vcmp.lt.s32.totalorder %v4438_v29, 14  ;;  %v9922_v15 = vmov 0  ;;  %vm9925_vm1 = vcmask 793600   ;;  %s7164_s8 = sld [smem:[#allocation2 + $0xad]] }
 0x1d2   :  { %9913 = vst [vmem:[#allocation235_spill] sm:$0xff] %v7102_v17  ;;  %vm7125_vm14 = vmand %vm9921_vm4, %vm9920_vm3  ;;  %v1946_v51 = vsel %vm9925_vm1, %v1942_v61, %v1944_v31  ;;  %v1912_v1 = vadd.f32 %v1910_v10, %v1885_v58  ;;  %v1930_v53 = vmul.f32 %v7027_v9, %v1922_v22  ;;  %v1931_v28 = vmul.f32 %v7027_v9, %v1923_v37 }
 0x1d3   :  { %9914 = vst [vmem:[#allocation236_spill] sm:$0xff] %v7105_v62  ;;  %v9923_v15 = vsel %vm7125_vm14, 4294967295, %v9922_v15  ;;  %vm9926_vm8 = vmmov %vm9925_vm1  ;;  %v1935_v24 = vmul.f32 %v7034_v25, %v1922_v22  ;;  %v1913_v19 = vadd.f32 %v1911_v21, %v1886_v47  ;;  %v1936_v57 = vmul.f32 %v7034_v25, %v1923_v37 }
 0x1d4   :  { %9919 = vst [vmem:[#allocation237_spill] sm:$0xff] %v9918_v13  ;;  %v1947_v55 = vsel %vm9926_vm8, %v1944_v31, %v1942_v61  ;;  %v7140_v3 = vstv %s7049_s16  ;;  %v7143_v61 = vstv %s7059_s18  ;;  %v1950_v31 = vsel %vm7113_vm0, %v1946_v51, 0.0  ;;  %vm9931_vm3 = vmmov %vm9925_vm1  ;;  %v2018_v32 = vpop.permute.xlu0 %2017  ;;  %s7190_s16 = sld [smem:[#allocation2 + $0x30]] }
 0x1d5   :  { %9924 = vst [vmem:[#allocation238_spill] sm:$0xff] %v9923_v15  ;;  %v1951_v58 = vsel %vm7125_vm14, %v1947_v55, 0.0  ;;  %vm9483_vm4 = vcmask 785408   ;;  %v7150_v10 = vstv %s7067_s9  ;;  %v7153_v9 = vstv %s7073_s12  ;;  %vm9935_vm8 = vmmov %vm9925_vm1  ;;  %s7199_s18 = sld [smem:[#allocation2 + $0x7b]] }
 0x1d6   :  { %9927 = vst [vmem:[#allocation239_spill] sm:$0xff] %v7140_v3  ;;  %v1927_v22 = vadd.f32 %v1925_v18, %v1902_v33  ;;  %v1928_v46 = vadd.f32 %v1926_v20, %v1903_v60  ;;  %v1971_v47 = vsel %vm9931_vm3, %v6910_v23, %v1970_v35  ;;  %v7158_v37 = vstv %s7083_s14  ;;  %vm9938_vm3 = vmmov %vm9925_vm1  ;;  %s7202_s9 = sld [smem:[#allocation2 + $0xc6]] }
 0x1d7   :  { %9928 = vst [vmem:[#allocation240_spill] sm:$0xff] %v7143_v61  ;;  %v1932_v21 = vadd.f32 %v1930_v53, %v1907_v6  ;;  %v1933_v51 = vadd.f32 %v1931_v28, %v1908_v16  ;;  %v1937_v25 = vadd.f32 %v1935_v24, %v1912_v1  ;;  %v1972_v55 = vsel %vm9925_vm1, %v1970_v35, %v6910_v23  ;;  %v7175_v23 = vpop.permute.xlu2 %2070  ;;  %v2020_v53 = vpop.permute.xlu1 %2019  ;;  %s7213_s12 = sld [smem:[#allocation2 + $0x49]] }
 0x1d8   :  { %9929 = vst [vmem:[#allocation241_spill] sm:$0xff] %v7150_v10  ;;  %v1938_v20 = vadd.f32 %v1936_v57, %v1913_v19  ;;  %v1953_v60 = vmul.f32 %v7037_v40, %v1950_v31  ;;  %v1954_v33 = vmul.f32 %v7037_v40, %v1951_v58  ;;  %v1958_v18 = vmul.f32 %v7054_v49, %v1950_v31  ;;  %s7221_s14 = sld [smem:[#allocation2 + $0x94]] }
 0x1d9   :  { %9930 = vst [vmem:[#allocation242_spill] sm:$0xff] %v7153_v9  ;;  %v1959_v6 = vmul.f32 %v7054_v49, %v1951_v58  ;;  %v1975_v16 = vsel %vm7113_vm0, %v1971_v47, 0.0  ;;  %v7173_v1 = vstv %s7095_s1  ;;  %v7178_v35 = vstv %s7107_s22  ;;  %s7226_s1 = sld [smem:[#allocation2 + $0xdf]] }
 0x1da   :  { %9932 = vst [vmem:[#allocation243_spill] sm:$0xff] %v7158_v37  ;;  %v1976_v57 = vsel %vm7125_vm14, %v1972_v55, 0.0  ;;  %v1996_v19 = vsel %vm9935_vm8, %v1993_v63, %v6999_v8  ;;  %v7185_v28 = vstv %s7117_s21  ;;  %v7188_v24 = vstv %s7131_s11  ;;  %s7230_s22 = sld [smem:[#allocation2 + $0x18]] }
 0x1db   :  { %9933 = vst [vmem:[#allocation244_spill] sm:$0xff] %v7173_v1  ;;  %v1963_v47 = vmul.f32 %v7057_v36, %v1950_v31  ;;  %v1964_v49 = vmul.f32 %v7057_v36, %v1951_v58  ;;  %v1997_v40 = vsel %vm9938_vm3, %v6999_v8, %v1993_v63  ;;  %v7197_v14 = vstv %s7136_s6  ;;  %s7250_s21 = sld [smem:[#allocation2 + $0x63]] }
 0x1dc   :  { %9934 = vst [vmem:[#allocation245_spill] sm:$0xff] %v7178_v35  ;;  %v1955_v55 = vadd.f32 %v1953_v60, %v1927_v22  ;;  %v1956_v39 = vadd.f32 %v1954_v33, %v1928_v46  ;;  %v1960_v59 = vadd.f32 %v1958_v18, %v1932_v21  ;;  %v1978_v44 = vmul.f32 %v7078_v41, %v1975_v16  ;;  %s7256_s11 = sld [smem:[#allocation2 + $0xae]] }
 0x1dd   :  { %9936 = vst [vmem:[#allocation246_spill] sm:$0xff] %v7185_v28  ;;  %v1961_v12 = vadd.f32 %v1959_v6, %v1933_v51  ;;  %v1979_v31 = vmul.f32 %v7078_v41, %v1976_v57  ;;  %v1983_v58 = vmul.f32 %v7081_v43, %v1975_v16  ;;  %v2000_v8 = vsel %vm7113_vm0, %v1996_v19, 0.0  ;;  %s7261_s6 = sld [smem:[#allocation2 + $0x31]] }
 0x1de   :  { %9937 = vst [vmem:[#allocation247_spill] sm:$0xff] %v7188_v24  ;;  %v1984_v63 = vmul.f32 %v7081_v43, %v1976_v57  ;;  %v1988_v22 = vmul.f32 %v7091_v7, %v1975_v16  ;;  %v1989_v46 = vmul.f32 %v7091_v7, %v1976_v57  ;;  %v2001_v21 = vsel %vm7125_vm14, %v1997_v40, 0.0  ;;  %v2046_v7 = vpop.permute.xlu0 %2045 }
 0x1df   :  { %9939 = vst [vmem:[#allocation248_spill] sm:$0xff] %v7197_v14  ;;  %v1965_v60 = vadd.f32 %v1963_v47, %v1937_v25  ;;  %v1966_v51 = vadd.f32 %v1964_v49, %v1938_v20  ;;  %v7216_v33 = vstv %s7160_s10  ;;  %v7219_v18 = vstv %s7164_s8  ;;  %s7345_s10 = sld [smem:[#allocation2 + $0x7c]] }
 0x1e0   :  { %9940 = vst [vmem:[#allocation249_spill] sm:$0xff] %v7216_v33  ;;  %v1980_v6 = vadd.f32 %v1978_v44, %v1955_v55  ;;  %v2003_v19 = vmul.f32 %v7099_v38, %v2000_v8  ;;  %v2022_v16 = vsel %vm9483_vm4, %v2018_v32, %v2020_v53  ;;  %v2023_v57 = vsel %vm9483_vm4, %v2020_v53, %v2018_v32  ;;  %v2069_v32 = vpop.permute.xlu1 %2068  ;;  %s7349_s8 = sld [smem:[#allocation2 + $0xc7]] }
 0x1e1   :  { %9941 = vst [vmem:[#allocation250_spill] sm:$0xff] %v7219_v18  ;;  %v1981_v40 = vadd.f32 %v1979_v31, %v1956_v39  ;;  %v1985_v43 = vadd.f32 %v1983_v58, %v1960_v59  ;;  %v2004_v49 = vmul.f32 %v7099_v38, %v2001_v21  ;;  %v2008_v25 = vmul.f32 %v7102_v17, %v2000_v8  ;;  %v7239_v58 = vpop.permute.xlu2 %2121 }
 0x1e2   :  { %v1986_v44 = vadd.f32 %v1984_v63, %v1961_v12  ;;  %v1990_v20 = vadd.f32 %v1988_v22, %v1965_v60  ;;  %v1991_v47 = vadd.f32 %v1989_v46, %v1966_v51  ;;  %v2009_v55 = vmul.f32 %v7102_v17, %v2001_v21 }
 0x1e3   :  { %v2013_v53 = vmul.f32 %v7105_v62, %v2000_v8  ;;  %v2014_v39 = vmul.f32 %v7105_v62, %v2001_v21  ;;  %vm9942_vm8 = vcmp.lt.s32.totalorder %v4428_v26, 14  ;;  %vm9943_vm3 = vcmp.lt.s32.totalorder %v4438_v29, 14 }
 0x1e4   :  { %v2026_v59 = vsel %vm9942_vm8, %v2022_v16, 0.0  ;;  %v2027_v31 = vsel %vm9943_vm3, %v2023_v57, 0.0  ;;  %v2005_v38 = vadd.f32 %v2003_v19, %v1980_v6  ;;  %v7242_v12 = vstv %s7190_s16  ;;  %vm9952_vm1 = vmmov %vm9942_vm8  ;;  %s7355_s16 = sld [smem:[#allocation2 + $0x4a]] }
 0x1e5   :  { %9944 = vst [vmem:[#allocation251_spill] sm:$0xff] %v7242_v12  ;;  %v7245_v63 = vstv %s7199_s18  ;;  %v7248_v22 = vstv %s7202_s9  ;;  %v2006_v8 = vadd.f32 %v2004_v49, %v1981_v40  ;;  %v2010_v46 = vadd.f32 %v2008_v25, %v1985_v43  ;;  %s7358_s18 = sld [smem:[#allocation2 + $0x95]] }
 0x1e6   :  { %9945 = vst [vmem:[#allocation252_spill] sm:$0xff] %v7245_v63  ;;  %v2047_v21 = vsel %vm9483_vm4, %v7093_v56, %v2046_v7  ;;  %v2048_v60 = vsel %vm9483_vm4, %v2046_v7, %v7093_v56  ;;  %v2011_v51 = vadd.f32 %v2009_v55, %v1986_v44  ;;  %v2029_v6 = vmul.f32 %v7140_v3, %v2026_v59  ;;  %v2096_v55 = vpop.permute.xlu0 %2095  ;;  %s7403_s9 = sld [smem:[#allocation2 + $0xe0]] }
 0x1e7   :  { %9946 = vst [vmem:[#allocation253_spill] sm:$0xff] %v7248_v22  ;;  %v2030_v19 = vmul.f32 %v7140_v3, %v2027_v31  ;;  %v2034_v16 = vmul.f32 %v7143_v61, %v2026_v59  ;;  %v2015_v43 = vadd.f32 %v2013_v53, %v1990_v20  ;;  %v2016_v57 = vadd.f32 %v2014_v39, %v1991_v47 }
 0x1e8   :  { %v2035_v40 = vmul.f32 %v7143_v61, %v2027_v31  ;;  %v7265_v49 = vstv %s7213_s12  ;;  %v2039_v7 = vmul.f32 %v7150_v10, %v2026_v59  ;;  %v2040_v56 = vmul.f32 %v7150_v10, %v2027_v31  ;;  %v2098_v10 = vpop.permute.xlu1 %2097 }
 0x1e9   :  { %9947 = vst [vmem:[#allocation254_spill] sm:$0xff] %v7265_v49  ;;  %v2051_v25 = vsel %vm9942_vm8, %v2047_v21, 0.0  ;;  %v2052_v44 = vsel %vm9943_vm3, %v2048_v60, 0.0  ;;  %v2072_v3 = vsel %vm9483_vm4, %v2069_v32, %v7175_v23  ;;  %v7276_v20 = vstv %s7221_s14 }
 0x1ea   :  { %9948 = vst [vmem:[#allocation255_spill] sm:$0xff] %v7276_v20  ;;  %v7279_v47 = vstv %s7226_s1  ;;  %v7282_v53 = vstv %s7230_s22  ;;  %v2031_v39 = vadd.f32 %v2029_v6, %v2005_v38  ;;  %v2032_v59 = vadd.f32 %v2030_v19, %v2006_v8 }
 0x1eb   :  { %9949 = vst [vmem:[#allocation256_spill] sm:$0xff] %v7279_v47  ;;  %v2036_v31 = vadd.f32 %v2034_v16, %v2010_v46  ;;  %v2073_v21 = vsel %vm9483_vm4, %v7175_v23, %v2069_v32  ;;  %v2037_v60 = vadd.f32 %v2035_v40, %v2011_v51  ;;  %v2054_v61 = vmul.f32 %v7153_v9, %v2051_v25  ;;  %v2149_v51 = vpop.permute.xlu2 %2148 }
 0x1ec   :  { %9950 = vst [vmem:[#allocation257_spill] sm:$0xff] %v7282_v53  ;;  %v2055_v62 = vmul.f32 %v7153_v9, %v2052_v44  ;;  %v2059_v17 = vmul.f32 %v7158_v37, %v2051_v25  ;;  %v2041_v41 = vadd.f32 %v2039_v7, %v2015_v43  ;;  %v2042_v36 = vadd.f32 %v2040_v56, %v2016_v57 }
 0x1ed   :  { %v2060_v38 = vmul.f32 %v7158_v37, %v2052_v44  ;;  %v2076_v8 = vsel %vm9942_vm8, %v2072_v3, 0.0  ;;  %v2077_v46 = vsel %vm9943_vm3, %v2073_v21, 0.0  ;;  %vm9951_vm4 = vcmp.lt.s32.totalorder %v4430_v27, 15 }
 0x1ee   :  { %vm7298_vm14 = vmand %vm9952_vm1, %vm9951_vm4  ;;  %v9953_v23 = vmov 0  ;;  %vm9955_vm0 = vcmask 777216   ;;  %v7304_v6 = vstv %s7250_s21  ;;  %v7307_v19 = vstv %s7256_s11  ;;  %v2124_v15 = vpop.permute.xlu0 %2123 }
 0x1ef   :  { %v9954_v23 = vsel %vm7298_vm14, 4294967295, %v9953_v23  ;;  %v2100_v32 = vsel %vm9955_vm0, %v2096_v55, %v2098_v10  ;;  %9956 = vst [vmem:[#allocation258_spill] sm:$0xff] %v7304_v6  ;;  %v2064_v3 = vmul.f32 %v7173_v1, %v2051_v25  ;;  %v2065_v16 = vmul.f32 %v7173_v1, %v2052_v44  ;;  %vm9961_vm4 = vmmov %vm9955_vm0 }
 0x1f0   :  { %9957 = vst [vmem:[#allocation259_spill] sm:$0xff] %v7307_v19  ;;  %vm9958_vm8 = vcmp.lt.s32.totalorder %v4440_v30, 15  ;;  %v2101_v57 = vsel %vm9961_vm4, %v2098_v10, %v2096_v55  ;;  %v7321_v40 = vstv %s7261_s6  ;;  %v2056_v7 = vadd.f32 %v2054_v61, %v2031_v39  ;;  %vm9963_vm1 = vmmov %vm9955_vm0 }
 0x1f1   :  { %vm7315_vm2 = vmand %vm9943_vm3, %vm9958_vm8  ;;  %9962 = vst [vmem:[#allocation260_spill] sm:$0xff] %v7321_v40  ;;  %v2057_v56 = vadd.f32 %v2055_v62, %v2032_v59  ;;  %v2061_v21 = vadd.f32 %v2059_v17, %v2036_v31  ;;  %v2079_v37 = vmul.f32 %v7178_v35, %v2076_v8  ;;  %v2062_v25 = vadd.f32 %v2060_v38, %v2037_v60  ;;  %v2147_v31 = vpop.permute.xlu1 %2146 }
 0x1f2   :  { %v2080_v44 = vmul.f32 %v7178_v35, %v2077_v46  ;;  %v2084_v1 = vmul.f32 %v7185_v28, %v2076_v8  ;;  %v2104_v9 = vsel %vm7298_vm14, %v2100_v32, 0.0  ;;  %v2085_v13 = vmul.f32 %v7185_v28, %v2077_v46  ;;  %vm9964_vm8 = vmmov %vm9955_vm0 }
 0x1f3   :  { %v2105_v10 = vsel %vm7315_vm2, %v2101_v57, 0.0  ;;  %v2125_v17 = vsel %vm9963_vm1, %v7239_v58, %v2124_v15  ;;  %v2126_v62 = vsel %vm9964_vm8, %v2124_v15, %v7239_v58  ;;  %v2066_v61 = vadd.f32 %v2064_v3, %v2041_v41  ;;  %vm9965_vm3 = vmmov %vm9955_vm0 }
 0x1f4   :  { %v2067_v55 = vadd.f32 %v2065_v16, %v2042_v36  ;;  %v2089_v39 = vmul.f32 %v7188_v24, %v2076_v8  ;;  %v2090_v59 = vmul.f32 %v7188_v24, %v2077_v46  ;;  %v2081_v60 = vadd.f32 %v2079_v37, %v2056_v7  ;;  %vm9966_vm4 = vmmov %vm9955_vm0 }
 0x1f5   :  { %v2107_v38 = vmul.f32 %v7197_v14, %v2104_v9  ;;  %v2129_v32 = vsel %vm7298_vm14, %v2125_v17, 0.0  ;;  %v2130_v57 = vsel %vm7315_vm2, %v2126_v62, 0.0  ;;  %v2082_v28 = vadd.f32 %v2080_v44, %v2057_v56 }
 0x1f6   :  { %v2108_v35 = vmul.f32 %v7197_v14, %v2105_v10  ;;  %v2112_v41 = vmul.f32 %v7216_v33, %v2104_v9  ;;  %v2113_v36 = vmul.f32 %v7216_v33, %v2105_v10  ;;  %v2086_v15 = vadd.f32 %v2084_v1, %v2061_v21  ;;  %v2174_v62 = vpop.permute.xlu0 %2173 }
 0x1f7   :  { %v2087_v58 = vadd.f32 %v2085_v13, %v2062_v25  ;;  %v2117_v37 = vmul.f32 %v7219_v18, %v2104_v9  ;;  %v2150_v8 = vsel %vm9965_vm3, %v2147_v31, %v2149_v51  ;;  %v2118_v46 = vmul.f32 %v7219_v18, %v2105_v10  ;;  %v2200_v9 = vpop.permute.xlu2 %2199 }
 0x1f8   :  { %v2132_v3 = vmul.f32 %v7242_v12, %v2129_v32  ;;  %v2133_v16 = vmul.f32 %v7242_v12, %v2130_v57  ;;  %v2151_v7 = vsel %vm9966_vm4, %v2149_v51, %v2147_v31  ;;  %v2091_v56 = vadd.f32 %v2089_v39, %v2066_v61 }
 0x1f9   :  { %v2092_v44 = vadd.f32 %v2090_v59, %v2067_v55  ;;  %v2109_v1 = vadd.f32 %v2107_v38, %v2081_v60  ;;  %v2137_v13 = vmul.f32 %v7245_v63, %v2129_v32  ;;  %v2110_v21 = vadd.f32 %v2108_v35, %v2082_v28 }
 0x1fa   :  { %v2114_v25 = vadd.f32 %v2112_v41, %v2086_v15  ;;  %v2115_v17 = vadd.f32 %v2113_v36, %v2087_v58  ;;  %v2154_v10 = vsel %vm7298_vm14, %v2150_v8, 0.0  ;;  %vm9967_vm1 = vcmp.lt.s32.totalorder %v4430_v27, 14  ;;  %v2176_v41 = vpop.permute.xlu1 %2175 }
 0x1fb   :  { %vm9968_vm8 = vcmp.lt.s32.totalorder %v4428_v26, 14  ;;  %v9969_v51 = vmov 0  ;;  %v2119_v61 = vadd.f32 %v2117_v37, %v2091_v56  ;;  %v2138_v55 = vmul.f32 %v7245_v63, %v2130_v57 }
 0x1fc   :  { %vm7366_vm3 = vmand %vm9968_vm8, %vm9967_vm1  ;;  %v2142_v39 = vmul.f32 %v7248_v22, %v2129_v32  ;;  %v2155_v35 = vsel %vm7315_vm2, %v2151_v7, 0.0  ;;  %vm9972_vm4 = vcmp.lt.s32.totalorder %v4440_v30, 14  ;;  %vm9973_vm0 = vcmp.lt.s32.totalorder %v4438_v29, 14 }
 0x1fd   :  { %v9970_v51 = vsel %vm7366_vm3, 4294967295, %v9969_v51  ;;  %vm7378_vm14 = vmand %vm9973_vm0, %vm9972_vm4  ;;  %v9974_v28 = vmov 0  ;;  %v2120_v59 = vadd.f32 %v2118_v46, %v2092_v44  ;;  %v2134_v31 = vadd.f32 %v2132_v3, %v2109_v1 }
 0x1fe   :  { %9971 = vst [vmem:[#allocation261_spill] sm:$0xff] %v9970_v51  ;;  %v9975_v28 = vsel %vm7378_vm14, 4294967295, %v9974_v28  ;;  %v2135_v60 = vadd.f32 %v2133_v16, %v2110_v21  ;;  %v2143_v38 = vmul.f32 %v7248_v22, %v2130_v57  ;;  %v2139_v32 = vadd.f32 %v2137_v13, %v2114_v25 }
 0x1ff   :  { %9976 = vst [vmem:[#allocation262_spill] sm:$0xff] %v9975_v28  ;;  %v2157_v36 = vmul.f32 %v7265_v49, %v2154_v10  ;;  %vm9977_vm1 = vcmask 769024   ;;  %v2158_v37 = vmul.f32 %v7265_v49, %v2155_v35  ;;  %v2162_v8 = vmul.f32 %v7276_v20, %v2154_v10  ;;  %v10225_v28 = vld [vmem:[#allocation131_spill] sm:$0xff] }
 0x200   :  { %v2178_v15 = vsel %vm9977_vm1, %v2174_v62, %v2176_v41  ;;  %vm9978_vm8 = vmmov %vm9977_vm1  ;;  %v2140_v3 = vadd.f32 %v2138_v55, %v2115_v17  ;;  %v2144_v16 = vadd.f32 %v2142_v39, %v2119_v61  ;;  %v2163_v7 = vmul.f32 %v7276_v20, %v2155_v35 }
 0x201   :  { %v2179_v58 = vsel %vm9978_vm8, %v2176_v41, %v2174_v62  ;;  %v2182_v46 = vsel %vm7366_vm3, %v2178_v15, 0.0  ;;  %v2167_v56 = vmul.f32 %v7279_v47, %v2154_v10  ;;  %v7397_v13 = vstv %s7345_s10  ;;  %v2202_v15 = vpop.permute.xlu0 %2201  ;;  %vm9983_vm0 = vmmov %vm9977_vm1 }
 0x202   :  { %v2183_v57 = vsel %vm7378_vm14, %v2179_v58, 0.0  ;;  %v2185_v44 = vmul.f32 %v7282_v53, %v2182_v46  ;;  %9979 = vst [vmem:[#allocation263_spill] sm:$0xff] %v7397_v13  ;;  %v7400_v21 = vstv %s7349_s8  ;;  %v2145_v25 = vadd.f32 %v2143_v38, %v2120_v59  ;;  %vm9984_vm4 = vmmov %vm9983_vm0  ;;  %v2227_v38 = vpop.permute.xlu2 %2226 }
 0x203   :  { %v2186_v1 = vmul.f32 %v7282_v53, %v2183_v57  ;;  %9980 = vst [vmem:[#allocation264_spill] sm:$0xff] %v7400_v21  ;;  %v2191_v62 = vmul.f32 %v7304_v6, %v2183_v57  ;;  %v7406_v41 = vstv %s7355_s16  ;;  %v7409_v17 = vstv %s7358_s18  ;;  %vm9985_vm1 = vmmov %vm9983_vm0 }
 0x204   :  { %9981 = vst [vmem:[#allocation265_spill] sm:$0xff] %v7406_v41  ;;  %v2159_v61 = vadd.f32 %v2157_v36, %v2134_v31  ;;  %v2160_v55 = vadd.f32 %v2158_v37, %v2135_v60  ;;  %v2164_v10 = vadd.f32 %v2162_v8, %v2139_v32  ;;  %v2168_v39 = vmul.f32 %v7279_v47, %v2155_v35  ;;  %v2225_v60 = vpop.permute.xlu1 %2224  ;;  %vm9986_vm8 = vmmov %vm9983_vm0  ;;  %v10224_v47 = vld [vmem:[#allocation130_spill] sm:$0xff] }
 0x205   :  { %9982 = vst [vmem:[#allocation266_spill] sm:$0xff] %v7409_v17  ;;  %v2165_v58 = vadd.f32 %v2163_v7, %v2140_v3  ;;  %v2169_v53 = vadd.f32 %v2167_v56, %v2144_v16  ;;  %v2203_v20 = vsel %vm9983_vm0, %v2200_v9, %v2202_v15  ;;  %v2204_v59 = vsel %vm9984_vm4, %v2202_v15, %v2200_v9 }
 0x206   :  { %v2187_v49 = vadd.f32 %v2185_v44, %v2159_v61  ;;  %v2188_v22 = vadd.f32 %v2186_v1, %v2160_v55  ;;  %v2207_v63 = vsel %vm7366_vm3, %v2203_v20, 0.0  ;;  %v2208_v31 = vsel %vm7378_vm14, %v2204_v59, 0.0 }
 0x207   :  { %v2193_v32 = vadd.f32 %v2191_v62, %v2165_v58  ;;  %v2210_v35 = vmul.f32 %v7321_v40, %v2207_v63  ;;  %v2211_v36 = vmul.f32 %v7321_v40, %v2208_v31  ;;  %v2216_v37 = vmul.f32 %v7397_v13, %v2208_v31 }
 0x208   :  { %v2190_v9 = vmul.f32 %v7304_v6, %v2182_v46  ;;  %v2195_v8 = vmul.f32 %v7307_v19, %v2182_v46  ;;  %v2228_v3 = vsel %vm9985_vm1, %v2225_v60, %v2227_v38  ;;  %v2229_v20 = vsel %vm9986_vm8, %v2227_v38, %v2225_v60 }
 0x209   :  { %v2196_v16 = vmul.f32 %v7307_v19, %v2183_v57  ;;  %v2212_v7 = vadd.f32 %v2210_v35, %v2187_v49  ;;  %v2213_v56 = vadd.f32 %v2211_v36, %v2188_v22  ;;  %v2218_v44 = vadd.f32 %v2216_v37, %v2193_v32 }
 0x20a   :  { %v2215_v1 = vmul.f32 %v7397_v13, %v2207_v63  ;;  %v2220_v62 = vmul.f32 %v7400_v21, %v2207_v63  ;;  %v2232_v61 = vsel %vm7366_vm3, %v2228_v3, 0.0  ;;  %v2233_v55 = vsel %vm7378_vm14, %v2229_v20, 0.0 }
 0x20b   :  { %v2235_v46 = vmul.f32 %v7406_v41, %v2232_v61  ;;  %v2236_v15 = vmul.f32 %v7406_v41, %v2233_v55  ;;  %v2241_v58 = vmul.f32 %v7409_v17, %v2233_v55  ;;  %v7436_v57 = vstv %s7403_s9 }
 0x20c   :  { %9987 = vst [vmem:[#allocation267_spill] sm:$0xff] %v7436_v57  ;;  %v2170_v22 = vadd.f32 %v2168_v39, %v2145_v25  ;;  %v2192_v49 = vadd.f32 %v2190_v9, %v2164_v10  ;;  %v2197_v59 = vadd.f32 %v2195_v8, %v2169_v53  ;;  %v2221_v38 = vmul.f32 %v7400_v21, %v2208_v31  ;;  %v9988_v10 = vld [vmem:[#allocation77_spill] sm:$0xff]  ;;  %v9989_v9 = vld [vmem:[#allocation79_spill] sm:$0xff]  ;;  %v9990_v8 = vld [vmem:[#allocation132_spill] sm:$0xff] }
 0x20d   :  { %v1858_v63 = vadd.f32 %v7031_v11, %v6750_v5  ;;  %v2237_v60 = vadd.f32 %v2235_v46, %v2212_v7  ;;  %v2238_v32 = vadd.f32 %v2236_v15, %v2213_v56  ;;  %v2243_v35 = vadd.f32 %v2241_v58, %v2218_v44  ;;  %v9993_v7 = vld [vmem:[#allocation225_spill] sm:$0xff]  ;;  %v9994_v44 = vld [vmem:[#allocation166_spill] sm:$0xff] }
 0x20e   :  { %v2198_v36 = vadd.f32 %v2196_v16, %v2170_v22  ;;  %v2217_v37 = vadd.f32 %v2215_v1, %v2192_v49  ;;  %v2222_v3 = vadd.f32 %v2220_v62, %v2197_v59  ;;  %v2240_v20 = vmul.f32 %v7409_v17, %v2232_v61 }
 0x20f   :  { %v2245_v41 = vmul.f32 %v7436_v57, %v2232_v61  ;;  %v7444_v13 = vadd.f32 %v2237_v60, %v7040_v2  ;;  %v7447_v53 = vadd.f32 %v2238_v32, %v7043_v42  ;;  %v7449_v25 = vadd.f32 %v2243_v35, %v1858_v63 }
 0x210   :  { %v1072_v5 = vadd.f32 %v5843_v48, %v9988_v10  ;;  %v1460_v11 = vadd.f32 %v6381_v34, %v6375_v45  ;;  %v2223_v39 = vadd.f32 %v2221_v38, %v2198_v36  ;;  %v2246_v31 = vmul.f32 %v7436_v57, %v2233_v55  ;;  %v9991_v48 = vld [vmem:[#allocation80_spill] sm:$0xff]  ;;  %v9992_v34 = vld [vmem:[#allocation133_spill] sm:$0xff]  ;;  %v10000_v10 = vld [vmem:[#allocation10_spill] sm:$0xff] }
 0x211   :  { %v1074_v16 = vadd.f32 %v9990_v8, %v9989_v9  ;;  %v1848_v2 = vadd.f32 %v7008_v52, %v6963_v50  ;;  %v1853_v42 = vadd.f32 %v7011_v54, %v7001_v4  ;;  %2281 = vrot.lane.b32.xlu2 %v7449_v25, %s4206_s17  ;;  %2257 = vrot.lane.b32.xlu0 %v7447_v53, %s4206_s17  ;;  %v9995_v50 = vld [vmem:[#allocation176_spill] sm:$0xff]  ;;  %vm9996_vm0 = vcmask 277504  }
 0x212   :  { %v1075_v45 = vadd.f32 %v9992_v34, %v9991_v48  ;;  %v1854_v56 = vadd.f32 %v9993_v7, %v7003_v0  ;;  %2259 = vrot.lane.b32.xlu1 %v7444_v13, %s4206_s17  ;;  %v1463_v52 = vadd.f32 %v9994_v44, %v1072_v5  ;;  %v2242_v4 = vadd.f32 %v2240_v20, %v2217_v37  ;;  %vm9997_vm4 = vmmov %vm9996_vm0 }
 0x213   :  { %v1465_v1 = vadd.f32 %v9995_v50, %v1074_v16  ;;  %v2247_v54 = vadd.f32 %v2245_v41, %v2222_v3  ;;  %v2248_v61 = vadd.f32 %v2246_v31, %v2223_v39  ;;  %v10001_v39 = vld [vmem:[#allocation11_spill] sm:$0xff]  ;;  %vm10003_vm1 = vmmov %vm9996_vm0 }
 0x214   :  { %v1466_v62 = vadd.f32 %v1460_v11, %v1075_v45  ;;  %v1857_v55 = vadd.f32 %v1848_v2, %v1463_v52  ;;  %v10002_v2 = vld [vmem:[#allocation12_spill] sm:$0xff]  ;;  %vm10004_vm8 = vmmov %vm9996_vm0 }
 0x215   :  { %v1859_v46 = vadd.f32 %v1853_v42, %v1465_v1  ;;  %v10006_v1 = vld [vmem:[#allocation13_spill] sm:$0xff] }
 0x216   :  { %v1860_v15 = vadd.f32 %v1854_v56, %v1466_v62  ;;  %v7474_v58 = vadd.f32 %v2242_v4, %v1857_v55  ;;  %v10007_v62 = vld [vmem:[#allocation15_spill] sm:$0xff] }
 0x217   :  { %v7476_v22 = vadd.f32 %v2247_v54, %v1859_v46  ;;  %v10008_v46 = vld [vmem:[#allocation16_spill] sm:$0xff] }
 0x218   :  { %v7478_v49 = vadd.f32 %v2248_v61, %v1860_v15 }
 0x219   :  { %2307 = vrot.lane.b32.xlu2 %v7476_v22, %s4206_s17  ;;  %2283 = vrot.lane.b32.xlu0 %v7474_v58, %s4206_s17 }
 0x21a   :  { %2305 = vrot.lane.b32.xlu1 %v7478_v49, %s4206_s17  ;;  %s10198_s17 = smov 110  }
 0x221   :  { %2349 = vrot.lane.b32.xlu2 %v7449_v25, %s4207_s25  ;;  %2327 = vrot.lane.b32.xlu0 %v7447_v53, %s4207_s25 }
 0x222   :  { %2329 = vrot.lane.b32.xlu1 %v7444_v13, %s4207_s25 }
 0x229   :  { %2373 = vrot.lane.b32.xlu2 %v7476_v22, %s4207_s25  ;;  %2351 = vrot.lane.b32.xlu0 %v7474_v58, %s4207_s25 }
 0x22a   :  { %2371 = vrot.lane.b32.xlu1 %v7478_v49, %s4207_s25  ;;  %s10228_s25 = smov 98  }
 0x231   :  { %2415 = vrot.lane.b32.xlu2 %v7449_v25, %s4208_s26  ;;  %2393 = vrot.lane.b32.xlu0 %v7447_v53, %s4208_s26 }
 0x232   :  { %2395 = vrot.lane.b32.xlu1 %v7444_v13, %s4208_s26 }
 0x239   :  { %2439 = vrot.lane.b32.xlu2 %v7476_v22, %s4208_s26  ;;  %2417 = vrot.lane.b32.xlu0 %v7474_v58, %s4208_s26 }
 0x23a   :  { %2437 = vrot.lane.b32.xlu1 %v7478_v49, %s4208_s26  ;;  %s10249_s26 = smov 97  }
 0x241   :  { %2481 = vrot.lane.b32.xlu2 %v7449_v25, %s4209_s27  ;;  %2459 = vrot.lane.b32.xlu0 %v7447_v53, %s4209_s27 }
 0x242   :  { %2461 = vrot.lane.b32.xlu1 %v7444_v13, %s4209_s27 }
 0x249   :  { %2505 = vrot.lane.b32.xlu2 %v7476_v22, %s4209_s27  ;;  %2483 = vrot.lane.b32.xlu0 %v7474_v58, %s4209_s27 }
 0x24a   :  { %2503 = vrot.lane.b32.xlu1 %v7478_v49, %s4209_s27  ;;  %s10273_s27 = smov 96  }
 0x251   :  { %2547 = vrot.lane.b32.xlu2 %v7449_v25, %s4210_s28  ;;  %2525 = vrot.lane.b32.xlu0 %v7447_v53, %s4210_s28 }
 0x252   :  { %2527 = vrot.lane.b32.xlu1 %v7444_v13, %s4210_s28 }
 0x259   :  { %2571 = vrot.lane.b32.xlu2 %v7476_v22, %s4210_s28  ;;  %2549 = vrot.lane.b32.xlu0 %v7474_v58, %s4210_s28 }
 0x25a   :  { %2569 = vrot.lane.b32.xlu1 %v7478_v49, %s4210_s28  ;;  %s10293_s28 = smov 95  }
 0x261   :  { %2619 = vrot.lane.b32.xlu2 %v7449_v25, %s4211_s29  ;;  %2597 = vrot.lane.b32.xlu0 %v7447_v53, %s4211_s29 }
 0x262   :  { %2599 = vrot.lane.b32.xlu1 %v7444_v13, %s4211_s29 }
 0x269   :  { %2643 = vrot.lane.b32.xlu2 %v7476_v22, %s4211_s29  ;;  %2621 = vrot.lane.b32.xlu0 %v7474_v58, %s4211_s29 }
 0x26a   :  { %2641 = vrot.lane.b32.xlu1 %v7478_v49, %s4211_s29  ;;  %s10313_s29 = smov 94  }
 0x26b   :  { %v2282_v0 = vpop.permute.xlu2 %2281 }
 0x271   :  { %2685 = vrot.lane.b32.xlu2 %v7449_v25, %s4212_s30  ;;  %2663 = vrot.lane.b32.xlu0 %v7447_v53, %s4212_s30 }
 0x272   :  { %2665 = vrot.lane.b32.xlu1 %v7444_v13, %s4212_s30 }
 0x273   :  { %v2308_v41 = vpop.permute.xlu2 %2307 }
 0x279   :  { %2709 = vrot.lane.b32.xlu2 %v7476_v22, %s4212_s30  ;;  %2687 = vrot.lane.b32.xlu0 %v7474_v58, %s4212_s30 }
 0x27a   :  { %2707 = vrot.lane.b32.xlu1 %v7478_v49, %s4212_s30 }
 0x27b   :  { %v7558_v59 = vpop.permute.xlu2 %2349 }
 0x281   :  { %2751 = vrot.lane.b32.xlu2 %v7449_v25, %s4213_s3  ;;  %2729 = vrot.lane.b32.xlu0 %v7447_v53, %s4213_s3 }
 0x282   :  { %2731 = vrot.lane.b32.xlu1 %v7444_v13, %s4213_s3 }
 0x283   :  { %v7566_v38 = vpop.permute.xlu2 %2373  ;;  %v2258_v63 = vpop.permute.xlu0 %2257 }
 0x284   :  { %v2260_v60 = vpop.permute.xlu1 %2259 }
 0x285   :  { %v2261_v32 = vsel %vm9996_vm0, %v2258_v63, %v2260_v60  ;;  %v2262_v35 = vsel %vm9997_vm4, %v2260_v60, %v2258_v63  ;;  %vm10005_vm4 = vmmov %vm9996_vm0 }
 0x286   :  { %v2265_v37 = vsel %vm4470_vm5, %v2261_v32, 0.0  ;;  %v2266_v20 = vsel %vm4483_vm6, %v2262_v35, 0.0 }
 0x287   :  { %v2267_v5 = vmul.f32 %v2265_v37, %v10000_v10  ;;  %v2268_v11 = vmul.f32 %v2266_v20, %v10000_v10  ;;  %v2271_v31 = vmul.f32 %v2265_v37, %v10001_v39  ;;  %v2272_v9 = vmul.f32 %v2266_v20, %v10001_v39  ;;  %v10009_v39 = vld [vmem:[#allocation7_spill] sm:$0xff] }
 0x288   :  { %v2275_v42 = vmul.f32 %v2265_v37, %v10002_v2  ;;  %v2276_v48 = vmul.f32 %v2266_v20, %v10002_v2 }
 0x289   :  { %2775 = vrot.lane.b32.xlu2 %v7476_v22, %s4213_s3  ;;  %2753 = vrot.lane.b32.xlu0 %v7474_v58, %s4213_s3 }
 0x28a   :  { %2773 = vrot.lane.b32.xlu1 %v7478_v49, %s4213_s3 }
 0x28b   :  { %v7584_v8 = vpop.permute.xlu2 %2415  ;;  %v2284_v16 = vpop.permute.xlu0 %2283 }
 0x28c   :  { %v2285_v34 = vsel %vm10003_vm1, %v2282_v0, %v2284_v16  ;;  %v2286_v45 = vsel %vm10004_vm8, %v2284_v16, %v2282_v0  ;;  %v2306_v7 = vpop.permute.xlu1 %2305 }
 0x28d   :  { %v2289_v56 = vsel %vm4470_vm5, %v2285_v34, 0.0  ;;  %v2290_v44 = vsel %vm4483_vm6, %v2286_v45, 0.0  ;;  %v2309_v52 = vsel %vm9996_vm0, %v2306_v7, %v2308_v41  ;;  %v2310_v50 = vsel %vm10005_vm4, %v2308_v41, %v2306_v7  ;;  %v10010_v34 = vld [vmem:[#allocation8_spill] sm:$0xff]  ;;  %v10011_v7 = vld [vmem:[#allocation9_spill] sm:$0xff] }
 0x28e   :  { %v2291_v4 = vmul.f32 %v2289_v56, %v10006_v1  ;;  %v2292_v54 = vmul.f32 %v2290_v44, %v10006_v1  ;;  %v2295_v61 = vmul.f32 %v2289_v56, %v10007_v62  ;;  %v2296_v55 = vmul.f32 %v2290_v44, %v10007_v62 }
 0x28f   :  { %v2299_v15 = vmul.f32 %v2289_v56, %v10008_v46  ;;  %v2300_v0 = vmul.f32 %v2290_v44, %v10008_v46  ;;  %v2313_v63 = vsel %vm4470_vm5, %v2309_v52, 0.0  ;;  %v2314_v60 = vsel %vm4483_vm6, %v2310_v50, 0.0  ;;  %v10016_v46 = vld [vmem:[#allocation17_spill] sm:$0xff] }
 0x290   :  { %v2293_v32 = vadd.f32 %v2291_v4, %v2267_v5  ;;  %v2294_v41 = vadd.f32 %v2292_v54, %v2268_v11  ;;  %v2297_v35 = vadd.f32 %v2295_v61, %v2271_v31  ;;  %v2298_v37 = vadd.f32 %v2296_v55, %v2272_v9 }
 0x291   :  { %v2301_v20 = vadd.f32 %v2299_v15, %v2275_v42  ;;  %v2302_v10 = vadd.f32 %v2300_v0, %v2276_v48  ;;  %v2315_v16 = vmul.f32 %v2313_v63, %v10009_v39  ;;  %v2316_v2 = vmul.f32 %v2314_v60, %v10009_v39  ;;  %2817 = vrot.lane.b32.xlu2 %v7449_v25, %s4214_s4 }
 0x292   :  { %v2319_v45 = vmul.f32 %v2313_v63, %v10010_v34  ;;  %v2320_v36 = vmul.f32 %v2314_v60, %v10010_v34  ;;  %v2323_v3 = vmul.f32 %v2313_v63, %v10011_v7  ;;  %v2324_v5 = vmul.f32 %v2314_v60, %v10011_v7  ;;  %2795 = vrot.lane.b32.xlu0 %v7447_v53, %s4214_s4  ;;  %v10017_v63 = vld [vmem:[#allocation18_spill] sm:$0xff] }
 0x293   :  { %v2317_v11 = vadd.f32 %v2315_v16, %v2293_v32  ;;  %v2318_v31 = vadd.f32 %v2316_v2, %v2294_v41  ;;  %2797 = vrot.lane.b32.xlu1 %v7444_v13, %s4214_s4  ;;  %v7618_v9 = vpop.permute.xlu2 %2439  ;;  %v2328_v42 = vpop.permute.xlu0 %2327  ;;  %vm10012_vm5 = vcmask 269312   ;;  %v10018_v41 = vld [vmem:[#allocation19_spill] sm:$0xff] }
 0x294   :  { %v2321_v48 = vadd.f32 %v2319_v45, %v2297_v35  ;;  %v2322_v56 = vadd.f32 %v2320_v36, %v2298_v37  ;;  %v2325_v44 = vadd.f32 %v2323_v3, %v2301_v20  ;;  %v2326_v52 = vadd.f32 %v2324_v5, %v2302_v10  ;;  %v2330_v50 = vpop.permute.xlu1 %2329  ;;  %vm10013_vm6 = vmmov %vm10012_vm5 }
 0x295   :  { %v2331_v1 = vsel %vm10012_vm5, %v2328_v42, %v2330_v50  ;;  %v2332_v4 = vsel %vm10013_vm6, %v2330_v50, %v2328_v42  ;;  %vm10019_vm1 = vmmov %vm10012_vm5  ;;  %v10024_v50 = vld [vmem:[#allocation21_spill] sm:$0xff]  ;;  %vm10031_vm5 = vcmp.ge.s32.totalorder %v4428_v26, 2  ;;  %vm10032_vm6 = vcmp.ge.s32.totalorder %v4438_v29, 2 }
 0x296   :  { %v2335_v62 = vsel %vm4655_vm10, %v2331_v1, 0.0  ;;  %v2336_v55 = vsel %vm4663_vm11, %v2332_v4, 0.0  ;;  %vm10020_vm8 = vmmov %vm10019_vm1  ;;  %v10025_v4 = vld [vmem:[#allocation22_spill] sm:$0xff] }
 0x297   :  { %v2337_v15 = vmul.f32 %v2335_v62, %v10016_v46  ;;  %v2338_v0 = vmul.f32 %v2336_v55, %v10016_v46  ;;  %v2341_v60 = vmul.f32 %v2335_v62, %v10017_v63  ;;  %v2342_v32 = vmul.f32 %v2336_v55, %v10017_v63  ;;  %vm10021_vm0 = vmmov %vm10019_vm1 }
 0x298   :  { %v2345_v35 = vmul.f32 %v2335_v62, %v10018_v41  ;;  %v2346_v37 = vmul.f32 %v2336_v55, %v10018_v41  ;;  %vm10022_vm4 = vmmov %vm10021_vm0 }
 0x299   :  { %v2339_v20 = vadd.f32 %v2337_v15, %v2317_v11  ;;  %v2340_v10 = vadd.f32 %v2338_v0, %v2318_v31  ;;  %v2343_v39 = vadd.f32 %v2341_v60, %v2321_v48  ;;  %v2344_v16 = vadd.f32 %v2342_v32, %v2322_v56  ;;  %2841 = vrot.lane.b32.xlu2 %v7476_v22, %s4214_s4  ;;  %v10023_v56 = vld [vmem:[#allocation20_spill] sm:$0xff] }
 0x29a   :  { %v2347_v2 = vadd.f32 %v2345_v35, %v2325_v44  ;;  %v2348_v34 = vadd.f32 %v2346_v37, %v2326_v52  ;;  %2819 = vrot.lane.b32.xlu0 %v7474_v58, %s4214_s4  ;;  %v10026_v35 = vld [vmem:[#allocation23_spill] sm:$0xff] }
 0x29b   :  { %2839 = vrot.lane.b32.xlu1 %v7478_v49, %s4214_s4  ;;  %v7638_v45 = vpop.permute.xlu2 %2481  ;;  %v2352_v36 = vpop.permute.xlu0 %2351 }
 0x29c   :  { %v2353_v7 = vsel %vm10019_vm1, %v7558_v59, %v2352_v36  ;;  %v2354_v3 = vsel %vm10020_vm8, %v2352_v36, %v7558_v59  ;;  %v2372_v5 = vpop.permute.xlu1 %2371 }
 0x29d   :  { %v2357_v11 = vsel %vm4655_vm10, %v2353_v7, 0.0  ;;  %v2358_v31 = vsel %vm4663_vm11, %v2354_v3, 0.0  ;;  %v2375_v42 = vsel %vm10021_vm0, %v2372_v5, %v7566_v38  ;;  %v2376_v48 = vsel %vm10022_vm4, %v7566_v38, %v2372_v5  ;;  %v10027_v7 = vld [vmem:[#allocation24_spill] sm:$0xff]  ;;  %v10028_v5 = vld [vmem:[#allocation25_spill] sm:$0xff]  ;;  %vm10038_vm0 = vmmov %vm10031_vm5 }
 0x29e   :  { %v2359_v44 = vmul.f32 %v2357_v11, %v10023_v56  ;;  %v2360_v52 = vmul.f32 %v2358_v31, %v10023_v56  ;;  %v2363_v1 = vmul.f32 %v2357_v11, %v10024_v50  ;;  %v2364_v59 = vmul.f32 %v2358_v31, %v10024_v50  ;;  %vm10039_vm4 = vmmov %vm10032_vm6 }
 0x29f   :  { %v2367_v62 = vmul.f32 %v2357_v11, %v10025_v4  ;;  %v2368_v55 = vmul.f32 %v2358_v31, %v10025_v4  ;;  %v2379_v46 = vsel %vm4655_vm10, %v2375_v42, 0.0  ;;  %v2380_v15 = vsel %vm4663_vm11, %v2376_v48, 0.0 }
 0x2a0   :  { %v2361_v0 = vadd.f32 %v2359_v44, %v2339_v20  ;;  %v2362_v38 = vadd.f32 %v2360_v52, %v2340_v10  ;;  %v2365_v63 = vadd.f32 %v2363_v1, %v2343_v39  ;;  %v2366_v60 = vadd.f32 %v2364_v59, %v2344_v16  ;;  %v10033_v1 = vld [vmem:[#allocation26_spill] sm:$0xff] }
 0x2a1   :  { %v2369_v32 = vadd.f32 %v2367_v62, %v2347_v2  ;;  %v2370_v41 = vadd.f32 %v2368_v55, %v2348_v34  ;;  %v2381_v37 = vmul.f32 %v2379_v46, %v10026_v35  ;;  %v2382_v36 = vmul.f32 %v2380_v15, %v10026_v35  ;;  %2883 = vrot.lane.b32.xlu2 %v7449_v25, %s4215_s19  ;;  %v10034_v62 = vld [vmem:[#allocation28_spill] sm:$0xff] }
 0x2a2   :  { %v2385_v3 = vmul.f32 %v2379_v46, %v10027_v7  ;;  %v2386_v54 = vmul.f32 %v2380_v15, %v10027_v7  ;;  %v2389_v61 = vmul.f32 %v2379_v46, %v10028_v5  ;;  %v2390_v20 = vmul.f32 %v2380_v15, %v10028_v5  ;;  %2861 = vrot.lane.b32.xlu0 %v7447_v53, %s4215_s19  ;;  %v10035_v15 = vld [vmem:[#allocation29_spill] sm:$0xff] }
 0x2a3   :  { %v2383_v10 = vadd.f32 %v2381_v37, %v2361_v0  ;;  %v2384_v39 = vadd.f32 %v2382_v36, %v2362_v38  ;;  %2863 = vrot.lane.b32.xlu1 %v7444_v13, %s4215_s19  ;;  %v7674_v16 = vpop.permute.xlu2 %2505  ;;  %v2394_v2 = vpop.permute.xlu0 %2393  ;;  %vm10029_vm10 = vcmask 261120  }
 0x2a4   :  { %v2387_v34 = vadd.f32 %v2385_v3, %v2365_v63  ;;  %v2388_v11 = vadd.f32 %v2386_v54, %v2366_v60  ;;  %v2391_v31 = vadd.f32 %v2389_v61, %v2369_v32  ;;  %v2392_v42 = vadd.f32 %v2390_v20, %v2370_v41  ;;  %v2396_v48 = vpop.permute.xlu1 %2395  ;;  %vm10030_vm11 = vmmov %vm10029_vm10 }
 0x2a5   :  { %v2397_v56 = vsel %vm10029_vm10, %v2394_v2, %v2396_v48  ;;  %v2398_v44 = vsel %vm10030_vm11, %v2396_v48, %v2394_v2  ;;  %vm10036_vm1 = vmmov %vm10029_vm10  ;;  %v10042_v2 = vld [vmem:[#allocation30_spill] sm:$0xff] }
 0x2a6   :  { %v2401_v52 = vsel %vm10031_vm5, %v2397_v56, 0.0  ;;  %v2402_v50 = vsel %vm10032_vm6, %v2398_v44, 0.0  ;;  %vm10037_vm8 = vmmov %vm10036_vm1  ;;  %v10044_v48 = vld [vmem:[#allocation34_spill] sm:$0xff] }
 0x2a7   :  { %v2403_v59 = vmul.f32 %v2401_v52, %v10033_v1  ;;  %v2404_v4 = vmul.f32 %v2402_v50, %v10033_v1  ;;  %v2407_v55 = vmul.f32 %v2401_v52, %v10034_v62  ;;  %v2408_v46 = vmul.f32 %v2402_v50, %v10034_v62  ;;  %vm10040_vm10 = vmmov %vm10036_vm1 }
 0x2a8   :  { %v2411_v0 = vmul.f32 %v2401_v52, %v10035_v15  ;;  %v2412_v38 = vmul.f32 %v2402_v50, %v10035_v15  ;;  %vm10041_vm11 = vmmov %vm10036_vm1 }
 0x2a9   :  { %v2405_v63 = vadd.f32 %v2403_v59, %v2383_v10  ;;  %v2406_v60 = vadd.f32 %v2404_v4, %v2384_v39  ;;  %v2409_v32 = vadd.f32 %v2407_v55, %v2387_v34  ;;  %v2410_v41 = vadd.f32 %v2408_v46, %v2388_v11  ;;  %2907 = vrot.lane.b32.xlu2 %v7476_v22, %s4215_s19  ;;  %vm10045_vm5 = vmmov %vm10038_vm0  ;;  %v10047_v46 = vld [vmem:[#allocation35_spill] sm:$0xff] }
 0x2aa   :  { %v2413_v35 = vadd.f32 %v2411_v0, %v2391_v31  ;;  %v2414_v37 = vadd.f32 %v2412_v38, %v2392_v42  ;;  %2885 = vrot.lane.b32.xlu0 %v7474_v58, %s4215_s19  ;;  %v10043_v31 = vld [vmem:[#allocation33_spill] sm:$0xff]  ;;  %vm10046_vm6 = vmmov %vm10039_vm4  ;;  %v10048_v38 = vld [vmem:[#allocation36_spill] sm:$0xff] }
 0x2ab   :  { %2905 = vrot.lane.b32.xlu1 %v7478_v49, %s4215_s19  ;;  %v7694_v36 = vpop.permute.xlu2 %2547  ;;  %v2418_v7 = vpop.permute.xlu0 %2417 }
 0x2ac   :  { %v2419_v3 = vsel %vm10036_vm1, %v7584_v8, %v2418_v7  ;;  %v2420_v54 = vsel %vm10037_vm8, %v2418_v7, %v7584_v8  ;;  %v2438_v5 = vpop.permute.xlu1 %2437  ;;  %vm10050_vm1 = vcmask 252928  }
 0x2ad   :  { %v2423_v61 = vsel %vm10038_vm0, %v2419_v3, 0.0  ;;  %v2424_v20 = vsel %vm10039_vm4, %v2420_v54, 0.0  ;;  %v2441_v10 = vsel %vm10040_vm10, %v2438_v5, %v7618_v9  ;;  %v2442_v39 = vsel %vm10041_vm11, %v7618_v9, %v2438_v5  ;;  %v10049_v54 = vld [vmem:[#allocation37_spill] sm:$0xff]  ;;  %vm10051_vm8 = vmmov %vm10050_vm1 }
 0x2ae   :  { %v2425_v34 = vmul.f32 %v2423_v61, %v10042_v2  ;;  %v2426_v11 = vmul.f32 %v2424_v20, %v10042_v2  ;;  %v2429_v42 = vmul.f32 %v2423_v61, %v10043_v31  ;;  %v2430_v8 = vmul.f32 %v2424_v20, %v10043_v31  ;;  %vm10057_vm0 = vmmov %vm10050_vm1 }
 0x2af   :  { %v2433_v56 = vmul.f32 %v2423_v61, %v10044_v48  ;;  %v2434_v44 = vmul.f32 %v2424_v20, %v10044_v48  ;;  %v2445_v52 = vsel %vm10045_vm5, %v2441_v10, 0.0  ;;  %v2446_v50 = vsel %vm10046_vm6, %v2442_v39, 0.0  ;;  %v10054_v48 = vld [vmem:[#allocation39_spill] sm:$0xff]  ;;  %vm10058_vm4 = vmmov %vm10057_vm0 }
 0x2b0   :  { %v2427_v1 = vadd.f32 %v2425_v34, %v2405_v63  ;;  %v2428_v9 = vadd.f32 %v2426_v11, %v2406_v60  ;;  %v2431_v59 = vadd.f32 %v2429_v42, %v2409_v32  ;;  %v2432_v4 = vadd.f32 %v2430_v8, %v2410_v41  ;;  %vm10059_vm10 = vmmov %vm10057_vm0 }
 0x2b1   :  { %v2435_v62 = vadd.f32 %v2433_v56, %v2413_v35  ;;  %v2436_v55 = vadd.f32 %v2434_v44, %v2414_v37  ;;  %v2447_v15 = vmul.f32 %v2445_v52, %v10047_v46  ;;  %v2448_v0 = vmul.f32 %v2446_v50, %v10047_v46  ;;  %2955 = vrot.lane.b32.xlu2 %v7449_v25, %s4216_s13  ;;  %vm10060_vm11 = vmmov %vm10057_vm0 }
 0x2b2   :  { %v2451_v7 = vmul.f32 %v2445_v52, %v10048_v38  ;;  %v2452_v3 = vmul.f32 %v2446_v50, %v10048_v38  ;;  %v2455_v5 = vmul.f32 %v2445_v52, %v10049_v54  ;;  %v2456_v63 = vmul.f32 %v2446_v50, %v10049_v54  ;;  %2933 = vrot.lane.b32.xlu0 %v7447_v53, %s4216_s13  ;;  %v10055_v52 = vld [vmem:[#allocation40_spill] sm:$0xff] }
 0x2b3   :  { %v2449_v60 = vadd.f32 %v2447_v15, %v2427_v1  ;;  %v2450_v32 = vadd.f32 %v2448_v0, %v2428_v9  ;;  %2935 = vrot.lane.b32.xlu1 %v7444_v13, %s4216_s13  ;;  %v7730_v41 = vpop.permute.xlu2 %2571  ;;  %v2460_v35 = vpop.permute.xlu0 %2459  ;;  %v10056_v9 = vld [vmem:[#allocation41_spill] sm:$0xff] }
 0x2b4   :  { %v2453_v37 = vadd.f32 %v2451_v7, %v2431_v59  ;;  %v2454_v61 = vadd.f32 %v2452_v3, %v2432_v4  ;;  %v2457_v20 = vadd.f32 %v2455_v5, %v2435_v62  ;;  %v2458_v10 = vadd.f32 %v2456_v63, %v2436_v55  ;;  %v2462_v39 = vpop.permute.xlu1 %2461 }
 0x2b5   :  { %v2463_v2 = vsel %vm10050_vm1, %v2460_v35, %v2462_v39  ;;  %v2464_v34 = vsel %vm10051_vm8, %v2462_v39, %v2460_v35  ;;  %v10062_v39 = vld [vmem:[#allocation43_spill] sm:$0xff] }
 0x2b6   :  { %v2467_v31 = vsel %vm4898_vm12, %v2463_v2, 0.0  ;;  %v2468_v8 = vsel %vm4914_vm7, %v2464_v34, 0.0  ;;  %v10063_v34 = vld [vmem:[#allocation44_spill] sm:$0xff] }
 0x2b7   :  { %v2469_v56 = vmul.f32 %v2467_v31, %v10054_v48  ;;  %v2470_v44 = vmul.f32 %v2468_v8, %v10054_v48  ;;  %v2473_v50 = vmul.f32 %v2467_v31, %v10055_v52  ;;  %v2474_v1 = vmul.f32 %v2468_v8, %v10055_v52 }
 0x2b8   :  { %v2477_v59 = vmul.f32 %v2467_v31, %v10056_v9  ;;  %v2478_v4 = vmul.f32 %v2468_v8, %v10056_v9 }
 0x2b9   :  { %v2471_v62 = vadd.f32 %v2469_v56, %v2449_v60  ;;  %v2472_v55 = vadd.f32 %v2470_v44, %v2450_v32  ;;  %v2475_v46 = vadd.f32 %v2473_v50, %v2453_v37  ;;  %v2476_v15 = vadd.f32 %v2474_v1, %v2454_v61  ;;  %2979 = vrot.lane.b32.xlu2 %v7476_v22, %s4216_s13  ;;  %v10061_v61 = vld [vmem:[#allocation42_spill] sm:$0xff] }
 0x2ba   :  { %v2479_v0 = vadd.f32 %v2477_v59, %v2457_v20  ;;  %v2480_v38 = vadd.f32 %v2478_v4, %v2458_v10  ;;  %2957 = vrot.lane.b32.xlu0 %v7474_v58, %s4216_s13  ;;  %v10064_v59 = vld [vmem:[#allocation45_spill] sm:$0xff] }
 0x2bb   :  { %2977 = vrot.lane.b32.xlu1 %v7478_v49, %s4216_s13  ;;  %v7750_v7 = vpop.permute.xlu2 %2619  ;;  %v2484_v3 = vpop.permute.xlu0 %2483 }
 0x2bc   :  { %v2485_v54 = vsel %vm10057_vm0, %v7638_v45, %v2484_v3  ;;  %v2486_v5 = vsel %vm10058_vm4, %v2484_v3, %v7638_v45  ;;  %v2504_v63 = vpop.permute.xlu1 %2503 }
 0x2bd   :  { %v2489_v60 = vsel %vm4898_vm12, %v2485_v54, 0.0  ;;  %v2490_v32 = vsel %vm4914_vm7, %v2486_v5, 0.0  ;;  %v2507_v35 = vsel %vm10059_vm10, %v2504_v63, %v7674_v16  ;;  %v2508_v37 = vsel %vm10060_vm11, %v7674_v16, %v2504_v63  ;;  %v10065_v54 = vld [vmem:[#allocation46_spill] sm:$0xff]  ;;  %v10066_v63 = vld [vmem:[#allocation47_spill] sm:$0xff] }
 0x2be   :  { %v2491_v20 = vmul.f32 %v2489_v60, %v10061_v61  ;;  %v2492_v10 = vmul.f32 %v2490_v32, %v10061_v61  ;;  %v2495_v2 = vmul.f32 %v2489_v60, %v10062_v39  ;;  %v2496_v45 = vmul.f32 %v2490_v32, %v10062_v39 }
 0x2bf   :  { %v2499_v31 = vmul.f32 %v2489_v60, %v10063_v34  ;;  %v2500_v8 = vmul.f32 %v2490_v32, %v10063_v34  ;;  %v2511_v48 = vsel %vm4898_vm12, %v2507_v35, 0.0  ;;  %v2512_v56 = vsel %vm4914_vm7, %v2508_v37, 0.0  ;;  %v10071_v34 = vld [vmem:[#allocation48_spill] sm:$0xff] }
 0x2c0   :  { %v2493_v44 = vadd.f32 %v2491_v20, %v2471_v62  ;;  %v2494_v16 = vadd.f32 %v2492_v10, %v2472_v55  ;;  %v2497_v52 = vadd.f32 %v2495_v2, %v2475_v46  ;;  %v2498_v50 = vadd.f32 %v2496_v45, %v2476_v15 }
 0x2c1   :  { %v2501_v1 = vadd.f32 %v2499_v31, %v2479_v0  ;;  %v2502_v9 = vadd.f32 %v2500_v8, %v2480_v38  ;;  %v2513_v4 = vmul.f32 %v2511_v48, %v10064_v59  ;;  %v2514_v3 = vmul.f32 %v2512_v56, %v10064_v59  ;;  %3021 = vrot.lane.b32.xlu2 %v7449_v25, %s4217_s24 }
 0x2c2   :  { %v2517_v5 = vmul.f32 %v2511_v48, %v10065_v54  ;;  %v2518_v11 = vmul.f32 %v2512_v56, %v10065_v54  ;;  %v2521_v42 = vmul.f32 %v2511_v48, %v10066_v63  ;;  %v2522_v62 = vmul.f32 %v2512_v56, %v10066_v63  ;;  %2999 = vrot.lane.b32.xlu0 %v7447_v53, %s4217_s24  ;;  %v10072_v48 = vld [vmem:[#allocation49_spill] sm:$0xff] }
 0x2c3   :  { %v2515_v55 = vadd.f32 %v2513_v4, %v2493_v44  ;;  %v2516_v46 = vadd.f32 %v2514_v3, %v2494_v16  ;;  %3001 = vrot.lane.b32.xlu1 %v7444_v13, %s4217_s24  ;;  %v7786_v15 = vpop.permute.xlu2 %2643  ;;  %v2526_v0 = vpop.permute.xlu0 %2525  ;;  %vm10067_vm7 = vcmask 244736   ;;  %v10073_v16 = vld [vmem:[#allocation52_spill] sm:$0xff] }
 0x2c4   :  { %v2519_v38 = vadd.f32 %v2517_v5, %v2497_v52  ;;  %v2520_v60 = vadd.f32 %v2518_v11, %v2498_v50  ;;  %v2523_v32 = vadd.f32 %v2521_v42, %v2501_v1  ;;  %v2524_v35 = vadd.f32 %v2522_v62, %v2502_v9  ;;  %v2528_v37 = vpop.permute.xlu1 %2527  ;;  %vm10068_vm12 = vmmov %vm10067_vm7 }
 0x2c5   :  { %v2529_v61 = vsel %vm10067_vm7, %v2526_v0, %v2528_v37  ;;  %v2530_v20 = vsel %vm10068_vm12, %v2528_v37, %v2526_v0  ;;  %vm10074_vm5 = vmmov %vm10067_vm7  ;;  %v10079_v37 = vld [vmem:[#allocation54_spill] sm:$0xff] }
 0x2c6   :  { %v2533_v39 = vsel %vm5022_vm13, %v2529_v61, 0.0  ;;  %v2534_v45 = vsel %vm5033_vm9, %v2530_v20, 0.0  ;;  %vm10075_vm6 = vmmov %vm10074_vm5  ;;  %v10080_v20 = vld [vmem:[#allocation55_spill] sm:$0xff] }
 0x2c7   :  { %v2535_v31 = vmul.f32 %v2533_v39, %v10071_v34  ;;  %v2536_v8 = vmul.f32 %v2534_v45, %v10071_v34  ;;  %v2539_v56 = vmul.f32 %v2533_v39, %v10072_v48  ;;  %v2540_v44 = vmul.f32 %v2534_v45, %v10072_v48  ;;  %vm10076_vm1 = vmmov %vm10074_vm5 }
 0x2c8   :  { %v2543_v52 = vmul.f32 %v2533_v39, %v10073_v16  ;;  %v2544_v50 = vmul.f32 %v2534_v45, %v10073_v16  ;;  %vm10077_vm8 = vmmov %vm10076_vm1 }
 0x2c9   :  { %v2537_v1 = vadd.f32 %v2535_v31, %v2515_v55  ;;  %v2538_v9 = vadd.f32 %v2536_v8, %v2516_v46  ;;  %v2541_v59 = vadd.f32 %v2539_v56, %v2519_v38  ;;  %v2542_v4 = vadd.f32 %v2540_v44, %v2520_v60  ;;  %3045 = vrot.lane.b32.xlu2 %v7476_v22, %s4217_s24  ;;  %v10078_v60 = vld [vmem:[#allocation53_spill] sm:$0xff] }
 0x2ca   :  { %v2545_v3 = vadd.f32 %v2543_v52, %v2523_v32  ;;  %v2546_v54 = vadd.f32 %v2544_v50, %v2524_v35  ;;  %3023 = vrot.lane.b32.xlu0 %v7474_v58, %s4217_s24  ;;  %v10081_v52 = vld [vmem:[#allocation56_spill] sm:$0xff] }
 0x2cb   :  { %3043 = vrot.lane.b32.xlu1 %v7478_v49, %s4217_s24  ;;  %v7806_v5 = vpop.permute.xlu2 %2685  ;;  %v2550_v11 = vpop.permute.xlu0 %2549 }
 0x2cc   :  { %v2551_v63 = vsel %vm10074_vm5, %v7694_v36, %v2550_v11  ;;  %v2552_v42 = vsel %vm10075_vm6, %v2550_v11, %v7694_v36  ;;  %v2570_v62 = vpop.permute.xlu1 %2569 }
 0x2cd   :  { %v2555_v55 = vsel %vm5022_vm13, %v2551_v63, 0.0  ;;  %v2556_v46 = vsel %vm5033_vm9, %v2552_v42, 0.0  ;;  %v2573_v0 = vsel %vm10076_vm1, %v2570_v62, %v7730_v41  ;;  %v2574_v38 = vsel %vm10077_vm8, %v7730_v41, %v2570_v62  ;;  %v10082_v63 = vld [vmem:[#allocation57_spill] sm:$0xff]  ;;  %v10083_v62 = vld [vmem:[#allocation14_spill] sm:$0xff] }
 0x2ce   :  { %v2557_v32 = vmul.f32 %v2555_v55, %v10078_v60  ;;  %v2558_v35 = vmul.f32 %v2556_v46, %v10078_v60  ;;  %v2561_v61 = vmul.f32 %v2555_v55, %v10079_v37  ;;  %v2562_v36 = vmul.f32 %v2556_v46, %v10079_v37 }
 0x2cf   :  { %v2565_v39 = vmul.f32 %v2555_v55, %v10080_v20  ;;  %v2566_v45 = vmul.f32 %v2556_v46, %v10080_v20  ;;  %v2577_v34 = vsel %vm5022_vm13, %v2573_v0, 0.0  ;;  %v2578_v31 = vsel %vm5033_vm9, %v2574_v38, 0.0  ;;  %v10089_v20 = vld [vmem:[#allocation58_spill] sm:$0xff] }
 0x2d0   :  { %v2559_v8 = vadd.f32 %v2557_v32, %v2537_v1  ;;  %v2560_v41 = vadd.f32 %v2558_v35, %v2538_v9  ;;  %v2563_v48 = vadd.f32 %v2561_v61, %v2541_v59  ;;  %v2564_v56 = vadd.f32 %v2562_v36, %v2542_v4  ;;  %v10087_v61 = vld [vmem:[#allocation70_spill] sm:$0xff] }
 0x2d1   :  { %v2567_v44 = vadd.f32 %v2565_v39, %v2545_v3  ;;  %v2568_v16 = vadd.f32 %v2566_v45, %v2546_v54  ;;  %v2579_v50 = vmul.f32 %v2577_v34, %v10081_v52  ;;  %v2580_v11 = vmul.f32 %v2578_v31, %v10081_v52  ;;  %3123 = vrot.lane.b32.xlu2 %v7474_v58, %s4218_s15 }
 0x2d2   :  { %v2583_v42 = vmul.f32 %v2577_v34, %v10082_v63  ;;  %v2584_v10 = vmul.f32 %v2578_v31, %v10082_v63  ;;  %v2587_v2 = vmul.f32 %v2577_v34, %v10083_v62  ;;  %v2588_v1 = vmul.f32 %v2578_v31, %v10083_v62  ;;  %3101 = vrot.lane.b32.xlu0 %v7444_v13, %s4218_s15  ;;  %v10090_v34 = vld [vmem:[#allocation61_spill] sm:$0xff] }
 0x2d3   :  { %v7840_v9 = vadd.f32 %v2579_v50, %v2559_v8  ;;  %v7842_v59 = vadd.f32 %v2580_v11, %v2560_v41  ;;  %3103 = vrot.lane.b32.xlu1 %v7447_v53, %s4218_s15  ;;  %v7846_v4 = vpop.permute.xlu2 %2709  ;;  %v2598_v3 = vpop.permute.xlu0 %2597  ;;  %vm10084_vm9 = vcmask 146432   ;;  %vm10088_vm0 = vnez %v10087_v61 }
 0x2d4   :  { %v7848_v54 = vadd.f32 %v2583_v42, %v2563_v48  ;;  %v7850_v55 = vadd.f32 %v2584_v10, %v2564_v56  ;;  %v7852_v46 = vadd.f32 %v2587_v2, %v2567_v44  ;;  %v7854_v0 = vadd.f32 %v2588_v1, %v2568_v16  ;;  %v2600_v38 = vpop.permute.xlu1 %2599  ;;  %vm10085_vm13 = vmmov %vm10084_vm9  ;;  %v10091_v56 = vld [vmem:[#allocation62_spill] sm:$0xff]  ;;  %v10096_v2 = vld [vmem:[#allocation27_spill] sm:$0xff] }
 0x2d5   :  { %v2601_v60 = vsel %vm10084_vm9, %v2598_v3, %v2600_v38  ;;  %v2602_v32 = vsel %vm10085_vm13, %v2600_v38, %v2598_v3  ;;  %vm10092_vm4 = vmmov %vm10084_vm9  ;;  %v10097_v38 = vld [vmem:[#allocation63_spill] sm:$0xff] }
 0x2d6   :  { %v2605_v37 = vsel %vm5170_vm15, %v2601_v60, 0.0  ;;  %v2606_v36 = vsel %vm10088_vm0, %v2602_v32, 0.0  ;;  %vm10093_vm10 = vmmov %vm10092_vm4  ;;  %v10098_v32 = vld [vmem:[#allocation64_spill] sm:$0xff] }
 0x2d7   :  { %v2607_v39 = vmul.f32 %v2605_v37, %v10089_v20  ;;  %v2608_v45 = vmul.f32 %v2606_v36, %v10089_v20  ;;  %v2611_v31 = vmul.f32 %v2605_v37, %v10090_v34  ;;  %v2612_v8 = vmul.f32 %v2606_v36, %v10090_v34  ;;  %vm10094_vm11 = vmmov %vm10092_vm4 }
 0x2d8   :  { %v2615_v44 = vmul.f32 %v2605_v37, %v10091_v56  ;;  %v2616_v16 = vmul.f32 %v2606_v36, %v10091_v56  ;;  %vm10095_vm7 = vmmov %vm10092_vm4 }
 0x2d9   :  { %3147 = vrot.lane.b32.xlu2 %v7478_v49, %s4218_s15 }
 0x2da   :  { %3125 = vrot.lane.b32.xlu0 %v7449_v25, %s4218_s15 }
 0x2db   :  { %3145 = vrot.lane.b32.xlu1 %v7476_v22, %s4218_s15  ;;  %v7872_v41 = vpop.permute.xlu2 %2751  ;;  %v2622_v48 = vpop.permute.xlu0 %2621 }
 0x2dc   :  { %v2623_v52 = vsel %vm10092_vm4, %v7750_v7, %v2622_v48  ;;  %v2624_v50 = vsel %vm10093_vm10, %v2622_v48, %v7750_v7  ;;  %v2642_v11 = vpop.permute.xlu1 %2641  ;;  %vm10123_vm10 = vcmp.ge.s32.totalorder %v4428_v26, 1 }
 0x2dd   :  { %v2627_v63 = vsel %vm5170_vm15, %v2623_v52, 0.0  ;;  %v2628_v42 = vsel %vm10088_vm0, %v2624_v50, 0.0  ;;  %v2645_v10 = vsel %vm10094_vm11, %v2642_v11, %v7786_v15  ;;  %v2646_v62 = vsel %vm10095_vm7, %v7786_v15, %v2642_v11 }
 0x2de   :  { %v2629_v1 = vmul.f32 %v2627_v63, %v10096_v2  ;;  %v2630_v3 = vmul.f32 %v2628_v42, %v10096_v2  ;;  %v2633_v60 = vmul.f32 %v2627_v63, %v10097_v38  ;;  %v2634_v7 = vmul.f32 %v2628_v42, %v10097_v38  ;;  %v10099_v2 = vld [vmem:[#allocation65_spill] sm:$0xff] }
 0x2df   :  { %v2637_v37 = vmul.f32 %v2627_v63, %v10098_v32  ;;  %v2638_v36 = vmul.f32 %v2628_v42, %v10098_v32  ;;  %v2649_v20 = vsel %vm5170_vm15, %v2645_v10, 0.0  ;;  %v2650_v34 = vsel %vm10088_vm0, %v2646_v62, 0.0  ;;  %v10100_v63 = vld [vmem:[#allocation66_spill] sm:$0xff] }
 0x2e0   :  { %v2631_v48 = vadd.f32 %v2629_v1, %v2607_v39  ;;  %v2632_v15 = vadd.f32 %v2630_v3, %v2608_v45  ;;  %v2635_v56 = vadd.f32 %v2633_v60, %v2611_v31  ;;  %v2636_v52 = vadd.f32 %v2634_v7, %v2612_v8  ;;  %v10101_v10 = vld [vmem:[#allocation38_spill] sm:$0xff] }
 0x2e1   :  { %v2639_v50 = vadd.f32 %v2637_v37, %v2615_v44  ;;  %v2640_v11 = vadd.f32 %v2638_v36, %v2616_v16  ;;  %v2651_v57 = vmul.f32 %v2649_v20, %v10099_v2  ;;  %v2652_v38 = vmul.f32 %v2650_v34, %v10099_v2  ;;  %3189 = vrot.lane.b32.xlu2 %v7474_v58, %s4219_s7  ;;  %v10104_v37 = vld [vmem:[#allocation85_spill] sm:$0xff]  ;;  %v10109_v2 = vld [vmem:[#allocation68_spill] sm:$0xff] }
 0x2e2   :  { %v2655_v42 = vmul.f32 %v2649_v20, %v10100_v63  ;;  %v2656_v35 = vmul.f32 %v2650_v34, %v10100_v63  ;;  %v2659_v61 = vmul.f32 %v2649_v20, %v10101_v10  ;;  %v2660_v39 = vmul.f32 %v2650_v34, %v10101_v10  ;;  %3167 = vrot.lane.b32.xlu0 %v7444_v13, %s4219_s7  ;;  %v10108_v34 = vld [vmem:[#allocation67_spill] sm:$0xff] }
 0x2e3   :  { %v2653_v45 = vadd.f32 %v2651_v57, %v2631_v48  ;;  %v2654_v31 = vadd.f32 %v2652_v38, %v2632_v15  ;;  %3169 = vrot.lane.b32.xlu1 %v7447_v53, %s4219_s7  ;;  %v7910_v8 = vpop.permute.xlu2 %2775  ;;  %v2664_v44 = vpop.permute.xlu0 %2663  ;;  %vm10102_vm15 = vcmask 138240   ;;  %vm10105_vm5 = vnez %v10104_v37  ;;  %v10106_v57 = vld [vmem:[#allocation86_spill] sm:$0xff] }
 0x2e4   :  { %v2657_v16 = vadd.f32 %v2655_v42, %v2635_v56  ;;  %v2658_v62 = vadd.f32 %v2656_v35, %v2636_v52  ;;  %v2661_v1 = vadd.f32 %v2659_v61, %v2639_v50  ;;  %v2662_v3 = vadd.f32 %v2660_v39, %v2640_v11  ;;  %v2666_v60 = vpop.permute.xlu1 %2665  ;;  %vm10103_vm12 = vmmov %vm10102_vm15  ;;  %v10110_v50 = vld [vmem:[#allocation71_spill] sm:$0xff] }
 0x2e5   :  { %v2667_v7 = vsel %vm10102_vm15, %v2664_v44, %v2666_v60  ;;  %v2668_v32 = vsel %vm10103_vm12, %v2666_v60, %v2664_v44  ;;  %vm10107_vm6 = vnez %v10106_v57  ;;  %vm10111_vm1 = vmmov %vm10103_vm12  ;;  %vm10121_vm0 = vcmask 130048  }
 0x2e6   :  { %v2671_v36 = vsel %vm10105_vm5, %v2667_v7, 0.0  ;;  %v2672_v20 = vsel %vm10107_vm6, %v2668_v32, 0.0  ;;  %vm10112_vm8 = vmmov %vm10111_vm1  ;;  %v10115_v32 = vld [vmem:[#allocation72_spill] sm:$0xff]  ;;  %vm10124_vm11 = vcmp.ge.s32.totalorder %v4438_v29, 1 }
 0x2e7   :  { %v2673_v48 = vmul.f32 %v2671_v36, %v10108_v34  ;;  %v2674_v15 = vmul.f32 %v2672_v20, %v10108_v34  ;;  %v2677_v56 = vmul.f32 %v2671_v36, %v10109_v2  ;;  %v2678_v52 = vmul.f32 %v2672_v20, %v10109_v2  ;;  %vm10113_vm9 = vmmov %vm10111_vm1  ;;  %v10116_v34 = vld [vmem:[#allocation75_spill] sm:$0xff] }
 0x2e8   :  { %v2681_v11 = vmul.f32 %v2671_v36, %v10110_v50  ;;  %v2682_v38 = vmul.f32 %v2672_v20, %v10110_v50  ;;  %vm10114_vm13 = vmmov %vm10111_vm1 }
 0x2e9   :  { %v2675_v63 = vadd.f32 %v2673_v48, %v2653_v45  ;;  %v2676_v42 = vadd.f32 %v2674_v15, %v2654_v31  ;;  %v2679_v35 = vadd.f32 %v2677_v56, %v2657_v16  ;;  %v2680_v10 = vadd.f32 %v2678_v52, %v2658_v62  ;;  %3213 = vrot.lane.b32.xlu2 %v7478_v49, %s4219_s7  ;;  %v10117_v15 = vld [vmem:[#allocation76_spill] sm:$0xff]  ;;  %vm10122_vm4 = vmmov %vm10121_vm0 }
 0x2ea   :  { %v2683_v61 = vadd.f32 %v2681_v11, %v2661_v1  ;;  %v2684_v39 = vadd.f32 %v2682_v38, %v2662_v3  ;;  %3191 = vrot.lane.b32.xlu0 %v7449_v25, %s4219_s7  ;;  %vm10128_vm7 = vmmov %vm10121_vm0 }
 0x2eb   :  { %3211 = vrot.lane.b32.xlu1 %v7476_v22, %s4219_s7  ;;  %v7930_v44 = vpop.permute.xlu2 %2817  ;;  %v2688_v60 = vpop.permute.xlu0 %2687  ;;  %vm10129_vm15 = vmmov %vm10121_vm0 }
 0x2ec   :  { %v2689_v45 = vsel %vm10111_vm1, %v7806_v5, %v2688_v60  ;;  %v2690_v31 = vsel %vm10112_vm8, %v2688_v60, %v7806_v5  ;;  %v2708_v16 = vpop.permute.xlu1 %2707  ;;  %vm10130_vm12 = vmmov %vm10123_vm10 }
 0x2ed   :  { %v2693_v62 = vsel %vm10105_vm5, %v2689_v45, 0.0  ;;  %v2694_v1 = vsel %vm10107_vm6, %v2690_v31, 0.0  ;;  %v2711_v3 = vsel %vm10113_vm9, %v2708_v16, %v7846_v4  ;;  %v2712_v7 = vsel %vm10114_vm13, %v7846_v4, %v2708_v16  ;;  %v10118_v16 = vld [vmem:[#allocation81_spill] sm:$0xff]  ;;  %vm10133_vm1 = vmmov %vm10121_vm0 }
 0x2ee   :  { %v2695_v36 = vmul.f32 %v2693_v62, %v10115_v32  ;;  %v2696_v20 = vmul.f32 %v2694_v1, %v10115_v32  ;;  %v2699_v48 = vmul.f32 %v2693_v62, %v10116_v34  ;;  %v2700_v5 = vmul.f32 %v2694_v1, %v10116_v34  ;;  %vm10137_vm8 = vmmov %vm10123_vm10 }
 0x2ef   :  { %v2703_v2 = vmul.f32 %v2693_v62, %v10117_v15  ;;  %v2704_v56 = vmul.f32 %v2694_v1, %v10117_v15  ;;  %v2715_v52 = vsel %vm10105_vm5, %v2711_v3, 0.0  ;;  %v2716_v50 = vsel %vm10107_vm6, %v2712_v7, 0.0  ;;  %v10119_v62 = vld [vmem:[#allocation82_spill] sm:$0xff]  ;;  %v10120_v3 = vld [vmem:[#allocation83_spill] sm:$0xff]  ;;  %vm10131_vm5 = vmmov %vm10124_vm11 }
 0x2f0   :  { %v2697_v11 = vadd.f32 %v2695_v36, %v2675_v63  ;;  %v2698_v4 = vadd.f32 %v2696_v20, %v2676_v42  ;;  %v2701_v38 = vadd.f32 %v2699_v48, %v2679_v35  ;;  %v2702_v60 = vadd.f32 %v2700_v5, %v2680_v10  ;;  %vm10132_vm6 = vmmov %vm10121_vm0 }
 0x2f1   :  { %v2705_v45 = vadd.f32 %v2703_v2, %v2683_v61  ;;  %v2706_v31 = vadd.f32 %v2704_v56, %v2684_v39  ;;  %v2717_v32 = vmul.f32 %v2715_v52, %v10118_v16  ;;  %v2718_v34 = vmul.f32 %v2716_v50, %v10118_v16  ;;  %3261 = vrot.lane.b32.xlu2 %v7474_v58, %s4220_s5  ;;  %vm10138_vm9 = vmmov %vm10131_vm5 }
 0x2f2   :  { %v2721_v1 = vmul.f32 %v2715_v52, %v10119_v62  ;;  %v2722_v37 = vmul.f32 %v2716_v50, %v10119_v62  ;;  %v2725_v57 = vmul.f32 %v2715_v52, %v10120_v3  ;;  %v2726_v63 = vmul.f32 %v2716_v50, %v10120_v3  ;;  %3239 = vrot.lane.b32.xlu0 %v7444_v13, %s4220_s5  ;;  %v10125_v52 = vld [vmem:[#allocation84_spill] sm:$0xff] }
 0x2f3   :  { %v2719_v42 = vadd.f32 %v2717_v32, %v2697_v11  ;;  %v2720_v35 = vadd.f32 %v2718_v34, %v2698_v4  ;;  %3241 = vrot.lane.b32.xlu1 %v7447_v53, %s4220_s5  ;;  %v7966_v10 = vpop.permute.xlu2 %2841  ;;  %v2730_v61 = vpop.permute.xlu0 %2729  ;;  %v10126_v4 = vld [vmem:[#allocation87_spill] sm:$0xff]  ;;  %vm10142_vm13 = vcmask 121856  }
 0x2f4   :  { %v2723_v39 = vadd.f32 %v2721_v1, %v2701_v38  ;;  %v2724_v7 = vadd.f32 %v2722_v37, %v2702_v60  ;;  %v2727_v36 = vadd.f32 %v2725_v57, %v2705_v45  ;;  %v2728_v20 = vadd.f32 %v2726_v63, %v2706_v31  ;;  %v2732_v48 = vpop.permute.xlu1 %2731  ;;  %v10127_v45 = vld [vmem:[#allocation88_spill] sm:$0xff] }
 0x2f5   :  { %v2733_v5 = vsel %vm10121_vm0, %v2730_v61, %v2732_v48  ;;  %v2734_v15 = vsel %vm10122_vm4, %v2732_v48, %v2730_v61  ;;  %v10134_v48 = vld [vmem:[#allocation89_spill] sm:$0xff]  ;;  %vm10143_vm0 = vmmov %vm10142_vm13 }
 0x2f6   :  { %v2737_v2 = vsel %vm10123_vm10, %v2733_v5, 0.0  ;;  %v2738_v56 = vsel %vm10124_vm11, %v2734_v15, 0.0  ;;  %vm10151_vm11 = vmmov %vm10143_vm0 }
 0x2f7   :  { %v2739_v50 = vmul.f32 %v2737_v2, %v10125_v52  ;;  %v2740_v11 = vmul.f32 %v2738_v56, %v10125_v52  ;;  %v2743_v38 = vmul.f32 %v2737_v2, %v10126_v4  ;;  %v2744_v60 = vmul.f32 %v2738_v56, %v10126_v4  ;;  %v10136_v52 = vld [vmem:[#allocation91_spill] sm:$0xff] }
 0x2f8   :  { %v2747_v31 = vmul.f32 %v2737_v2, %v10127_v45  ;;  %v2748_v16 = vmul.f32 %v2738_v56, %v10127_v45  ;;  %v10135_v2 = vld [vmem:[#allocation90_spill] sm:$0xff] }
 0x2f9   :  { %v2741_v32 = vadd.f32 %v2739_v50, %v2719_v42  ;;  %v2742_v34 = vadd.f32 %v2740_v11, %v2720_v35  ;;  %v2745_v62 = vadd.f32 %v2743_v38, %v2723_v39  ;;  %v2746_v1 = vadd.f32 %v2744_v60, %v2724_v7  ;;  %3285 = vrot.lane.b32.xlu2 %v7478_v49, %s4220_s5 }
 0x2fa   :  { %v2749_v37 = vadd.f32 %v2747_v31, %v2727_v36  ;;  %v2750_v3 = vadd.f32 %v2748_v16, %v2728_v20  ;;  %3263 = vrot.lane.b32.xlu0 %v7449_v25, %s4220_s5 }
 0x2fb   :  { %3283 = vrot.lane.b32.xlu1 %v7476_v22, %s4220_s5  ;;  %v7986_v57 = vpop.permute.xlu2 %2883  ;;  %v2754_v63 = vpop.permute.xlu0 %2753 }
 0x2fc   :  { %v2755_v42 = vsel %vm10128_vm7, %v7872_v41, %v2754_v63  ;;  %v2756_v35 = vsel %vm10129_vm15, %v2754_v63, %v7872_v41  ;;  %v2774_v61 = vpop.permute.xlu1 %2773  ;;  %vm10152_vm7 = vmmov %vm10143_vm0 }
 0x2fd   :  { %v2759_v39 = vsel %vm10130_vm12, %v2755_v42, 0.0  ;;  %v2760_v7 = vsel %vm10131_vm5, %v2756_v35, 0.0  ;;  %v2777_v36 = vsel %vm10132_vm6, %v2774_v61, %v7910_v8  ;;  %v2778_v20 = vsel %vm10133_vm1, %v7910_v8, %v2774_v61  ;;  %v10139_v42 = vld [vmem:[#allocation92_spill] sm:$0xff]  ;;  %vm10153_vm15 = vmmov %vm10143_vm0 }
 0x2fe   :  { %v2761_v5 = vmul.f32 %v2759_v39, %v10134_v48  ;;  %v2762_v15 = vmul.f32 %v2760_v7, %v10134_v48  ;;  %v2765_v56 = vmul.f32 %v2759_v39, %v10135_v2  ;;  %v2766_v41 = vmul.f32 %v2760_v7, %v10135_v2  ;;  %v10141_v48 = vld [vmem:[#allocation94_spill] sm:$0xff]  ;;  %vm10154_vm12 = vmmov %vm10143_vm0 }
 0x2ff   :  { %v2769_v50 = vmul.f32 %v2759_v39, %v10136_v52  ;;  %v2770_v11 = vmul.f32 %v2760_v7, %v10136_v52  ;;  %v2781_v4 = vsel %vm10137_vm8, %v2777_v36, 0.0  ;;  %v2782_v38 = vsel %vm10138_vm9, %v2778_v20, 0.0  ;;  %v10140_v39 = vld [vmem:[#allocation93_spill] sm:$0xff] }
 0x300   :  { %v2763_v60 = vadd.f32 %v2761_v5, %v2741_v32  ;;  %v2764_v8 = vadd.f32 %v2762_v15, %v2742_v34  ;;  %v2767_v45 = vadd.f32 %v2765_v56, %v2745_v62  ;;  %v2768_v31 = vadd.f32 %v2766_v41, %v2746_v1 }
 0x301   :  { %v2771_v16 = vadd.f32 %v2769_v50, %v2749_v37  ;;  %v2772_v63 = vadd.f32 %v2770_v11, %v2750_v3  ;;  %v2783_v35 = vmul.f32 %v2781_v4, %v10139_v42  ;;  %v2784_v61 = vmul.f32 %v2782_v38, %v10139_v42  ;;  %3327 = vrot.lane.b32.xlu2 %v7474_v58, %s4221_s23  ;;  %v10144_v50 = vld [vmem:[#allocation105_spill] sm:$0xff] }
 0x302   :  { %v2787_v7 = vmul.f32 %v2781_v4, %v10140_v39  ;;  %v2788_v36 = vmul.f32 %v2782_v38, %v10140_v39  ;;  %v2791_v2 = vmul.f32 %v2781_v4, %v10141_v48  ;;  %v2792_v32 = vmul.f32 %v2782_v38, %v10141_v48  ;;  %3305 = vrot.lane.b32.xlu0 %v7444_v13, %s4221_s23  ;;  %v10146_v4 = vld [vmem:[#allocation106_spill] sm:$0xff] }
 0x303   :  { %v2785_v34 = vadd.f32 %v2783_v35, %v2763_v60  ;;  %v2786_v62 = vadd.f32 %v2784_v61, %v2764_v8  ;;  %3307 = vrot.lane.b32.xlu1 %v7447_v53, %s4221_s23  ;;  %v8022_v1 = vpop.permute.xlu2 %2907  ;;  %vm10145_vm4 = vnez %v10144_v50  ;;  %vm10147_vm10 = vnez %v10146_v4  ;;  %v10148_v60 = vld [vmem:[#allocation95_spill] sm:$0xff]  ;;  %v10159_v50 = vld [vmem:[#allocation102_spill] sm:$0xff] }
 0x304   :  { %v2789_v37 = vadd.f32 %v2787_v7, %v2767_v45  ;;  %v2790_v3 = vadd.f32 %v2788_v36, %v2768_v31  ;;  %v2793_v20 = vadd.f32 %v2791_v2, %v2771_v16  ;;  %v2794_v5 = vadd.f32 %v2792_v32, %v2772_v63  ;;  %v2796_v15 = vpop.permute.xlu0 %2795  ;;  %v10149_v45 = vld [vmem:[#allocation96_spill] sm:$0xff]  ;;  %v10150_v63 = vld [vmem:[#allocation97_spill] sm:$0xff] }
 0x305   :  { %v2798_v56 = vpop.permute.xlu1 %2797  ;;  %vm10161_vm5 = vcmask 113664  }
 0x306   :  { %v2799_v41 = vsel %vm10142_vm13, %v2796_v15, %v2798_v56  ;;  %v2800_v52 = vsel %vm10143_vm0, %v2798_v56, %v2796_v15  ;;  %vm10162_vm6 = vmmov %vm10161_vm5 }
 0x307   :  { %v2803_v11 = vsel %vm10145_vm4, %v2799_v41, 0.0  ;;  %v2804_v38 = vsel %vm10147_vm10, %v2800_v52, 0.0  ;;  %v10155_v52 = vld [vmem:[#allocation98_spill] sm:$0xff]  ;;  %vm10170_vm9 = vmmov %vm10161_vm5 }
 0x308   :  { %v2805_v8 = vmul.f32 %v2803_v11, %v10148_v60  ;;  %v2806_v42 = vmul.f32 %v2804_v38, %v10148_v60  ;;  %v2809_v31 = vmul.f32 %v2803_v11, %v10149_v45  ;;  %v2810_v16 = vmul.f32 %v2804_v38, %v10149_v45  ;;  %v10156_v60 = vld [vmem:[#allocation99_spill] sm:$0xff]  ;;  %vm10171_vm13 = vmmov %vm10161_vm5 }
 0x309   :  { %v2813_v35 = vmul.f32 %v2803_v11, %v10150_v63  ;;  %v2814_v61 = vmul.f32 %v2804_v38, %v10150_v63  ;;  %3351 = vrot.lane.b32.xlu2 %v7478_v49, %s4221_s23  ;;  %vm10172_vm0 = vmmov %vm10161_vm5 }
 0x30a   :  { %v2807_v39 = vadd.f32 %v2805_v8, %v2785_v34  ;;  %v2808_v7 = vadd.f32 %v2806_v42, %v2786_v62  ;;  %v2811_v36 = vadd.f32 %v2809_v31, %v2789_v37  ;;  %v2812_v48 = vadd.f32 %v2810_v16, %v2790_v3  ;;  %3329 = vrot.lane.b32.xlu0 %v7449_v25, %s4221_s23  ;;  %v10157_v42 = vld [vmem:[#allocation100_spill] sm:$0xff] }
 0x30b   :  { %v2815_v2 = vadd.f32 %v2813_v35, %v2793_v20  ;;  %v2816_v32 = vadd.f32 %v2814_v61, %v2794_v5  ;;  %3349 = vrot.lane.b32.xlu1 %v7476_v22, %s4221_s23  ;;  %v8042_v15 = vpop.permute.xlu2 %2955 }
 0x30c   :  { %v2820_v56 = vpop.permute.xlu0 %2819 }
 0x30d   :  { %v2821_v41 = vsel %vm10151_vm11, %v7930_v44, %v2820_v56  ;;  %v2822_v34 = vsel %vm10152_vm7, %v2820_v56, %v7930_v44  ;;  %v2840_v62 = vpop.permute.xlu1 %2839  ;;  %vm10182_vm7 = vcmp.ge.s32.totalorder %v4430_v27, 2 }
 0x30e   :  { %v2825_v37 = vsel %vm10145_vm4, %v2821_v41, 0.0  ;;  %v2826_v3 = vsel %vm10147_vm10, %v2822_v34, 0.0  ;;  %v2843_v20 = vsel %vm10153_vm15, %v2840_v62, %v7966_v10  ;;  %v2844_v5 = vsel %vm10154_vm12, %v7966_v10, %v2840_v62  ;;  %v10158_v62 = vld [vmem:[#allocation101_spill] sm:$0xff] }
 0x30f   :  { %v2827_v11 = vmul.f32 %v2825_v37, %v10155_v52  ;;  %v2828_v38 = vmul.f32 %v2826_v3, %v10155_v52  ;;  %v2831_v8 = vmul.f32 %v2825_v37, %v10156_v60  ;;  %v2832_v44 = vmul.f32 %v2826_v3, %v10156_v60 }
 0x310   :  { %v2835_v45 = vmul.f32 %v2825_v37, %v10157_v42  ;;  %v2836_v31 = vmul.f32 %v2826_v3, %v10157_v42  ;;  %v2847_v16 = vsel %vm10145_vm4, %v2843_v20, 0.0  ;;  %v2848_v63 = vsel %vm10147_vm10, %v2844_v5, 0.0  ;;  %vm10173_vm4 = vmmov %vm10172_vm0 }
 0x311   :  { %v2829_v35 = vadd.f32 %v2827_v11, %v2807_v39  ;;  %v2830_v10 = vadd.f32 %v2828_v38, %v2808_v7  ;;  %v2833_v61 = vadd.f32 %v2831_v8, %v2811_v36  ;;  %v2834_v56 = vadd.f32 %v2832_v44, %v2812_v48  ;;  %3393 = vrot.lane.b32.xlu2 %v7474_v58, %s4222_s20  ;;  %v10160_v39 = vld [vmem:[#allocation103_spill] sm:$0xff] }
 0x312   :  { %v2837_v41 = vadd.f32 %v2835_v45, %v2815_v2  ;;  %v2838_v34 = vadd.f32 %v2836_v31, %v2816_v32  ;;  %v2849_v52 = vmul.f32 %v2847_v16, %v10158_v62  ;;  %v2850_v37 = vmul.f32 %v2848_v63, %v10158_v62  ;;  %3371 = vrot.lane.b32.xlu0 %v7444_v13, %s4222_s20  ;;  %v10163_v45 = vld [vmem:[#allocation117_spill] sm:$0xff]  ;;  %v10167_v62 = vld [vmem:[#allocation104_spill] sm:$0xff] }
 0x313   :  { %v2853_v3 = vmul.f32 %v2847_v16, %v10159_v50  ;;  %v2854_v4 = vmul.f32 %v2848_v63, %v10159_v50  ;;  %v2857_v7 = vmul.f32 %v2847_v16, %v10160_v39  ;;  %v2858_v36 = vmul.f32 %v2848_v63, %v10160_v39  ;;  %3373 = vrot.lane.b32.xlu1 %v7447_v53, %s4222_s20  ;;  %v8078_v48 = vpop.permute.xlu2 %2979  ;;  %v10165_v16 = vld [vmem:[#allocation118_spill] sm:$0xff] }
 0x314   :  { %v2851_v2 = vadd.f32 %v2849_v52, %v2829_v35  ;;  %v2852_v32 = vadd.f32 %v2850_v37, %v2830_v10  ;;  %v2862_v20 = vpop.permute.xlu0 %2861  ;;  %vm10164_vm1 = vnez %v10163_v45  ;;  %vm10166_vm8 = vnez %v10165_v16  ;;  %v10168_v10 = vld [vmem:[#allocation107_spill] sm:$0xff]  ;;  %v10178_v45 = vld [vmem:[#allocation113_spill] sm:$0xff] }
 0x315   :  { %v2855_v5 = vadd.f32 %v2853_v3, %v2833_v61  ;;  %v2856_v11 = vadd.f32 %v2854_v4, %v2834_v56  ;;  %v2859_v38 = vadd.f32 %v2857_v7, %v2837_v41  ;;  %v2860_v60 = vadd.f32 %v2858_v36, %v2838_v34  ;;  %v2864_v8 = vpop.permute.xlu1 %2863  ;;  %v10169_v41 = vld [vmem:[#allocation108_spill] sm:$0xff] }
 0x316   :  { %v2865_v44 = vsel %vm10161_vm5, %v2862_v20, %v2864_v8  ;;  %v2866_v42 = vsel %vm10162_vm6, %v2864_v8, %v2862_v20  ;;  %vm10180_vm10 = vcmask 15360   ;;  %vm10183_vm15 = vcmp.ge.s32.totalorder %v4440_v30, 2  ;;  %vm10189_vm6 = vmmov %vm10182_vm7 }
 0x317   :  { %v2869_v31 = vsel %vm10164_vm1, %v2865_v44, 0.0  ;;  %v2870_v63 = vsel %vm10166_vm8, %v2866_v42, 0.0  ;;  %v10174_v42 = vld [vmem:[#allocation109_spill] sm:$0xff]  ;;  %vm10181_vm11 = vmmov %vm10180_vm10 }
 0x318   :  { %v2871_v50 = vmul.f32 %v2869_v31, %v10167_v62  ;;  %v2872_v35 = vmul.f32 %v2870_v63, %v10167_v62  ;;  %v2875_v61 = vmul.f32 %v2869_v31, %v10168_v10  ;;  %v2876_v56 = vmul.f32 %v2870_v63, %v10168_v10  ;;  %v10175_v62 = vld [vmem:[#allocation110_spill] sm:$0xff]  ;;  %vm10187_vm12 = vmmov %vm10180_vm10 }
 0x319   :  { %v2879_v34 = vmul.f32 %v2869_v31, %v10169_v41  ;;  %v2880_v52 = vmul.f32 %v2870_v63, %v10169_v41  ;;  %3417 = vrot.lane.b32.xlu2 %v7478_v49, %s4222_s20  ;;  %vm10188_vm5 = vmmov %vm10180_vm10 }
 0x31a   :  { %v2873_v37 = vadd.f32 %v2871_v50, %v2851_v2  ;;  %v2874_v3 = vadd.f32 %v2872_v35, %v2852_v32  ;;  %v2877_v4 = vadd.f32 %v2875_v61, %v2855_v5  ;;  %v2878_v39 = vadd.f32 %v2876_v56, %v2856_v11  ;;  %3395 = vrot.lane.b32.xlu0 %v7449_v25, %s4222_s20  ;;  %v10176_v35 = vld [vmem:[#allocation111_spill] sm:$0xff] }
 0x31b   :  { %v2881_v7 = vadd.f32 %v2879_v34, %v2859_v38  ;;  %v2882_v36 = vadd.f32 %v2880_v52, %v2860_v60  ;;  %3415 = vrot.lane.b32.xlu1 %v7476_v22, %s4222_s20  ;;  %v8098_v20 = vpop.permute.xlu2 %3021 }
 0x31c   :  { %v2886_v8 = vpop.permute.xlu0 %2885 }
 0x31d   :  { %v2887_v44 = vsel %vm10170_vm9, %v7986_v57, %v2886_v8  ;;  %v2888_v2 = vsel %vm10171_vm13, %v2886_v8, %v7986_v57  ;;  %v2906_v32 = vpop.permute.xlu1 %2905  ;;  %vm10192_vm9 = vmmov %vm10188_vm5 }
 0x31e   :  { %v2891_v5 = vsel %vm10164_vm1, %v2887_v44, 0.0  ;;  %v2892_v11 = vsel %vm10166_vm8, %v2888_v2, 0.0  ;;  %v2909_v38 = vsel %vm10172_vm0, %v2906_v32, %v8022_v1  ;;  %v2910_v60 = vsel %vm10173_vm4, %v8022_v1, %v2906_v32  ;;  %v10177_v32 = vld [vmem:[#allocation112_spill] sm:$0xff]  ;;  %vm10196_vm13 = vmmov %vm10189_vm6 }
 0x31f   :  { %v2893_v31 = vmul.f32 %v2891_v5, %v10174_v42  ;;  %v2894_v63 = vmul.f32 %v2892_v11, %v10174_v42  ;;  %v2897_v50 = vmul.f32 %v2891_v5, %v10175_v62  ;;  %v2898_v57 = vmul.f32 %v2892_v11, %v10175_v62 }
 0x320   :  { %v2901_v10 = vmul.f32 %v2891_v5, %v10176_v35  ;;  %v2902_v61 = vmul.f32 %v2892_v11, %v10176_v35  ;;  %v2913_v56 = vsel %vm10164_vm1, %v2909_v38, 0.0  ;;  %v2914_v41 = vsel %vm10166_vm8, %v2910_v60, 0.0  ;;  %vm10190_vm1 = vmmov %vm10183_vm15 }
 0x321   :  { %v2895_v34 = vadd.f32 %v2893_v31, %v2873_v37  ;;  %v2896_v1 = vadd.f32 %v2894_v63, %v2874_v3  ;;  %v2899_v52 = vadd.f32 %v2897_v50, %v2877_v4  ;;  %v2900_v8 = vadd.f32 %v2898_v57, %v2878_v39  ;;  %3459 = vrot.lane.b32.xlu2 %v7474_v58, %s4223_s0  ;;  %v10179_v37 = vld [vmem:[#allocation114_spill] sm:$0xff]  ;;  %vm10191_vm8 = vmmov %vm10188_vm5 }
 0x322   :  { %v2903_v44 = vadd.f32 %v2901_v10, %v2881_v7  ;;  %v2904_v2 = vadd.f32 %v2902_v61, %v2882_v36  ;;  %v2915_v42 = vmul.f32 %v2913_v56, %v10177_v32  ;;  %v2916_v5 = vmul.f32 %v2914_v41, %v10177_v32  ;;  %3437 = vrot.lane.b32.xlu0 %v7444_v13, %s4223_s0  ;;  %v10186_v32 = vld [vmem:[#allocation119_spill] sm:$0xff]  ;;  %vm10197_vm0 = vmmov %vm10190_vm1 }
 0x323   :  { %v2919_v11 = vmul.f32 %v2913_v56, %v10178_v45  ;;  %v2920_v16 = vmul.f32 %v2914_v41, %v10178_v45  ;;  %v2923_v3 = vmul.f32 %v2913_v56, %v10179_v37  ;;  %v2924_v4 = vmul.f32 %v2914_v41, %v10179_v37  ;;  %3439 = vrot.lane.b32.xlu1 %v7447_v53, %s4223_s0  ;;  %v8134_v39 = vpop.permute.xlu2 %3045 }
 0x324   :  { %v2917_v7 = vadd.f32 %v2915_v42, %v2895_v34  ;;  %v2918_v36 = vadd.f32 %v2916_v5, %v2896_v1  ;;  %v2934_v38 = vpop.permute.xlu0 %2933  ;;  %vm10204_vm4 = vcmask 7168  }
 0x325   :  { %v2921_v60 = vadd.f32 %v2919_v11, %v2899_v52  ;;  %v2922_v31 = vadd.f32 %v2920_v16, %v2900_v8  ;;  %v2925_v63 = vadd.f32 %v2923_v3, %v2903_v44  ;;  %v2926_v62 = vadd.f32 %v2924_v4, %v2904_v2  ;;  %v2936_v50 = vpop.permute.xlu1 %2935  ;;  %v10185_v52 = vld [vmem:[#allocation116_spill] sm:$0xff] }
 0x326   :  { %v8137_v57 = vadd.f32 %v2917_v7, %v7840_v9  ;;  %v8140_v35 = vadd.f32 %v2918_v36, %v7842_v59  ;;  %v2937_v10 = vsel %vm10180_vm10, %v2934_v38, %v2936_v50  ;;  %v2938_v61 = vsel %vm10181_vm11, %v2936_v50, %v2934_v38  ;;  %v10193_v36 = vld [vmem:[#allocation120_spill] sm:$0xff]  ;;  %vm10205_vm10 = vmmov %vm10204_vm4 }
 0x327   :  { %v8145_v56 = vadd.f32 %v2921_v60, %v7848_v54  ;;  %v8148_v41 = vadd.f32 %v2922_v31, %v7850_v55  ;;  %v8151_v34 = vadd.f32 %v2925_v63, %v7852_v46  ;;  %v8154_v1 = vadd.f32 %v2926_v62, %v7854_v0  ;;  %v10184_v55 = vld [vmem:[#allocation115_spill] sm:$0xff]  ;;  %v10194_v31 = vld [vmem:[#allocation121_spill] sm:$0xff]  ;;  %v10195_v62 = vld [vmem:[#allocation122_spill] sm:$0xff] }
 0x328   :  { %v2941_v9 = vsel %vm10182_vm7, %v2937_v10, 0.0  ;;  %v2942_v59 = vsel %vm10183_vm15, %v2938_v61, 0.0  ;;  %vm10207_vm11 = vcmp.ge.s32.totalorder %v4430_v27, 1  ;;  %vm10208_vm7 = vcmp.ge.s32.totalorder %v4440_v30, 1  ;;  %vm10216_vm15 = vmmov %vm10204_vm4 }
 0x329   :  { %3483 = vrot.lane.b32.xlu2 %v7478_v49, %s4223_s0  ;;  %v2943_v46 = vmul.f32 %v2941_v9, %v10184_v55  ;;  %v2944_v0 = vmul.f32 %v2942_v59, %v10184_v55  ;;  %v2947_v8 = vmul.f32 %v2941_v9, %v10185_v52  ;;  %v2948_v44 = vmul.f32 %v2942_v59, %v10185_v52 }
 0x32a   :  { %3461 = vrot.lane.b32.xlu0 %v7449_v25, %s4223_s0  ;;  %v2951_v42 = vmul.f32 %v2941_v9, %v10186_v32  ;;  %v2952_v5 = vmul.f32 %v2942_v59, %v10186_v32 }
 0x32b   :  { %3481 = vrot.lane.b32.xlu1 %v7476_v22, %s4223_s0  ;;  %v8166_v54 = vpop.permute.xlu2 %3123 }
 0x32c   :  { %v2958_v2 = vpop.permute.xlu0 %2957 }
 0x32d   :  { %v2959_v45 = vsel %vm10187_vm12, %v8042_v15, %v2958_v2  ;;  %v2960_v11 = vsel %vm10188_vm5, %v2958_v2, %v8042_v15  ;;  %v2978_v16 = vpop.permute.xlu1 %2977  ;;  %vm10217_vm12 = vmmov %vm10204_vm4 }
 0x32e   :  { %v2963_v37 = vsel %vm10189_vm6, %v2959_v45, 0.0  ;;  %v2964_v3 = vsel %vm10190_vm1, %v2960_v11, 0.0  ;;  %v2981_v4 = vsel %vm10191_vm8, %v2978_v16, %v8078_v48  ;;  %v2982_v7 = vsel %vm10192_vm9, %v8078_v48, %v2978_v16  ;;  %v10199_v45 = vld [vmem:[#allocation123_spill] sm:$0xff]  ;;  %vm10219_vm5 = vmmov %vm10207_vm11 }
 0x32f   :  { %v2965_v38 = vmul.f32 %v2963_v37, %v10193_v36  ;;  %v2966_v60 = vmul.f32 %v2964_v3, %v10193_v36  ;;  %v2969_v63 = vmul.f32 %v2963_v37, %v10194_v31  ;;  %v2970_v15 = vmul.f32 %v2964_v3, %v10194_v31  ;;  %v10202_v36 = vld [vmem:[#allocation136_spill] sm:$0xff]  ;;  %vm10220_vm6 = vmmov %vm10208_vm7 }
 0x330   :  { %v2973_v50 = vmul.f32 %v2963_v37, %v10195_v62  ;;  %v2974_v10 = vmul.f32 %v2964_v3, %v10195_v62  ;;  %v2985_v61 = vsel %vm10196_vm13, %v2981_v4, 0.0  ;;  %v2986_v9 = vsel %vm10197_vm0, %v2982_v7, 0.0  ;;  %v10200_v37 = vld [vmem:[#allocation124_spill] sm:$0xff]  ;;  %vm10221_vm1 = vmmov %vm10204_vm4 }
 0x331   :  { %v2967_v59 = vadd.f32 %v2965_v38, %v2943_v46  ;;  %v2968_v48 = vadd.f32 %v2966_v60, %v2944_v0  ;;  %v2971_v55 = vadd.f32 %v2969_v63, %v2947_v8  ;;  %v2972_v52 = vadd.f32 %v2970_v15, %v2948_v44  ;;  %3525 = vrot.lane.b32.xlu2 %v7474_v58, %s10198_s17  ;;  %v10201_v46 = vld [vmem:[#allocation125_spill] sm:$0xff]  ;;  %vm10222_vm8 = vmmov %vm10221_vm1 }
 0x332   :  { %v2975_v2 = vadd.f32 %v2973_v50, %v2951_v42  ;;  %v2976_v32 = vadd.f32 %v2974_v10, %v2952_v5  ;;  %v2987_v11 = vmul.f32 %v2985_v61, %v10199_v45  ;;  %v2988_v16 = vmul.f32 %v2986_v9, %v10199_v45  ;;  %3503 = vrot.lane.b32.xlu0 %v7444_v13, %s10198_s17  ;;  %v10203_v60 = vld [vmem:[#allocation137_spill] sm:$0xff]  ;;  %vm10226_vm9 = vmmov %vm10219_vm5 }
 0x333   :  { %v2991_v3 = vmul.f32 %v2985_v61, %v10200_v37  ;;  %v2992_v4 = vmul.f32 %v2986_v9, %v10200_v37  ;;  %v2995_v0 = vmul.f32 %v2985_v61, %v10201_v46  ;;  %v2996_v8 = vmul.f32 %v2986_v9, %v10201_v46  ;;  %3505 = vrot.lane.b32.xlu1 %v7447_v53, %s10198_s17  ;;  %v8208_v44 = vpop.permute.xlu2 %3147  ;;  %vm10227_vm13 = vmmov %vm10220_vm6 }
 0x334   :  { %v2989_v42 = vadd.f32 %v2987_v11, %v2967_v59  ;;  %v2990_v5 = vadd.f32 %v2988_v16, %v2968_v48  ;;  %v3000_v7 = vpop.permute.xlu0 %2999  ;;  %v8212_v38 = vmul.f32 %v7447_v53, %v10202_v36  ;;  %v8216_v31 = vmul.f32 %v7447_v53, %v10203_v60  ;;  %v10206_v59 = vld [vmem:[#allocation138_spill] sm:$0xff] }
 0x335   :  { %v2993_v63 = vadd.f32 %v2991_v3, %v2971_v55  ;;  %v2994_v15 = vadd.f32 %v2992_v4, %v2972_v52  ;;  %v2997_v62 = vadd.f32 %v2995_v0, %v2975_v2  ;;  %v2998_v50 = vadd.f32 %v2996_v8, %v2976_v32  ;;  %v3002_v10 = vpop.permute.xlu1 %3001  ;;  %v10209_v32 = vld [vmem:[#allocation126_spill] sm:$0xff]  ;;  %v10210_v3 = vld [vmem:[#allocation127_spill] sm:$0xff]  ;;  %v10211_v0 = vld [vmem:[#allocation128_spill] sm:$0xff] }
 0x336   :  { %v3003_v61 = vsel %vm10204_vm4, %v3000_v7, %v3002_v10  ;;  %v3004_v9 = vsel %vm10205_vm10, %v3002_v10, %v3000_v7  ;;  %v8222_v48 = vmul.f32 %v7447_v53, %v10206_v59  ;;  %v8226_v45 = vmul.f32 %v7444_v13, %v10202_v36  ;;  %v10212_v36 = vld [vmem:[#allocation139_spill] sm:$0xff] }
 0x337   :  { %v3007_v11 = vsel %vm10207_vm11, %v3003_v61, 0.0  ;;  %v3008_v55 = vsel %vm10208_vm7, %v3004_v9, 0.0  ;;  %v8234_v52 = vmul.f32 %v7444_v13, %v10203_v60  ;;  %v8238_v2 = vmul.f32 %v7444_v13, %v10206_v59 }
 0x338   :  { %v3009_v16 = vmul.f32 %v3007_v11, %v10209_v32  ;;  %v3010_v37 = vmul.f32 %v3008_v55, %v10209_v32  ;;  %v3013_v4 = vmul.f32 %v3007_v11, %v10210_v3  ;;  %v3014_v46 = vmul.f32 %v3008_v55, %v10210_v3 }
 0x339   :  { %v3017_v8 = vmul.f32 %v3007_v11, %v10211_v0  ;;  %v3018_v7 = vmul.f32 %v3008_v55, %v10211_v0  ;;  %3549 = vrot.lane.b32.xlu2 %v7478_v49, %s10198_s17  ;;  %v8250_v60 = vmul.f32 %v7474_v58, %v10212_v36  ;;  %v8254_v10 = vmul.f32 %v7449_v25, %v10212_v36  ;;  %v10213_v0 = vld [vmem:[#allocation140_spill] sm:$0xff] }
 0x33a   :  { %v3011_v61 = vadd.f32 %v3009_v16, %v2989_v42  ;;  %v3012_v9 = vadd.f32 %v3010_v37, %v2990_v5  ;;  %v3015_v59 = vadd.f32 %v3013_v4, %v2993_v63  ;;  %v3016_v32 = vadd.f32 %v3014_v46, %v2994_v15  ;;  %3527 = vrot.lane.b32.xlu0 %v7449_v25, %s10198_s17  ;;  %v10214_v63 = vld [vmem:[#allocation141_spill] sm:$0xff] }
 0x33b   :  { %v3019_v11 = vadd.f32 %v3017_v8, %v2997_v62  ;;  %v3020_v55 = vadd.f32 %v3018_v7, %v2998_v50  ;;  %3547 = vrot.lane.b32.xlu1 %v7476_v22, %s10198_s17  ;;  %v8260_v3 = vpop.permute.xlu2 %3189  ;;  %v8264_v17 = vmul.f32 %v7474_v58, %v10213_v0  ;;  %v3082_v42 = vmul.f32 %v7449_v25, %v10213_v0  ;;  %v10215_v50 = vld [vmem:[#allocation142_spill] sm:$0xff]  ;;  %v10218_v7 = vld [vmem:[#allocation143_spill] sm:$0xff] }
 0x33c   :  { %v3024_v5 = vpop.permute.xlu0 %3023  ;;  %v3085_v15 = vmul.f32 %v7474_v58, %v10214_v63  ;;  %v3086_v62 = vmul.f32 %v7449_v25, %v10214_v63  ;;  %v8274_v16 = vmul.f32 %v7476_v22, %v10215_v50  ;;  %v3090_v37 = vmul.f32 %v7478_v49, %v10215_v50 }
 0x33d   :  { %v3025_v4 = vsel %vm10216_vm15, %v8098_v20, %v3024_v5  ;;  %v3026_v46 = vsel %vm10217_vm12, %v3024_v5, %v8098_v20  ;;  %v3044_v8 = vpop.permute.xlu1 %3043  ;;  %v8284_v36 = vmul.f32 %v7476_v22, %v10218_v7  ;;  %v3094_v0 = vmul.f32 %v7478_v49, %v10218_v7  ;;  %v10223_v5 = vld [vmem:[#allocation129_spill] sm:$0xff] }
 0x33e   :  { %v3029_v63 = vsel %vm10219_vm5, %v3025_v4, 0.0  ;;  %v3030_v50 = vsel %vm10220_vm6, %v3026_v46, 0.0  ;;  %v3047_v21 = vsel %vm10221_vm1, %v3044_v8, %v8134_v39  ;;  %v3048_v20 = vsel %vm10222_vm8, %v8134_v39, %v3044_v8 }
 0x33f   :  { %v3031_v40 = vmul.f32 %v3029_v63, %v10223_v5  ;;  %v3032_v19 = vmul.f32 %v3030_v50, %v10223_v5  ;;  %v3035_v6 = vmul.f32 %v3029_v63, %v10224_v47  ;;  %v3036_v7 = vmul.f32 %v3030_v50, %v10224_v47  ;;  %v10229_v47 = vld [vmem:[#allocation134_spill] sm:$0xff] }
 0x340   :  { %v3039_v51 = vmul.f32 %v3029_v63, %v10225_v28  ;;  %v3040_v4 = vmul.f32 %v3030_v50, %v10225_v28  ;;  %v3051_v46 = vsel %vm10226_vm9, %v3047_v21, 0.0  ;;  %v3052_v12 = vsel %vm10227_vm13, %v3048_v20, 0.0  ;;  %v10230_v28 = vld [vmem:[#allocation73_spill] sm:$0xff] }
 0x341   :  { %v3033_v18 = vadd.f32 %v3031_v40, %v3011_v61  ;;  %v3034_v39 = vadd.f32 %v3032_v19, %v3012_v9  ;;  %v3037_v8 = vadd.f32 %v3035_v6, %v3015_v59  ;;  %v3038_v33 = vadd.f32 %v3036_v7, %v3016_v32  ;;  %3597 = vrot.lane.b32.xlu2 %v7474_v58, %s10228_s25  ;;  %v10231_v40 = vld [vmem:[#allocation135_spill] sm:$0xff]  ;;  %v10232_v32 = vld [vmem:[#allocation144_spill] sm:$0xff] }
 0x342   :  { %v3041_v5 = vadd.f32 %v3039_v51, %v3019_v11  ;;  %v3042_v14 = vadd.f32 %v3040_v4, %v3020_v55  ;;  %v3053_v24 = vmul.f32 %v3051_v46, %v10229_v47  ;;  %v3054_v63 = vmul.f32 %v3052_v12, %v10229_v47  ;;  %3575 = vrot.lane.b32.xlu0 %v7444_v13, %s10228_s25 }
 0x343   :  { %v3057_v21 = vmul.f32 %v3051_v46, %v10230_v28  ;;  %v3058_v50 = vmul.f32 %v3052_v12, %v10230_v28  ;;  %v3061_v19 = vmul.f32 %v3051_v46, %v10231_v40  ;;  %v3062_v6 = vmul.f32 %v3052_v12, %v10231_v40  ;;  %3577 = vrot.lane.b32.xlu1 %v7447_v53, %s10228_s25  ;;  %v8318_v51 = vpop.permute.xlu2 %3213 }
 0x344   :  { %v3055_v61 = vadd.f32 %v3053_v24, %v3033_v18  ;;  %v3056_v9 = vadd.f32 %v3054_v63, %v3034_v39  ;;  %v3102_v59 = vpop.permute.xlu0 %3101  ;;  %v3097_v11 = vmul.f32 %v7476_v22, %v10232_v32  ;;  %v3098_v55 = vmul.f32 %v7478_v49, %v10232_v32  ;;  %v10239_v32 = vld [vmem:[#allocation146_spill] sm:$0xff] }
 0x345   :  { %v3059_v20 = vadd.f32 %v3057_v21, %v3037_v8  ;;  %v3060_v7 = vadd.f32 %v3058_v50, %v3038_v33  ;;  %v3063_v4 = vadd.f32 %v3061_v19, %v3041_v5  ;;  %v3064_v46 = vadd.f32 %v3062_v6, %v3042_v14  ;;  %v3104_v47 = vpop.permute.xlu1 %3103 }
 0x346   :  { %v3067_v12 = vadd.f32 %v8226_v45, %v3055_v61  ;;  %v3068_v28 = vadd.f32 %v8212_v38, %v3056_v9  ;;  %vm10233_vm0 = vcmask 1039360   ;;  %vm10235_vm10 = vcmp.lt.s32.totalorder %v4430_v27, 15 }
 0x347   :  { %v3105_v40 = vsel %vm10233_vm0, %v3102_v59, %v3104_v47  ;;  %vm10234_vm4 = vmmov %vm10233_vm0  ;;  %v3071_v18 = vadd.f32 %v8234_v52, %v3059_v20  ;;  %v3072_v39 = vadd.f32 %v8216_v31, %v3060_v7  ;;  %v3075_v63 = vadd.f32 %v8238_v2, %v3063_v4  ;;  %v10237_v2 = vld [vmem:[#allocation145_spill] sm:$0xff] }
 0x348   :  { %v3106_v24 = vsel %vm10234_vm4, %v3104_v47, %v3102_v59  ;;  %v3076_v8 = vadd.f32 %v8222_v48, %v3064_v46  ;;  %v3080_v33 = vadd.f32 %v8254_v10, %v3068_v28  ;;  %v3079_v14 = vadd.f32 %v8250_v60, %v3067_v12  ;;  %vm10240_vm7 = vmmov %vm10233_vm0 }
 0x349   :  { %v3109_v45 = vsel %vm10235_vm10, %v3105_v40, 0.0  ;;  %vm10236_vm11 = vcmp.lt.s32.totalorder %v4440_v30, 15  ;;  %v3084_v5 = vadd.f32 %v3082_v42, %v3072_v39  ;;  %v3083_v52 = vadd.f32 %v8264_v17, %v3071_v18  ;;  %3621 = vrot.lane.b32.xlu2 %v7478_v49, %s10228_s25  ;;  %vm10241_vm15 = vmmov %vm10233_vm0  ;;  %v10244_v40 = vld [vmem:[#allocation147_spill] sm:$0xff]  ;;  %v10245_v39 = vld [vmem:[#allocation148_spill] sm:$0xff] }
 0x34a   :  { %v3110_v38 = vsel %vm10236_vm11, %v3106_v24, 0.0  ;;  %v3088_v21 = vadd.f32 %v3086_v62, %v3076_v8  ;;  %v3087_v50 = vadd.f32 %v3085_v15, %v3075_v63  ;;  %v3092_v31 = vadd.f32 %v3090_v37, %v3080_v33  ;;  %3599 = vrot.lane.b32.xlu0 %v7449_v25, %s10228_s25  ;;  %vm10242_vm12 = vmmov %vm10235_vm10 }
 0x34b   :  { %v3091_v48 = vadd.f32 %v8274_v16, %v3079_v14  ;;  %v3111_v10 = vmul.f32 %v3109_v45, %v10237_v2  ;;  %v3112_v60 = vmul.f32 %v3110_v38, %v10237_v2  ;;  %v3096_v19 = vadd.f32 %v3094_v0, %v3084_v5  ;;  %3619 = vrot.lane.b32.xlu1 %v7476_v22, %s10228_s25  ;;  %v8349_v17 = vpop.permute.xlu2 %3261  ;;  %v10238_v16 = vld [vmem:[#allocation74_spill] sm:$0xff]  ;;  %vm10243_vm5 = vmmov %vm10236_vm11 }
 0x34c   :  { %v3100_v6 = vadd.f32 %v3098_v55, %v3088_v21  ;;  %v3095_v42 = vadd.f32 %v8284_v36, %v3083_v52  ;;  %v3099_v62 = vadd.f32 %v3097_v11, %v3087_v50  ;;  %v3115_v61 = vmul.f32 %v3109_v45, %v10238_v16  ;;  %v3126_v59 = vpop.permute.xlu0 %3125  ;;  %vm10247_vm6 = vmmov %vm10233_vm0 }
 0x34d   :  { %v3113_v15 = vadd.f32 %v3111_v10, %v3091_v48  ;;  %v3114_v37 = vadd.f32 %v3112_v60, %v3092_v31  ;;  %v3116_v9 = vmul.f32 %v3110_v38, %v10238_v16  ;;  %v3119_v20 = vmul.f32 %v3109_v45, %v10239_v32  ;;  %v3146_v55 = vpop.permute.xlu1 %3145  ;;  %vm10248_vm1 = vmmov %vm10233_vm0  ;;  %v10252_v60 = vld [vmem:[#allocation149_spill] sm:$0xff]  ;;  %v10254_v16 = vld [vmem:[#allocation151_spill] sm:$0xff] }
 0x34e   :  { %v3120_v0 = vmul.f32 %v3110_v38, %v10239_v32  ;;  %v3127_v36 = vsel %vm10240_vm7, %v8166_v54, %v3126_v59  ;;  %v3128_v11 = vsel %vm10241_vm15, %v3126_v59, %v8166_v54  ;;  %v3117_v7 = vadd.f32 %v3115_v61, %v3095_v42  ;;  %v10246_v54 = vld [vmem:[#allocation78_spill] sm:$0xff]  ;;  %vm10250_vm8 = vmmov %vm10235_vm10 }
 0x34f   :  { %v3118_v4 = vadd.f32 %v3116_v9, %v3096_v19  ;;  %v3131_v46 = vsel %vm10242_vm12, %v3127_v36, 0.0  ;;  %v3132_v47 = vsel %vm10243_vm5, %v3128_v11, 0.0  ;;  %v3121_v12 = vadd.f32 %v3119_v20, %v3099_v62  ;;  %vm10251_vm9 = vmmov %vm10243_vm5  ;;  %v10253_v42 = vld [vmem:[#allocation150_spill] sm:$0xff] }
 0x350   :  { %v3122_v28 = vadd.f32 %v3120_v0, %v3100_v6  ;;  %v3133_v24 = vmul.f32 %v3131_v46, %v10244_v40  ;;  %v3134_v18 = vmul.f32 %v3132_v47, %v10244_v40  ;;  %v3137_v63 = vmul.f32 %v3131_v46, %v10245_v39 }
 0x351   :  { %v3138_v8 = vmul.f32 %v3132_v47, %v10245_v39  ;;  %v3141_v33 = vmul.f32 %v3131_v46, %v10246_v54  ;;  %v3142_v14 = vmul.f32 %v3132_v47, %v10246_v54  ;;  %v3149_v5 = vsel %vm10247_vm6, %v3146_v55, %v8208_v44  ;;  %3663 = vrot.lane.b32.xlu2 %v7474_v58, %s10249_s26 }
 0x352   :  { %v3135_v45 = vadd.f32 %v3133_v24, %v3113_v15  ;;  %v3136_v38 = vadd.f32 %v3134_v18, %v3114_v37  ;;  %v3150_v21 = vsel %vm10248_vm1, %v8208_v44, %v3146_v55  ;;  %v3139_v52 = vadd.f32 %v3137_v63, %v3117_v7  ;;  %3641 = vrot.lane.b32.xlu0 %v7444_v13, %s10249_s26  ;;  %v10260_v24 = vld [vmem:[#allocation153_spill] sm:$0xff]  ;;  %v10261_v63 = vld [vmem:[#allocation154_spill] sm:$0xff] }
 0x353   :  { %v3140_v50 = vadd.f32 %v3138_v8, %v3118_v4  ;;  %v3143_v31 = vadd.f32 %v3141_v33, %v3121_v12  ;;  %v3144_v48 = vadd.f32 %v3142_v14, %v3122_v28  ;;  %v3153_v2 = vsel %vm10250_vm8, %v3149_v5, 0.0  ;;  %3643 = vrot.lane.b32.xlu1 %v7447_v53, %s10249_s26  ;;  %v8383_v44 = vpop.permute.xlu2 %3285  ;;  %v10259_v12 = vld [vmem:[#allocation152_spill] sm:$0xff] }
 0x354   :  { %v3154_v10 = vsel %vm10251_vm9, %v3150_v21, 0.0  ;;  %v3155_v19 = vmul.f32 %v3153_v2, %v10252_v60  ;;  %v3159_v62 = vmul.f32 %v3153_v2, %v10253_v42  ;;  %v3168_v37 = vpop.permute.xlu0 %3167  ;;  %v3163_v61 = vmul.f32 %v3153_v2, %v10254_v16 }
 0x355   :  { %v3156_v6 = vmul.f32 %v3154_v10, %v10252_v60  ;;  %v3160_v15 = vmul.f32 %v3154_v10, %v10253_v42  ;;  %v3164_v9 = vmul.f32 %v3154_v10, %v10254_v16  ;;  %v3170_v59 = vpop.permute.xlu1 %3169  ;;  %vm10255_vm13 = vcmask 1031168   ;;  %v10268_v42 = vld [vmem:[#allocation155_spill] sm:$0xff] }
 0x356   :  { %v3157_v32 = vadd.f32 %v3155_v19, %v3135_v45  ;;  %v3161_v0 = vadd.f32 %v3159_v62, %v3139_v52  ;;  %v3165_v11 = vadd.f32 %v3163_v61, %v3143_v31  ;;  %v3171_v7 = vsel %vm10255_vm13, %v3168_v37, %v3170_v59  ;;  %vm10256_vm0 = vmmov %vm10255_vm13  ;;  %v10270_v61 = vld [vmem:[#allocation157_spill] sm:$0xff] }
 0x357   :  { %v3158_v20 = vadd.f32 %v3156_v6, %v3136_v38  ;;  %v3162_v36 = vadd.f32 %v3160_v15, %v3140_v50  ;;  %v3166_v55 = vadd.f32 %v3164_v9, %v3144_v48  ;;  %v3172_v4 = vsel %vm10256_vm0, %v3170_v59, %v3168_v37  ;;  %vm10262_vm11 = vmmov %vm10256_vm0  ;;  %v10269_v37 = vld [vmem:[#allocation156_spill] sm:$0xff] }
 0x358   :  { %vm10257_vm4 = vcmp.lt.s32.totalorder %v4430_v27, 14  ;;  %vm10258_vm10 = vcmp.lt.s32.totalorder %v4440_v30, 14  ;;  %vm10263_vm7 = vmmov %vm10256_vm0  ;;  %v10275_v27 = vld [vmem:[#allocation159_spill] sm:$0xff]  ;;  %vm10277_vm9 = vcmask 932864  }
 0x359   :  { %v3175_v46 = vsel %vm10257_vm4, %v3171_v7, 0.0  ;;  %v3176_v47 = vsel %vm10258_vm10, %v3172_v4, 0.0  ;;  %3687 = vrot.lane.b32.xlu2 %v7478_v49, %s10249_s26  ;;  %vm10264_vm15 = vmmov %vm10257_vm4  ;;  %v10274_v4 = vld [vmem:[#allocation158_spill] sm:$0xff] }
 0x35a   :  { %v3177_v28 = vmul.f32 %v3175_v46, %v10259_v12  ;;  %v3178_v40 = vmul.f32 %v3176_v47, %v10259_v12  ;;  %v3181_v18 = vmul.f32 %v3175_v46, %v10260_v24  ;;  %v3182_v39 = vmul.f32 %v3176_v47, %v10260_v24  ;;  %3665 = vrot.lane.b32.xlu0 %v7449_v25, %s10249_s26  ;;  %vm10265_vm12 = vmmov %vm10258_vm10 }
 0x35b   :  { %v3185_v8 = vmul.f32 %v3175_v46, %v10261_v63  ;;  %v3186_v54 = vmul.f32 %v3176_v47, %v10261_v63  ;;  %3685 = vrot.lane.b32.xlu1 %v7476_v22, %s10249_s26  ;;  %v8409_v5 = vpop.permute.xlu2 %3327  ;;  %vm10266_vm5 = vmmov %vm10256_vm0 }
 0x35c   :  { %v3179_v33 = vadd.f32 %v3177_v28, %v3157_v32  ;;  %v3180_v14 = vadd.f32 %v3178_v40, %v3158_v20  ;;  %v3183_v45 = vadd.f32 %v3181_v18, %v3161_v0  ;;  %v3184_v38 = vadd.f32 %v3182_v39, %v3162_v36  ;;  %v3192_v50 = vpop.permute.xlu0 %3191  ;;  %vm10267_vm6 = vmmov %vm10256_vm0  ;;  %v10276_v28 = vld [vmem:[#allocation160_spill] sm:$0xff] }
 0x35d   :  { %v3187_v21 = vadd.f32 %v3185_v8, %v3165_v11  ;;  %v3188_v52 = vadd.f32 %v3186_v54, %v3166_v55  ;;  %v3193_v31 = vsel %vm10262_vm11, %v8260_v3, %v3192_v50  ;;  %v3194_v48 = vsel %vm10263_vm7, %v3192_v50, %v8260_v3  ;;  %v3212_v2 = vpop.permute.xlu1 %3211  ;;  %vm10271_vm1 = vmmov %vm10257_vm4 }
 0x35e   :  { %v3197_v10 = vsel %vm10264_vm15, %v3193_v31, 0.0  ;;  %v3198_v60 = vsel %vm10265_vm12, %v3194_v48, 0.0  ;;  %v3215_v19 = vsel %vm10266_vm5, %v3212_v2, %v8318_v51  ;;  %v3216_v6 = vsel %vm10267_vm6, %v8318_v51, %v3212_v2  ;;  %vm10272_vm8 = vmmov %vm10258_vm10 }
 0x35f   :  { %v3199_v62 = vmul.f32 %v3197_v10, %v10268_v42  ;;  %v3200_v15 = vmul.f32 %v3198_v60, %v10268_v42  ;;  %v3203_v16 = vmul.f32 %v3197_v10, %v10269_v37  ;;  %v3204_v3 = vmul.f32 %v3198_v60, %v10269_v37  ;;  %vm10278_vm13 = vmmov %vm10277_vm9  ;;  %v10284_v42 = vld [vmem:[#allocation164_spill] sm:$0xff] }
 0x360   :  { %v3207_v9 = vmul.f32 %v3197_v10, %v10270_v61  ;;  %v3208_v59 = vmul.f32 %v3198_v60, %v10270_v61  ;;  %v3219_v32 = vsel %vm10271_vm1, %v3215_v19, 0.0  ;;  %v3220_v20 = vsel %vm10272_vm8, %v3216_v6, 0.0  ;;  %v10281_v19 = vld [vmem:[#allocation162_spill] sm:$0xff]  ;;  %vm10286_vm10 = vmmov %vm10277_vm9 }
 0x361   :  { %v3201_v0 = vadd.f32 %v3199_v62, %v3179_v33  ;;  %v3202_v51 = vadd.f32 %v3200_v15, %v3180_v14  ;;  %v3205_v36 = vadd.f32 %v3203_v16, %v3183_v45  ;;  %v3206_v11 = vadd.f32 %v3204_v3, %v3184_v38  ;;  %3729 = vrot.lane.b32.xlu2 %v7474_v58, %s10273_s27  ;;  %v10285_v16 = vld [vmem:[#allocation169_spill] sm:$0xff]  ;;  %vm10287_vm11 = vmmov %vm10277_vm9 }
 0x362   :  { %v3209_v55 = vadd.f32 %v3207_v9, %v3187_v21  ;;  %v3210_v7 = vadd.f32 %v3208_v59, %v3188_v52  ;;  %v3221_v46 = vmul.f32 %v3219_v32, %v10274_v4  ;;  %v3222_v47 = vmul.f32 %v3220_v20, %v10274_v4  ;;  %3707 = vrot.lane.b32.xlu0 %v7444_v13, %s10273_s27  ;;  %vm10288_vm7 = vmmov %vm10277_vm9  ;;  %v10291_v4 = vld [vmem:[#allocation167_spill] sm:$0xff] }
 0x363   :  { %v3225_v12 = vmul.f32 %v3219_v32, %v10275_v27  ;;  %v3226_v30 = vmul.f32 %v3220_v20, %v10275_v27  ;;  %v3229_v40 = vmul.f32 %v3219_v32, %v10276_v28  ;;  %v3230_v24 = vmul.f32 %v3220_v20, %v10276_v28  ;;  %3709 = vrot.lane.b32.xlu1 %v7447_v53, %s10273_s27  ;;  %v8445_v18 = vpop.permute.xlu2 %3351  ;;  %vm10289_vm15 = vmmov %vm10288_vm7 }
 0x364   :  { %v3223_v39 = vadd.f32 %v3221_v46, %v3201_v0  ;;  %v3224_v63 = vadd.f32 %v3222_v47, %v3202_v51  ;;  %v3240_v8 = vpop.permute.xlu0 %3239  ;;  %vm10282_vm4 = vnez %v10281_v19  ;;  %v10292_v47 = vld [vmem:[#allocation168_spill] sm:$0xff]  ;;  %vm10297_vm12 = vcmask 924672  }
 0x365   :  { %v3227_v54 = vadd.f32 %v3225_v12, %v3205_v36  ;;  %v3228_v33 = vadd.f32 %v3226_v30, %v3206_v11  ;;  %v3231_v14 = vadd.f32 %v3229_v40, %v3209_v55  ;;  %v3232_v45 = vadd.f32 %v3230_v24, %v3210_v7  ;;  %v3242_v38 = vpop.permute.xlu1 %3241  ;;  %v10290_v11 = vld [vmem:[#allocation165_spill] sm:$0xff]  ;;  %vm10298_vm5 = vmmov %vm10297_vm12 }
 0x366   :  { %v8448_v21 = vadd.f32 %v3223_v39, %v8137_v57  ;;  %v8451_v52 = vadd.f32 %v3224_v63, %v8140_v35  ;;  %v3243_v50 = vsel %vm10277_vm9, %v3240_v8, %v3242_v38  ;;  %v3244_v31 = vsel %vm10278_vm13, %v3242_v38, %v3240_v8  ;;  %v10279_v57 = vld [vmem:[#allocation161_spill] sm:$0xff]  ;;  %vm10306_vm8 = vmmov %vm10298_vm5 }
 0x367   :  { %v8456_v48 = vadd.f32 %v3227_v54, %v8145_v56  ;;  %v8459_v2 = vadd.f32 %v3228_v33, %v8148_v41  ;;  %v8462_v10 = vadd.f32 %v3231_v14, %v8151_v34  ;;  %v8465_v60 = vadd.f32 %v3232_v45, %v8154_v1  ;;  %v10283_v41 = vld [vmem:[#allocation163_spill] sm:$0xff]  ;;  %v10294_v54 = vld [vmem:[#allocation170_spill] sm:$0xff]  ;;  %vm10307_vm9 = vmmov %vm10298_vm5 }
 0x368   :  { %vm10280_vm0 = vnez %v10279_v57  ;;  %v3248_v6 = vsel %vm10282_vm4, %v3244_v31, 0.0  ;;  %v10295_v45 = vld [vmem:[#allocation171_spill] sm:$0xff]  ;;  %v10296_v31 = vld [vmem:[#allocation172_spill] sm:$0xff]  ;;  %vm10308_vm13 = vmmov %vm10298_vm5 }
 0x369   :  { %v3247_v35 = vsel %vm10280_vm0, %v3243_v50, 0.0  ;;  %3753 = vrot.lane.b32.xlu2 %v7478_v49, %s10273_s27  ;;  %v3250_v1 = vmul.f32 %v3248_v6, %v10283_v41  ;;  %v3254_v15 = vmul.f32 %v3248_v6, %v10284_v42  ;;  %v3258_v61 = vmul.f32 %v3248_v6, %v10285_v16 }
 0x36a   :  { %3731 = vrot.lane.b32.xlu0 %v7449_v25, %s10273_s27  ;;  %v3249_v34 = vmul.f32 %v3247_v35, %v10283_v41  ;;  %v3253_v62 = vmul.f32 %v3247_v35, %v10284_v42  ;;  %v3257_v3 = vmul.f32 %v3247_v35, %v10285_v16 }
 0x36b   :  { %3751 = vrot.lane.b32.xlu1 %v7476_v22, %s10273_s27  ;;  %v8477_v56 = vpop.permute.xlu2 %3393 }
 0x36c   :  { %v3264_v37 = vpop.permute.xlu0 %3263 }
 0x36d   :  { %v3265_v9 = vsel %vm10286_vm10, %v8349_v17, %v3264_v37  ;;  %v3266_v59 = vsel %vm10287_vm11, %v3264_v37, %v8349_v17  ;;  %v3284_v32 = vpop.permute.xlu1 %3283  ;;  %vm10319_vm11 = vcmp.lt.s32.totalorder %v4428_v26, 15 }
 0x36e   :  { %v3269_v20 = vsel %vm10280_vm0, %v3265_v9, 0.0  ;;  %v3270_v0 = vsel %vm10282_vm4, %v3266_v59, 0.0  ;;  %v3287_v51 = vsel %vm10288_vm7, %v3284_v32, %v8383_v44  ;;  %v3288_v36 = vsel %vm10289_vm15, %v8383_v44, %v3284_v32  ;;  %v10301_v59 = vld [vmem:[#allocation174_spill] sm:$0xff] }
 0x36f   :  { %v3271_v55 = vmul.f32 %v3269_v20, %v10290_v11  ;;  %v3272_v7 = vmul.f32 %v3270_v0, %v10290_v11  ;;  %v3275_v46 = vmul.f32 %v3269_v20, %v10291_v4  ;;  %v3276_v17 = vmul.f32 %v3270_v0, %v10291_v4 }
 0x370   :  { %v3279_v27 = vmul.f32 %v3269_v20, %v10292_v47  ;;  %v3280_v12 = vmul.f32 %v3270_v0, %v10292_v47  ;;  %v3291_v30 = vsel %vm10280_vm0, %v3287_v51, 0.0  ;;  %v3292_v28 = vsel %vm10282_vm4, %v3288_v36, 0.0  ;;  %v10303_v20 = vld [vmem:[#allocation175_spill] sm:$0xff]  ;;  %v10304_v36 = vld [vmem:[#allocation177_spill] sm:$0xff]  ;;  %vm10309_vm0 = vmmov %vm10298_vm5 }
 0x371   :  { %v3273_v40 = vadd.f32 %v3271_v55, %v3249_v34  ;;  %v3274_v44 = vadd.f32 %v3272_v7, %v3250_v1  ;;  %v3277_v24 = vadd.f32 %v3275_v46, %v3253_v62  ;;  %v3278_v39 = vadd.f32 %v3276_v17, %v3254_v15  ;;  %3795 = vrot.lane.b32.xlu2 %v7474_v58, %s10293_s28  ;;  %v10305_v7 = vld [vmem:[#allocation178_spill] sm:$0xff] }
 0x372   :  { %v3281_v63 = vadd.f32 %v3279_v27, %v3257_v3  ;;  %v3282_v8 = vadd.f32 %v3280_v12, %v3258_v61  ;;  %v3293_v33 = vmul.f32 %v3291_v30, %v10294_v54  ;;  %v3294_v14 = vmul.f32 %v3292_v28, %v10294_v54  ;;  %3773 = vrot.lane.b32.xlu0 %v7444_v13, %s10293_s28  ;;  %v10299_v61 = vld [vmem:[#allocation173_spill] sm:$0xff] }
 0x373   :  { %v3297_v38 = vmul.f32 %v3291_v30, %v10295_v45  ;;  %v3298_v50 = vmul.f32 %v3292_v28, %v10295_v45  ;;  %v3301_v57 = vmul.f32 %v3291_v30, %v10296_v31  ;;  %v3302_v35 = vmul.f32 %v3292_v28, %v10296_v31  ;;  %3775 = vrot.lane.b32.xlu1 %v7447_v53, %s10293_s28  ;;  %v8519_v19 = vpop.permute.xlu2 %3417  ;;  %v10310_v45 = vld [vmem:[#allocation179_spill] sm:$0xff]  ;;  %v10311_v31 = vld [vmem:[#allocation180_spill] sm:$0xff] }
 0x374   :  { %v3295_v6 = vadd.f32 %v3293_v33, %v3273_v40  ;;  %v3296_v41 = vadd.f32 %v3294_v14, %v3274_v44  ;;  %v3306_v34 = vpop.permute.xlu0 %3305  ;;  %vm10300_vm6 = vnez %v10299_v61  ;;  %vm10302_vm1 = vnez %v10301_v59  ;;  %v10315_v61 = vld [vmem:[#allocation183_spill] sm:$0xff] }
 0x375   :  { %v3299_v1 = vadd.f32 %v3297_v38, %v3277_v24  ;;  %v3300_v42 = vadd.f32 %v3298_v50, %v3278_v39  ;;  %v3303_v62 = vadd.f32 %v3301_v57, %v3281_v63  ;;  %v3304_v15 = vadd.f32 %v3302_v35, %v3282_v8  ;;  %v3308_v37 = vpop.permute.xlu1 %3307  ;;  %v10312_v35 = vld [vmem:[#allocation181_spill] sm:$0xff] }
 0x376   :  { %v3309_v16 = vsel %vm10297_vm12, %v3306_v34, %v3308_v37  ;;  %v3310_v3 = vsel %vm10298_vm5, %v3308_v37, %v3306_v34  ;;  %vm10317_vm4 = vcmask 916480   ;;  %vm10320_vm7 = vcmp.lt.s32.totalorder %v4438_v29, 15  ;;  %vm10326_vm5 = vmmov %vm10319_vm11 }
 0x377   :  { %v3313_v9 = vsel %vm10300_vm6, %v3309_v16, 0.0  ;;  %v3314_v32 = vsel %vm10302_vm1, %v3310_v3, 0.0  ;;  %v10314_v3 = vld [vmem:[#allocation182_spill] sm:$0xff]  ;;  %vm10318_vm10 = vmmov %vm10317_vm4 }
 0x378   :  { %v3315_v0 = vmul.f32 %v3313_v9, %v10303_v20  ;;  %v3316_v51 = vmul.f32 %v3314_v32, %v10303_v20  ;;  %v3319_v11 = vmul.f32 %v3313_v9, %v10304_v36  ;;  %v3320_v55 = vmul.f32 %v3314_v32, %v10304_v36  ;;  %vm10324_vm15 = vmmov %vm10317_vm4 }
 0x379   :  { %v3323_v4 = vmul.f32 %v3313_v9, %v10305_v7  ;;  %v3324_v46 = vmul.f32 %v3314_v32, %v10305_v7  ;;  %3819 = vrot.lane.b32.xlu2 %v7478_v49, %s10293_s28  ;;  %vm10325_vm12 = vmmov %vm10317_vm4 }
 0x37a   :  { %v3317_v17 = vadd.f32 %v3315_v0, %v3295_v6  ;;  %v3318_v47 = vadd.f32 %v3316_v51, %v3296_v41  ;;  %v3321_v27 = vadd.f32 %v3319_v11, %v3299_v1  ;;  %v3322_v12 = vadd.f32 %v3320_v55, %v3300_v42  ;;  %3797 = vrot.lane.b32.xlu0 %v7449_v25, %s10293_s28  ;;  %v10316_v0 = vld [vmem:[#allocation184_spill] sm:$0xff] }
 0x37b   :  { %v3325_v30 = vadd.f32 %v3323_v4, %v3303_v62  ;;  %v3326_v28 = vadd.f32 %v3324_v46, %v3304_v15  ;;  %3817 = vrot.lane.b32.xlu1 %v7476_v22, %s10293_s28  ;;  %v8539_v40 = vpop.permute.xlu2 %3459 }
 0x37c   :  { %v3330_v44 = vpop.permute.xlu0 %3329 }
 0x37d   :  { %v3331_v24 = vsel %vm10306_vm8, %v8409_v5, %v3330_v44  ;;  %v3332_v39 = vsel %vm10307_vm9, %v3330_v44, %v8409_v5  ;;  %v3350_v63 = vpop.permute.xlu1 %3349  ;;  %vm10333_vm9 = vmmov %vm10326_vm5 }
 0x37e   :  { %v3335_v8 = vsel %vm10300_vm6, %v3331_v24, 0.0  ;;  %v3336_v54 = vsel %vm10302_vm1, %v3332_v39, 0.0  ;;  %v3353_v33 = vsel %vm10308_vm13, %v3350_v63, %v8445_v18  ;;  %v3354_v14 = vsel %vm10309_vm0, %v8445_v18, %v3350_v63  ;;  %v10322_v39 = vld [vmem:[#allocation186_spill] sm:$0xff] }
 0x37f   :  { %v3337_v38 = vmul.f32 %v3335_v8, %v10310_v45  ;;  %v3338_v50 = vmul.f32 %v3336_v54, %v10310_v45  ;;  %v3341_v57 = vmul.f32 %v3335_v8, %v10311_v31  ;;  %v3342_v5 = vmul.f32 %v3336_v54, %v10311_v31 }
 0x380   :  { %v3345_v6 = vmul.f32 %v3335_v8, %v10312_v35  ;;  %v3346_v41 = vmul.f32 %v3336_v54, %v10312_v35  ;;  %v3357_v34 = vsel %vm10300_vm6, %v3353_v33, 0.0  ;;  %v3358_v1 = vsel %vm10302_vm1, %v3354_v14, 0.0  ;;  %v10323_v54 = vld [vmem:[#allocation187_spill] sm:$0xff]  ;;  %vm10327_vm6 = vmmov %vm10320_vm7 }
 0x381   :  { %v3339_v42 = vadd.f32 %v3337_v38, %v3317_v17  ;;  %v3340_v18 = vadd.f32 %v3338_v50, %v3318_v47  ;;  %v3343_v62 = vadd.f32 %v3341_v57, %v3321_v27  ;;  %v3344_v15 = vadd.f32 %v3342_v5, %v3322_v12  ;;  %3861 = vrot.lane.b32.xlu2 %v7474_v58, %s10313_s29  ;;  %vm10328_vm1 = vmmov %vm10317_vm4 }
 0x382   :  { %v3347_v37 = vadd.f32 %v3345_v6, %v3325_v30  ;;  %v3348_v16 = vadd.f32 %v3346_v41, %v3326_v28  ;;  %v3359_v9 = vmul.f32 %v3357_v34, %v10314_v3  ;;  %v3360_v32 = vmul.f32 %v3358_v1, %v10314_v3  ;;  %3839 = vrot.lane.b32.xlu0 %v7444_v13, %s10313_s29  ;;  %v10321_v28 = vld [vmem:[#allocation185_spill] sm:$0xff]  ;;  %vm10329_vm8 = vmmov %vm10328_vm1  ;;  %v10332_v3 = vld [vmem:[#allocation190_spill] sm:$0xff] }
 0x383   :  { %v3363_v20 = vmul.f32 %v3357_v34, %v10315_v61  ;;  %v3364_v59 = vmul.f32 %v3358_v1, %v10315_v61  ;;  %v3367_v51 = vmul.f32 %v3357_v34, %v10316_v0  ;;  %v3368_v36 = vmul.f32 %v3358_v1, %v10316_v0  ;;  %3841 = vrot.lane.b32.xlu1 %v7447_v53, %s10313_s29  ;;  %v8575_v47 = vpop.permute.xlu2 %3483  ;;  %vm10334_vm13 = vmmov %vm10327_vm6 }
 0x384   :  { %v3361_v58 = vadd.f32 %v3359_v9, %v3339_v42  ;;  %v3362_v11 = vadd.f32 %v3360_v32, %v3340_v18  ;;  %v3372_v55 = vpop.permute.xlu0 %3371  ;;  %v10330_v18 = vld [vmem:[#allocation188_spill] sm:$0xff]  ;;  %vm10338_vm0 = vcmask 908288  }
 0x385   :  { %v3365_v7 = vadd.f32 %v3363_v20, %v3343_v62  ;;  %v3366_v4 = vadd.f32 %v3364_v59, %v3344_v15  ;;  %v3369_v46 = vadd.f32 %v3367_v51, %v3347_v37  ;;  %v3370_v17 = vadd.f32 %v3368_v36, %v3348_v16  ;;  %v3374_v13 = vpop.permute.xlu1 %3373 }
 0x386   :  { %v3375_v27 = vsel %vm10317_vm4, %v3372_v55, %v3374_v13  ;;  %v3376_v12 = vsel %vm10318_vm10, %v3374_v13, %v3372_v55  ;;  %v10337_v13 = vld [vmem:[#allocation193_spill] sm:$0xff]  ;;  %vm10339_vm4 = vmmov %vm10338_vm0 }
 0x387   :  { %v3379_v30 = vsel %vm10319_vm11, %v3375_v27, 0.0  ;;  %v3380_v53 = vsel %vm10320_vm7, %v3376_v12, 0.0  ;;  %vm10347_vm7 = vmmov %vm10338_vm0 }
 0x388   :  { %v3381_v44 = vmul.f32 %v3379_v30, %v10321_v28  ;;  %v3382_v24 = vmul.f32 %v3380_v53, %v10321_v28  ;;  %v3385_v63 = vmul.f32 %v3379_v30, %v10322_v39  ;;  %v3386_v8 = vmul.f32 %v3380_v53, %v10322_v39 }
 0x389   :  { %v3389_v33 = vmul.f32 %v3379_v30, %v10323_v54  ;;  %v3390_v14 = vmul.f32 %v3380_v53, %v10323_v54  ;;  %3885 = vrot.lane.b32.xlu2 %v7478_v49, %s10313_s29 }
 0x38a   :  { %v3383_v45 = vadd.f32 %v3381_v44, %v3361_v58  ;;  %v3384_v38 = vadd.f32 %v3382_v24, %v3362_v11  ;;  %v3387_v50 = vadd.f32 %v3385_v63, %v3365_v7  ;;  %v3388_v31 = vadd.f32 %v3386_v8, %v3366_v4  ;;  %3863 = vrot.lane.b32.xlu0 %v7449_v25, %s10313_s29  ;;  %v10335_v11 = vld [vmem:[#allocation191_spill] sm:$0xff]  ;;  %v10336_v4 = vld [vmem:[#allocation192_spill] sm:$0xff] }
 0x38b   :  { %v3391_v57 = vadd.f32 %v3389_v33, %v3369_v46  ;;  %v3392_v5 = vadd.f32 %v3390_v14, %v3370_v17  ;;  %3883 = vrot.lane.b32.xlu1 %v7476_v22, %s10313_s29  ;;  %v8607_v42 = vpop.permute.xlu2 %3525  ;;  %v10340_v14 = vld [vmem:[#allocation194_spill] sm:$0xff] }
 0x38c   :  { %v3396_v35 = vpop.permute.xlu0 %3395  ;;  %vm10341_vm10 = vnez %v10340_v14 }
 0x38d   :  { %v3397_v6 = vsel %vm10324_vm15, %v8477_v56, %v3396_v35  ;;  %v3398_v41 = vsel %vm10325_vm12, %v3396_v35, %v8477_v56  ;;  %v3416_v49 = vpop.permute.xlu1 %3415  ;;  %v10331_v56 = vld [vmem:[#allocation189_spill] sm:$0xff]  ;;  %vm10348_vm15 = vmmov %vm10338_vm0 }
 0x38e   :  { %v3401_v34 = vsel %vm10326_vm5, %v3397_v6, 0.0  ;;  %v3402_v1 = vsel %vm10327_vm6, %v3398_v41, 0.0  ;;  %v3419_v25 = vsel %vm10328_vm1, %v3416_v49, %v8519_v19  ;;  %v3420_v22 = vsel %vm10329_vm8, %v8519_v19, %v3416_v49  ;;  %v10345_v35 = vld [vmem:[#allocation197_spill] sm:$0xff]  ;;  %vm10349_vm12 = vmmov %vm10338_vm0 }
 0x38f   :  { %v3403_v62 = vmul.f32 %v3401_v34, %v10330_v18  ;;  %v3404_v15 = vmul.f32 %v3402_v1, %v10330_v18  ;;  %v3407_v37 = vmul.f32 %v3401_v34, %v10331_v56  ;;  %v3408_v16 = vmul.f32 %v3402_v1, %v10331_v56  ;;  %vm10350_vm5 = vmmov %vm10338_vm0 }
 0x390   :  { %v3411_v9 = vmul.f32 %v3401_v34, %v10332_v3  ;;  %v3412_v32 = vmul.f32 %v3402_v1, %v10332_v3  ;;  %v3423_v61 = vsel %vm10333_vm9, %v3419_v25, 0.0  ;;  %v3424_v19 = vsel %vm10334_vm13, %v3420_v22, 0.0  ;;  %v10346_v34 = vld [vmem:[#allocation198_spill] sm:$0xff] }
 0x391   :  { %v3405_v20 = vadd.f32 %v3403_v62, %v3383_v45  ;;  %v3406_v59 = vadd.f32 %v3404_v15, %v3384_v38  ;;  %v3409_v0 = vadd.f32 %v3407_v37, %v3387_v50  ;;  %v3410_v51 = vadd.f32 %v3408_v16, %v3388_v31  ;;  %v10342_v38 = vld [vmem:[#allocation195_spill] sm:$0xff]  ;;  %v10344_v31 = vld [vmem:[#allocation196_spill] sm:$0xff] }
 0x392   :  { %v3413_v36 = vadd.f32 %v3411_v9, %v3391_v57  ;;  %v3414_v58 = vadd.f32 %v3412_v32, %v3392_v5  ;;  %v3425_v55 = vmul.f32 %v3423_v61, %v10335_v11  ;;  %v3426_v7 = vmul.f32 %v3424_v19, %v10335_v11 }
 0x393   :  { %v3429_v46 = vmul.f32 %v3423_v61, %v10336_v4  ;;  %v3430_v17 = vmul.f32 %v3424_v19, %v10336_v4  ;;  %v3433_v27 = vmul.f32 %v3423_v61, %v10337_v13  ;;  %v3434_v12 = vmul.f32 %v3424_v19, %v10337_v13  ;;  %v8635_v49 = vpop.permute.xlu2 %3549 }
 0x394   :  { %v3427_v30 = vadd.f32 %v3425_v55, %v3405_v20  ;;  %v3428_v53 = vadd.f32 %v3426_v7, %v3406_v59  ;;  %v3438_v28 = vpop.permute.xlu0 %3437  ;;  %vm10343_vm11 = vnez %v10342_v38  ;;  %v10353_v55 = vld [vmem:[#allocation201_spill] sm:$0xff]  ;;  %vm10357_vm6 = vcmask 900096  }
 0x395   :  { %v3431_v44 = vadd.f32 %v3429_v46, %v3409_v0  ;;  %v3432_v24 = vadd.f32 %v3430_v17, %v3410_v51  ;;  %v3435_v39 = vadd.f32 %v3433_v27, %v3413_v36  ;;  %v3436_v63 = vadd.f32 %v3434_v12, %v3414_v58  ;;  %v3440_v8 = vpop.permute.xlu1 %3439  ;;  %v10351_v0 = vld [vmem:[#allocation199_spill] sm:$0xff]  ;;  %v10352_v58 = vld [vmem:[#allocation200_spill] sm:$0xff]  ;;  %vm10358_vm1 = vmmov %vm10357_vm6 }
 0x396   :  { %v3441_v54 = vsel %vm10338_vm0, %v3438_v28, %v3440_v8  ;;  %v3442_v33 = vsel %vm10339_vm4, %v3440_v8, %v3438_v28  ;;  %v10354_v28 = vld [vmem:[#allocation202_spill] sm:$0xff]  ;;  %vm10366_vm13 = vmmov %vm10358_vm1 }
 0x397   :  { %v3445_v45 = vsel %vm10341_vm10, %v3441_v54, 0.0  ;;  %v3446_v50 = vsel %vm10343_vm11, %v3442_v33, 0.0  ;;  %v10356_v33 = vld [vmem:[#allocation204_spill] sm:$0xff]  ;;  %vm10367_vm0 = vmmov %vm10358_vm1 }
 0x398   :  { %v3447_v57 = vmul.f32 %v3445_v45, %v10344_v31  ;;  %v3448_v5 = vmul.f32 %v3446_v50, %v10344_v31  ;;  %v3451_v6 = vmul.f32 %v3445_v45, %v10345_v35  ;;  %v3452_v41 = vmul.f32 %v3446_v50, %v10345_v35  ;;  %vm10368_vm4 = vmmov %vm10367_vm0 }
 0x399   :  { %v3455_v1 = vmul.f32 %v3445_v45, %v10346_v34  ;;  %v3456_v25 = vmul.f32 %v3446_v50, %v10346_v34 }
 0x39a   :  { %v3449_v22 = vadd.f32 %v3447_v57, %v3427_v30  ;;  %v3450_v18 = vadd.f32 %v3448_v5, %v3428_v53  ;;  %v3453_v62 = vadd.f32 %v3451_v6, %v3431_v44  ;;  %v3454_v15 = vadd.f32 %v3452_v41, %v3432_v24 }
 0x39b   :  { %v3457_v56 = vadd.f32 %v3455_v1, %v3435_v39  ;;  %v3458_v37 = vadd.f32 %v3456_v25, %v3436_v63  ;;  %v8663_v39 = vpop.permute.xlu2 %3597  ;;  %v10355_v63 = vld [vmem:[#allocation203_spill] sm:$0xff]  ;;  %v10359_v25 = vld [vmem:[#allocation205_spill] sm:$0xff] }
 0x39c   :  { %v3462_v16 = vpop.permute.xlu0 %3461  ;;  %vm10360_vm8 = vnez %v10359_v25 }
 0x39d   :  { %v3463_v3 = vsel %vm10347_vm7, %v8539_v40, %v3462_v16  ;;  %v3464_v9 = vsel %vm10348_vm15, %v3462_v16, %v8539_v40  ;;  %v3482_v32 = vpop.permute.xlu1 %3481  ;;  %v10364_v16 = vld [vmem:[#allocation208_spill] sm:$0xff] }
 0x39e   :  { %v3467_v61 = vsel %vm10341_vm10, %v3463_v3, 0.0  ;;  %v3468_v19 = vsel %vm10343_vm11, %v3464_v9, 0.0  ;;  %v3485_v20 = vsel %vm10349_vm12, %v3482_v32, %v8575_v47  ;;  %v3486_v59 = vsel %vm10350_vm5, %v8575_v47, %v3482_v32  ;;  %v10365_v32 = vld [vmem:[#allocation209_spill] sm:$0xff] }
 0x39f   :  { %v3469_v51 = vmul.f32 %v3467_v61, %v10351_v0  ;;  %v3470_v36 = vmul.f32 %v3468_v19, %v10351_v0  ;;  %v3473_v11 = vmul.f32 %v3467_v61, %v10352_v58  ;;  %v3474_v40 = vmul.f32 %v3468_v19, %v10352_v58 }
 0x3a0   :  { %v3477_v7 = vmul.f32 %v3467_v61, %v10353_v55  ;;  %v3478_v4 = vmul.f32 %v3468_v19, %v10353_v55  ;;  %v3489_v46 = vsel %vm10341_vm10, %v3485_v20, 0.0  ;;  %v3490_v17 = vsel %vm10343_vm11, %v3486_v59, 0.0  ;;  %vm10369_vm10 = vmmov %vm10367_vm0 }
 0x3a1   :  { %v3471_v13 = vadd.f32 %v3469_v51, %v3449_v22  ;;  %v3472_v47 = vadd.f32 %v3470_v36, %v3450_v18  ;;  %v3475_v27 = vadd.f32 %v3473_v11, %v3453_v62  ;;  %v3476_v12 = vadd.f32 %v3474_v40, %v3454_v15  ;;  %v10361_v18 = vld [vmem:[#allocation206_spill] sm:$0xff]  ;;  %v10363_v15 = vld [vmem:[#allocation207_spill] sm:$0xff] }
 0x3a2   :  { %v3479_v30 = vadd.f32 %v3477_v7, %v3457_v56  ;;  %v3480_v53 = vadd.f32 %v3478_v4, %v3458_v37  ;;  %v3491_v44 = vmul.f32 %v3489_v46, %v10354_v28  ;;  %v3492_v24 = vmul.f32 %v3490_v17, %v10354_v28 }
 0x3a3   :  { %v3495_v8 = vmul.f32 %v3489_v46, %v10355_v63  ;;  %v3496_v54 = vmul.f32 %v3490_v17, %v10355_v63  ;;  %v3499_v14 = vmul.f32 %v3489_v46, %v10356_v33  ;;  %v3500_v45 = vmul.f32 %v3490_v17, %v10356_v33  ;;  %v3622_v40 = vpop.permute.xlu2 %3621 }
 0x3a4   :  { %v3493_v38 = vadd.f32 %v3491_v44, %v3471_v13  ;;  %v3494_v50 = vadd.f32 %v3492_v24, %v3472_v47  ;;  %v3504_v31 = vpop.permute.xlu0 %3503  ;;  %vm10362_vm9 = vnez %v10361_v18  ;;  %v10372_v44 = vld [vmem:[#allocation212_spill] sm:$0xff]  ;;  %vm10376_vm11 = vcmask 801792  }
 0x3a5   :  { %v3497_v57 = vadd.f32 %v3495_v8, %v3475_v27  ;;  %v3498_v5 = vadd.f32 %v3496_v54, %v3476_v12  ;;  %v3501_v35 = vadd.f32 %v3499_v14, %v3479_v30  ;;  %v3502_v6 = vadd.f32 %v3500_v45, %v3480_v53  ;;  %v3506_v41 = vpop.permute.xlu1 %3505  ;;  %v10370_v27 = vld [vmem:[#allocation210_spill] sm:$0xff]  ;;  %v10371_v53 = vld [vmem:[#allocation211_spill] sm:$0xff]  ;;  %vm10377_vm7 = vmmov %vm10376_vm11 }
 0x3a6   :  { %v3507_v34 = vsel %vm10357_vm6, %v3504_v31, %v3506_v41  ;;  %v3508_v1 = vsel %vm10358_vm1, %v3506_v41, %v3504_v31  ;;  %v10373_v31 = vld [vmem:[#allocation213_spill] sm:$0xff]  ;;  %vm10378_vm15 = vmmov %vm10377_vm7 }
 0x3a7   :  { %v3511_v22 = vsel %vm10360_vm8, %v3507_v34, 0.0  ;;  %v3512_v62 = vsel %vm10362_vm9, %v3508_v1, 0.0  ;;  %v10375_v34 = vld [vmem:[#allocation215_spill] sm:$0xff]  ;;  %vm10379_vm12 = vmmov %vm10377_vm7 }
 0x3a8   :  { %v3513_v56 = vmul.f32 %v3511_v22, %v10363_v15  ;;  %v3514_v37 = vmul.f32 %v3512_v62, %v10363_v15  ;;  %v3517_v3 = vmul.f32 %v3511_v22, %v10364_v16  ;;  %v3518_v9 = vmul.f32 %v3512_v62, %v10364_v16  ;;  %vm10384_vm1 = vmmov %vm10377_vm7 }
 0x3a9   :  { %v3521_v61 = vmul.f32 %v3511_v22, %v10365_v32  ;;  %v3522_v19 = vmul.f32 %v3512_v62, %v10365_v32 }
 0x3aa   :  { %v3515_v20 = vadd.f32 %v3513_v56, %v3493_v38  ;;  %v3516_v59 = vadd.f32 %v3514_v37, %v3494_v50  ;;  %v3519_v0 = vadd.f32 %v3517_v3, %v3497_v57  ;;  %v3520_v51 = vadd.f32 %v3518_v9, %v3498_v5 }
 0x3ab   :  { %v3523_v36 = vadd.f32 %v3521_v61, %v3501_v35  ;;  %v3524_v58 = vadd.f32 %v3522_v19, %v3502_v6  ;;  %v10374_v35 = vld [vmem:[#allocation214_spill] sm:$0xff]  ;;  %v3664_v61 = vpop.permute.xlu2 %3663 }
 0x3ac   :  { %v3528_v11 = vpop.permute.xlu0 %3527 }
 0x3ad   :  { %v3529_v55 = vsel %vm10366_vm13, %v8607_v42, %v3528_v11  ;;  %v3530_v7 = vsel %vm10367_vm0, %v3528_v11, %v8607_v42  ;;  %v3548_v4 = vpop.permute.xlu1 %3547 }
 0x3ae   :  { %v3533_v46 = vsel %vm10360_vm8, %v3529_v55, 0.0  ;;  %v3534_v17 = vsel %vm10362_vm9, %v3530_v7, 0.0  ;;  %v3551_v13 = vsel %vm10368_vm4, %v3548_v4, %v8635_v49  ;;  %v3552_v47 = vsel %vm10369_vm10, %v8635_v49, %v3548_v4  ;;  %v10380_v55 = vld [vmem:[#allocation220_spill] sm:$0xff] }
 0x3af   :  { %v3535_v12 = vmul.f32 %v3533_v46, %v10370_v27  ;;  %v3536_v30 = vmul.f32 %v3534_v17, %v10370_v27  ;;  %v3539_v28 = vmul.f32 %v3533_v46, %v10371_v53  ;;  %v3540_v42 = vmul.f32 %v3534_v17, %v10371_v53  ;;  %v10382_v7 = vld [vmem:[#allocation224_spill] sm:$0xff]  ;;  %v10386_v27 = vld [vmem:[#allocation219_spill] sm:$0xff] }
 0x3b0   :  { %v3543_v24 = vmul.f32 %v3533_v46, %v10372_v44  ;;  %v3544_v63 = vmul.f32 %v3534_v17, %v10372_v44  ;;  %v3555_v8 = vsel %vm10360_vm8, %v3551_v13, 0.0  ;;  %v3556_v54 = vsel %vm10362_vm9, %v3552_v47, 0.0  ;;  %vm10385_vm8 = vmmov %vm10384_vm1 }
 0x3b1   :  { %v3537_v33 = vadd.f32 %v3535_v12, %v3515_v20  ;;  %v3538_v49 = vadd.f32 %v3536_v30, %v3516_v59  ;;  %v3541_v14 = vadd.f32 %v3539_v28, %v3519_v0  ;;  %v3542_v45 = vadd.f32 %v3540_v42, %v3520_v51  ;;  %v10387_v28 = vld [vmem:[#allocation216_spill] sm:$0xff] }
 0x3b2   :  { %v3545_v38 = vadd.f32 %v3543_v24, %v3523_v36  ;;  %v3546_v50 = vadd.f32 %v3544_v63, %v3524_v58  ;;  %v3557_v57 = vmul.f32 %v3555_v8, %v10373_v31  ;;  %v3558_v5 = vmul.f32 %v3556_v54, %v10373_v31  ;;  %v10388_v24 = vld [vmem:[#allocation221_spill] sm:$0xff] }
 0x3b3   :  { %v3561_v6 = vmul.f32 %v3555_v8, %v10374_v35  ;;  %v3562_v41 = vmul.f32 %v3556_v54, %v10374_v35  ;;  %v3565_v1 = vmul.f32 %v3555_v8, %v10375_v34  ;;  %v3566_v25 = vmul.f32 %v3556_v54, %v10375_v34  ;;  %v10393_v35 = vld [vmem:[#allocation218_spill] sm:$0xff] }
 0x3b4   :  { %v3559_v22 = vadd.f32 %v3557_v57, %v3537_v33  ;;  %v3560_v18 = vadd.f32 %v3558_v5, %v3538_v49  ;;  %v3576_v62 = vpop.permute.xlu0 %3575  ;;  %vm10381_vm5 = vnez %v10380_v55  ;;  %vm10383_vm6 = vnez %v10382_v7  ;;  %v10389_v33 = vld [vmem:[#allocation217_spill] sm:$0xff] }
 0x3b5   :  { %v3563_v15 = vadd.f32 %v3561_v6, %v3541_v14  ;;  %v3564_v56 = vadd.f32 %v3562_v41, %v3542_v45  ;;  %v3567_v37 = vadd.f32 %v3565_v1, %v3545_v38  ;;  %v3568_v16 = vadd.f32 %v3566_v25, %v3546_v50  ;;  %v3578_v3 = vpop.permute.xlu1 %3577  ;;  %v10390_v38 = vld [vmem:[#allocation222_spill] sm:$0xff] }
 0x3b6   :  { %v8710_v9 = vadd.f32 %v3559_v22, %v8448_v21  ;;  %v8713_v32 = vadd.f32 %v3560_v18, %v8451_v52  ;;  %v8727_v21 = vpop.permute.xlu2 %3687  ;;  %vm10391_vm9 = vcmask 793600   ;;  %v10394_v18 = vld [vmem:[#allocation223_spill] sm:$0xff] }
 0x3b7   :  { %v8716_v19 = vadd.f32 %v3563_v15, %v8456_v48  ;;  %v8719_v20 = vadd.f32 %v3564_v56, %v8459_v2  ;;  %v8722_v59 = vadd.f32 %v3567_v37, %v8462_v10  ;;  %v8725_v0 = vadd.f32 %v3568_v16, %v8465_v60  ;;  %vm10392_vm13 = vmmov %vm10391_vm9  ;;  %v10395_v56 = vld [vmem:[#allocation237_spill] sm:$0xff]  ;;  %v10397_v16 = vld [vmem:[#allocation238_spill] sm:$0xff] }
 0x3b8   :  { %v3579_v2 = vsel %vm10378_vm15, %v3576_v62, %v3578_v3  ;;  %v3580_v10 = vsel %vm10379_vm12, %v3578_v3, %v3576_v62  ;;  %vm10396_vm0 = vnez %v10395_v56  ;;  %vm10398_vm4 = vnez %v10397_v16  ;;  %vm10399_vm10 = vmmov %vm10391_vm9  ;;  %v10413_v56 = vld [vmem:[#allocation234_spill] sm:$0xff] }
 0x3b9   :  { %v3583_v46 = vsel %vm10381_vm5, %v3579_v2, 0.0  ;;  %v3584_v17 = vsel %vm10383_vm6, %v3580_v10, 0.0  ;;  %vm10411_vm12 = vcmask 785408  }
 0x3ba   :  { %v3585_v42 = vmul.f32 %v3583_v46, %v10387_v28  ;;  %v3586_v44 = vmul.f32 %v3584_v17, %v10387_v28  ;;  %v3589_v49 = vmul.f32 %v3583_v46, %v10389_v33  ;;  %v3590_v14 = vmul.f32 %v3584_v17, %v10389_v33 }
 0x3bb   :  { %v3593_v6 = vmul.f32 %v3583_v46, %v10393_v35  ;;  %v3594_v41 = vmul.f32 %v3584_v17, %v10393_v35  ;;  %v10409_v35 = vld [vmem:[#allocation232_spill] sm:$0xff] }
 0x3bc   :  { %v3600_v51 = vpop.permute.xlu0 %3599 }
 0x3bd   :  { %v3620_v36 = vpop.permute.xlu1 %3619  ;;  %v3601_v11 = vsel %vm10376_vm11, %v8663_v39, %v3600_v51  ;;  %v3602_v48 = vsel %vm10377_vm7, %v3600_v51, %v8663_v39  ;;  %vm10400_vm11 = vmmov %vm10391_vm9 }
 0x3be   :  { %v3605_v60 = vsel %vm10381_vm5, %v3601_v11, 0.0  ;;  %v3606_v4 = vsel %vm10383_vm6, %v3602_v48, 0.0  ;;  %v8743_v13 = vpop.permute.xlu2 %3729  ;;  %v3623_v39 = vsel %vm10384_vm1, %v3620_v36, %v3622_v40  ;;  %v3624_v47 = vsel %vm10385_vm8, %v3622_v40, %v3620_v36  ;;  %v10401_v11 = vld [vmem:[#allocation226_spill] sm:$0xff]  ;;  %vm10405_vm7 = vmmov %vm10391_vm9 }
 0x3bf   :  { %v3607_v12 = vmul.f32 %v3605_v60, %v10386_v27  ;;  %v3608_v30 = vmul.f32 %v3606_v4, %v10386_v27  ;;  %v3611_v63 = vmul.f32 %v3605_v60, %v10388_v24  ;;  %v3612_v8 = vmul.f32 %v3606_v4, %v10388_v24  ;;  %vm10406_vm15 = vmmov %vm10405_vm7 }
 0x3c0   :  { %v3627_v40 = vsel %vm10381_vm5, %v3623_v39, 0.0  ;;  %v3628_v45 = vsel %vm10383_vm6, %v3624_v47, 0.0  ;;  %v3615_v50 = vmul.f32 %v3605_v60, %v10390_v38  ;;  %v3616_v31 = vmul.f32 %v3606_v4, %v10390_v38  ;;  %v10402_v60 = vld [vmem:[#allocation227_spill] sm:$0xff]  ;;  %v10403_v39 = vld [vmem:[#allocation228_spill] sm:$0xff]  ;;  %vm10412_vm5 = vmmov %vm10411_vm12 }
 0x3c1   :  { %v3609_v34 = vadd.f32 %v3607_v12, %v3585_v42  ;;  %v3610_v1 = vadd.f32 %v3608_v30, %v3586_v44  ;;  %v3613_v25 = vadd.f32 %v3611_v63, %v3589_v49  ;;  %v3614_v22 = vadd.f32 %v3612_v8, %v3590_v14  ;;  %v10404_v42 = vld [vmem:[#allocation229_spill] sm:$0xff]  ;;  %v10407_v14 = vld [vmem:[#allocation230_spill] sm:$0xff]  ;;  %v10408_v38 = vld [vmem:[#allocation231_spill] sm:$0xff] }
 0x3c2   :  { %v3629_v62 = vmul.f32 %v3627_v40, %v10394_v18  ;;  %v3630_v15 = vmul.f32 %v3628_v45, %v10394_v18  ;;  %v3633_v48 = vmul.f32 %v3627_v40, %v10401_v11  ;;  %v3634_v2 = vmul.f32 %v3628_v45, %v10401_v11  ;;  %vm10416_vm8 = vmmov %vm10412_vm5 }
 0x3c3   :  { %v3637_v7 = vmul.f32 %v3627_v40, %v10402_v60  ;;  %v3638_v4 = vmul.f32 %v3628_v45, %v10402_v60  ;;  %vm10414_vm6 = vcmp.lt.s32.totalorder %v4428_v26, 14  ;;  %vm10415_vm1 = vcmp.lt.s32.totalorder %v4438_v29, 14  ;;  %v10434_v26 = vld [vmem:[#allocation245_spill] sm:$0xff] }
 0x3c4   :  { %v3642_v58 = vpop.permute.xlu0 %3641  ;;  %v3631_v10 = vadd.f32 %v3629_v62, %v3609_v34  ;;  %v3632_v55 = vadd.f32 %v3630_v15, %v3610_v1  ;;  %v3636_v28 = vadd.f32 %v3634_v2, %v3614_v22 }
 0x3c5   :  { %v3644_v52 = vpop.permute.xlu1 %3643 }
 0x3c6   :  { %v3645_v57 = vsel %vm10391_vm9, %v3642_v58, %v3644_v52  ;;  %v3646_v5 = vsel %vm10392_vm13, %v3644_v52, %v3642_v58  ;;  %v3617_v58 = vadd.f32 %v3615_v50, %v3593_v6  ;;  %v3618_v52 = vadd.f32 %v3616_v31, %v3594_v41  ;;  %v8777_v17 = vpop.permute.xlu2 %3753  ;;  %vm10417_vm9 = vmmov %vm10412_vm5 }
 0x3c7   :  { %v3649_v37 = vsel %vm10396_vm0, %v3645_v57, 0.0  ;;  %v3650_v3 = vsel %vm10398_vm4, %v3646_v5, 0.0  ;;  %vm10421_vm13 = vmmov %vm10414_vm6 }
 0x3c8   :  { %v3651_v47 = vmul.f32 %v3649_v37, %v10403_v39  ;;  %v3652_v27 = vmul.f32 %v3650_v3, %v10403_v39  ;;  %v3655_v44 = vmul.f32 %v3649_v37, %v10404_v42  ;;  %v3656_v24 = vmul.f32 %v3650_v3, %v10404_v42 }
 0x3c9   :  { %v3639_v63 = vadd.f32 %v3637_v7, %v3617_v58  ;;  %v3640_v8 = vadd.f32 %v3638_v4, %v3618_v52  ;;  %v3659_v40 = vmul.f32 %v3649_v37, %v10407_v14  ;;  %v3660_v45 = vmul.f32 %v3650_v3, %v10407_v14  ;;  %v10423_v14 = vld [vmem:[#allocation240_spill] sm:$0xff] }
 0x3ca   :  { %v3653_v57 = vadd.f32 %v3651_v47, %v3631_v10  ;;  %v3654_v5 = vadd.f32 %v3652_v27, %v3632_v55  ;;  %v3658_v1 = vadd.f32 %v3656_v24, %v3636_v28  ;;  %v10418_v47 = vld [vmem:[#allocation235_spill] sm:$0xff] }
 0x3cb   :  { %v3661_v37 = vadd.f32 %v3659_v40, %v3639_v63  ;;  %v3662_v3 = vadd.f32 %v3660_v45, %v3640_v8 }
 0x3cc   :  { %v3666_v53 = vpop.permute.xlu0 %3665 }
 0x3cd   :  { %v3686_v54 = vpop.permute.xlu1 %3685  ;;  %v3667_v51 = vsel %vm10399_vm10, %v3664_v61, %v3666_v53  ;;  %v3668_v36 = vsel %vm10400_vm11, %v3666_v53, %v3664_v61  ;;  %v3635_v53 = vadd.f32 %v3633_v48, %v3613_v25  ;;  %vm10429_vm11 = vmmov %vm10414_vm6 }
 0x3ce   :  { %v3671_v61 = vsel %vm10396_vm0, %v3667_v51, 0.0  ;;  %v3672_v12 = vsel %vm10398_vm4, %v3668_v36, 0.0  ;;  %v3689_v33 = vsel %vm10405_vm7, %v3686_v54, %v8727_v21  ;;  %v3690_v49 = vsel %vm10406_vm15, %v8727_v21, %v3686_v54  ;;  %v10410_v54 = vld [vmem:[#allocation233_spill] sm:$0xff]  ;;  %v8815_v4 = vpop.permute.xlu2 %3795 }
 0x3cf   :  { %v3673_v50 = vmul.f32 %v3671_v61, %v10408_v38  ;;  %v3674_v31 = vmul.f32 %v3672_v12, %v10408_v38  ;;  %v3677_v6 = vmul.f32 %v3671_v61, %v10409_v35  ;;  %v3678_v41 = vmul.f32 %v3672_v12, %v10409_v35 }
 0x3d0   :  { %v3657_v34 = vadd.f32 %v3655_v44, %v3635_v53  ;;  %v3693_v25 = vsel %vm10396_vm0, %v3689_v33, 0.0  ;;  %v3694_v21 = vsel %vm10398_vm4, %v3690_v49, 0.0  ;;  %v3681_v22 = vmul.f32 %v3671_v61, %v10410_v54  ;;  %v10419_v53 = vld [vmem:[#allocation236_spill] sm:$0xff]  ;;  %v10420_v44 = vld [vmem:[#allocation239_spill] sm:$0xff]  ;;  %vm10422_vm0 = vmmov %vm10415_vm1 }
 0x3d1   :  { %v3682_v18 = vmul.f32 %v3672_v12, %v10410_v54  ;;  %v3675_v51 = vadd.f32 %v3673_v50, %v3653_v57  ;;  %v3676_v36 = vadd.f32 %v3674_v31, %v3654_v5  ;;  %v3680_v11 = vadd.f32 %v3678_v41, %v3658_v1  ;;  %vm10424_vm4 = vmmov %vm10412_vm5  ;;  %v10426_v5 = vld [vmem:[#allocation242_spill] sm:$0xff]  ;;  %v10427_v41 = vld [vmem:[#allocation243_spill] sm:$0xff] }
 0x3d2   :  { %v3679_v52 = vadd.f32 %v3677_v6, %v3657_v34  ;;  %v3695_v48 = vmul.f32 %v3693_v25, %v10413_v56  ;;  %v3696_v16 = vmul.f32 %v3694_v21, %v10413_v56  ;;  %v3699_v27 = vmul.f32 %v3693_v25, %v10418_v47  ;;  %vm10425_vm10 = vmmov %vm10424_vm4 }
 0x3d3   :  { %v3684_v39 = vadd.f32 %v3682_v18, %v3662_v3  ;;  %v3700_v61 = vmul.f32 %v3694_v21, %v10418_v47  ;;  %v3703_v28 = vmul.f32 %v3693_v25, %v10419_v53  ;;  %v3704_v42 = vmul.f32 %v3694_v21, %v10419_v53  ;;  %vm10430_vm7 = vmmov %vm10422_vm0 }
 0x3d4   :  { %v3708_v46 = vpop.permute.xlu0 %3707  ;;  %v3697_v12 = vadd.f32 %v3695_v48, %v3675_v51  ;;  %v3701_v33 = vadd.f32 %v3699_v27, %v3679_v52  ;;  %vm10432_vm15 = vcmask 777216  }
 0x3d5   :  { %v3710_v30 = vpop.permute.xlu1 %3709  ;;  %v3702_v49 = vadd.f32 %v3700_v61, %v3680_v11  ;;  %v3706_v50 = vadd.f32 %v3704_v42, %v3684_v39  ;;  %v10435_v39 = vld [vmem:[#allocation246_spill] sm:$0xff] }
 0x3d6   :  { %v3711_v62 = vsel %vm10411_vm12, %v3708_v46, %v3710_v30  ;;  %v3712_v15 = vsel %vm10412_vm5, %v3710_v30, %v3708_v46  ;;  %v3683_v46 = vadd.f32 %v3681_v22, %v3661_v37  ;;  %v3698_v30 = vadd.f32 %v3696_v16, %v3676_v36  ;;  %v10428_v22 = vld [vmem:[#allocation241_spill] sm:$0xff]  ;;  %v10431_v36 = vld [vmem:[#allocation244_spill] sm:$0xff]  ;;  %vm10433_vm12 = vmmov %vm10432_vm15 }
 0x3d7   :  { %v3715_v10 = vsel %vm10414_vm6, %v3711_v62, 0.0  ;;  %v3716_v55 = vsel %vm10415_vm1, %v3712_v15, 0.0  ;;  %vm10436_vm5 = vnez %v9954_v23  ;;  %vm10439_vm6 = vmmov %vm10433_vm12 }
 0x3d8   :  { %v3717_v24 = vmul.f32 %v3715_v10, %v10420_v44  ;;  %v3718_v63 = vmul.f32 %v3716_v55, %v10420_v44  ;;  %v3721_v40 = vmul.f32 %v3715_v10, %v10423_v14  ;;  %v3722_v45 = vmul.f32 %v3716_v55, %v10423_v14  ;;  %vm10440_vm1 = vmmov %vm10439_vm6 }
 0x3d9   :  { %v3705_v38 = vadd.f32 %v3703_v28, %v3683_v46  ;;  %v3725_v18 = vmul.f32 %v3715_v10, %v10428_v22  ;;  %v3726_v62 = vmul.f32 %v3716_v55, %v10428_v22  ;;  %v3820_v55 = vpop.permute.xlu2 %3819  ;;  %v10437_v28 = vld [vmem:[#allocation247_spill] sm:$0xff] }
 0x3da   :  { %v3719_v21 = vadd.f32 %v3717_v24, %v3697_v12  ;;  %v3720_v54 = vadd.f32 %v3718_v63, %v3698_v30  ;;  %v3723_v37 = vadd.f32 %v3721_v40, %v3701_v33  ;;  %v3724_v3 = vadd.f32 %v3722_v45, %v3702_v49  ;;  %v10438_v49 = vld [vmem:[#allocation248_spill] sm:$0xff] }
 0x3dc   :  { %v3732_v58 = vpop.permute.xlu0 %3731 }
 0x3dd   :  { %v3752_v2 = vpop.permute.xlu1 %3751  ;;  %v3733_v60 = vsel %vm10416_vm8, %v8743_v13, %v3732_v58  ;;  %v3734_v7 = vsel %vm10417_vm9, %v3732_v58, %v8743_v13  ;;  %vm10444_vm8 = vmmov %vm10440_vm1 }
 0x3de   :  { %v3737_v13 = vsel %vm10421_vm13, %v3733_v60, 0.0  ;;  %v3738_v8 = vsel %vm10422_vm0, %v3734_v7, 0.0  ;;  %v3755_v31 = vsel %vm10424_vm4, %v3752_v2, %v8777_v17  ;;  %v3756_v57 = vsel %vm10425_vm10, %v8777_v17, %v3752_v2  ;;  %vm10445_vm9 = vmmov %vm10440_vm1 }
 0x3df   :  { %v3739_v35 = vmul.f32 %v3737_v13, %v10426_v5  ;;  %v3740_v6 = vmul.f32 %v3738_v8, %v10426_v5  ;;  %v3743_v34 = vmul.f32 %v3737_v13, %v10427_v41  ;;  %v3744_v1 = vmul.f32 %v3738_v8, %v10427_v41 }
 0x3e0   :  { %v3759_v17 = vsel %vm10429_vm11, %v3755_v31, 0.0  ;;  %v3760_v51 = vsel %vm10430_vm7, %v3756_v57, 0.0  ;;  %v3747_v58 = vmul.f32 %v3737_v13, %v10431_v36  ;;  %v3748_v52 = vmul.f32 %v3738_v8, %v10431_v36  ;;  %v10441_v31 = vld [vmem:[#allocation249_spill] sm:$0xff] }
 0x3e1   :  { %v3741_v48 = vadd.f32 %v3739_v35, %v3719_v21  ;;  %v3742_v16 = vadd.f32 %v3740_v6, %v3720_v54  ;;  %v3745_v2 = vadd.f32 %v3743_v34, %v3723_v37  ;;  %v3746_v10 = vadd.f32 %v3744_v1, %v3724_v3  ;;  %v10442_v1 = vld [vmem:[#allocation250_spill] sm:$0xff]  ;;  %v10443_v54 = vld [vmem:[#allocation251_spill] sm:$0xff] }
 0x3e2   :  { %v3727_v60 = vadd.f32 %v3725_v18, %v3705_v38  ;;  %v3728_v7 = vadd.f32 %v3726_v62, %v3706_v50  ;;  %v3761_v46 = vmul.f32 %v3759_v17, %v10434_v26  ;;  %v3762_v29 = vmul.f32 %v3760_v51, %v10434_v26 }
 0x3e3   :  { %v3765_v47 = vmul.f32 %v3759_v17, %v10435_v39  ;;  %v3766_v27 = vmul.f32 %v3760_v51, %v10435_v39  ;;  %v3769_v42 = vmul.f32 %v3759_v17, %v10437_v28  ;;  %v3770_v44 = vmul.f32 %v3760_v51, %v10437_v28  ;;  %v10447_v17 = vld [vmem:[#allocation253_spill] sm:$0xff]  ;;  %v10451_v28 = vld [vmem:[#allocation255_spill] sm:$0xff] }
 0x3e4   :  { %v3774_v25 = vpop.permute.xlu0 %3773  ;;  %v3749_v30 = vadd.f32 %v3747_v58, %v3727_v60  ;;  %v3750_v53 = vadd.f32 %v3748_v52, %v3728_v7  ;;  %v3763_v24 = vadd.f32 %v3761_v46, %v3741_v48  ;;  %v3764_v63 = vadd.f32 %v3762_v29, %v3742_v16  ;;  %v3862_v48 = vpop.permute.xlu2 %3861 }
 0x3e5   :  { %v3776_v15 = vpop.permute.xlu1 %3775  ;;  %v3767_v13 = vadd.f32 %v3765_v47, %v3745_v2  ;;  %v3768_v8 = vadd.f32 %v3766_v27, %v3746_v10  ;;  %vm10449_vm13 = vcmask 769024  }
 0x3e6   :  { %v3777_v11 = vsel %vm10432_vm15, %v3774_v25, %v3776_v15  ;;  %v3778_v56 = vsel %vm10433_vm12, %v3776_v15, %v3774_v25  ;;  %v3771_v41 = vadd.f32 %v3769_v42, %v3749_v30  ;;  %v3772_v34 = vadd.f32 %v3770_v44, %v3750_v53  ;;  %v10446_v15 = vld [vmem:[#allocation252_spill] sm:$0xff]  ;;  %vm10450_vm0 = vmmov %vm10449_vm13 }
 0x3e7   :  { %v3781_v61 = vsel %vm10436_vm5, %v3777_v11, 0.0  ;;  %v3782_v12 = vsel %vm7315_vm2, %v3778_v56, 0.0  ;;  %vm10459_vm4 = vmmov %vm10450_vm0 }
 0x3e8   :  { %v3783_v14 = vmul.f32 %v3781_v61, %v10438_v49  ;;  %v3784_v40 = vmul.f32 %v3782_v12, %v10438_v49  ;;  %v3787_v57 = vmul.f32 %v3781_v61, %v10441_v31  ;;  %v3788_v5 = vmul.f32 %v3782_v12, %v10441_v31  ;;  %vm10460_vm10 = vmmov %vm10450_vm0 }
 0x3e9   :  { %v3791_v25 = vmul.f32 %v3781_v61, %v10442_v1  ;;  %v3792_v21 = vmul.f32 %v3782_v12, %v10442_v1  ;;  %v10448_v61 = vld [vmem:[#allocation254_spill] sm:$0xff]  ;;  %vm10461_vm11 = vmmov %vm10450_vm0 }
 0x3ea   :  { %v3785_v58 = vadd.f32 %v3783_v14, %v3763_v24  ;;  %v3786_v52 = vadd.f32 %v3784_v40, %v3764_v63  ;;  %v3789_v11 = vadd.f32 %v3787_v57, %v3767_v13  ;;  %v3790_v56 = vadd.f32 %v3788_v5, %v3768_v8  ;;  %v10454_v8 = vld [vmem:[#allocation257_spill] sm:$0xff]  ;;  %v10455_v14 = vld [vmem:[#allocation258_spill] sm:$0xff]  ;;  %v10457_v57 = vld [vmem:[#allocation259_spill] sm:$0xff] }
 0x3eb   :  { %v3793_v16 = vadd.f32 %v3791_v25, %v3771_v41  ;;  %v3794_v2 = vadd.f32 %v3792_v21, %v3772_v34 }
 0x3ec   :  { %v3798_v33 = vpop.permute.xlu0 %3797 }
 0x3ed   :  { %v3799_v45 = vsel %vm10439_vm6, %v8815_v4, %v3798_v33  ;;  %v3800_v38 = vsel %vm10440_vm1, %v3798_v33, %v8815_v4  ;;  %v3818_v50 = vpop.permute.xlu1 %3817 }
 0x3ee   :  { %v3803_v35 = vsel %vm10436_vm5, %v3799_v45, 0.0  ;;  %v3804_v6 = vsel %vm7315_vm2, %v3800_v38, 0.0  ;;  %v3821_v18 = vsel %vm10444_vm8, %v3818_v50, %v3820_v55  ;;  %v3822_v62 = vsel %vm10445_vm9, %v3820_v55, %v3818_v50  ;;  %v10456_v38 = vld [vmem:[#allocation256_spill] sm:$0xff] }
 0x3ef   :  { %v3805_v22 = vmul.f32 %v3803_v35, %v10443_v54  ;;  %v3806_v4 = vmul.f32 %v3804_v6, %v10443_v54  ;;  %v3809_v37 = vmul.f32 %v3803_v35, %v10446_v15  ;;  %v3810_v3 = vmul.f32 %v3804_v6, %v10446_v15  ;;  %v3886_v15 = vpop.permute.xlu2 %3885 }
 0x3f0   :  { %v3813_v51 = vmul.f32 %v3803_v35, %v10447_v17  ;;  %v3814_v36 = vmul.f32 %v3804_v6, %v10447_v17  ;;  %v3825_v10 = vsel %vm10436_vm5, %v3821_v18, 0.0  ;;  %v3826_v55 = vsel %vm7315_vm2, %v3822_v62, 0.0  ;;  %vm10458_vm2 = vmmov %vm10450_vm0 }
 0x3f1   :  { %v3807_v60 = vadd.f32 %v3805_v22, %v3785_v58  ;;  %v3808_v7 = vadd.f32 %v3806_v4, %v3786_v52  ;;  %v3811_v46 = vadd.f32 %v3809_v37, %v3789_v11  ;;  %v3812_v29 = vadd.f32 %v3810_v3, %v3790_v56 }
 0x3f2   :  { %v3815_v39 = vadd.f32 %v3813_v51, %v3793_v16  ;;  %v3816_v47 = vadd.f32 %v3814_v36, %v3794_v2  ;;  %v3827_v12 = vmul.f32 %v3825_v10, %v10448_v61  ;;  %v3828_v30 = vmul.f32 %v3826_v55, %v10448_v61  ;;  %v10462_v16 = vld [vmem:[#allocation260_spill] sm:$0xff] }
 0x3f3   :  { %v3831_v42 = vmul.f32 %v3825_v10, %v10451_v28  ;;  %v3832_v43 = vmul.f32 %v3826_v55, %v10451_v28  ;;  %v3835_v50 = vmul.f32 %v3825_v10, %v10456_v38  ;;  %v3836_v31 = vmul.f32 %v3826_v55, %v10456_v38  ;;  %v10463_v55 = vld [vmem:[#allocation263_spill] sm:$0xff] }
 0x3f4   :  { %v3840_v26 = vpop.permute.xlu0 %3839  ;;  %v3829_v6 = vadd.f32 %v3827_v12, %v3807_v60  ;;  %v3830_v41 = vadd.f32 %v3828_v30, %v3808_v7 }
 0x3f5   :  { %v3842_v27 = vpop.permute.xlu1 %3841  ;;  %v3833_v34 = vadd.f32 %v3831_v42, %v3811_v46  ;;  %v3834_v1 = vadd.f32 %v3832_v43, %v3812_v29  ;;  %v3837_v25 = vadd.f32 %v3835_v50, %v3815_v39  ;;  %v3838_v21 = vadd.f32 %v3836_v31, %v3816_v47  ;;  %v10466_v43 = vld [vmem:[#allocation266_spill] sm:$0xff] }
 0x3f6   :  { %v3843_v53 = vsel %vm10449_vm13, %v3840_v26, %v3842_v27  ;;  %v3844_v23 = vsel %vm10450_vm0, %v3842_v27, %v3840_v26 }
 0x3f7   :  { %v3847_v24 = vsel %vm7366_vm3, %v3843_v53, 0.0  ;;  %v3848_v13 = vsel %vm7378_vm14, %v3844_v23, 0.0  ;;  %v10465_v23 = vld [vmem:[#allocation265_spill] sm:$0xff] }
 0x3f8   :  { %v3849_v33 = vmul.f32 %v3847_v24, %v10454_v8  ;;  %v3850_v49 = vmul.f32 %v3848_v13, %v10454_v8  ;;  %v3853_v40 = vmul.f32 %v3847_v24, %v10455_v14  ;;  %v3854_v45 = vmul.f32 %v3848_v13, %v10455_v14  ;;  %v10467_v8 = vld [vmem:[#allocation267_spill] sm:$0xff] }
 0x3f9   :  { %v3857_v5 = vmul.f32 %v3847_v24, %v10457_v57  ;;  %v3858_v35 = vmul.f32 %v3848_v13, %v10457_v57 }
 0x3fa   :  { %v3851_v54 = vadd.f32 %v3849_v33, %v3829_v6  ;;  %v3852_v22 = vadd.f32 %v3850_v49, %v3830_v41  ;;  %v3855_v4 = vadd.f32 %v3853_v40, %v3833_v34  ;;  %v3856_v18 = vadd.f32 %v3854_v45, %v3834_v1 }
 0x3fb   :  { %v3859_v37 = vadd.f32 %v3857_v5, %v3837_v25  ;;  %v3860_v3 = vadd.f32 %v3858_v35, %v3838_v21 }
 0x3fc   :  { %v3864_v62 = vpop.permute.xlu0 %3863 }
 0x3fd   :  { %v3865_v17 = vsel %vm10458_vm2, %v3862_v48, %v3864_v62  ;;  %v3866_v51 = vsel %vm10459_vm4, %v3864_v62, %v3862_v48  ;;  %v3884_v36 = vpop.permute.xlu1 %3883  ;;  %v10464_v48 = vld [vmem:[#allocation264_spill] sm:$0xff] }
 0x3fe   :  { %v3869_v58 = vsel %vm7366_vm3, %v3865_v17, 0.0  ;;  %v3870_v52 = vsel %vm7378_vm14, %v3866_v51, 0.0  ;;  %v3887_v11 = vsel %vm10460_vm10, %v3884_v36, %v3886_v15  ;;  %v3888_v56 = vsel %vm10461_vm11, %v3886_v15, %v3884_v36 }
 0x3ff   :  { %v3871_v2 = vmul.f32 %v3869_v58, %v10462_v16  ;;  %v3872_v10 = vmul.f32 %v3870_v52, %v10462_v16  ;;  %v3875_v60 = vmul.f32 %v3869_v58, %v10463_v55  ;;  %v3876_v7 = vmul.f32 %v3870_v52, %v10463_v55 }
 0x400   :  { %v3879_v26 = vmul.f32 %v3869_v58, %v10464_v48  ;;  %v3880_v46 = vmul.f32 %v3870_v52, %v10464_v48  ;;  %v3891_v29 = vsel %vm7366_vm3, %v3887_v11, 0.0  ;;  %v3892_v39 = vsel %vm7378_vm14, %v3888_v56, 0.0 }
 0x401   :  { %v3873_v47 = vadd.f32 %v3871_v2, %v3851_v54  ;;  %v3874_v27 = vadd.f32 %v3872_v10, %v3852_v22  ;;  %v3877_v61 = vadd.f32 %v3875_v60, %v3855_v4  ;;  %v3878_v12 = vadd.f32 %v3876_v7, %v3856_v18 }
 0x402   :  { %v3881_v30 = vadd.f32 %v3879_v26, %v3859_v37  ;;  %v3882_v53 = vadd.f32 %v3880_v46, %v3860_v3  ;;  %v3893_v28 = vmul.f32 %v3891_v29, %v10465_v23  ;;  %v3894_v42 = vmul.f32 %v3892_v39, %v10465_v23 }
 0x403   :  { %v3897_v24 = vmul.f32 %v3891_v29, %v10466_v43  ;;  %v3898_v13 = vmul.f32 %v3892_v39, %v10466_v43  ;;  %v3901_v44 = vmul.f32 %v3891_v29, %v10467_v8  ;;  %v3902_v33 = vmul.f32 %v3892_v39, %v10467_v8 }
 0x404   :  { %v3895_v63 = vadd.f32 %v3893_v28, %v3873_v47  ;;  %v3896_v49 = vadd.f32 %v3894_v42, %v3874_v27 }
 0x405   :  { %v3899_v14 = vadd.f32 %v3897_v24, %v3877_v61  ;;  %v3900_v40 = vadd.f32 %v3898_v13, %v3878_v12  ;;  %v3903_v45 = vadd.f32 %v3901_v44, %v3881_v30  ;;  %v3904_v38 = vadd.f32 %v3902_v33, %v3882_v53 }
 0x406   :  { %v3905_v50 = vadd.f32 %v3895_v63, %v8710_v9  ;;  %v3906_v31 = vadd.f32 %v3896_v49, %v8713_v32 }
 0x407   :  { %v3907_v57 = vadd.f32 %v3899_v14, %v8716_v19  ;;  %v3908_v5 = vadd.f32 %v3900_v40, %v8719_v20  ;;  %v3909_v35 = vadd.f32 %v3903_v45, %v8722_v59  ;;  %v3910_v6 = vadd.f32 %v3904_v38, %v8725_v0 }
 0x408   :  { %3911 = vst [vmem:[%s8951_s2] sm:$0x3] %v3905_v50 }
 0x409   :  { %3912 = vst [vmem:[%s8951_s2 + $0x8] sm:$0x3] %v3906_v31  ;;  %v3915_v41 = vrot.slane %v3907_v57, 6  ;;  %v3916_v9 = vrot.slane %v3908_v5, 6  ;;  %v3923_v34 = vrot.slane %v3909_v35, 4  ;;  %v3924_v32 = vrot.slane %v3910_v6, 4 }
 0x40b   :  { %3919 = vst [vmem:[%s8951_s2] sm:$0xc] %v3915_v41 }
 0x40c   :  { %3920 = vst [vmem:[%s8951_s2 + $0x8] sm:$0xc] %v3916_v9 }
 0x40d   :  { %3927 = vst [vmem:[%s8951_s2] sm:$0x30] %v3923_v34 }
 0x40e   :  { %3928 = vst [vmem:[%s8951_s2 + $0x8] sm:$0x30] %v3924_v32 }
 0x40f   :  { %3933 = vsyncpa [#allocation3], 1 }

</bundles_post_ra>
